<compile_context>
chip_gen: v7x
topology: tpu7x:2x2x1
jax: 0.10.0
libtpu: 0.0.40
codegen_flags: <defaults>
</compile_context>

<pallas_src>
import jax
import jax.numpy as jnp
from jax.experimental import pallas as pl
from jax.experimental.pallas import tpu as pltpu

# ----------------------------- model config ---------------------------------
B, C = 2, 4          # batch, channels
BC = B * C
LENTH = 16           # N  : token axis == image_width
DIM = 32             # dim: embedding axis == image_height
N, D = LENTH, DIM
T = BC * N           # 128 flattened tokens (fills the MXU row dim / sublanes)
DEPTH = 2            # transformer depth
HEADS = 8            # only used for the project_out flag (True here)
DIM_HEAD = 64        # only used for the attention scale
SCALE = DIM_HEAD ** (-0.5)   # intentionally dim_head**-0.5, matches PyTorch ref
LN_EPS = 1e-5        # torch nn.LayerNorm default
NEG_INF = -1e30      # additive block-diagonal mask value


# ------------------------------ math helpers ---------------------------------
def _layernorm(x, g, b):
    mu = jnp.mean(x, axis=-1, keepdims=True)
    xc = x - mu
    var = jnp.mean(xc * xc, axis=-1, keepdims=True)
    return xc * jax.lax.rsqrt(var + LN_EPS) * g + b


def _softmax(x):
    # exact softmax (used by the plain-JAX reference)
    m = jnp.max(x, axis=-1, keepdims=True)
    e = jnp.exp(x - m)
    return e / jnp.sum(e, axis=-1, keepdims=True)


def _softmax_approx(x):
    # kernel softmax: divide via the EUP approximate reciprocal
    m = jnp.max(x, axis=-1, keepdims=True)
    e = jnp.exp(x - m)
    return e * pl.reciprocal(jnp.sum(e, axis=-1, keepdims=True), approx=True)


def _gelu_exact(x):
    # torch nn.GELU() default = exact erf formulation
    return 0.5 * x * (1.0 + jax.lax.erf(x * (2.0 ** -0.5)))


def _bf16(x):
    return x.astype(jnp.bfloat16)


# ------------------------------- kernel -------------------------------------
def vit_kernel(x_ref, vitpos_ref, mask_ref, dist_ref, attnpos_ref, mvb_ref,
               ln1g_ref, ln1b_ref, wqkv_ref,
               wmv1_ref, wmv2_ref, bmv2_ref,
               wo_ref, bo_ref,
               ln2g_ref, ln2b_ref,
               wf1_ref, bf1_ref, wf2_ref, bf2_ref,
               o_ref):
    # Token-major input (T, D) = (128, 32); pos embedding already pre-tiled.
    x = x_ref[...] + vitpos_ref[...]                      # (T, D) f32
    mask = mask_ref[...]                                  # (T, T): 0 on-block, -1e30 off
    dist = dist_ref[...]                                  # (T, T): |i-j|^2 tiled

    for l in range(DEPTH):                                # static unroll over depth
        # ---------------- PreNorm + Attention (full-tile, block-masked) -----
        h = _layernorm(x, ln1g_ref[l:l + 1, :], ln1b_ref[l:l + 1, :])
        qkv = jnp.dot(_bf16(h), wqkv_ref[l],
                      preferred_element_type=jnp.float32)  # (T, 3D) one MXU push
        q = _bf16(qkv[:, :D])        # SCALE pre-folded into the Q weight columns
        k = _bf16(qkv[:, D:2 * D])
        v = _bf16(qkv[:, 2 * D:])

        # One full-tile q @ k^T; the block-diagonal mask keeps tokens of
        # different (b, c) slices from attending to each other.
        s = jax.lax.dot_general(q, k, (((1,), (1,)), ((), ())),
                                preferred_element_type=jnp.float32) + mask
        attn = _softmax_approx(s)                          # off-block rows exactly 0

        # make_var branch -- consumed before `weight` so its temps die early.
        attn_w = attn + attnpos_ref[l]                     # pos emb is block-diagonal
        mv = jnp.dot(attn_w, wmv1_ref[l],
                     preferred_element_type=jnp.float32) + mvb_ref[l]
        mv = jnp.maximum(mv, 0.0)                          # off-block stays exactly 0
        wvar = jnp.sum(mv * wmv2_ref[l], axis=-1, keepdims=True) \
            + bmv2_ref[l:l + 1, :]                         # (T, 1)

        inv_den = pl.reciprocal(2.0 * wvar * wvar + 1e-6, approx=True)
        # Re-mask before the second softmax (off-block attn*weight entries are
        # 0, which would otherwise leak into the row sums).
        attn2 = _softmax_approx(attn * jnp.exp(-dist * inv_den) + mask)

        out = jnp.dot(_bf16(attn2), v, preferred_element_type=jnp.float32)   # (T, D)
        out = jnp.dot(_bf16(out), wo_ref[l],
                      preferred_element_type=jnp.float32) + bo_ref[l:l + 1, :]
        x = x + out

        # ---------------- PreNorm + FeedForward -----------------------------
        h = _layernorm(x, ln2g_ref[l:l + 1, :], ln2b_ref[l:l + 1, :])
        h = jnp.dot(_bf16(h), wf1_ref[l],
                    preferred_element_type=jnp.float32) + bf1_ref[l:l + 1, :]
        h = _gelu_exact(h)
        h = jnp.dot(_bf16(h), wf2_ref[l],
                    preferred_element_type=jnp.float32) + bf2_ref[l:l + 1, :]
        x = x + h

    # Lane-dense epilogue: one (T, D) -> (D, T) transpose, unmasked full-vreg
    # stores (last dim = 128).  NCHW permute happens in the (tiny) wrapper.
    o_ref[...] = x.T


# ------------------------- kernel-side param prep ----------------------------
def prepare_kernel_params(params):
    """One-off host/XLA-side preparation of kernel constants (bf16 weights,
    fused QKV with folded scale, pre-tiled pos embeddings, block-diag masks)."""
    (vit_pos, dist, attn_pos, ln1_g, ln1_b, wq, wk, wv,
     wmv1, bmv1, wmv2, bmv2, wo, bo, ln2_g, ln2_b,
     wf1, bf1, wf2, bf2) = params

    tok = jnp.arange(T)
    blk = tok // N                            # (b*C + c) slice id per token
    iN = tok % N                              # position within slice
    ch = blk % C                              # channel per token
    same = blk[:, None] == blk[None, :]       # (T, T) block-diagonal predicate

    # Fused QKV weight (bf16), softmax scale folded into the Q columns.
    wqkv = jnp.concatenate([wq * SCALE, wk, wv], axis=-1).astype(jnp.bfloat16)

    # ViT pos embedding pre-tiled over batch: (T, D).
    vitpos_t = jnp.tile(vit_pos.reshape(C * N, D), (B, 1)).astype(jnp.float32)

    # Additive block-diagonal mask and tiled |i-j|^2 distances.
    mask_bias = jnp.where(same, 0.0, NEG_INF).astype(jnp.float32)       # (T, T)
    dist_t = jnp.tile(dist, (BC, BC)).astype(jnp.float32)               # (T, T)

    # Per-layer attention pos embedding / make_var weight+bias on the block
    # diagonal (exactly 0 off-block so off-block rows never contribute).
    attnpos_t = jnp.where(same[None],
                          attn_pos[:, ch[:, None], iN[:, None], iN[None, :]],
                          0.0).astype(jnp.float32)                      # (DEPTH, T, T)
    wmv1_t = jnp.where(same[None],
                       wmv1[:, iN[:, None], iN[None, :]],
                       0.0).astype(jnp.float32)                         # (DEPTH, T, T)
    mvb_t = jnp.where(same[None],
                      bmv1[:, iN][:, None, :],
                      0.0).astype(jnp.float32)                          # (DEPTH, T, T)
    wmv2_t = wmv2[:, :, iN].astype(jnp.float32)                         # (DEPTH, 1, T)

    return (vitpos_t, mask_bias, dist_t, attnpos_t, mvb_t,
            ln1_g, ln1_b, wqkv,
            wmv1_t, wmv2_t, bmv2,
            wo.astype(jnp.bfloat16), bo,
            ln2_g, ln2_b,
            wf1.astype(jnp.bfloat16), bf1,
            wf2.astype(jnp.bfloat16), bf2)


# ------------------------------ wrapper --------------------------------------
def vit_forward(img, params):
    """img: (B, C, H=DIM, W=LENTH) NCHW float32 -> NCHW float32."""
    assert img.shape == (B, C, DIM, LENTH)
    kp = prepare_kernel_params(params)    # tiny; hoist/cache when called repeatedly

    # NCHW -> token-major (B*C*N, D) = (128, 32); 16 KiB, done once in XLA.
    x_tok = jnp.transpose(img, (0, 1, 3, 2)).reshape(T, D)

    n_inputs = 1 + len(kp)
    out = pl.pallas_call(
        vit_kernel,
        out_shape=jax.ShapeDtypeStruct((D, T), jnp.float32),
        in_specs=[pl.BlockSpec(memory_space=pltpu.MemorySpace.VMEM)] * n_inputs,
        out_specs=pl.BlockSpec(memory_space=pltpu.MemorySpace.VMEM),
    )(x_tok, *kp)

    # (D, B*C*N) lane-dense slab -> NCHW (B, C, D, N); 16 KiB permute in XLA.
    return jnp.transpose(out.reshape(D, B, C, N), (1, 2, 0, 3))


# -------------------------- parameter init -----------------------------------
def init_params(key):
    keys = iter(jax.random.split(key, 40))

    def nrm(shape, scale=0.05):
        return (scale * jax.random.normal(next(keys), shape)).astype(jnp.float32)

    # ViT pos embedding: torch.randn(1, C, image_width=LENTH, image_height=DIM)
    vit_pos = nrm((C, LENTH, DIM), 1.0)
    # squared-index-distance matrix |j - i|^2
    idx = jnp.arange(LENTH, dtype=jnp.float32)
    dist = (idx[None, :] - idx[:, None]) ** 2
    # per-layer Attention pos embedding: torch.randn(1, C, LENTH, LENTH)
    attn_pos = nrm((DEPTH, C, LENTH, LENTH), 1.0)

    ln1_g = jnp.ones((DEPTH, DIM), jnp.float32)
    ln1_b = jnp.zeros((DEPTH, DIM), jnp.float32)
    wq = nrm((DEPTH, DIM, DIM))
    wk = nrm((DEPTH, DIM, DIM))
    wv = nrm((DEPTH, DIM, DIM))
    wmv1 = nrm((DEPTH, LENTH, LENTH))
    bmv1 = nrm((DEPTH, LENTH))
    wmv2 = nrm((DEPTH, 1, LENTH))
    bmv2 = nrm((DEPTH, 1))
    wo = nrm((DEPTH, DIM, DIM))
    bo = nrm((DEPTH, DIM))
    ln2_g = jnp.ones((DEPTH, DIM), jnp.float32)
    ln2_b = jnp.zeros((DEPTH, DIM), jnp.float32)
    wf1 = nrm((DEPTH, DIM, DIM))
    bf1 = nrm((DEPTH, DIM))
    wf2 = nrm((DEPTH, DIM, DIM))
    bf2 = nrm((DEPTH, DIM))

    return (vit_pos, dist, attn_pos, ln1_g, ln1_b, wq, wk, wv,
            wmv1, bmv1, wmv2, bmv2, wo, bo, ln2_g, ln2_b,
            wf1, bf1, wf2, bf2)


# -------------------------- plain-JAX reference -------------------------------
def vit_reference(img, params):
    (vit_pos, dist, attn_pos, ln1_g, ln1_b, wq, wk, wv,
     wmv1, bmv1, wmv2, bmv2, wo, bo, ln2_g, ln2_b,
     wf1, bf1, wf2, bf2) = params
    x = jnp.transpose(img, (0, 1, 3, 2)) + vit_pos[None]
    for l in range(DEPTH):
        h = _layernorm(x, ln1_g[l], ln1_b[l])
        q, k, v = h @ wq[l], h @ wk[l], h @ wv[l]
        dots = jnp.einsum('bcnd,bcmd->bcnm', q, k) * SCALE
        attn = _softmax(dots)
        attn_w = attn + attn_pos[l][None]
        mv = jnp.maximum(attn_w @ wmv1[l] + bmv1[l], 0.0)
        w = jnp.einsum('bcnm,m->bcn', mv, wmv2[l][0])[..., None] + bmv2[l]
        weight = jnp.exp(-dist[None, None] / (2.0 * w * w + 1e-6))
        attn2 = _softmax(attn * weight)
        out = (attn2 @ v) @ wo[l] + bo[l]
        x = out + x
        h = _layernorm(x, ln2_g[l], ln2_b[l])
        h = _gelu_exact(h @ wf1[l] + bf1[l])
        h = h @ wf2[l] + bf2[l]
        x = h + x
    return jnp.transpose(x, (0, 1, 3, 2))


# --------------------------------- main ---------------------------------------
if __name__ == "__main__":
    key = jax.random.PRNGKey(0)
    k_img, k_par = jax.random.split(key)
    # img in NCHW: (B, C, H=DIM, W=LENTH)
    img = jax.random.normal(k_img, (B, C, DIM, LENTH), dtype=jnp.float32)
    params = init_params(k_par)

    out = jax.block_until_ready(jax.jit(vit_forward)(img, params))
    ref = jax.block_until_ready(vit_reference(img, params))

    assert out.shape == img.shape
    assert bool(jnp.all(jnp.isfinite(out)))
    err = float(jnp.max(jnp.abs(out - ref)))
    # bf16 MXU operands + approx EUP reciprocals vs. an all-f32 reference.
    assert bool(jnp.allclose(out, ref, atol=2e-2, rtol=2e-2)), \
        f"max abs err {err}"
    print("KERNEL_OK")
</pallas_src>

<mosaic_0001>
module attributes {stable_mosaic.version = 11 : i64} {
  func.func @vit_kernel(%arg0: memref<128x32xf32, #tpu.memory_space<vmem>>, %arg1: memref<128x32xf32, #tpu.memory_space<vmem>>, %arg2: memref<128x128xf32, #tpu.memory_space<vmem>>, %arg3: memref<128x128xf32, #tpu.memory_space<vmem>>, %arg4: memref<2x128x128xf32, #tpu.memory_space<vmem>>, %arg5: memref<2x128x128xf32, #tpu.memory_space<vmem>>, %arg6: memref<2x32xf32, #tpu.memory_space<vmem>>, %arg7: memref<2x32xf32, #tpu.memory_space<vmem>>, %arg8: memref<2x32x96xbf16, #tpu.memory_space<vmem>>, %arg9: memref<2x128x128xf32, #tpu.memory_space<vmem>>, %arg10: memref<2x1x128xf32, #tpu.memory_space<vmem>>, %arg11: memref<2x1xf32, #tpu.memory_space<vmem>>, %arg12: memref<2x32x32xbf16, #tpu.memory_space<vmem>>, %arg13: memref<2x32xf32, #tpu.memory_space<vmem>>, %arg14: memref<2x32xf32, #tpu.memory_space<vmem>>, %arg15: memref<2x32xf32, #tpu.memory_space<vmem>>, %arg16: memref<2x32x32xbf16, #tpu.memory_space<vmem>>, %arg17: memref<2x32xf32, #tpu.memory_space<vmem>>, %arg18: memref<2x32x32xbf16, #tpu.memory_space<vmem>>, %arg19: memref<2x32xf32, #tpu.memory_space<vmem>>, %arg20: memref<32x128xf32, #tpu.memory_space<vmem>>) attributes {dimension_semantics = [], scalar_prefetch = 0 : i64, scratch_operands = 0 : i64, tpu.core_type = #tpu.core_type<tc>} {
    %c0 = arith.constant 0 : index
    %c0_0 = arith.constant 0 : index
    %0 = vector.load %arg0[%c0, %c0_0] : memref<128x32xf32, #tpu.memory_space<vmem>>, vector<128x32xf32>
    %c0_1 = arith.constant 0 : index
    %c0_2 = arith.constant 0 : index
    %1 = vector.load %arg1[%c0_1, %c0_2] : memref<128x32xf32, #tpu.memory_space<vmem>>, vector<128x32xf32>
    %2 = arith.addf %0, %1 : vector<128x32xf32>
    %c0_3 = arith.constant 0 : index
    %c0_4 = arith.constant 0 : index
    %3 = vector.load %arg2[%c0_3, %c0_4] : memref<128x128xf32, #tpu.memory_space<vmem>>, vector<128x128xf32>
    %c0_5 = arith.constant 0 : index
    %c0_6 = arith.constant 0 : index
    %4 = vector.load %arg3[%c0_5, %c0_6] : memref<128x128xf32, #tpu.memory_space<vmem>>, vector<128x128xf32>
    %c0_7 = arith.constant 0 : index
    %c0_8 = arith.constant 0 : index
    %5 = vector.load %arg6[%c0_7, %c0_8] : memref<2x32xf32, #tpu.memory_space<vmem>>, vector<1x32xf32>
    %c0_9 = arith.constant 0 : index
    %c0_10 = arith.constant 0 : index
    %6 = vector.load %arg7[%c0_9, %c0_10] : memref<2x32xf32, #tpu.memory_space<vmem>>, vector<1x32xf32>
    %cst = arith.constant dense<0.000000e+00> : vector<128xf32>
    %7 = vector.multi_reduction <add>, %2, %cst [1] : vector<128x32xf32> to vector<128xf32>
    %8 = vector.shape_cast %7 : vector<128xf32> to vector<128x1xf32>
    %cst_11 = arith.constant 3.200000e+01 : f32
    %9 = vector.broadcast %cst_11 : f32 to vector<128x1xf32>
    %10 = arith.divf %8, %9 : vector<128x1xf32>
    %11 = vector.broadcast %10 : vector<128x1xf32> to vector<128x32xf32>
    %12 = arith.subf %2, %11 : vector<128x32xf32>
    %13 = arith.mulf %12, %12 : vector<128x32xf32>
    %cst_12 = arith.constant dense<0.000000e+00> : vector<128xf32>
    %14 = vector.multi_reduction <add>, %13, %cst_12 [1] : vector<128x32xf32> to vector<128xf32>
    %15 = vector.shape_cast %14 : vector<128xf32> to vector<128x1xf32>
    %cst_13 = arith.constant 3.200000e+01 : f32
    %16 = vector.broadcast %cst_13 : f32 to vector<128x1xf32>
    %17 = arith.divf %15, %16 : vector<128x1xf32>
    %cst_14 = arith.constant 9.99999974E-6 : f32
    %18 = vector.broadcast %cst_14 : f32 to vector<128x1xf32>
    %19 = arith.addf %17, %18 : vector<128x1xf32>
    %20 = math.rsqrt %19 : vector<128x1xf32>
    %21 = vector.broadcast %20 : vector<128x1xf32> to vector<128x32xf32>
    %22 = arith.mulf %12, %21 : vector<128x32xf32>
    %23 = vector.broadcast %5 : vector<1x32xf32> to vector<128x32xf32>
    %24 = arith.mulf %22, %23 : vector<128x32xf32>
    %25 = vector.broadcast %6 : vector<1x32xf32> to vector<128x32xf32>
    %26 = arith.addf %24, %25 : vector<128x32xf32>
    %27 = arith.truncf %26 : vector<128x32xf32> to vector<128x32xbf16>
    %c0_15 = arith.constant 0 : index
    %c0_16 = arith.constant 0 : index
    %c0_17 = arith.constant 0 : index
    %28 = vector.load %arg8[%c0_15, %c0_16, %c0_17] : memref<2x32x96xbf16, #tpu.memory_space<vmem>>, vector<1x32x96xbf16>
    %29 = vector.shape_cast %28 : vector<1x32x96xbf16> to vector<32x96xbf16>
    %cst_18 = arith.constant dense<0.000000e+00> : vector<128x96xf32>
    %30 = tpu.matmul %27, %29, %cst_18 {dimension_numbers = #tpu.dot_dimension_numbers<[1], [0], [0], [1], [0, 0, 1, 1], [], []>} : vector<128x32xbf16>, vector<32x96xbf16>, vector<128x96xf32> -> vector<128x96xf32>
    %31 = vector.extract_strided_slice %30 {offsets = [0, 0], sizes = [128, 32], strides = [1, 1]} : vector<128x96xf32> to vector<128x32xf32>
    %32 = arith.truncf %31 : vector<128x32xf32> to vector<128x32xbf16>
    %33 = vector.extract_strided_slice %30 {offsets = [0, 32], sizes = [128, 32], strides = [1, 1]} : vector<128x96xf32> to vector<128x32xf32>
    %34 = arith.truncf %33 : vector<128x32xf32> to vector<128x32xbf16>
    %35 = vector.extract_strided_slice %30 {offsets = [0, 64], sizes = [128, 32], strides = [1, 1]} : vector<128x96xf32> to vector<128x32xf32>
    %36 = arith.truncf %35 : vector<128x32xf32> to vector<128x32xbf16>
    %cst_19 = arith.constant dense<0.000000e+00> : vector<128x128xf32>
    %37 = tpu.matmul %32, %34, %cst_19 {dimension_numbers = #tpu.dot_dimension_numbers<[1], [1], [0], [0], [0, 0, 1, 0], [], []>} : vector<128x32xbf16>, vector<128x32xbf16>, vector<128x128xf32> -> vector<128x128xf32>
    %38 = arith.addf %37, %3 : vector<128x128xf32>
    %cst_20 = arith.constant dense<0xFF800000> : vector<128xf32>
    %39 = vector.multi_reduction <maximumf>, %38, %cst_20 [1] : vector<128x128xf32> to vector<128xf32>
    %40 = vector.shape_cast %39 : vector<128xf32> to vector<128x1xf32>
    %41 = vector.broadcast %40 : vector<128x1xf32> to vector<128x128xf32>
    %42 = arith.subf %38, %41 : vector<128x128xf32>
    %43 = math.exp %42 : vector<128x128xf32>
    %cst_21 = arith.constant dense<0.000000e+00> : vector<128xf32>
    %44 = vector.multi_reduction <add>, %43, %cst_21 [1] : vector<128x128xf32> to vector<128xf32>
    %45 = vector.shape_cast %44 : vector<128xf32> to vector<128x1xf32>
    %46 = tpu.reciprocal %45 {approx = true} : vector<128x1xf32> -> vector<128x1xf32>
    %47 = vector.broadcast %46 : vector<128x1xf32> to vector<128x128xf32>
    %48 = arith.mulf %43, %47 : vector<128x128xf32>
    %c0_22 = arith.constant 0 : index
    %c0_23 = arith.constant 0 : index
    %c0_24 = arith.constant 0 : index
    %49 = vector.load %arg4[%c0_22, %c0_23, %c0_24] : memref<2x128x128xf32, #tpu.memory_space<vmem>>, vector<1x128x128xf32>
    %50 = vector.shape_cast %49 : vector<1x128x128xf32> to vector<128x128xf32>
    %51 = arith.addf %48, %50 : vector<128x128xf32>
    %c0_25 = arith.constant 0 : index
    %c0_26 = arith.constant 0 : index
    %c0_27 = arith.constant 0 : index
    %52 = vector.load %arg9[%c0_25, %c0_26, %c0_27] : memref<2x128x128xf32, #tpu.memory_space<vmem>>, vector<1x128x128xf32>
    %53 = vector.shape_cast %52 : vector<1x128x128xf32> to vector<128x128xf32>
    %cst_28 = arith.constant dense<0.000000e+00> : vector<128x128xf32>
    %54 = tpu.matmul %51, %53, %cst_28 {dimension_numbers = #tpu.dot_dimension_numbers<[1], [0], [0], [1], [0, 0, 1, 1], [], []>} : vector<128x128xf32>, vector<128x128xf32>, vector<128x128xf32> -> vector<128x128xf32>
    %c0_29 = arith.constant 0 : index
    %c0_30 = arith.constant 0 : index
    %c0_31 = arith.constant 0 : index
    %55 = vector.load %arg5[%c0_29, %c0_30, %c0_31] : memref<2x128x128xf32, #tpu.memory_space<vmem>>, vector<1x128x128xf32>
    %56 = vector.shape_cast %55 : vector<1x128x128xf32> to vector<128x128xf32>
    %57 = arith.addf %54, %56 : vector<128x128xf32>
    %cst_32 = arith.constant 0.000000e+00 : f32
    %58 = vector.broadcast %cst_32 : f32 to vector<128x128xf32>
    %59 = arith.maximumf %57, %58 : vector<128x128xf32>
    %c0_33 = arith.constant 0 : index
    %c0_34 = arith.constant 0 : index
    %c0_35 = arith.constant 0 : index
    %60 = vector.load %arg10[%c0_33, %c0_34, %c0_35] : memref<2x1x128xf32, #tpu.memory_space<vmem>>, vector<1x1x128xf32>
    %61 = vector.shape_cast %60 : vector<1x1x128xf32> to vector<1x128xf32>
    %62 = vector.broadcast %61 : vector<1x128xf32> to vector<128x128xf32>
    %63 = arith.mulf %59, %62 : vector<128x128xf32>
    %cst_36 = arith.constant dense<0.000000e+00> : vector<128xf32>
    %64 = vector.multi_reduction <add>, %63, %cst_36 [1] : vector<128x128xf32> to vector<128xf32>
    %65 = vector.shape_cast %64 : vector<128xf32> to vector<128x1xf32>
    %c0_37 = arith.constant 0 : index
    %c0_38 = arith.constant 0 : index
    %66 = vector.load %arg11[%c0_37, %c0_38] : memref<2x1xf32, #tpu.memory_space<vmem>>, vector<1x1xf32>
    %67 = vector.broadcast %66 : vector<1x1xf32> to vector<128x1xf32>
    %68 = arith.addf %65, %67 : vector<128x1xf32>
    %cst_39 = arith.constant 2.000000e+00 : f32
    %69 = vector.broadcast %cst_39 : f32 to vector<128x1xf32>
    %70 = arith.mulf %69, %68 : vector<128x1xf32>
    %71 = arith.mulf %70, %68 : vector<128x1xf32>
    %cst_40 = arith.constant 9.99999997E-7 : f32
    %72 = vector.broadcast %cst_40 : f32 to vector<128x1xf32>
    %73 = arith.addf %71, %72 : vector<128x1xf32>
    %74 = tpu.reciprocal %73 {approx = true} : vector<128x1xf32> -> vector<128x1xf32>
    %cst_41 = arith.constant 0.000000e+00 : f32
    %75 = vector.broadcast %cst_41 : f32 to vector<128x128xf32>
    %76 = arith.subf %75, %4 : vector<128x128xf32>
    %77 = vector.broadcast %74 : vector<128x1xf32> to vector<128x128xf32>
    %78 = arith.mulf %76, %77 : vector<128x128xf32>
    %79 = math.exp %78 : vector<128x128xf32>
    %80 = arith.mulf %48, %79 : vector<128x128xf32>
    %81 = arith.addf %80, %3 : vector<128x128xf32>
    %cst_42 = arith.constant dense<0xFF800000> : vector<128xf32>
    %82 = vector.multi_reduction <maximumf>, %81, %cst_42 [1] : vector<128x128xf32> to vector<128xf32>
    %83 = vector.shape_cast %82 : vector<128xf32> to vector<128x1xf32>
    %84 = vector.broadcast %83 : vector<128x1xf32> to vector<128x128xf32>
    %85 = arith.subf %81, %84 : vector<128x128xf32>
    %86 = math.exp %85 : vector<128x128xf32>
    %cst_43 = arith.constant dense<0.000000e+00> : vector<128xf32>
    %87 = vector.multi_reduction <add>, %86, %cst_43 [1] : vector<128x128xf32> to vector<128xf32>
    %88 = vector.shape_cast %87 : vector<128xf32> to vector<128x1xf32>
    %89 = tpu.reciprocal %88 {approx = true} : vector<128x1xf32> -> vector<128x1xf32>
    %90 = vector.broadcast %89 : vector<128x1xf32> to vector<128x128xf32>
    %91 = arith.mulf %86, %90 : vector<128x128xf32>
    %92 = arith.truncf %91 : vector<128x128xf32> to vector<128x128xbf16>
    %cst_44 = arith.constant dense<0.000000e+00> : vector<128x32xf32>
    %93 = tpu.matmul %92, %36, %cst_44 {dimension_numbers = #tpu.dot_dimension_numbers<[1], [0], [0], [1], [0, 0, 1, 1], [], []>} : vector<128x128xbf16>, vector<128x32xbf16>, vector<128x32xf32> -> vector<128x32xf32>
    %94 = arith.truncf %93 : vector<128x32xf32> to vector<128x32xbf16>
    %c0_45 = arith.constant 0 : index
    %c0_46 = arith.constant 0 : index
    %c0_47 = arith.constant 0 : index
    %95 = vector.load %arg12[%c0_45, %c0_46, %c0_47] : memref<2x32x32xbf16, #tpu.memory_space<vmem>>, vector<1x32x32xbf16>
    %96 = vector.shape_cast %95 : vector<1x32x32xbf16> to vector<32x32xbf16>
    %cst_48 = arith.constant dense<0.000000e+00> : vector<128x32xf32>
    %97 = tpu.matmul %94, %96, %cst_48 {dimension_numbers = #tpu.dot_dimension_numbers<[1], [0], [0], [1], [0, 0, 1, 1], [], []>} : vector<128x32xbf16>, vector<32x32xbf16>, vector<128x32xf32> -> vector<128x32xf32>
    %c0_49 = arith.constant 0 : index
    %c0_50 = arith.constant 0 : index
    %98 = vector.load %arg13[%c0_49, %c0_50] : memref<2x32xf32, #tpu.memory_space<vmem>>, vector<1x32xf32>
    %99 = vector.broadcast %98 : vector<1x32xf32> to vector<128x32xf32>
    %100 = arith.addf %97, %99 : vector<128x32xf32>
    %101 = arith.addf %2, %100 : vector<128x32xf32>
    %c0_51 = arith.constant 0 : index
    %c0_52 = arith.constant 0 : index
    %102 = vector.load %arg14[%c0_51, %c0_52] : memref<2x32xf32, #tpu.memory_space<vmem>>, vector<1x32xf32>
    %c0_53 = arith.constant 0 : index
    %c0_54 = arith.constant 0 : index
    %103 = vector.load %arg15[%c0_53, %c0_54] : memref<2x32xf32, #tpu.memory_space<vmem>>, vector<1x32xf32>
    %cst_55 = arith.constant dense<0.000000e+00> : vector<128xf32>
    %104 = vector.multi_reduction <add>, %101, %cst_55 [1] : vector<128x32xf32> to vector<128xf32>
    %105 = vector.shape_cast %104 : vector<128xf32> to vector<128x1xf32>
    %cst_56 = arith.constant 3.200000e+01 : f32
    %106 = vector.broadcast %cst_56 : f32 to vector<128x1xf32>
    %107 = arith.divf %105, %106 : vector<128x1xf32>
    %108 = vector.broadcast %107 : vector<128x1xf32> to vector<128x32xf32>
    %109 = arith.subf %101, %108 : vector<128x32xf32>
    %110 = arith.mulf %109, %109 : vector<128x32xf32>
    %cst_57 = arith.constant dense<0.000000e+00> : vector<128xf32>
    %111 = vector.multi_reduction <add>, %110, %cst_57 [1] : vector<128x32xf32> to vector<128xf32>
    %112 = vector.shape_cast %111 : vector<128xf32> to vector<128x1xf32>
    %cst_58 = arith.constant 3.200000e+01 : f32
    %113 = vector.broadcast %cst_58 : f32 to vector<128x1xf32>
    %114 = arith.divf %112, %113 : vector<128x1xf32>
    %cst_59 = arith.constant 9.99999974E-6 : f32
    %115 = vector.broadcast %cst_59 : f32 to vector<128x1xf32>
    %116 = arith.addf %114, %115 : vector<128x1xf32>
    %117 = math.rsqrt %116 : vector<128x1xf32>
    %118 = vector.broadcast %117 : vector<128x1xf32> to vector<128x32xf32>
    %119 = arith.mulf %109, %118 : vector<128x32xf32>
    %120 = vector.broadcast %102 : vector<1x32xf32> to vector<128x32xf32>
    %121 = arith.mulf %119, %120 : vector<128x32xf32>
    %122 = vector.broadcast %103 : vector<1x32xf32> to vector<128x32xf32>
    %123 = arith.addf %121, %122 : vector<128x32xf32>
    %124 = arith.truncf %123 : vector<128x32xf32> to vector<128x32xbf16>
    %c0_60 = arith.constant 0 : index
    %c0_61 = arith.constant 0 : index
    %c0_62 = arith.constant 0 : index
    %125 = vector.load %arg16[%c0_60, %c0_61, %c0_62] : memref<2x32x32xbf16, #tpu.memory_space<vmem>>, vector<1x32x32xbf16>
    %126 = vector.shape_cast %125 : vector<1x32x32xbf16> to vector<32x32xbf16>
    %cst_63 = arith.constant dense<0.000000e+00> : vector<128x32xf32>
    %127 = tpu.matmul %124, %126, %cst_63 {dimension_numbers = #tpu.dot_dimension_numbers<[1], [0], [0], [1], [0, 0, 1, 1], [], []>} : vector<128x32xbf16>, vector<32x32xbf16>, vector<128x32xf32> -> vector<128x32xf32>
    %c0_64 = arith.constant 0 : index
    %c0_65 = arith.constant 0 : index
    %128 = vector.load %arg17[%c0_64, %c0_65] : memref<2x32xf32, #tpu.memory_space<vmem>>, vector<1x32xf32>
    %129 = vector.broadcast %128 : vector<1x32xf32> to vector<128x32xf32>
    %130 = arith.addf %127, %129 : vector<128x32xf32>
    %cst_66 = arith.constant 5.000000e-01 : f32
    %131 = vector.broadcast %cst_66 : f32 to vector<128x32xf32>
    %132 = arith.mulf %131, %130 : vector<128x32xf32>
    %cst_67 = arith.constant 0.707106769 : f32
    %133 = vector.broadcast %cst_67 : f32 to vector<128x32xf32>
    %134 = arith.mulf %130, %133 : vector<128x32xf32>
    %135 = math.erf %134 : vector<128x32xf32>
    %cst_68 = arith.constant 1.000000e+00 : f32
    %136 = vector.broadcast %cst_68 : f32 to vector<128x32xf32>
    %137 = arith.addf %136, %135 : vector<128x32xf32>
    %138 = arith.mulf %132, %137 : vector<128x32xf32>
    %139 = arith.truncf %138 : vector<128x32xf32> to vector<128x32xbf16>
    %c0_69 = arith.constant 0 : index
    %c0_70 = arith.constant 0 : index
    %c0_71 = arith.constant 0 : index
    %140 = vector.load %arg18[%c0_69, %c0_70, %c0_71] : memref<2x32x32xbf16, #tpu.memory_space<vmem>>, vector<1x32x32xbf16>
    %141 = vector.shape_cast %140 : vector<1x32x32xbf16> to vector<32x32xbf16>
    %cst_72 = arith.constant dense<0.000000e+00> : vector<128x32xf32>
    %142 = tpu.matmul %139, %141, %cst_72 {dimension_numbers = #tpu.dot_dimension_numbers<[1], [0], [0], [1], [0, 0, 1, 1], [], []>} : vector<128x32xbf16>, vector<32x32xbf16>, vector<128x32xf32> -> vector<128x32xf32>
    %c0_73 = arith.constant 0 : index
    %c0_74 = arith.constant 0 : index
    %143 = vector.load %arg19[%c0_73, %c0_74] : memref<2x32xf32, #tpu.memory_space<vmem>>, vector<1x32xf32>
    %144 = vector.broadcast %143 : vector<1x32xf32> to vector<128x32xf32>
    %145 = arith.addf %142, %144 : vector<128x32xf32>
    %146 = arith.addf %101, %145 : vector<128x32xf32>
    %c1 = arith.constant 1 : index
    %c0_75 = arith.constant 0 : index
    %147 = vector.load %arg6[%c1, %c0_75] : memref<2x32xf32, #tpu.memory_space<vmem>>, vector<1x32xf32>
    %c1_76 = arith.constant 1 : index
    %c0_77 = arith.constant 0 : index
    %148 = vector.load %arg7[%c1_76, %c0_77] : memref<2x32xf32, #tpu.memory_space<vmem>>, vector<1x32xf32>
    %cst_78 = arith.constant dense<0.000000e+00> : vector<128xf32>
    %149 = vector.multi_reduction <add>, %146, %cst_78 [1] : vector<128x32xf32> to vector<128xf32>
    %150 = vector.shape_cast %149 : vector<128xf32> to vector<128x1xf32>
    %cst_79 = arith.constant 3.200000e+01 : f32
    %151 = vector.broadcast %cst_79 : f32 to vector<128x1xf32>
    %152 = arith.divf %150, %151 : vector<128x1xf32>
    %153 = vector.broadcast %152 : vector<128x1xf32> to vector<128x32xf32>
    %154 = arith.subf %146, %153 : vector<128x32xf32>
    %155 = arith.mulf %154, %154 : vector<128x32xf32>
    %cst_80 = arith.constant dense<0.000000e+00> : vector<128xf32>
    %156 = vector.multi_reduction <add>, %155, %cst_80 [1] : vector<128x32xf32> to vector<128xf32>
    %157 = vector.shape_cast %156 : vector<128xf32> to vector<128x1xf32>
    %cst_81 = arith.constant 3.200000e+01 : f32
    %158 = vector.broadcast %cst_81 : f32 to vector<128x1xf32>
    %159 = arith.divf %157, %158 : vector<128x1xf32>
    %cst_82 = arith.constant 9.99999974E-6 : f32
    %160 = vector.broadcast %cst_82 : f32 to vector<128x1xf32>
    %161 = arith.addf %159, %160 : vector<128x1xf32>
    %162 = math.rsqrt %161 : vector<128x1xf32>
    %163 = vector.broadcast %162 : vector<128x1xf32> to vector<128x32xf32>
    %164 = arith.mulf %154, %163 : vector<128x32xf32>
    %165 = vector.broadcast %147 : vector<1x32xf32> to vector<128x32xf32>
    %166 = arith.mulf %164, %165 : vector<128x32xf32>
    %167 = vector.broadcast %148 : vector<1x32xf32> to vector<128x32xf32>
    %168 = arith.addf %166, %167 : vector<128x32xf32>
    %169 = arith.truncf %168 : vector<128x32xf32> to vector<128x32xbf16>
    %c1_83 = arith.constant 1 : index
    %c0_84 = arith.constant 0 : index
    %c0_85 = arith.constant 0 : index
    %170 = vector.load %arg8[%c1_83, %c0_84, %c0_85] : memref<2x32x96xbf16, #tpu.memory_space<vmem>>, vector<1x32x96xbf16>
    %171 = vector.shape_cast %170 : vector<1x32x96xbf16> to vector<32x96xbf16>
    %cst_86 = arith.constant dense<0.000000e+00> : vector<128x96xf32>
    %172 = tpu.matmul %169, %171, %cst_86 {dimension_numbers = #tpu.dot_dimension_numbers<[1], [0], [0], [1], [0, 0, 1, 1], [], []>} : vector<128x32xbf16>, vector<32x96xbf16>, vector<128x96xf32> -> vector<128x96xf32>
    %173 = vector.extract_strided_slice %172 {offsets = [0, 0], sizes = [128, 32], strides = [1, 1]} : vector<128x96xf32> to vector<128x32xf32>
    %174 = arith.truncf %173 : vector<128x32xf32> to vector<128x32xbf16>
    %175 = vector.extract_strided_slice %172 {offsets = [0, 32], sizes = [128, 32], strides = [1, 1]} : vector<128x96xf32> to vector<128x32xf32>
    %176 = arith.truncf %175 : vector<128x32xf32> to vector<128x32xbf16>
    %177 = vector.extract_strided_slice %172 {offsets = [0, 64], sizes = [128, 32], strides = [1, 1]} : vector<128x96xf32> to vector<128x32xf32>
    %178 = arith.truncf %177 : vector<128x32xf32> to vector<128x32xbf16>
    %cst_87 = arith.constant dense<0.000000e+00> : vector<128x128xf32>
    %179 = tpu.matmul %174, %176, %cst_87 {dimension_numbers = #tpu.dot_dimension_numbers<[1], [1], [0], [0], [0, 0, 1, 0], [], []>} : vector<128x32xbf16>, vector<128x32xbf16>, vector<128x128xf32> -> vector<128x128xf32>
    %180 = arith.addf %179, %3 : vector<128x128xf32>
    %cst_88 = arith.constant dense<0xFF800000> : vector<128xf32>
    %181 = vector.multi_reduction <maximumf>, %180, %cst_88 [1] : vector<128x128xf32> to vector<128xf32>
    %182 = vector.shape_cast %181 : vector<128xf32> to vector<128x1xf32>
    %183 = vector.broadcast %182 : vector<128x1xf32> to vector<128x128xf32>
    %184 = arith.subf %180, %183 : vector<128x128xf32>
    %185 = math.exp %184 : vector<128x128xf32>
    %cst_89 = arith.constant dense<0.000000e+00> : vector<128xf32>
    %186 = vector.multi_reduction <add>, %185, %cst_89 [1] : vector<128x128xf32> to vector<128xf32>
    %187 = vector.shape_cast %186 : vector<128xf32> to vector<128x1xf32>
    %188 = tpu.reciprocal %187 {approx = true} : vector<128x1xf32> -> vector<128x1xf32>
    %189 = vector.broadcast %188 : vector<128x1xf32> to vector<128x128xf32>
    %190 = arith.mulf %185, %189 : vector<128x128xf32>
    %c1_90 = arith.constant 1 : index
    %c0_91 = arith.constant 0 : index
    %c0_92 = arith.constant 0 : index
    %191 = vector.load %arg4[%c1_90, %c0_91, %c0_92] : memref<2x128x128xf32, #tpu.memory_space<vmem>>, vector<1x128x128xf32>
    %192 = vector.shape_cast %191 : vector<1x128x128xf32> to vector<128x128xf32>
    %193 = arith.addf %190, %192 : vector<128x128xf32>
    %c1_93 = arith.constant 1 : index
    %c0_94 = arith.constant 0 : index
    %c0_95 = arith.constant 0 : index
    %194 = vector.load %arg9[%c1_93, %c0_94, %c0_95] : memref<2x128x128xf32, #tpu.memory_space<vmem>>, vector<1x128x128xf32>
    %195 = vector.shape_cast %194 : vector<1x128x128xf32> to vector<128x128xf32>
    %cst_96 = arith.constant dense<0.000000e+00> : vector<128x128xf32>
    %196 = tpu.matmul %193, %195, %cst_96 {dimension_numbers = #tpu.dot_dimension_numbers<[1], [0], [0], [1], [0, 0, 1, 1], [], []>} : vector<128x128xf32>, vector<128x128xf32>, vector<128x128xf32> -> vector<128x128xf32>
    %c1_97 = arith.constant 1 : index
    %c0_98 = arith.constant 0 : index
    %c0_99 = arith.constant 0 : index
    %197 = vector.load %arg5[%c1_97, %c0_98, %c0_99] : memref<2x128x128xf32, #tpu.memory_space<vmem>>, vector<1x128x128xf32>
    %198 = vector.shape_cast %197 : vector<1x128x128xf32> to vector<128x128xf32>
    %199 = arith.addf %196, %198 : vector<128x128xf32>
    %cst_100 = arith.constant 0.000000e+00 : f32
    %200 = vector.broadcast %cst_100 : f32 to vector<128x128xf32>
    %201 = arith.maximumf %199, %200 : vector<128x128xf32>
    %c1_101 = arith.constant 1 : index
    %c0_102 = arith.constant 0 : index
    %c0_103 = arith.constant 0 : index
    %202 = vector.load %arg10[%c1_101, %c0_102, %c0_103] : memref<2x1x128xf32, #tpu.memory_space<vmem>>, vector<1x1x128xf32>
    %203 = vector.shape_cast %202 : vector<1x1x128xf32> to vector<1x128xf32>
    %204 = vector.broadcast %203 : vector<1x128xf32> to vector<128x128xf32>
    %205 = arith.mulf %201, %204 : vector<128x128xf32>
    %cst_104 = arith.constant dense<0.000000e+00> : vector<128xf32>
    %206 = vector.multi_reduction <add>, %205, %cst_104 [1] : vector<128x128xf32> to vector<128xf32>
    %207 = vector.shape_cast %206 : vector<128xf32> to vector<128x1xf32>
    %c1_105 = arith.constant 1 : index
    %c0_106 = arith.constant 0 : index
    %208 = vector.load %arg11[%c1_105, %c0_106] : memref<2x1xf32, #tpu.memory_space<vmem>>, vector<1x1xf32>
    %209 = vector.broadcast %208 : vector<1x1xf32> to vector<128x1xf32>
    %210 = arith.addf %207, %209 : vector<128x1xf32>
    %cst_107 = arith.constant 2.000000e+00 : f32
    %211 = vector.broadcast %cst_107 : f32 to vector<128x1xf32>
    %212 = arith.mulf %211, %210 : vector<128x1xf32>
    %213 = arith.mulf %212, %210 : vector<128x1xf32>
    %cst_108 = arith.constant 9.99999997E-7 : f32
    %214 = vector.broadcast %cst_108 : f32 to vector<128x1xf32>
    %215 = arith.addf %213, %214 : vector<128x1xf32>
    %216 = tpu.reciprocal %215 {approx = true} : vector<128x1xf32> -> vector<128x1xf32>
    %cst_109 = arith.constant 0.000000e+00 : f32
    %217 = vector.broadcast %cst_109 : f32 to vector<128x128xf32>
    %218 = arith.subf %217, %4 : vector<128x128xf32>
    %219 = vector.broadcast %216 : vector<128x1xf32> to vector<128x128xf32>
    %220 = arith.mulf %218, %219 : vector<128x128xf32>
    %221 = math.exp %220 : vector<128x128xf32>
    %222 = arith.mulf %190, %221 : vector<128x128xf32>
    %223 = arith.addf %222, %3 : vector<128x128xf32>
    %cst_110 = arith.constant dense<0xFF800000> : vector<128xf32>
    %224 = vector.multi_reduction <maximumf>, %223, %cst_110 [1] : vector<128x128xf32> to vector<128xf32>
    %225 = vector.shape_cast %224 : vector<128xf32> to vector<128x1xf32>
    %226 = vector.broadcast %225 : vector<128x1xf32> to vector<128x128xf32>
    %227 = arith.subf %223, %226 : vector<128x128xf32>
    %228 = math.exp %227 : vector<128x128xf32>
    %cst_111 = arith.constant dense<0.000000e+00> : vector<128xf32>
    %229 = vector.multi_reduction <add>, %228, %cst_111 [1] : vector<128x128xf32> to vector<128xf32>
    %230 = vector.shape_cast %229 : vector<128xf32> to vector<128x1xf32>
    %231 = tpu.reciprocal %230 {approx = true} : vector<128x1xf32> -> vector<128x1xf32>
    %232 = vector.broadcast %231 : vector<128x1xf32> to vector<128x128xf32>
    %233 = arith.mulf %228, %232 : vector<128x128xf32>
    %234 = arith.truncf %233 : vector<128x128xf32> to vector<128x128xbf16>
    %cst_112 = arith.constant dense<0.000000e+00> : vector<128x32xf32>
    %235 = tpu.matmul %234, %178, %cst_112 {dimension_numbers = #tpu.dot_dimension_numbers<[1], [0], [0], [1], [0, 0, 1, 1], [], []>} : vector<128x128xbf16>, vector<128x32xbf16>, vector<128x32xf32> -> vector<128x32xf32>
    %236 = arith.truncf %235 : vector<128x32xf32> to vector<128x32xbf16>
    %c1_113 = arith.constant 1 : index
    %c0_114 = arith.constant 0 : index
    %c0_115 = arith.constant 0 : index
    %237 = vector.load %arg12[%c1_113, %c0_114, %c0_115] : memref<2x32x32xbf16, #tpu.memory_space<vmem>>, vector<1x32x32xbf16>
    %238 = vector.shape_cast %237 : vector<1x32x32xbf16> to vector<32x32xbf16>
    %cst_116 = arith.constant dense<0.000000e+00> : vector<128x32xf32>
    %239 = tpu.matmul %236, %238, %cst_116 {dimension_numbers = #tpu.dot_dimension_numbers<[1], [0], [0], [1], [0, 0, 1, 1], [], []>} : vector<128x32xbf16>, vector<32x32xbf16>, vector<128x32xf32> -> vector<128x32xf32>
    %c1_117 = arith.constant 1 : index
    %c0_118 = arith.constant 0 : index
    %240 = vector.load %arg13[%c1_117, %c0_118] : memref<2x32xf32, #tpu.memory_space<vmem>>, vector<1x32xf32>
    %241 = vector.broadcast %240 : vector<1x32xf32> to vector<128x32xf32>
    %242 = arith.addf %239, %241 : vector<128x32xf32>
    %243 = arith.addf %146, %242 : vector<128x32xf32>
    %c1_119 = arith.constant 1 : index
    %c0_120 = arith.constant 0 : index
    %244 = vector.load %arg14[%c1_119, %c0_120] : memref<2x32xf32, #tpu.memory_space<vmem>>, vector<1x32xf32>
    %c1_121 = arith.constant 1 : index
    %c0_122 = arith.constant 0 : index
    %245 = vector.load %arg15[%c1_121, %c0_122] : memref<2x32xf32, #tpu.memory_space<vmem>>, vector<1x32xf32>
    %cst_123 = arith.constant dense<0.000000e+00> : vector<128xf32>
    %246 = vector.multi_reduction <add>, %243, %cst_123 [1] : vector<128x32xf32> to vector<128xf32>
    %247 = vector.shape_cast %246 : vector<128xf32> to vector<128x1xf32>
    %cst_124 = arith.constant 3.200000e+01 : f32
    %248 = vector.broadcast %cst_124 : f32 to vector<128x1xf32>
    %249 = arith.divf %247, %248 : vector<128x1xf32>
    %250 = vector.broadcast %249 : vector<128x1xf32> to vector<128x32xf32>
    %251 = arith.subf %243, %250 : vector<128x32xf32>
    %252 = arith.mulf %251, %251 : vector<128x32xf32>
    %cst_125 = arith.constant dense<0.000000e+00> : vector<128xf32>
    %253 = vector.multi_reduction <add>, %252, %cst_125 [1] : vector<128x32xf32> to vector<128xf32>
    %254 = vector.shape_cast %253 : vector<128xf32> to vector<128x1xf32>
    %cst_126 = arith.constant 3.200000e+01 : f32
    %255 = vector.broadcast %cst_126 : f32 to vector<128x1xf32>
    %256 = arith.divf %254, %255 : vector<128x1xf32>
    %cst_127 = arith.constant 9.99999974E-6 : f32
    %257 = vector.broadcast %cst_127 : f32 to vector<128x1xf32>
    %258 = arith.addf %256, %257 : vector<128x1xf32>
    %259 = math.rsqrt %258 : vector<128x1xf32>
    %260 = vector.broadcast %259 : vector<128x1xf32> to vector<128x32xf32>
    %261 = arith.mulf %251, %260 : vector<128x32xf32>
    %262 = vector.broadcast %244 : vector<1x32xf32> to vector<128x32xf32>
    %263 = arith.mulf %261, %262 : vector<128x32xf32>
    %264 = vector.broadcast %245 : vector<1x32xf32> to vector<128x32xf32>
    %265 = arith.addf %263, %264 : vector<128x32xf32>
    %266 = arith.truncf %265 : vector<128x32xf32> to vector<128x32xbf16>
    %c1_128 = arith.constant 1 : index
    %c0_129 = arith.constant 0 : index
    %c0_130 = arith.constant 0 : index
    %267 = vector.load %arg16[%c1_128, %c0_129, %c0_130] : memref<2x32x32xbf16, #tpu.memory_space<vmem>>, vector<1x32x32xbf16>
    %268 = vector.shape_cast %267 : vector<1x32x32xbf16> to vector<32x32xbf16>
    %cst_131 = arith.constant dense<0.000000e+00> : vector<128x32xf32>
    %269 = tpu.matmul %266, %268, %cst_131 {dimension_numbers = #tpu.dot_dimension_numbers<[1], [0], [0], [1], [0, 0, 1, 1], [], []>} : vector<128x32xbf16>, vector<32x32xbf16>, vector<128x32xf32> -> vector<128x32xf32>
    %c1_132 = arith.constant 1 : index
    %c0_133 = arith.constant 0 : index
    %270 = vector.load %arg17[%c1_132, %c0_133] : memref<2x32xf32, #tpu.memory_space<vmem>>, vector<1x32xf32>
    %271 = vector.broadcast %270 : vector<1x32xf32> to vector<128x32xf32>
    %272 = arith.addf %269, %271 : vector<128x32xf32>
    %cst_134 = arith.constant 5.000000e-01 : f32
    %273 = vector.broadcast %cst_134 : f32 to vector<128x32xf32>
    %274 = arith.mulf %273, %272 : vector<128x32xf32>
    %cst_135 = arith.constant 0.707106769 : f32
    %275 = vector.broadcast %cst_135 : f32 to vector<128x32xf32>
    %276 = arith.mulf %272, %275 : vector<128x32xf32>
    %277 = math.erf %276 : vector<128x32xf32>
    %cst_136 = arith.constant 1.000000e+00 : f32
    %278 = vector.broadcast %cst_136 : f32 to vector<128x32xf32>
    %279 = arith.addf %278, %277 : vector<128x32xf32>
    %280 = arith.mulf %274, %279 : vector<128x32xf32>
    %281 = arith.truncf %280 : vector<128x32xf32> to vector<128x32xbf16>
    %c1_137 = arith.constant 1 : index
    %c0_138 = arith.constant 0 : index
    %c0_139 = arith.constant 0 : index
    %282 = vector.load %arg18[%c1_137, %c0_138, %c0_139] : memref<2x32x32xbf16, #tpu.memory_space<vmem>>, vector<1x32x32xbf16>
    %283 = vector.shape_cast %282 : vector<1x32x32xbf16> to vector<32x32xbf16>
    %cst_140 = arith.constant dense<0.000000e+00> : vector<128x32xf32>
    %284 = tpu.matmul %281, %283, %cst_140 {dimension_numbers = #tpu.dot_dimension_numbers<[1], [0], [0], [1], [0, 0, 1, 1], [], []>} : vector<128x32xbf16>, vector<32x32xbf16>, vector<128x32xf32> -> vector<128x32xf32>
    %c1_141 = arith.constant 1 : index
    %c0_142 = arith.constant 0 : index
    %285 = vector.load %arg19[%c1_141, %c0_142] : memref<2x32xf32, #tpu.memory_space<vmem>>, vector<1x32xf32>
    %286 = vector.broadcast %285 : vector<1x32xf32> to vector<128x32xf32>
    %287 = arith.addf %284, %286 : vector<128x32xf32>
    %288 = arith.addf %243, %287 : vector<128x32xf32>
    %289 = tpu.transpose %288, [1, 0] : vector<128x32xf32> -> vector<32x128xf32>
    %c0_143 = arith.constant 0 : index
    %c0_144 = arith.constant 0 : index
    %290 = vector.load %arg20[%c0_143, %c0_144] : memref<32x128xf32, #tpu.memory_space<vmem>>, vector<32x128xf32>
    tpu.vector_store %arg20[%c0_143, %c0_144], %289 {strides = array<i32>} : memref<32x128xf32, #tpu.memory_space<vmem>>, vector<32x128xf32>,
    return
  }
}

</mosaic_0001>

<bundles_post_ra>
// kernel: tile.16
= control target key start
LH: loop header
LB: loop body
LE: loop exit
PB: predicated region body
PF: predicated region fallthrough
CT: control target
= control target key end

     0   :  { %s888_s0 = inlined_call_operand.vmem [shape: f32[16,16], index: 0, kind: input, shape index: {}]   ;;  %s889_s1 = inlined_call_operand.vmem [shape: f32[8,16,8,16], index: 1, kind: output, shape index: {}]  }
   0x1   :  { %v4_v0 = vld [vmem:[%s888_s0] ss:$0 sm:$0xff]  ;;  %v311_v1 = vld [vmem:[%s888_s0 + $0x1] ss:$0 sm:$0xff]  ;;  %v320_v2 = vld [vmem:[%s888_s0 + $0x2] ss:$0 sm:$0xff] }
   0x2   :  { %5 = vst [vmem:[%s889_s1] sm:$0xff] %v4_v0  ;;  %304 = vst [vmem:[%s889_s1 + $0x80] sm:$0xff] %v4_v0  ;;  %v329_v3 = vld [vmem:[%s888_s0 + $0x3] ss:$0 sm:$0xff]  ;;  %v338_v4 = vld [vmem:[%s888_s0 + $0x4] ss:$0 sm:$0xff] }
   0x3   :  { %305 = vst [vmem:[%s889_s1 + $0x100] sm:$0xff] %v4_v0  ;;  %306 = vst [vmem:[%s889_s1 + $0x180] sm:$0xff] %v4_v0  ;;  %v347_v5 = vld [vmem:[%s888_s0 + $0x5] ss:$0 sm:$0xff]  ;;  %v356_v6 = vld [vmem:[%s888_s0 + $0x6] ss:$0 sm:$0xff] }
   0x4   :  { %307 = vst [vmem:[%s889_s1 + $0x200] sm:$0xff] %v4_v0  ;;  %308 = vst [vmem:[%s889_s1 + $0x280] sm:$0xff] %v4_v0  ;;  %v365_v7 = vld [vmem:[%s888_s0 + $0x7] ss:$0 sm:$0xff]  ;;  %v374_v8 = vld [vmem:[%s888_s0 + $0x8] ss:$0 sm:$0xff] }
   0x5   :  { %309 = vst [vmem:[%s889_s1 + $0x300] sm:$0xff] %v4_v0  ;;  %310 = vst [vmem:[%s889_s1 + $0x380] sm:$0xff] %v4_v0  ;;  %v383_v9 = vld [vmem:[%s888_s0 + $0x9] ss:$0 sm:$0xff]  ;;  %v392_v10 = vld [vmem:[%s888_s0 + $0xa] ss:$0 sm:$0xff] }
   0x6   :  { %312 = vst [vmem:[%s889_s1 + $0x8] sm:$0xff] %v311_v1  ;;  %313 = vst [vmem:[%s889_s1 + $0x88] sm:$0xff] %v311_v1  ;;  %v401_v11 = vld [vmem:[%s888_s0 + $0xb] ss:$0 sm:$0xff]  ;;  %v410_v12 = vld [vmem:[%s888_s0 + $0xc] ss:$0 sm:$0xff] }
   0x7   :  { %314 = vst [vmem:[%s889_s1 + $0x108] sm:$0xff] %v311_v1  ;;  %315 = vst [vmem:[%s889_s1 + $0x188] sm:$0xff] %v311_v1  ;;  %v419_v13 = vld [vmem:[%s888_s0 + $0xd] ss:$0 sm:$0xff]  ;;  %v428_v14 = vld [vmem:[%s888_s0 + $0xe] ss:$0 sm:$0xff] }
   0x8   :  { %316 = vst [vmem:[%s889_s1 + $0x208] sm:$0xff] %v311_v1  ;;  %317 = vst [vmem:[%s889_s1 + $0x288] sm:$0xff] %v311_v1  ;;  %v437_v15 = vld [vmem:[%s888_s0 + $0xf] ss:$0 sm:$0xff] }
   0x9   :  { %318 = vst [vmem:[%s889_s1 + $0x308] sm:$0xff] %v311_v1  ;;  %319 = vst [vmem:[%s889_s1 + $0x388] sm:$0xff] %v311_v1 }
   0xa   :  { %321 = vst [vmem:[%s889_s1 + $0x10] sm:$0xff] %v320_v2  ;;  %322 = vst [vmem:[%s889_s1 + $0x90] sm:$0xff] %v320_v2 }
   0xb   :  { %323 = vst [vmem:[%s889_s1 + $0x110] sm:$0xff] %v320_v2  ;;  %324 = vst [vmem:[%s889_s1 + $0x190] sm:$0xff] %v320_v2 }
   0xc   :  { %325 = vst [vmem:[%s889_s1 + $0x210] sm:$0xff] %v320_v2  ;;  %326 = vst [vmem:[%s889_s1 + $0x290] sm:$0xff] %v320_v2 }
   0xd   :  { %327 = vst [vmem:[%s889_s1 + $0x310] sm:$0xff] %v320_v2  ;;  %328 = vst [vmem:[%s889_s1 + $0x390] sm:$0xff] %v320_v2 }
   0xe   :  { %330 = vst [vmem:[%s889_s1 + $0x18] sm:$0xff] %v329_v3  ;;  %331 = vst [vmem:[%s889_s1 + $0x98] sm:$0xff] %v329_v3 }
   0xf   :  { %332 = vst [vmem:[%s889_s1 + $0x118] sm:$0xff] %v329_v3  ;;  %333 = vst [vmem:[%s889_s1 + $0x198] sm:$0xff] %v329_v3 }
  0x10   :  { %334 = vst [vmem:[%s889_s1 + $0x218] sm:$0xff] %v329_v3  ;;  %335 = vst [vmem:[%s889_s1 + $0x298] sm:$0xff] %v329_v3 }
  0x11   :  { %336 = vst [vmem:[%s889_s1 + $0x318] sm:$0xff] %v329_v3  ;;  %337 = vst [vmem:[%s889_s1 + $0x398] sm:$0xff] %v329_v3 }
  0x12   :  { %339 = vst [vmem:[%s889_s1 + $0x20] sm:$0xff] %v338_v4  ;;  %340 = vst [vmem:[%s889_s1 + $0xa0] sm:$0xff] %v338_v4 }
  0x13   :  { %341 = vst [vmem:[%s889_s1 + $0x120] sm:$0xff] %v338_v4  ;;  %342 = vst [vmem:[%s889_s1 + $0x1a0] sm:$0xff] %v338_v4 }
  0x14   :  { %343 = vst [vmem:[%s889_s1 + $0x220] sm:$0xff] %v338_v4  ;;  %344 = vst [vmem:[%s889_s1 + $0x2a0] sm:$0xff] %v338_v4 }
  0x15   :  { %345 = vst [vmem:[%s889_s1 + $0x320] sm:$0xff] %v338_v4  ;;  %346 = vst [vmem:[%s889_s1 + $0x3a0] sm:$0xff] %v338_v4 }
  0x16   :  { %348 = vst [vmem:[%s889_s1 + $0x28] sm:$0xff] %v347_v5  ;;  %349 = vst [vmem:[%s889_s1 + $0xa8] sm:$0xff] %v347_v5 }
  0x17   :  { %350 = vst [vmem:[%s889_s1 + $0x128] sm:$0xff] %v347_v5  ;;  %351 = vst [vmem:[%s889_s1 + $0x1a8] sm:$0xff] %v347_v5 }
  0x18   :  { %352 = vst [vmem:[%s889_s1 + $0x228] sm:$0xff] %v347_v5  ;;  %353 = vst [vmem:[%s889_s1 + $0x2a8] sm:$0xff] %v347_v5 }
  0x19   :  { %354 = vst [vmem:[%s889_s1 + $0x328] sm:$0xff] %v347_v5  ;;  %355 = vst [vmem:[%s889_s1 + $0x3a8] sm:$0xff] %v347_v5 }
  0x1a   :  { %357 = vst [vmem:[%s889_s1 + $0x30] sm:$0xff] %v356_v6  ;;  %358 = vst [vmem:[%s889_s1 + $0xb0] sm:$0xff] %v356_v6 }
  0x1b   :  { %359 = vst [vmem:[%s889_s1 + $0x130] sm:$0xff] %v356_v6  ;;  %360 = vst [vmem:[%s889_s1 + $0x1b0] sm:$0xff] %v356_v6 }
  0x1c   :  { %361 = vst [vmem:[%s889_s1 + $0x230] sm:$0xff] %v356_v6  ;;  %362 = vst [vmem:[%s889_s1 + $0x2b0] sm:$0xff] %v356_v6 }
  0x1d   :  { %363 = vst [vmem:[%s889_s1 + $0x330] sm:$0xff] %v356_v6  ;;  %364 = vst [vmem:[%s889_s1 + $0x3b0] sm:$0xff] %v356_v6 }
  0x1e   :  { %366 = vst [vmem:[%s889_s1 + $0x38] sm:$0xff] %v365_v7  ;;  %367 = vst [vmem:[%s889_s1 + $0xb8] sm:$0xff] %v365_v7 }
  0x1f   :  { %368 = vst [vmem:[%s889_s1 + $0x138] sm:$0xff] %v365_v7  ;;  %369 = vst [vmem:[%s889_s1 + $0x1b8] sm:$0xff] %v365_v7 }
  0x20   :  { %370 = vst [vmem:[%s889_s1 + $0x238] sm:$0xff] %v365_v7  ;;  %371 = vst [vmem:[%s889_s1 + $0x2b8] sm:$0xff] %v365_v7 }
  0x21   :  { %372 = vst [vmem:[%s889_s1 + $0x338] sm:$0xff] %v365_v7  ;;  %373 = vst [vmem:[%s889_s1 + $0x3b8] sm:$0xff] %v365_v7 }
  0x22   :  { %375 = vst [vmem:[%s889_s1 + $0x40] sm:$0xff] %v374_v8  ;;  %376 = vst [vmem:[%s889_s1 + $0xc0] sm:$0xff] %v374_v8 }
  0x23   :  { %377 = vst [vmem:[%s889_s1 + $0x140] sm:$0xff] %v374_v8  ;;  %378 = vst [vmem:[%s889_s1 + $0x1c0] sm:$0xff] %v374_v8 }
  0x24   :  { %379 = vst [vmem:[%s889_s1 + $0x240] sm:$0xff] %v374_v8  ;;  %380 = vst [vmem:[%s889_s1 + $0x2c0] sm:$0xff] %v374_v8 }
  0x25   :  { %381 = vst [vmem:[%s889_s1 + $0x340] sm:$0xff] %v374_v8  ;;  %382 = vst [vmem:[%s889_s1 + $0x3c0] sm:$0xff] %v374_v8 }
  0x26   :  { %384 = vst [vmem:[%s889_s1 + $0x48] sm:$0xff] %v383_v9  ;;  %385 = vst [vmem:[%s889_s1 + $0xc8] sm:$0xff] %v383_v9 }
  0x27   :  { %386 = vst [vmem:[%s889_s1 + $0x148] sm:$0xff] %v383_v9  ;;  %387 = vst [vmem:[%s889_s1 + $0x1c8] sm:$0xff] %v383_v9 }
  0x28   :  { %388 = vst [vmem:[%s889_s1 + $0x248] sm:$0xff] %v383_v9  ;;  %389 = vst [vmem:[%s889_s1 + $0x2c8] sm:$0xff] %v383_v9 }
  0x29   :  { %390 = vst [vmem:[%s889_s1 + $0x348] sm:$0xff] %v383_v9  ;;  %391 = vst [vmem:[%s889_s1 + $0x3c8] sm:$0xff] %v383_v9 }
  0x2a   :  { %393 = vst [vmem:[%s889_s1 + $0x50] sm:$0xff] %v392_v10  ;;  %394 = vst [vmem:[%s889_s1 + $0xd0] sm:$0xff] %v392_v10 }
  0x2b   :  { %395 = vst [vmem:[%s889_s1 + $0x150] sm:$0xff] %v392_v10  ;;  %396 = vst [vmem:[%s889_s1 + $0x1d0] sm:$0xff] %v392_v10 }
  0x2c   :  { %397 = vst [vmem:[%s889_s1 + $0x250] sm:$0xff] %v392_v10  ;;  %398 = vst [vmem:[%s889_s1 + $0x2d0] sm:$0xff] %v392_v10 }
  0x2d   :  { %399 = vst [vmem:[%s889_s1 + $0x350] sm:$0xff] %v392_v10  ;;  %400 = vst [vmem:[%s889_s1 + $0x3d0] sm:$0xff] %v392_v10 }
  0x2e   :  { %402 = vst [vmem:[%s889_s1 + $0x58] sm:$0xff] %v401_v11  ;;  %403 = vst [vmem:[%s889_s1 + $0xd8] sm:$0xff] %v401_v11 }
  0x2f   :  { %404 = vst [vmem:[%s889_s1 + $0x158] sm:$0xff] %v401_v11  ;;  %405 = vst [vmem:[%s889_s1 + $0x1d8] sm:$0xff] %v401_v11 }
  0x30   :  { %406 = vst [vmem:[%s889_s1 + $0x258] sm:$0xff] %v401_v11  ;;  %407 = vst [vmem:[%s889_s1 + $0x2d8] sm:$0xff] %v401_v11 }
  0x31   :  { %408 = vst [vmem:[%s889_s1 + $0x358] sm:$0xff] %v401_v11  ;;  %409 = vst [vmem:[%s889_s1 + $0x3d8] sm:$0xff] %v401_v11 }
  0x32   :  { %411 = vst [vmem:[%s889_s1 + $0x60] sm:$0xff] %v410_v12  ;;  %412 = vst [vmem:[%s889_s1 + $0xe0] sm:$0xff] %v410_v12 }
  0x33   :  { %413 = vst [vmem:[%s889_s1 + $0x160] sm:$0xff] %v410_v12  ;;  %414 = vst [vmem:[%s889_s1 + $0x1e0] sm:$0xff] %v410_v12 }
  0x34   :  { %415 = vst [vmem:[%s889_s1 + $0x260] sm:$0xff] %v410_v12  ;;  %416 = vst [vmem:[%s889_s1 + $0x2e0] sm:$0xff] %v410_v12 }
  0x35   :  { %417 = vst [vmem:[%s889_s1 + $0x360] sm:$0xff] %v410_v12  ;;  %418 = vst [vmem:[%s889_s1 + $0x3e0] sm:$0xff] %v410_v12 }
  0x36   :  { %420 = vst [vmem:[%s889_s1 + $0x68] sm:$0xff] %v419_v13  ;;  %421 = vst [vmem:[%s889_s1 + $0xe8] sm:$0xff] %v419_v13 }
  0x37   :  { %422 = vst [vmem:[%s889_s1 + $0x168] sm:$0xff] %v419_v13  ;;  %423 = vst [vmem:[%s889_s1 + $0x1e8] sm:$0xff] %v419_v13 }
  0x38   :  { %424 = vst [vmem:[%s889_s1 + $0x268] sm:$0xff] %v419_v13  ;;  %425 = vst [vmem:[%s889_s1 + $0x2e8] sm:$0xff] %v419_v13 }
  0x39   :  { %426 = vst [vmem:[%s889_s1 + $0x368] sm:$0xff] %v419_v13  ;;  %427 = vst [vmem:[%s889_s1 + $0x3e8] sm:$0xff] %v419_v13 }
  0x3a   :  { %429 = vst [vmem:[%s889_s1 + $0x70] sm:$0xff] %v428_v14  ;;  %430 = vst [vmem:[%s889_s1 + $0xf0] sm:$0xff] %v428_v14 }
  0x3b   :  { %431 = vst [vmem:[%s889_s1 + $0x170] sm:$0xff] %v428_v14  ;;  %432 = vst [vmem:[%s889_s1 + $0x1f0] sm:$0xff] %v428_v14 }
  0x3c   :  { %433 = vst [vmem:[%s889_s1 + $0x270] sm:$0xff] %v428_v14  ;;  %434 = vst [vmem:[%s889_s1 + $0x2f0] sm:$0xff] %v428_v14 }
  0x3d   :  { %435 = vst [vmem:[%s889_s1 + $0x370] sm:$0xff] %v428_v14  ;;  %436 = vst [vmem:[%s889_s1 + $0x3f0] sm:$0xff] %v428_v14 }
  0x3e   :  { %438 = vst [vmem:[%s889_s1 + $0x78] sm:$0xff] %v437_v15  ;;  %439 = vst [vmem:[%s889_s1 + $0xf8] sm:$0xff] %v437_v15 }
  0x3f   :  { %440 = vst [vmem:[%s889_s1 + $0x178] sm:$0xff] %v437_v15  ;;  %441 = vst [vmem:[%s889_s1 + $0x1f8] sm:$0xff] %v437_v15 }
  0x40   :  { %442 = vst [vmem:[%s889_s1 + $0x278] sm:$0xff] %v437_v15  ;;  %443 = vst [vmem:[%s889_s1 + $0x2f8] sm:$0xff] %v437_v15 }
  0x41   :  { %444 = vst [vmem:[%s889_s1 + $0x378] sm:$0xff] %v437_v15  ;;  %445 = vst [vmem:[%s889_s1 + $0x3f8] sm:$0xff] %v437_v15 }

// kernel: tile.17
= control target key start
LH: loop header
LB: loop body
LE: loop exit
PB: predicated region body
PF: predicated region fallthrough
CT: control target
= control target key end

     0   :  { %vm4_vm0 = vcmask 1047556   ;;  %s1749_s14 = smov 112   ;;  %s1750_s30 = smov 96   ;;  %vm6_vm1 = vcmask 130048   ;;  %vm151_vm2 = vcmask 1048448   ;;  %vm326_vm3 = vcmask 917248   ;;  %s3286_s0 = inlined_call_operand.vmem [shape: f32[8,16,8,16], index: 0, kind: input, shape index: {}]   ;;  %s3287_s1 = inlined_call_operand.vmem [shape: f32[128,128], index: 1, kind: output, shape index: {}]  }
   0x1   :  { %v1418_v0 = vld [vmem:[%s3286_s0 + $0x207] ss:$8 sm:$0xf]   ;;  %v1462_v48 = vld [vmem:[%s3286_s0 + $0x106] ss:$8 sm:$0xf]  }
   0x2   :  { %v1419_v1 = vld [vmem:[%s3286_s0 + $0x207] ss:$8 sm:$0xf0]   ;;  %v1463_v49 = vld [vmem:[%s3286_s0 + $0x106] ss:$8 sm:$0xf0]  }
   0x3   :  { %v169_v2 = vsel %vm4_vm0, %v1419_v1, %v1418_v0  ;;  %v1413_v3 = vld [vmem:[%s3286_s0 + $0x7] ss:$8 sm:$0xf]   ;;  %v1460_v50 = vld [vmem:[%s3286_s0 + $0x6] ss:$8 sm:$0xf]   ;;  %v333_v52 = vsel %vm4_vm0, %v1463_v49, %v1462_v48 }
   0x4   :  { %v1414_v4 = vld [vmem:[%s3286_s0 + $0x7] ss:$8 sm:$0xf0]   ;;  %170 = vrot.lane.b32.xlu1 %v169_v2, %s1749_s14  ;;  %v1461_v51 = vld [vmem:[%s3286_s0 + $0x6] ss:$8 sm:$0xf0]  }
   0x5   :  { %v148_v5 = vsel %vm4_vm0, %v1414_v4, %v1413_v3  ;;  %v1421_v6 = vld [vmem:[%s3286_s0 + $0x307] ss:$8 sm:$0xf]   ;;  %v323_v53 = vsel %vm4_vm0, %v1461_v51, %v1460_v50  ;;  %v1468_v54 = vld [vmem:[%s3286_s0 + $0x306] ss:$8 sm:$0xf]  }
   0x6   :  { %v1422_v7 = vld [vmem:[%s3286_s0 + $0x307] ss:$8 sm:$0xf0]   ;;  %149 = vrot.lane.b32.xlu0 %v148_v5, %s1749_s14  ;;  %v1469_v55 = vld [vmem:[%s3286_s0 + $0x306] ss:$8 sm:$0xf0]  }
   0x7   :  { %v180_v8 = vsel %vm4_vm0, %v1422_v7, %v1421_v6  ;;  %v1415_v9 = vld [vmem:[%s3286_s0 + $0x107] ss:$8 sm:$0xf]   ;;  %v1465_v56 = vld [vmem:[%s3286_s0 + $0x206] ss:$8 sm:$0xf]   ;;  %v355_v58 = vsel %vm4_vm0, %v1469_v55, %v1468_v54 }
   0x8   :  { %v1416_v10 = vld [vmem:[%s3286_s0 + $0x107] ss:$8 sm:$0xf0]   ;;  %181 = vrot.lane.b32.xlu1 %v180_v8, %s1749_s14  ;;  %v1466_v57 = vld [vmem:[%s3286_s0 + $0x206] ss:$8 sm:$0xf0]  }
   0x9   :  { %v158_v11 = vsel %vm4_vm0, %v1416_v10, %v1415_v9  ;;  %v1427_v12 = vld [vmem:[%s3286_s0 + $0x147] ss:$8 sm:$0xf]   ;;  %v344_v59 = vsel %vm4_vm0, %v1466_v57, %v1465_v56  ;;  %v1474_v60 = vld [vmem:[%s3286_s0 + $0x146] ss:$8 sm:$0xf]  }
   0xa   :  { %v1428_v13 = vld [vmem:[%s3286_s0 + $0x147] ss:$8 sm:$0xf0]   ;;  %159 = vrot.lane.b32.xlu0 %v158_v11, %s1749_s14  ;;  %v1475_v61 = vld [vmem:[%s3286_s0 + $0x146] ss:$8 sm:$0xf0]  }
   0xb   :  { %v1424_v14 = vld [vmem:[%s3286_s0 + $0x47] ss:$8 sm:$0xf]   ;;  %v202_v16 = vsel %vm4_vm0, %v1428_v13, %v1427_v12  ;;  %v1471_v62 = vld [vmem:[%s3286_s0 + $0x46] ss:$8 sm:$0xf]   ;;  %v377_v0 = vsel %vm4_vm0, %v1475_v61, %v1474_v60 }
   0xc   :  { %v1425_v15 = vld [vmem:[%s3286_s0 + $0x47] ss:$8 sm:$0xf0]   ;;  %203 = vrot.lane.b32.xlu1 %v202_v16, %s1749_s14  ;;  %v1472_v63 = vld [vmem:[%s3286_s0 + $0x46] ss:$8 sm:$0xf0]  }
   0xd   :  { %v191_v17 = vsel %vm4_vm0, %v1425_v15, %v1424_v14  ;;  %v1433_v18 = vld [vmem:[%s3286_s0 + $0x347] ss:$8 sm:$0xf]   ;;  %v366_v1 = vsel %vm4_vm0, %v1472_v63, %v1471_v62  ;;  %v1480_v2 = vld [vmem:[%s3286_s0 + $0x346] ss:$8 sm:$0xf]  }
   0xe   :  { %v1434_v19 = vld [vmem:[%s3286_s0 + $0x347] ss:$8 sm:$0xf0]   ;;  %192 = vrot.lane.b32.xlu0 %v191_v17, %s1749_s14  ;;  %v1481_v3 = vld [vmem:[%s3286_s0 + $0x346] ss:$8 sm:$0xf0]  }
   0xf   :  { %v1430_v20 = vld [vmem:[%s3286_s0 + $0x247] ss:$8 sm:$0xf]   ;;  %v224_v22 = vsel %vm4_vm0, %v1434_v19, %v1433_v18  ;;  %v1477_v4 = vld [vmem:[%s3286_s0 + $0x246] ss:$8 sm:$0xf]   ;;  %v399_v6 = vsel %vm4_vm0, %v1481_v3, %v1480_v2 }
  0x10   :  { %v1431_v21 = vld [vmem:[%s3286_s0 + $0x247] ss:$8 sm:$0xf0]   ;;  %225 = vrot.lane.b32.xlu1 %v224_v22, %s1749_s14  ;;  %v1478_v5 = vld [vmem:[%s3286_s0 + $0x246] ss:$8 sm:$0xf0]  }
  0x11   :  { %v213_v23 = vsel %vm4_vm0, %v1431_v21, %v1430_v20  ;;  %v1439_v24 = vld [vmem:[%s3286_s0 + $0x187] ss:$8 sm:$0xf]   ;;  %v388_v7 = vsel %vm4_vm0, %v1478_v5, %v1477_v4  ;;  %v1486_v8 = vld [vmem:[%s3286_s0 + $0x186] ss:$8 sm:$0xf]  }
  0x12   :  { %v1440_v25 = vld [vmem:[%s3286_s0 + $0x187] ss:$8 sm:$0xf0]   ;;  %214 = vrot.lane.b32.xlu0 %v213_v23, %s1749_s14  ;;  %v1487_v9 = vld [vmem:[%s3286_s0 + $0x186] ss:$8 sm:$0xf0]  }
  0x13   :  { %v1436_v26 = vld [vmem:[%s3286_s0 + $0x87] ss:$8 sm:$0xf]   ;;  %v246_v28 = vsel %vm4_vm0, %v1440_v25, %v1439_v24  ;;  %v1483_v10 = vld [vmem:[%s3286_s0 + $0x86] ss:$8 sm:$0xf]   ;;  %v421_v12 = vsel %vm4_vm0, %v1487_v9, %v1486_v8 }
  0x14   :  { %v1437_v27 = vld [vmem:[%s3286_s0 + $0x87] ss:$8 sm:$0xf0]   ;;  %247 = vrot.lane.b32.xlu1 %v246_v28, %s1749_s14  ;;  %v1484_v11 = vld [vmem:[%s3286_s0 + $0x86] ss:$8 sm:$0xf0]  }
  0x15   :  { %v235_v29 = vsel %vm4_vm0, %v1437_v27, %v1436_v26  ;;  %v1445_v30 = vld [vmem:[%s3286_s0 + $0x387] ss:$8 sm:$0xf]   ;;  %v410_v13 = vsel %vm4_vm0, %v1484_v11, %v1483_v10  ;;  %v1492_v14 = vld [vmem:[%s3286_s0 + $0x386] ss:$8 sm:$0xf]  }
  0x16   :  { %v1446_v31 = vld [vmem:[%s3286_s0 + $0x387] ss:$8 sm:$0xf0]   ;;  %236 = vrot.lane.b32.xlu0 %v235_v29, %s1749_s14  ;;  %v1493_v15 = vld [vmem:[%s3286_s0 + $0x386] ss:$8 sm:$0xf0]  }
  0x17   :  { %v1442_v32 = vld [vmem:[%s3286_s0 + $0x287] ss:$8 sm:$0xf]   ;;  %v268_v34 = vsel %vm4_vm0, %v1446_v31, %v1445_v30  ;;  %v1489_v16 = vld [vmem:[%s3286_s0 + $0x286] ss:$8 sm:$0xf]   ;;  %v443_v18 = vsel %vm4_vm0, %v1493_v15, %v1492_v14 }
  0x18   :  { %v1443_v33 = vld [vmem:[%s3286_s0 + $0x287] ss:$8 sm:$0xf0]   ;;  %269 = vrot.lane.b32.xlu1 %v268_v34, %s1749_s14  ;;  %v1490_v17 = vld [vmem:[%s3286_s0 + $0x286] ss:$8 sm:$0xf0]  }
  0x19   :  { %v257_v35 = vsel %vm4_vm0, %v1443_v33, %v1442_v32  ;;  %v1451_v36 = vld [vmem:[%s3286_s0 + $0x1c7] ss:$8 sm:$0xf]   ;;  %v432_v19 = vsel %vm4_vm0, %v1490_v17, %v1489_v16  ;;  %v1498_v20 = vld [vmem:[%s3286_s0 + $0x1c6] ss:$8 sm:$0xf]  }
  0x1a   :  { %v1452_v37 = vld [vmem:[%s3286_s0 + $0x1c7] ss:$8 sm:$0xf0]   ;;  %258 = vrot.lane.b32.xlu0 %v257_v35, %s1749_s14  ;;  %v1499_v21 = vld [vmem:[%s3286_s0 + $0x1c6] ss:$8 sm:$0xf0]  }
  0x1b   :  { %v1448_v38 = vld [vmem:[%s3286_s0 + $0xc7] ss:$8 sm:$0xf]   ;;  %v290_v40 = vsel %vm4_vm0, %v1452_v37, %v1451_v36  ;;  %v1495_v22 = vld [vmem:[%s3286_s0 + $0xc6] ss:$8 sm:$0xf]   ;;  %v465_v24 = vsel %vm4_vm0, %v1499_v21, %v1498_v20 }
  0x1c   :  { %v1449_v39 = vld [vmem:[%s3286_s0 + $0xc7] ss:$8 sm:$0xf0]   ;;  %291 = vrot.lane.b32.xlu1 %v290_v40, %s1749_s14  ;;  %v1496_v23 = vld [vmem:[%s3286_s0 + $0xc6] ss:$8 sm:$0xf0]  }
  0x1d   :  { %v279_v41 = vsel %vm4_vm0, %v1449_v39, %v1448_v38  ;;  %v1457_v42 = vld [vmem:[%s3286_s0 + $0x3c7] ss:$8 sm:$0xf]   ;;  %v1504_v25 = vld [vmem:[%s3286_s0 + $0x3c6] ss:$8 sm:$0xf]   ;;  %v454_v26 = vsel %vm4_vm0, %v1496_v23, %v1495_v22 }
  0x1e   :  { %v1458_v43 = vld [vmem:[%s3286_s0 + $0x3c7] ss:$8 sm:$0xf0]   ;;  %280 = vrot.lane.b32.xlu0 %v279_v41, %s1749_s14  ;;  %v1505_v27 = vld [vmem:[%s3286_s0 + $0x3c6] ss:$8 sm:$0xf0]  }
  0x1f   :  { %v1454_v44 = vld [vmem:[%s3286_s0 + $0x2c7] ss:$8 sm:$0xf]   ;;  %v312_v46 = vsel %vm4_vm0, %v1458_v43, %v1457_v42  ;;  %v1501_v28 = vld [vmem:[%s3286_s0 + $0x2c6] ss:$8 sm:$0xf]   ;;  %v487_v32 = vsel %vm4_vm0, %v1505_v27, %v1504_v25 }
  0x20   :  { %v1455_v45 = vld [vmem:[%s3286_s0 + $0x2c7] ss:$8 sm:$0xf0]   ;;  %313 = vrot.lane.b32.xlu1 %v312_v46, %s1749_s14  ;;  %v1502_v29 = vld [vmem:[%s3286_s0 + $0x2c6] ss:$8 sm:$0xf0]  }
  0x21   :  { %v301_v47 = vsel %vm4_vm0, %v1455_v45, %v1454_v44  ;;  %v1509_v30 = vld [vmem:[%s3286_s0 + $0x105] ss:$8 sm:$0xf]   ;;  %v1389_v31 = vld [vmem:[%s3286_s0 + $0x200] ss:$8 sm:$0xf]   ;;  %v476_v35 = vsel %vm4_vm0, %v1502_v29, %v1501_v28 }
  0x22   :  { %302 = vrot.lane.b32.xlu0 %v301_v47, %s1749_s14  ;;  %v1390_v33 = vld [vmem:[%s3286_s0 + $0x200] ss:$8 sm:$0xf0]   ;;  %v1510_v36 = vld [vmem:[%s3286_s0 + $0x105] ss:$8 sm:$0xf0]  }
  0x23   :  { %v2_v34 = vld [vmem:[%s3286_s0] ss:$8 sm:$0xf]   ;;  %v76_v37 = vsel %vm4_vm0, %v1390_v33, %v1389_v31  ;;  %v1507_v39 = vld [vmem:[%s3286_s0 + $0x5] ss:$8 sm:$0xf]   ;;  %v508_v44 = vsel %vm4_vm0, %v1510_v36, %v1509_v30 }
  0x24   :  { %334 = vrot.lane.b32.xlu1 %v333_v52, %s1750_s30  ;;  %v3_v38 = vld [vmem:[%s3286_s0] ss:$8 sm:$0xf0]   ;;  %v1508_v40 = vld [vmem:[%s3286_s0 + $0x5] ss:$8 sm:$0xf0]  }
  0x25   :  { %1391 = vst.msk [vmem:[%s3287_s1 + $0x40] sm:$0xff] %vm6_vm1, %v76_v37   ;;  %v5_v41 = vsel %vm4_vm0, %v3_v38, %v2_v34  ;;  %v1515_v42 = vld [vmem:[%s3286_s0 + $0x305] ss:$8 sm:$0xf]   ;;  %v498_v47 = vsel %vm4_vm0, %v1508_v40, %v1507_v39  ;;  %s1751_s3 = smov 80   ;;  %s1752_s28 = smov 64  }
  0x26   :  { %324 = vrot.lane.b32.xlu0 %v323_v53, %s1750_s30  ;;  %7 = vst.msk [vmem:[%s3287_s1] sm:$0xff] %vm6_vm1, %v5_v41   ;;  %v1401_v43 = vld [vmem:[%s3286_s0 + $0x300] ss:$8 sm:$0xf]   ;;  %s1753_s23 = smov 48   ;;  %s1754_s9 = smov 32  }
  0x27   :  { %v1402_v45 = vld [vmem:[%s3286_s0 + $0x300] ss:$8 sm:$0xf0]   ;;  %v1516_v48 = vld [vmem:[%s3286_s0 + $0x305] ss:$8 sm:$0xf0]  }
  0x28   :  { %356 = vrot.lane.b32.xlu1 %v355_v58, %s1750_s30  ;;  %v1377_v46 = vld [vmem:[%s3286_s0 + $0x100] ss:$8 sm:$0xf]   ;;  %v112_v49 = vsel %vm4_vm0, %v1402_v45, %v1401_v43  ;;  %v1512_v51 = vld [vmem:[%s3286_s0 + $0x205] ss:$8 sm:$0xf]   ;;  %v530_v56 = vsel %vm4_vm0, %v1516_v48, %v1515_v42 }
  0x29   :  { %v1378_v50 = vld [vmem:[%s3286_s0 + $0x100] ss:$8 sm:$0xf0]   ;;  %v1513_v52 = vld [vmem:[%s3286_s0 + $0x205] ss:$8 sm:$0xf0]  }
  0x2a   :  { %345 = vrot.lane.b32.xlu0 %v344_v59, %s1750_s30  ;;  %1403 = vst.msk [vmem:[%s3287_s1 + $0x60] sm:$0xff] %vm6_vm1, %v112_v49   ;;  %v40_v53 = vsel %vm4_vm0, %v1378_v50, %v1377_v46  ;;  %v1521_v54 = vld [vmem:[%s3286_s0 + $0x145] ss:$8 sm:$0xf]   ;;  %v519_v59 = vsel %vm4_vm0, %v1513_v52, %v1512_v51  ;;  %vm501_vm4 = vcmask 786048   ;;  %s1755_s20 = smov 16  }
  0x2b   :  { %1379 = vst.msk [vmem:[%s3287_s1 + $0x20] sm:$0xff] %vm6_vm1, %v40_v53   ;;  %v1380_v55 = vld [vmem:[%s3286_s0 + $0x140] ss:$8 sm:$0xf]   ;;  %vm676_vm5 = vcmask 654848   ;;  %vm851_vm6 = vcmask 523648  }
  0x2c   :  { %378 = vrot.lane.b32.xlu1 %v377_v0, %s1750_s30  ;;  %v1381_v57 = vld [vmem:[%s3286_s0 + $0x140] ss:$8 sm:$0xf0]   ;;  %v1522_v60 = vld [vmem:[%s3286_s0 + $0x145] ss:$8 sm:$0xf0]  }
  0x2d   :  { %v1368_v58 = vld [vmem:[%s3286_s0 + $0x40] ss:$8 sm:$0xf]   ;;  %v49_v61 = vsel %vm4_vm0, %v1381_v57, %v1380_v55  ;;  %v1518_v63 = vld [vmem:[%s3286_s0 + $0x45] ss:$8 sm:$0xf]   ;;  %v552_v4 = vsel %vm4_vm0, %v1522_v60, %v1521_v54 }
  0x2e   :  { %367 = vrot.lane.b32.xlu0 %v366_v1, %s1750_s30  ;;  %v1369_v62 = vld [vmem:[%s3286_s0 + $0x40] ss:$8 sm:$0xf0]   ;;  %v1519_v0 = vld [vmem:[%s3286_s0 + $0x45] ss:$8 sm:$0xf0]  }
  0x2f   :  { %1382 = vst.msk [vmem:[%s3287_s1 + $0x28] sm:$0xff] %vm6_vm1, %v49_v61   ;;  %v13_v1 = vsel %vm4_vm0, %v1369_v62, %v1368_v58  ;;  %v1527_v2 = vld [vmem:[%s3286_s0 + $0x345] ss:$8 sm:$0xf]   ;;  %vm1026_vm7 = vcmask 392448   ;;  %vm1201_vm8 = vcmask 261248  }
  0x30   :  { %400 = vrot.lane.b32.xlu1 %v399_v6, %s1750_s30  ;;  %1370 = vst.msk [vmem:[%s3287_s1 + $0x8] sm:$0xff] %vm6_vm1, %v13_v1   ;;  %v1404_v3 = vld [vmem:[%s3286_s0 + $0x340] ss:$8 sm:$0xf]  }
  0x31   :  { %v1405_v5 = vld [vmem:[%s3286_s0 + $0x340] ss:$8 sm:$0xf0]   ;;  %v1528_v8 = vld [vmem:[%s3286_s0 + $0x345] ss:$8 sm:$0xf0]  }
  0x32   :  { %389 = vrot.lane.b32.xlu0 %v388_v7, %s1750_s30  ;;  %v1392_v6 = vld [vmem:[%s3286_s0 + $0x240] ss:$8 sm:$0xf]   ;;  %v541_v7 = vsel %vm4_vm0, %v1519_v0, %v1518_v63  ;;  %v121_v9 = vsel %vm4_vm0, %v1405_v5, %v1404_v3  ;;  %v1524_v11 = vld [vmem:[%s3286_s0 + $0x245] ss:$8 sm:$0xf]   ;;  %v574_v16 = vsel %vm4_vm0, %v1528_v8, %v1527_v2 }
  0x33   :  { %v1393_v10 = vld [vmem:[%s3286_s0 + $0x240] ss:$8 sm:$0xf0]   ;;  %1406 = vst.msk [vmem:[%s3287_s1 + $0x68] sm:$0xff] %vm6_vm1, %v121_v9  }
  0x34   :  { %422 = vrot.lane.b32.xlu1 %v421_v12, %s1750_s30  ;;  %v1525_v12 = vld [vmem:[%s3286_s0 + $0x245] ss:$8 sm:$0xf0]   ;;  %v1383_v17 = vld [vmem:[%s3286_s0 + $0x180] ss:$8 sm:$0xf]  }
  0x35   :  { %v1533_v14 = vld [vmem:[%s3286_s0 + $0x185] ss:$8 sm:$0xf]   ;;  %v1371_v21 = vld [vmem:[%s3286_s0 + $0x80] ss:$8 sm:$0xf]  }
  0x36   :  { %411 = vrot.lane.b32.xlu0 %v410_v13, %s1750_s30  ;;  %v85_v13 = vsel %vm4_vm0, %v1393_v10, %v1392_v6  ;;  %v1534_v15 = vld [vmem:[%s3286_s0 + $0x185] ss:$8 sm:$0xf0]   ;;  %v1372_v22 = vld [vmem:[%s3286_s0 + $0x80] ss:$8 sm:$0xf0]  }
  0x37   :  { %1394 = vst.msk [vmem:[%s3287_s1 + $0x48] sm:$0xff] %vm6_vm1, %v85_v13   ;;  %v1530_v23 = vld [vmem:[%s3286_s0 + $0x85] ss:$8 sm:$0xf]   ;;  %v22_v25 = vsel %vm4_vm0, %v1372_v22, %v1371_v21  ;;  %v596_v28 = vsel %vm4_vm0, %v1534_v15, %v1533_v14 }
  0x38   :  { %444 = vrot.lane.b32.xlu1 %v443_v18, %s1750_s30  ;;  %v1384_v18 = vld [vmem:[%s3286_s0 + $0x180] ss:$8 sm:$0xf0]   ;;  %v1540_v27 = vld [vmem:[%s3286_s0 + $0x385] ss:$8 sm:$0xf0]  }
  0x39   :  { %v58_v20 = vsel %vm4_vm0, %v1384_v18, %v1383_v17  ;;  %1373 = vst.msk [vmem:[%s3287_s1 + $0x10] sm:$0xff] %vm6_vm1, %v22_v25   ;;  %v1407_v29 = vld [vmem:[%s3286_s0 + $0x380] ss:$8 sm:$0xf]  }
  0x3a   :  { %433 = vrot.lane.b32.xlu0 %v432_v19, %s1750_s30  ;;  %v563_v19 = vsel %vm4_vm0, %v1525_v12, %v1524_v11  ;;  %1385 = vst.msk [vmem:[%s3287_s1 + $0x30] sm:$0xff] %vm6_vm1, %v58_v20   ;;  %v1408_v30 = vld [vmem:[%s3286_s0 + $0x380] ss:$8 sm:$0xf0]  }
  0x3b   :  { %v1395_v33 = vld [vmem:[%s3286_s0 + $0x280] ss:$8 sm:$0xf]   ;;  %v1537_v36 = vld [vmem:[%s3286_s0 + $0x285] ss:$8 sm:$0xf0]  }
  0x3c   :  { %466 = vrot.lane.b32.xlu1 %v465_v24, %s1750_s30  ;;  %v1531_v24 = vld [vmem:[%s3286_s0 + $0x85] ss:$8 sm:$0xf0]   ;;  %v1396_v34 = vld [vmem:[%s3286_s0 + $0x280] ss:$8 sm:$0xf0]  }
  0x3d   :  { %v585_v31 = vsel %vm4_vm0, %v1531_v24, %v1530_v23  ;;  %v94_v37 = vsel %vm4_vm0, %v1396_v34, %v1395_v33  ;;  %v1545_v38 = vld [vmem:[%s3286_s0 + $0x1c5] ss:$8 sm:$0xf]   ;;  %v1386_v41 = vld [vmem:[%s3286_s0 + $0x1c0] ss:$8 sm:$0xf]  }
  0x3e   :  { %455 = vrot.lane.b32.xlu0 %v454_v26, %s1750_s30  ;;  %v1539_v26 = vld [vmem:[%s3286_s0 + $0x385] ss:$8 sm:$0xf]   ;;  %1397 = vst.msk [vmem:[%s3287_s1 + $0x50] sm:$0xff] %vm6_vm1, %v94_v37  }
  0x3f   :  { %v1546_v39 = vld [vmem:[%s3286_s0 + $0x1c5] ss:$8 sm:$0xf0]   ;;  %v618_v40 = vsel %vm4_vm0, %v1540_v27, %v1539_v26  ;;  %v1387_v42 = vld [vmem:[%s3286_s0 + $0x1c0] ss:$8 sm:$0xf0]  }
  0x40   :  { %488 = vrot.lane.b32.xlu1 %v487_v32, %s1750_s30  ;;  %v130_v32 = vsel %vm4_vm0, %v1408_v30, %v1407_v29  ;;  %v1374_v45 = vld [vmem:[%s3286_s0 + $0xc0] ss:$8 sm:$0xf]   ;;  %v1543_v48 = vld [vmem:[%s3286_s0 + $0xc5] ss:$8 sm:$0xf0]   ;;  %v640_v52 = vsel %vm4_vm0, %v1546_v39, %v1545_v38 }
  0x41   :  { %1409 = vst.msk [vmem:[%s3287_s1 + $0x70] sm:$0xff] %vm6_vm1, %v130_v32   ;;  %v1375_v46 = vld [vmem:[%s3286_s0 + $0xc0] ss:$8 sm:$0xf0]  }
  0x42   :  { %477 = vrot.lane.b32.xlu0 %v476_v35, %s1750_s30  ;;  %v1536_v35 = vld [vmem:[%s3286_s0 + $0x285] ss:$8 sm:$0xf]   ;;  %v31_v49 = vsel %vm4_vm0, %v1375_v46, %v1374_v45  ;;  %v1410_v53 = vld [vmem:[%s3286_s0 + $0x3c0] ss:$8 sm:$0xf]  }
  0x43   :  { %v607_v43 = vsel %vm4_vm0, %v1537_v36, %v1536_v35  ;;  %v1551_v50 = vld [vmem:[%s3286_s0 + $0x3c5] ss:$8 sm:$0xf]   ;;  %1376 = vst.msk [vmem:[%s3287_s1 + $0x18] sm:$0xff] %vm6_vm1, %v31_v49  }
  0x44   :  { %509 = vrot.lane.b32.xlu1 %v508_v44, %s1751_s3  ;;  %v67_v44 = vsel %vm4_vm0, %v1387_v42, %v1386_v41  ;;  %v1552_v51 = vld [vmem:[%s3286_s0 + $0x3c5] ss:$8 sm:$0xf0]   ;;  %v1411_v54 = vld [vmem:[%s3286_s0 + $0x3c0] ss:$8 sm:$0xf0]  }
  0x45   :  { %1388 = vst.msk [vmem:[%s3287_s1 + $0x38] sm:$0xff] %vm6_vm1, %v67_v44   ;;  %v1398_v57 = vld [vmem:[%s3286_s0 + $0x2c0] ss:$8 sm:$0xf]   ;;  %v662_v62 = vsel %vm4_vm0, %v1552_v51, %v1551_v50 }
  0x46   :  { %499 = vrot.lane.b32.xlu0 %v498_v47, %s1751_s3  ;;  %v1542_v47 = vld [vmem:[%s3286_s0 + $0xc5] ss:$8 sm:$0xf]   ;;  %v1399_v58 = vld [vmem:[%s3286_s0 + $0x2c0] ss:$8 sm:$0xf0]  }
  0x47   :  { %v629_v55 = vsel %vm4_vm0, %v1543_v48, %v1542_v47  ;;  %v1549_v60 = vld [vmem:[%s3286_s0 + $0x2c5] ss:$8 sm:$0xf0]   ;;  %v103_v61 = vsel %vm4_vm0, %v1399_v58, %v1398_v57  ;;  %v1556_v0 = vld [vmem:[%s3286_s0 + $0x104] ss:$8 sm:$0xf]  }
  0x48   :  { %531 = vrot.lane.b32.xlu1 %v530_v56, %s1751_s3  ;;  %v139_v56 = vsel %vm4_vm0, %v1411_v54, %v1410_v53  ;;  %1400 = vst.msk [vmem:[%s3287_s1 + $0x58] sm:$0xff] %vm6_vm1, %v103_v61   ;;  %v1557_v1 = vld [vmem:[%s3286_s0 + $0x104] ss:$8 sm:$0xf0]  }
  0x49   :  { %1412 = vst.msk [vmem:[%s3287_s1 + $0x78] sm:$0xff] %vm6_vm1, %v139_v56   ;;  %v1554_v2 = vld [vmem:[%s3286_s0 + $0x4] ss:$8 sm:$0xf]  }
  0x4a   :  { %520 = vrot.lane.b32.xlu0 %v519_v59, %s1751_s3  ;;  %v1548_v59 = vld [vmem:[%s3286_s0 + $0x2c5] ss:$8 sm:$0xf]   ;;  %v1555_v3 = vld [vmem:[%s3286_s0 + $0x4] ss:$8 sm:$0xf0]  }
  0x4b   :  { %v651_v63 = vsel %vm4_vm0, %v1549_v60, %v1548_v59  ;;  %v673_v5 = vsel %vm4_vm0, %v1555_v3, %v1554_v2  ;;  %v1562_v6 = vld [vmem:[%s3286_s0 + $0x304] ss:$8 sm:$0xf]   ;;  %v1603_v53 = vld [vmem:[%s3286_s0 + $0x103] ss:$8 sm:$0xf]  }
  0x4c   :  { %553 = vrot.lane.b32.xlu1 %v552_v4, %s1751_s3  ;;  %v683_v4 = vsel %vm4_vm0, %v1557_v1, %v1556_v0  ;;  %v1559_v8 = vld [vmem:[%s3286_s0 + $0x204] ss:$8 sm:$0xf]   ;;  %v1604_v54 = vld [vmem:[%s3286_s0 + $0x103] ss:$8 sm:$0xf0]  }
  0x4d   :  { %v1560_v9 = vld [vmem:[%s3286_s0 + $0x204] ss:$8 sm:$0xf0]   ;;  %v1601_v56 = vld [vmem:[%s3286_s0 + $0x3] ss:$8 sm:$0xf]   ;;  %v858_v58 = vsel %vm4_vm0, %v1604_v54, %v1603_v53 }
  0x4e   :  { %542 = vrot.lane.b32.xlu0 %v541_v7, %s1751_s3  ;;  %v1563_v7 = vld [vmem:[%s3286_s0 + $0x304] ss:$8 sm:$0xf0]   ;;  %v694_v11 = vsel %vm4_vm0, %v1560_v9, %v1559_v8  ;;  %v1602_v57 = vld [vmem:[%s3286_s0 + $0x3] ss:$8 sm:$0xf0]  }
  0x4f   :  { %v705_v10 = vsel %vm4_vm0, %v1563_v7, %v1562_v6  ;;  %v1568_v12 = vld [vmem:[%s3286_s0 + $0x144] ss:$8 sm:$0xf]   ;;  %v848_v60 = vsel %vm4_vm0, %v1602_v57, %v1601_v56  ;;  %v1609_v61 = vld [vmem:[%s3286_s0 + $0x303] ss:$8 sm:$0xf]  }
  0x50   :  { %575 = vrot.lane.b32.xlu1 %v574_v16, %s1751_s3  ;;  %v1569_v13 = vld [vmem:[%s3286_s0 + $0x144] ss:$8 sm:$0xf0]   ;;  %v1606_v0 = vld [vmem:[%s3286_s0 + $0x203] ss:$8 sm:$0xf]  }
  0x51   :  { %v1565_v14 = vld [vmem:[%s3286_s0 + $0x44] ss:$8 sm:$0xf]   ;;  %v727_v16 = vsel %vm4_vm0, %v1569_v13, %v1568_v12  ;;  %v1607_v1 = vld [vmem:[%s3286_s0 + $0x203] ss:$8 sm:$0xf0]  }
  0x52   :  { %564 = vrot.lane.b32.xlu0 %v563_v19, %s1751_s3  ;;  %v1566_v15 = vld [vmem:[%s3286_s0 + $0x44] ss:$8 sm:$0xf0]   ;;  %v1616_v6 = vld [vmem:[%s3286_s0 + $0x143] ss:$8 sm:$0xf0]  }
  0x53   :  { %v716_v17 = vsel %vm4_vm0, %v1566_v15, %v1565_v14  ;;  %v1574_v18 = vld [vmem:[%s3286_s0 + $0x344] ss:$8 sm:$0xf]   ;;  %v1612_v8 = vld [vmem:[%s3286_s0 + $0x43] ss:$8 sm:$0xf]  }
  0x54   :  { %597 = vrot.lane.b32.xlu1 %v596_v28, %s1751_s3  ;;  %v1575_v19 = vld [vmem:[%s3286_s0 + $0x344] ss:$8 sm:$0xf0]   ;;  %v1613_v9 = vld [vmem:[%s3286_s0 + $0x43] ss:$8 sm:$0xf0]  }
  0x55   :  { %v1571_v20 = vld [vmem:[%s3286_s0 + $0x244] ss:$8 sm:$0xf]   ;;  %v749_v22 = vsel %vm4_vm0, %v1575_v19, %v1574_v18  ;;  %v891_v12 = vsel %vm4_vm0, %v1613_v9, %v1612_v8  ;;  %v1621_v13 = vld [vmem:[%s3286_s0 + $0x343] ss:$8 sm:$0xf]  }
  0x56   :  { %586 = vrot.lane.b32.xlu0 %v585_v31, %s1751_s3  ;;  %v1572_v21 = vld [vmem:[%s3286_s0 + $0x244] ss:$8 sm:$0xf0]   ;;  %v1622_v14 = vld [vmem:[%s3286_s0 + $0x343] ss:$8 sm:$0xf0]  }
  0x57   :  { %v738_v23 = vsel %vm4_vm0, %v1572_v21, %v1571_v20  ;;  %v1580_v24 = vld [vmem:[%s3286_s0 + $0x184] ss:$8 sm:$0xf]   ;;  %v924_v18 = vsel %vm4_vm0, %v1622_v14, %v1621_v13  ;;  %v1627_v21 = vld [vmem:[%s3286_s0 + $0x183] ss:$8 sm:$0xf]  }
  0x58   :  { %619 = vrot.lane.b32.xlu1 %v618_v40, %s1751_s3  ;;  %v1581_v25 = vld [vmem:[%s3286_s0 + $0x184] ss:$8 sm:$0xf0]   ;;  %v1650_v53 = vld [vmem:[%s3286_s0 + $0x102] ss:$8 sm:$0xf]  }
  0x59   :  { %v1577_v26 = vld [vmem:[%s3286_s0 + $0x84] ss:$8 sm:$0xf]   ;;  %v771_v28 = vsel %vm4_vm0, %v1581_v25, %v1580_v24  ;;  %v1624_v24 = vld [vmem:[%s3286_s0 + $0x83] ss:$8 sm:$0xf]  }
  0x5a   :  { %608 = vrot.lane.b32.xlu0 %v607_v43, %s1751_s3  ;;  %v1578_v27 = vld [vmem:[%s3286_s0 + $0x84] ss:$8 sm:$0xf0]   ;;  %v1625_v25 = vld [vmem:[%s3286_s0 + $0x83] ss:$8 sm:$0xf0]  }
  0x5b   :  { %v760_v29 = vsel %vm4_vm0, %v1578_v27, %v1577_v26  ;;  %v1586_v30 = vld [vmem:[%s3286_s0 + $0x384] ss:$8 sm:$0xf]   ;;  %v1651_v54 = vld [vmem:[%s3286_s0 + $0x102] ss:$8 sm:$0xf0]  }
  0x5c   :  { %641 = vrot.lane.b32.xlu1 %v640_v52, %s1751_s3  ;;  %v1587_v31 = vld [vmem:[%s3286_s0 + $0x384] ss:$8 sm:$0xf0]   ;;  %v1648_v56 = vld [vmem:[%s3286_s0 + $0x2] ss:$8 sm:$0xf]  }
  0x5d   :  { %v1583_v32 = vld [vmem:[%s3286_s0 + $0x284] ss:$8 sm:$0xf]   ;;  %v793_v34 = vsel %vm4_vm0, %v1587_v31, %v1586_v30  ;;  %v1634_v30 = vld [vmem:[%s3286_s0 + $0x383] ss:$8 sm:$0xf0]  }
  0x5e   :  { %630 = vrot.lane.b32.xlu0 %v629_v55, %s1751_s3  ;;  %v1584_v33 = vld [vmem:[%s3286_s0 + $0x284] ss:$8 sm:$0xf0]   ;;  %v1649_v57 = vld [vmem:[%s3286_s0 + $0x2] ss:$8 sm:$0xf0]  }
  0x5f   :  { %v782_v36 = vsel %vm4_vm0, %v1584_v33, %v1583_v32  ;;  %v1592_v37 = vld [vmem:[%s3286_s0 + $0x1c4] ss:$8 sm:$0xf]   ;;  %v1630_v32 = vld [vmem:[%s3286_s0 + $0x283] ss:$8 sm:$0xf]  }
  0x60   :  { %663 = vrot.lane.b32.xlu1 %v662_v62, %s1751_s3  ;;  %v1593_v38 = vld [vmem:[%s3286_s0 + $0x1c4] ss:$8 sm:$0xf0]   ;;  %v1610_v62 = vld [vmem:[%s3286_s0 + $0x303] ss:$8 sm:$0xf0]  }
  0x61   :  { %v1589_v40 = vld [vmem:[%s3286_s0 + $0xc4] ss:$8 sm:$0xf]   ;;  %v815_v42 = vsel %vm4_vm0, %v1593_v38, %v1592_v37  ;;  %v880_v2 = vsel %vm4_vm0, %v1610_v62, %v1609_v61  ;;  %v1631_v33 = vld [vmem:[%s3286_s0 + $0x283] ss:$8 sm:$0xf0]  }
  0x62   :  { %652 = vrot.lane.b32.xlu0 %v651_v63, %s1751_s3  ;;  %v1590_v41 = vld [vmem:[%s3286_s0 + $0xc4] ss:$8 sm:$0xf0]   ;;  %v1639_v37 = vld [vmem:[%s3286_s0 + $0x1c3] ss:$8 sm:$0xf]  }
  0x63   :  { %v804_v44 = vsel %vm4_vm0, %v1590_v41, %v1589_v40  ;;  %v1598_v45 = vld [vmem:[%s3286_s0 + $0x3c4] ss:$8 sm:$0xf]   ;;  %v1640_v38 = vld [vmem:[%s3286_s0 + $0x1c3] ss:$8 sm:$0xf0]  }
  0x64   :  { %684 = vrot.lane.b32.xlu1 %v683_v4, %s1752_s28  ;;  %v1599_v46 = vld [vmem:[%s3286_s0 + $0x3c4] ss:$8 sm:$0xf0]   ;;  %v869_v4 = vsel %vm4_vm0, %v1607_v1, %v1606_v0  ;;  %v1636_v40 = vld [vmem:[%s3286_s0 + $0xc3] ss:$8 sm:$0xf]  }
  0x65   :  { %v1595_v48 = vld [vmem:[%s3286_s0 + $0x2c4] ss:$8 sm:$0xf]   ;;  %v837_v50 = vsel %vm4_vm0, %v1599_v46, %v1598_v45  ;;  %v1637_v41 = vld [vmem:[%s3286_s0 + $0xc3] ss:$8 sm:$0xf0]  }
  0x66   :  { %674 = vrot.lane.b32.xlu0 %v673_v5, %s1752_s28  ;;  %v1596_v49 = vld [vmem:[%s3286_s0 + $0x2c4] ss:$8 sm:$0xf0]   ;;  %v1615_v5 = vld [vmem:[%s3286_s0 + $0x143] ss:$8 sm:$0xf]  }
  0x67   :  { %v826_v52 = vsel %vm4_vm0, %v1596_v49, %v1595_v48  ;;  %v1645_v45 = vld [vmem:[%s3286_s0 + $0x3c3] ss:$8 sm:$0xf]   ;;  %v1656_v61 = vld [vmem:[%s3286_s0 + $0x302] ss:$8 sm:$0xf]  }
  0x68   :  { %706 = vrot.lane.b32.xlu1 %v705_v10, %s1752_s28  ;;  %v902_v10 = vsel %vm4_vm0, %v1616_v6, %v1615_v5  ;;  %v1646_v46 = vld [vmem:[%s3286_s0 + $0x3c3] ss:$8 sm:$0xf0]   ;;  %v1657_v62 = vld [vmem:[%s3286_s0 + $0x302] ss:$8 sm:$0xf0]  }
  0x69   :  { %v1642_v48 = vld [vmem:[%s3286_s0 + $0x2c3] ss:$8 sm:$0xf]   ;;  %v1653_v0 = vld [vmem:[%s3286_s0 + $0x202] ss:$8 sm:$0xf]  }
  0x6a   :  { %695 = vrot.lane.b32.xlu0 %v694_v11, %s1752_s28  ;;  %v1643_v49 = vld [vmem:[%s3286_s0 + $0x2c3] ss:$8 sm:$0xf0]   ;;  %v1654_v1 = vld [vmem:[%s3286_s0 + $0x202] ss:$8 sm:$0xf0]  }
  0x6b   :  { %v1662_v5 = vld [vmem:[%s3286_s0 + $0x142] ss:$8 sm:$0xf]  }
  0x6c   :  { %728 = vrot.lane.b32.xlu1 %v727_v16, %s1752_s28  ;;  %v1618_v16 = vld [vmem:[%s3286_s0 + $0x243] ss:$8 sm:$0xf]   ;;  %v1663_v6 = vld [vmem:[%s3286_s0 + $0x142] ss:$8 sm:$0xf0]  }
  0x6d   :  { %v1659_v8 = vld [vmem:[%s3286_s0 + $0x42] ss:$8 sm:$0xf]  }
  0x6e   :  { %717 = vrot.lane.b32.xlu0 %v716_v17, %s1752_s28  ;;  %v1619_v17 = vld [vmem:[%s3286_s0 + $0x243] ss:$8 sm:$0xf0]   ;;  %v1660_v9 = vld [vmem:[%s3286_s0 + $0x42] ss:$8 sm:$0xf0]  }
  0x6f   :  { %v913_v20 = vsel %vm4_vm0, %v1619_v17, %v1618_v16  ;;  %v1668_v13 = vld [vmem:[%s3286_s0 + $0x342] ss:$8 sm:$0xf]  }
  0x70   :  { %750 = vrot.lane.b32.xlu1 %v749_v22, %s1752_s28  ;;  %v1628_v22 = vld [vmem:[%s3286_s0 + $0x183] ss:$8 sm:$0xf0]   ;;  %v1669_v14 = vld [vmem:[%s3286_s0 + $0x342] ss:$8 sm:$0xf0]  }
  0x71   :  { %v946_v26 = vsel %vm4_vm0, %v1628_v22, %v1627_v21  ;;  %v1665_v16 = vld [vmem:[%s3286_s0 + $0x242] ss:$8 sm:$0xf]  }
  0x72   :  { %739 = vrot.lane.b32.xlu0 %v738_v23, %s1752_s28  ;;  %v1666_v17 = vld [vmem:[%s3286_s0 + $0x242] ss:$8 sm:$0xf0]  }
  0x73   :  { %v1674_v21 = vld [vmem:[%s3286_s0 + $0x182] ss:$8 sm:$0xf]  }
  0x74   :  { %772 = vrot.lane.b32.xlu1 %v771_v28, %s1752_s28  ;;  %v935_v28 = vsel %vm4_vm0, %v1625_v25, %v1624_v24  ;;  %v1675_v22 = vld [vmem:[%s3286_s0 + $0x182] ss:$8 sm:$0xf0]  }
  0x75   :  { %v1671_v24 = vld [vmem:[%s3286_s0 + $0x82] ss:$8 sm:$0xf]  }
  0x76   :  { %761 = vrot.lane.b32.xlu0 %v760_v29, %s1752_s28  ;;  %v171_v35 = vpop.permute.xlu1 %170   ;;  %v1633_v29 = vld [vmem:[%s3286_s0 + $0x383] ss:$8 sm:$0xf]   ;;  %v1672_v25 = vld [vmem:[%s3286_s0 + $0x82] ss:$8 sm:$0xf0]  }
  0x77   :  { %1420 = vst.msk [vmem:[%s3287_s1 + $0x40] sm:$0xff] %vm151_vm2, %v171_v35  }
  0x78   :  { %v150_v39 = vpop.permute.xlu0 %149   ;;  %794 = vrot.lane.b32.xlu1 %v793_v34, %s1752_s28  ;;  %v968_v34 = vsel %vm4_vm0, %v1634_v30, %v1633_v29  ;;  %v1680_v29 = vld [vmem:[%s3286_s0 + $0x382] ss:$8 sm:$0xf]  }
  0x79   :  { %152 = vst.msk [vmem:[%s3287_s1] sm:$0xff] %vm151_vm2, %v150_v39   ;;  %v1681_v30 = vld [vmem:[%s3286_s0 + $0x382] ss:$8 sm:$0xf0]  }
  0x7a   :  { %783 = vrot.lane.b32.xlu0 %v782_v36, %s1752_s28  ;;  %v182_v43 = vpop.permute.xlu1 %181   ;;  %v957_v36 = vsel %vm4_vm0, %v1631_v33, %v1630_v32  ;;  %v1677_v32 = vld [vmem:[%s3286_s0 + $0x282] ss:$8 sm:$0xf]  }
  0x7b   :  { %1423 = vst.msk [vmem:[%s3287_s1 + $0x60] sm:$0xff] %vm151_vm2, %v182_v43   ;;  %v1678_v33 = vld [vmem:[%s3286_s0 + $0x282] ss:$8 sm:$0xf0]  }
  0x7c   :  { %v160_v47 = vpop.permute.xlu0 %159   ;;  %816 = vrot.lane.b32.xlu1 %v815_v42, %s1752_s28  ;;  %v990_v42 = vsel %vm4_vm0, %v1640_v38, %v1639_v37  ;;  %v1686_v37 = vld [vmem:[%s3286_s0 + $0x1c2] ss:$8 sm:$0xf]  }
  0x7d   :  { %1417 = vst.msk [vmem:[%s3287_s1 + $0x20] sm:$0xff] %vm151_vm2, %v160_v47   ;;  %v1687_v38 = vld [vmem:[%s3286_s0 + $0x1c2] ss:$8 sm:$0xf0]  }
  0x7e   :  { %805 = vrot.lane.b32.xlu0 %v804_v44, %s1752_s28  ;;  %v204_v51 = vpop.permute.xlu1 %203   ;;  %v979_v44 = vsel %vm4_vm0, %v1637_v41, %v1636_v40  ;;  %v1683_v40 = vld [vmem:[%s3286_s0 + $0xc2] ss:$8 sm:$0xf]  }
  0x7f   :  { %1429 = vst.msk [vmem:[%s3287_s1 + $0x28] sm:$0xff] %vm151_vm2, %v204_v51   ;;  %v1684_v41 = vld [vmem:[%s3286_s0 + $0xc2] ss:$8 sm:$0xf0]  }
  0x80   :  { %v193_v55 = vpop.permute.xlu0 %192   ;;  %838 = vrot.lane.b32.xlu1 %v837_v50, %s1752_s28  ;;  %v1012_v50 = vsel %vm4_vm0, %v1646_v46, %v1645_v45  ;;  %v1692_v45 = vld [vmem:[%s3286_s0 + $0x3c2] ss:$8 sm:$0xf]  }
  0x81   :  { %1426 = vst.msk [vmem:[%s3287_s1 + $0x8] sm:$0xff] %vm151_vm2, %v193_v55   ;;  %v1693_v46 = vld [vmem:[%s3286_s0 + $0x3c2] ss:$8 sm:$0xf0]  }
  0x82   :  { %827 = vrot.lane.b32.xlu0 %v826_v52, %s1752_s28  ;;  %v226_v59 = vpop.permute.xlu1 %225   ;;  %v1001_v52 = vsel %vm4_vm0, %v1643_v49, %v1642_v48  ;;  %v1689_v48 = vld [vmem:[%s3286_s0 + $0x2c2] ss:$8 sm:$0xf]  }
  0x83   :  { %1435 = vst.msk [vmem:[%s3287_s1 + $0x68] sm:$0xff] %vm151_vm2, %v226_v59   ;;  %v1690_v49 = vld [vmem:[%s3286_s0 + $0x2c2] ss:$8 sm:$0xf0]  }
  0x84   :  { %v215_v63 = vpop.permute.xlu0 %214   ;;  %859 = vrot.lane.b32.xlu1 %v858_v58, %s1753_s23  ;;  %v1033_v58 = vsel %vm4_vm0, %v1651_v54, %v1650_v53  ;;  %v1697_v53 = vld [vmem:[%s3286_s0 + $0x101] ss:$8 sm:$0xf]  }
  0x85   :  { %1432 = vst.msk [vmem:[%s3287_s1 + $0x48] sm:$0xff] %vm151_vm2, %v215_v63   ;;  %v1698_v54 = vld [vmem:[%s3286_s0 + $0x101] ss:$8 sm:$0xf0]  }
  0x86   :  { %849 = vrot.lane.b32.xlu0 %v848_v60, %s1753_s23  ;;  %v248_v3 = vpop.permute.xlu1 %247   ;;  %v1023_v60 = vsel %vm4_vm0, %v1649_v57, %v1648_v56  ;;  %v1695_v56 = vld [vmem:[%s3286_s0 + $0x1] ss:$8 sm:$0xf]  }
  0x87   :  { %1441 = vst.msk [vmem:[%s3287_s1 + $0x30] sm:$0xff] %vm151_vm2, %v248_v3   ;;  %v1696_v57 = vld [vmem:[%s3286_s0 + $0x1] ss:$8 sm:$0xf0]  }
  0x88   :  { %v237_v7 = vpop.permute.xlu0 %236   ;;  %881 = vrot.lane.b32.xlu1 %v880_v2, %s1753_s23  ;;  %v1055_v2 = vsel %vm4_vm0, %v1657_v62, %v1656_v61  ;;  %v1703_v61 = vld [vmem:[%s3286_s0 + $0x301] ss:$8 sm:$0xf]  }
  0x89   :  { %1438 = vst.msk [vmem:[%s3287_s1 + $0x10] sm:$0xff] %vm151_vm2, %v237_v7   ;;  %v1704_v62 = vld [vmem:[%s3286_s0 + $0x301] ss:$8 sm:$0xf0]  }
  0x8a   :  { %870 = vrot.lane.b32.xlu0 %v869_v4, %s1753_s23  ;;  %v270_v11 = vpop.permute.xlu1 %269   ;;  %v1044_v4 = vsel %vm4_vm0, %v1654_v1, %v1653_v0  ;;  %v1700_v0 = vld [vmem:[%s3286_s0 + $0x201] ss:$8 sm:$0xf]  }
  0x8b   :  { %1447 = vst.msk [vmem:[%s3287_s1 + $0x70] sm:$0xff] %vm151_vm2, %v270_v11   ;;  %v1701_v1 = vld [vmem:[%s3286_s0 + $0x201] ss:$8 sm:$0xf0]  }
  0x8c   :  { %v259_v15 = vpop.permute.xlu0 %258   ;;  %903 = vrot.lane.b32.xlu1 %v902_v10, %s1753_s23  ;;  %v1077_v10 = vsel %vm4_vm0, %v1663_v6, %v1662_v5  ;;  %v1709_v5 = vld [vmem:[%s3286_s0 + $0x141] ss:$8 sm:$0xf]  }
  0x8d   :  { %1444 = vst.msk [vmem:[%s3287_s1 + $0x50] sm:$0xff] %vm151_vm2, %v259_v15   ;;  %v1710_v6 = vld [vmem:[%s3286_s0 + $0x141] ss:$8 sm:$0xf0]  }
  0x8e   :  { %892 = vrot.lane.b32.xlu0 %v891_v12, %s1753_s23  ;;  %v292_v19 = vpop.permute.xlu1 %291   ;;  %v1066_v12 = vsel %vm4_vm0, %v1660_v9, %v1659_v8  ;;  %v1706_v8 = vld [vmem:[%s3286_s0 + $0x41] ss:$8 sm:$0xf]  }
  0x8f   :  { %1453 = vst.msk [vmem:[%s3287_s1 + $0x38] sm:$0xff] %vm151_vm2, %v292_v19   ;;  %v1707_v9 = vld [vmem:[%s3286_s0 + $0x41] ss:$8 sm:$0xf0]  }
  0x90   :  { %v281_v23 = vpop.permute.xlu0 %280   ;;  %925 = vrot.lane.b32.xlu1 %v924_v18, %s1753_s23  ;;  %v1099_v18 = vsel %vm4_vm0, %v1669_v14, %v1668_v13  ;;  %v1715_v13 = vld [vmem:[%s3286_s0 + $0x341] ss:$8 sm:$0xf]  }
  0x91   :  { %1450 = vst.msk [vmem:[%s3287_s1 + $0x18] sm:$0xff] %vm151_vm2, %v281_v23   ;;  %v1716_v14 = vld [vmem:[%s3286_s0 + $0x341] ss:$8 sm:$0xf0]  }
  0x92   :  { %914 = vrot.lane.b32.xlu0 %v913_v20, %s1753_s23  ;;  %v314_v27 = vpop.permute.xlu1 %313   ;;  %v1088_v20 = vsel %vm4_vm0, %v1666_v17, %v1665_v16  ;;  %v1712_v16 = vld [vmem:[%s3286_s0 + $0x241] ss:$8 sm:$0xf]  }
  0x93   :  { %1459 = vst.msk [vmem:[%s3287_s1 + $0x78] sm:$0xff] %vm151_vm2, %v314_v27   ;;  %v1713_v17 = vld [vmem:[%s3286_s0 + $0x241] ss:$8 sm:$0xf0]  }
  0x94   :  { %v303_v31 = vpop.permute.xlu0 %302   ;;  %947 = vrot.lane.b32.xlu1 %v946_v26, %s1753_s23  ;;  %v1121_v26 = vsel %vm4_vm0, %v1675_v22, %v1674_v21  ;;  %v1721_v21 = vld [vmem:[%s3286_s0 + $0x181] ss:$8 sm:$0xf]  }
  0x95   :  { %1456 = vst.msk [vmem:[%s3287_s1 + $0x58] sm:$0xff] %vm151_vm2, %v303_v31   ;;  %v1722_v22 = vld [vmem:[%s3286_s0 + $0x181] ss:$8 sm:$0xf0]  }
  0x96   :  { %936 = vrot.lane.b32.xlu0 %v935_v28, %s1753_s23  ;;  %v335_v35 = vpop.permute.xlu1 %334   ;;  %v1110_v28 = vsel %vm4_vm0, %v1672_v25, %v1671_v24  ;;  %v1718_v24 = vld [vmem:[%s3286_s0 + $0x81] ss:$8 sm:$0xf]  }
  0x97   :  { %1464 = vst.msk [vmem:[%s3287_s1 + $0x20] sm:$0xff] %vm326_vm3, %v335_v35   ;;  %v1719_v25 = vld [vmem:[%s3286_s0 + $0x81] ss:$8 sm:$0xf0]  }
  0x98   :  { %v325_v39 = vpop.permute.xlu0 %324   ;;  %969 = vrot.lane.b32.xlu1 %v968_v34, %s1753_s23  ;;  %v1143_v34 = vsel %vm4_vm0, %v1681_v30, %v1680_v29  ;;  %v1727_v29 = vld [vmem:[%s3286_s0 + $0x381] ss:$8 sm:$0xf]  }
  0x99   :  { %327 = vst.msk [vmem:[%s3287_s1] sm:$0xff] %vm326_vm3, %v325_v39   ;;  %v1728_v30 = vld [vmem:[%s3286_s0 + $0x381] ss:$8 sm:$0xf0]  }
  0x9a   :  { %958 = vrot.lane.b32.xlu0 %v957_v36, %s1753_s23  ;;  %v357_v43 = vpop.permute.xlu1 %356   ;;  %v1132_v36 = vsel %vm4_vm0, %v1678_v33, %v1677_v32  ;;  %v1724_v32 = vld [vmem:[%s3286_s0 + $0x281] ss:$8 sm:$0xf]  }
  0x9b   :  { %1470 = vst.msk [vmem:[%s3287_s1 + $0x60] sm:$0xff] %vm326_vm3, %v357_v43   ;;  %v1725_v33 = vld [vmem:[%s3286_s0 + $0x281] ss:$8 sm:$0xf0]  }
  0x9c   :  { %v346_v47 = vpop.permute.xlu0 %345   ;;  %991 = vrot.lane.b32.xlu1 %v990_v42, %s1753_s23  ;;  %v1165_v42 = vsel %vm4_vm0, %v1687_v38, %v1686_v37  ;;  %v1733_v37 = vld [vmem:[%s3286_s0 + $0x1c1] ss:$8 sm:$0xf]  }
  0x9d   :  { %1467 = vst.msk [vmem:[%s3287_s1 + $0x40] sm:$0xff] %vm326_vm3, %v346_v47   ;;  %v1734_v38 = vld [vmem:[%s3286_s0 + $0x1c1] ss:$8 sm:$0xf0]  }
  0x9e   :  { %980 = vrot.lane.b32.xlu0 %v979_v44, %s1753_s23  ;;  %v379_v51 = vpop.permute.xlu1 %378   ;;  %v1154_v44 = vsel %vm4_vm0, %v1684_v41, %v1683_v40  ;;  %v1730_v40 = vld [vmem:[%s3286_s0 + $0xc1] ss:$8 sm:$0xf]  }
  0x9f   :  { %1476 = vst.msk [vmem:[%s3287_s1 + $0x28] sm:$0xff] %vm326_vm3, %v379_v51   ;;  %v1731_v41 = vld [vmem:[%s3286_s0 + $0xc1] ss:$8 sm:$0xf0]  }
  0xa0   :  { %v368_v55 = vpop.permute.xlu0 %367   ;;  %1013 = vrot.lane.b32.xlu1 %v1012_v50, %s1753_s23  ;;  %v1187_v50 = vsel %vm4_vm0, %v1693_v46, %v1692_v45  ;;  %v1739_v45 = vld [vmem:[%s3286_s0 + $0x3c1] ss:$8 sm:$0xf]  }
  0xa1   :  { %1473 = vst.msk [vmem:[%s3287_s1 + $0x8] sm:$0xff] %vm326_vm3, %v368_v55   ;;  %v1740_v46 = vld [vmem:[%s3286_s0 + $0x3c1] ss:$8 sm:$0xf0]  }
  0xa2   :  { %1002 = vrot.lane.b32.xlu0 %v1001_v52, %s1753_s23  ;;  %v401_v59 = vpop.permute.xlu1 %400   ;;  %v1176_v52 = vsel %vm4_vm0, %v1690_v49, %v1689_v48  ;;  %v1736_v48 = vld [vmem:[%s3286_s0 + $0x2c1] ss:$8 sm:$0xf]  }
  0xa3   :  { %1482 = vst.msk [vmem:[%s3287_s1 + $0x68] sm:$0xff] %vm326_vm3, %v401_v59   ;;  %v1737_v49 = vld [vmem:[%s3286_s0 + $0x2c1] ss:$8 sm:$0xf0]  }
  0xa4   :  { %v390_v63 = vpop.permute.xlu0 %389   ;;  %1034 = vrot.lane.b32.xlu1 %v1033_v58, %s1754_s9  ;;  %v1208_v58 = vsel %vm4_vm0, %v1698_v54, %v1697_v53 }
  0xa5   :  { %1479 = vst.msk [vmem:[%s3287_s1 + $0x48] sm:$0xff] %vm326_vm3, %v390_v63  }
  0xa6   :  { %1024 = vrot.lane.b32.xlu0 %v1023_v60, %s1754_s9  ;;  %v423_v3 = vpop.permute.xlu1 %422   ;;  %v1198_v60 = vsel %vm4_vm0, %v1696_v57, %v1695_v56 }
  0xa7   :  { %1488 = vst.msk [vmem:[%s3287_s1 + $0x30] sm:$0xff] %vm326_vm3, %v423_v3  }
  0xa8   :  { %v412_v7 = vpop.permute.xlu0 %411   ;;  %1056 = vrot.lane.b32.xlu1 %v1055_v2, %s1754_s9  ;;  %v1230_v2 = vsel %vm4_vm0, %v1704_v62, %v1703_v61 }
  0xa9   :  { %1485 = vst.msk [vmem:[%s3287_s1 + $0x10] sm:$0xff] %vm326_vm3, %v412_v7  }
  0xaa   :  { %1045 = vrot.lane.b32.xlu0 %v1044_v4, %s1754_s9  ;;  %v445_v11 = vpop.permute.xlu1 %444   ;;  %v1219_v4 = vsel %vm4_vm0, %v1701_v1, %v1700_v0 }
  0xab   :  { %1494 = vst.msk [vmem:[%s3287_s1 + $0x70] sm:$0xff] %vm326_vm3, %v445_v11  }
  0xac   :  { %v434_v15 = vpop.permute.xlu0 %433   ;;  %1078 = vrot.lane.b32.xlu1 %v1077_v10, %s1754_s9  ;;  %v1252_v10 = vsel %vm4_vm0, %v1710_v6, %v1709_v5 }
  0xad   :  { %1491 = vst.msk [vmem:[%s3287_s1 + $0x50] sm:$0xff] %vm326_vm3, %v434_v15  }
  0xae   :  { %1067 = vrot.lane.b32.xlu0 %v1066_v12, %s1754_s9  ;;  %v467_v19 = vpop.permute.xlu1 %466   ;;  %v1241_v12 = vsel %vm4_vm0, %v1707_v9, %v1706_v8 }
  0xaf   :  { %1500 = vst.msk [vmem:[%s3287_s1 + $0x38] sm:$0xff] %vm326_vm3, %v467_v19  }
  0xb0   :  { %v456_v23 = vpop.permute.xlu0 %455   ;;  %1100 = vrot.lane.b32.xlu1 %v1099_v18, %s1754_s9  ;;  %v1274_v18 = vsel %vm4_vm0, %v1716_v14, %v1715_v13 }
  0xb1   :  { %1497 = vst.msk [vmem:[%s3287_s1 + $0x18] sm:$0xff] %vm326_vm3, %v456_v23  }
  0xb2   :  { %1089 = vrot.lane.b32.xlu0 %v1088_v20, %s1754_s9  ;;  %v489_v27 = vpop.permute.xlu1 %488   ;;  %v1263_v20 = vsel %vm4_vm0, %v1713_v17, %v1712_v16 }
  0xb3   :  { %1506 = vst.msk [vmem:[%s3287_s1 + $0x78] sm:$0xff] %vm326_vm3, %v489_v27  }
  0xb4   :  { %v478_v31 = vpop.permute.xlu0 %477   ;;  %1122 = vrot.lane.b32.xlu1 %v1121_v26, %s1754_s9  ;;  %v1296_v26 = vsel %vm4_vm0, %v1722_v22, %v1721_v21 }
  0xb5   :  { %1503 = vst.msk [vmem:[%s3287_s1 + $0x58] sm:$0xff] %vm326_vm3, %v478_v31  }
  0xb6   :  { %1111 = vrot.lane.b32.xlu0 %v1110_v28, %s1754_s9  ;;  %v510_v35 = vpop.permute.xlu1 %509   ;;  %v1285_v28 = vsel %vm4_vm0, %v1719_v25, %v1718_v24 }
  0xb7   :  { %1511 = vst.msk [vmem:[%s3287_s1 + $0x20] sm:$0xff] %vm501_vm4, %v510_v35  }
  0xb8   :  { %v500_v39 = vpop.permute.xlu0 %499   ;;  %1144 = vrot.lane.b32.xlu1 %v1143_v34, %s1754_s9  ;;  %v1318_v34 = vsel %vm4_vm0, %v1728_v30, %v1727_v29 }
  0xb9   :  { %502 = vst.msk [vmem:[%s3287_s1] sm:$0xff] %vm501_vm4, %v500_v39  }
  0xba   :  { %1133 = vrot.lane.b32.xlu0 %v1132_v36, %s1754_s9  ;;  %v532_v43 = vpop.permute.xlu1 %531   ;;  %v1307_v36 = vsel %vm4_vm0, %v1725_v33, %v1724_v32 }
  0xbb   :  { %1517 = vst.msk [vmem:[%s3287_s1 + $0x60] sm:$0xff] %vm501_vm4, %v532_v43  }
  0xbc   :  { %v521_v47 = vpop.permute.xlu0 %520   ;;  %1166 = vrot.lane.b32.xlu1 %v1165_v42, %s1754_s9  ;;  %v1340_v42 = vsel %vm4_vm0, %v1734_v38, %v1733_v37 }
  0xbd   :  { %1514 = vst.msk [vmem:[%s3287_s1 + $0x40] sm:$0xff] %vm501_vm4, %v521_v47  }
  0xbe   :  { %1155 = vrot.lane.b32.xlu0 %v1154_v44, %s1754_s9  ;;  %v554_v51 = vpop.permute.xlu1 %553   ;;  %v1329_v44 = vsel %vm4_vm0, %v1731_v41, %v1730_v40 }
  0xbf   :  { %1523 = vst.msk [vmem:[%s3287_s1 + $0x28] sm:$0xff] %vm501_vm4, %v554_v51  }
  0xc0   :  { %v543_v55 = vpop.permute.xlu0 %542   ;;  %1188 = vrot.lane.b32.xlu1 %v1187_v50, %s1754_s9  ;;  %v1362_v50 = vsel %vm4_vm0, %v1740_v46, %v1739_v45 }
  0xc1   :  { %1520 = vst.msk [vmem:[%s3287_s1 + $0x8] sm:$0xff] %vm501_vm4, %v543_v55  }
  0xc2   :  { %1177 = vrot.lane.b32.xlu0 %v1176_v52, %s1754_s9  ;;  %v576_v59 = vpop.permute.xlu1 %575   ;;  %v1351_v52 = vsel %vm4_vm0, %v1737_v49, %v1736_v48 }
  0xc3   :  { %1529 = vst.msk [vmem:[%s3287_s1 + $0x68] sm:$0xff] %vm501_vm4, %v576_v59  }
  0xc4   :  { %v565_v63 = vpop.permute.xlu0 %564   ;;  %1209 = vrot.lane.b32.xlu1 %v1208_v58, %s1755_s20 }
  0xc5   :  { %1526 = vst.msk [vmem:[%s3287_s1 + $0x48] sm:$0xff] %vm501_vm4, %v565_v63  }
  0xc6   :  { %1199 = vrot.lane.b32.xlu0 %v1198_v60, %s1755_s20  ;;  %v598_v3 = vpop.permute.xlu1 %597  }
  0xc7   :  { %1535 = vst.msk [vmem:[%s3287_s1 + $0x30] sm:$0xff] %vm501_vm4, %v598_v3  }
  0xc8   :  { %v587_v7 = vpop.permute.xlu0 %586   ;;  %1231 = vrot.lane.b32.xlu1 %v1230_v2, %s1755_s20 }
  0xc9   :  { %1532 = vst.msk [vmem:[%s3287_s1 + $0x10] sm:$0xff] %vm501_vm4, %v587_v7  }
  0xca   :  { %1220 = vrot.lane.b32.xlu0 %v1219_v4, %s1755_s20  ;;  %v620_v11 = vpop.permute.xlu1 %619  }
  0xcb   :  { %1541 = vst.msk [vmem:[%s3287_s1 + $0x70] sm:$0xff] %vm501_vm4, %v620_v11  }
  0xcc   :  { %v609_v15 = vpop.permute.xlu0 %608   ;;  %1253 = vrot.lane.b32.xlu1 %v1252_v10, %s1755_s20 }
  0xcd   :  { %1538 = vst.msk [vmem:[%s3287_s1 + $0x50] sm:$0xff] %vm501_vm4, %v609_v15  }
  0xce   :  { %1242 = vrot.lane.b32.xlu0 %v1241_v12, %s1755_s20  ;;  %v642_v19 = vpop.permute.xlu1 %641  }
  0xcf   :  { %1547 = vst.msk [vmem:[%s3287_s1 + $0x38] sm:$0xff] %vm501_vm4, %v642_v19  }
  0xd0   :  { %v631_v23 = vpop.permute.xlu0 %630   ;;  %1275 = vrot.lane.b32.xlu1 %v1274_v18, %s1755_s20 }
  0xd1   :  { %1544 = vst.msk [vmem:[%s3287_s1 + $0x18] sm:$0xff] %vm501_vm4, %v631_v23  }
  0xd2   :  { %1264 = vrot.lane.b32.xlu0 %v1263_v20, %s1755_s20  ;;  %v664_v27 = vpop.permute.xlu1 %663  }
  0xd3   :  { %1553 = vst.msk [vmem:[%s3287_s1 + $0x78] sm:$0xff] %vm501_vm4, %v664_v27  }
  0xd4   :  { %v653_v31 = vpop.permute.xlu0 %652   ;;  %1297 = vrot.lane.b32.xlu1 %v1296_v26, %s1755_s20 }
  0xd5   :  { %1550 = vst.msk [vmem:[%s3287_s1 + $0x58] sm:$0xff] %vm501_vm4, %v653_v31  }
  0xd6   :  { %1286 = vrot.lane.b32.xlu0 %v1285_v28, %s1755_s20  ;;  %v685_v35 = vpop.permute.xlu1 %684  }
  0xd7   :  { %1558 = vst.msk [vmem:[%s3287_s1 + $0x20] sm:$0xff] %vm676_vm5, %v685_v35  }
  0xd8   :  { %v675_v39 = vpop.permute.xlu0 %674   ;;  %1319 = vrot.lane.b32.xlu1 %v1318_v34, %s1755_s20 }
  0xd9   :  { %677 = vst.msk [vmem:[%s3287_s1] sm:$0xff] %vm676_vm5, %v675_v39  }
  0xda   :  { %1308 = vrot.lane.b32.xlu0 %v1307_v36, %s1755_s20  ;;  %v707_v43 = vpop.permute.xlu1 %706  }
  0xdb   :  { %1564 = vst.msk [vmem:[%s3287_s1 + $0x60] sm:$0xff] %vm676_vm5, %v707_v43  }
  0xdc   :  { %v696_v47 = vpop.permute.xlu0 %695   ;;  %1341 = vrot.lane.b32.xlu1 %v1340_v42, %s1755_s20 }
  0xdd   :  { %1561 = vst.msk [vmem:[%s3287_s1 + $0x40] sm:$0xff] %vm676_vm5, %v696_v47  }
  0xde   :  { %1330 = vrot.lane.b32.xlu0 %v1329_v44, %s1755_s20  ;;  %v729_v51 = vpop.permute.xlu1 %728  }
  0xdf   :  { %1570 = vst.msk [vmem:[%s3287_s1 + $0x28] sm:$0xff] %vm676_vm5, %v729_v51  }
  0xe0   :  { %v718_v53 = vpop.permute.xlu0 %717   ;;  %1363 = vrot.lane.b32.xlu1 %v1362_v50, %s1755_s20 }
  0xe1   :  { %1567 = vst.msk [vmem:[%s3287_s1 + $0x8] sm:$0xff] %vm676_vm5, %v718_v53  }
  0xe2   :  { %1352 = vrot.lane.b32.xlu0 %v1351_v52, %s1755_s20  ;;  %v751_v54 = vpop.permute.xlu1 %750  }
  0xe3   :  { %1576 = vst.msk [vmem:[%s3287_s1 + $0x68] sm:$0xff] %vm676_vm5, %v751_v54  }
  0xe4   :  { %v740_v55 = vpop.permute.xlu0 %739  }
  0xe5   :  { %1573 = vst.msk [vmem:[%s3287_s1 + $0x48] sm:$0xff] %vm676_vm5, %v740_v55  }
  0xe6   :  { %v773_v56 = vpop.permute.xlu1 %772  }
  0xe7   :  { %1582 = vst.msk [vmem:[%s3287_s1 + $0x30] sm:$0xff] %vm676_vm5, %v773_v56  }
  0xe8   :  { %v762_v57 = vpop.permute.xlu0 %761  }
  0xe9   :  { %1579 = vst.msk [vmem:[%s3287_s1 + $0x10] sm:$0xff] %vm676_vm5, %v762_v57  }
  0xea   :  { %v795_v58 = vpop.permute.xlu1 %794  }
  0xeb   :  { %1588 = vst.msk [vmem:[%s3287_s1 + $0x70] sm:$0xff] %vm676_vm5, %v795_v58  }
  0xec   :  { %v784_v59 = vpop.permute.xlu0 %783  }
  0xed   :  { %1585 = vst.msk [vmem:[%s3287_s1 + $0x50] sm:$0xff] %vm676_vm5, %v784_v59  }
  0xee   :  { %v817_v60 = vpop.permute.xlu1 %816  }
  0xef   :  { %1594 = vst.msk [vmem:[%s3287_s1 + $0x38] sm:$0xff] %vm676_vm5, %v817_v60  }
  0xf0   :  { %v806_v61 = vpop.permute.xlu0 %805  }
  0xf1   :  { %1591 = vst.msk [vmem:[%s3287_s1 + $0x18] sm:$0xff] %vm676_vm5, %v806_v61  }
  0xf2   :  { %v839_v62 = vpop.permute.xlu1 %838  }
  0xf3   :  { %1600 = vst.msk [vmem:[%s3287_s1 + $0x78] sm:$0xff] %vm676_vm5, %v839_v62  }
  0xf4   :  { %v828_v63 = vpop.permute.xlu0 %827  }
  0xf5   :  { %1597 = vst.msk [vmem:[%s3287_s1 + $0x58] sm:$0xff] %vm676_vm5, %v828_v63  }
  0xf6   :  { %v860_v0 = vpop.permute.xlu1 %859  }
  0xf7   :  { %1605 = vst.msk [vmem:[%s3287_s1 + $0x20] sm:$0xff] %vm851_vm6, %v860_v0  }
  0xf8   :  { %v850_v1 = vpop.permute.xlu0 %849  }
  0xf9   :  { %852 = vst.msk [vmem:[%s3287_s1] sm:$0xff] %vm851_vm6, %v850_v1  }
  0xfa   :  { %v882_v2 = vpop.permute.xlu1 %881  }
  0xfb   :  { %1611 = vst.msk [vmem:[%s3287_s1 + $0x60] sm:$0xff] %vm851_vm6, %v882_v2  }
  0xfc   :  { %v871_v3 = vpop.permute.xlu0 %870  }
  0xfd   :  { %1608 = vst.msk [vmem:[%s3287_s1 + $0x40] sm:$0xff] %vm851_vm6, %v871_v3  }
  0xfe   :  { %v904_v4 = vpop.permute.xlu1 %903  }
  0xff   :  { %1617 = vst.msk [vmem:[%s3287_s1 + $0x28] sm:$0xff] %vm851_vm6, %v904_v4  }
 0x100   :  { %v893_v5 = vpop.permute.xlu0 %892  }
 0x101   :  { %1614 = vst.msk [vmem:[%s3287_s1 + $0x8] sm:$0xff] %vm851_vm6, %v893_v5  }
 0x102   :  { %v926_v6 = vpop.permute.xlu1 %925  }
 0x103   :  { %1623 = vst.msk [vmem:[%s3287_s1 + $0x68] sm:$0xff] %vm851_vm6, %v926_v6  }
 0x104   :  { %v915_v7 = vpop.permute.xlu0 %914  }
 0x105   :  { %1620 = vst.msk [vmem:[%s3287_s1 + $0x48] sm:$0xff] %vm851_vm6, %v915_v7  }
 0x106   :  { %v948_v8 = vpop.permute.xlu1 %947  }
 0x107   :  { %1629 = vst.msk [vmem:[%s3287_s1 + $0x30] sm:$0xff] %vm851_vm6, %v948_v8  }
 0x108   :  { %v937_v9 = vpop.permute.xlu0 %936  }
 0x109   :  { %1626 = vst.msk [vmem:[%s3287_s1 + $0x10] sm:$0xff] %vm851_vm6, %v937_v9  }
 0x10a   :  { %v970_v10 = vpop.permute.xlu1 %969  }
 0x10b   :  { %1635 = vst.msk [vmem:[%s3287_s1 + $0x70] sm:$0xff] %vm851_vm6, %v970_v10  }
 0x10c   :  { %v959_v11 = vpop.permute.xlu0 %958  }
 0x10d   :  { %1632 = vst.msk [vmem:[%s3287_s1 + $0x50] sm:$0xff] %vm851_vm6, %v959_v11  }
 0x10e   :  { %v992_v12 = vpop.permute.xlu1 %991  }
 0x10f   :  { %1641 = vst.msk [vmem:[%s3287_s1 + $0x38] sm:$0xff] %vm851_vm6, %v992_v12  }
 0x110   :  { %v981_v13 = vpop.permute.xlu0 %980  }
 0x111   :  { %1638 = vst.msk [vmem:[%s3287_s1 + $0x18] sm:$0xff] %vm851_vm6, %v981_v13  }
 0x112   :  { %v1014_v14 = vpop.permute.xlu1 %1013  }
 0x113   :  { %1647 = vst.msk [vmem:[%s3287_s1 + $0x78] sm:$0xff] %vm851_vm6, %v1014_v14  }
 0x114   :  { %v1003_v15 = vpop.permute.xlu0 %1002  }
 0x115   :  { %1644 = vst.msk [vmem:[%s3287_s1 + $0x58] sm:$0xff] %vm851_vm6, %v1003_v15  }
 0x116   :  { %v1035_v16 = vpop.permute.xlu1 %1034  }
 0x117   :  { %1652 = vst.msk [vmem:[%s3287_s1 + $0x20] sm:$0xff] %vm1026_vm7, %v1035_v16  }
 0x118   :  { %v1025_v17 = vpop.permute.xlu0 %1024  }
 0x119   :  { %1027 = vst.msk [vmem:[%s3287_s1] sm:$0xff] %vm1026_vm7, %v1025_v17  }
 0x11a   :  { %v1057_v18 = vpop.permute.xlu1 %1056  }
 0x11b   :  { %1658 = vst.msk [vmem:[%s3287_s1 + $0x60] sm:$0xff] %vm1026_vm7, %v1057_v18  }
 0x11c   :  { %v1046_v19 = vpop.permute.xlu0 %1045  }
 0x11d   :  { %1655 = vst.msk [vmem:[%s3287_s1 + $0x40] sm:$0xff] %vm1026_vm7, %v1046_v19  }
 0x11e   :  { %v1079_v20 = vpop.permute.xlu1 %1078  }
 0x11f   :  { %1664 = vst.msk [vmem:[%s3287_s1 + $0x28] sm:$0xff] %vm1026_vm7, %v1079_v20  }
 0x120   :  { %v1068_v21 = vpop.permute.xlu0 %1067  }
 0x121   :  { %1661 = vst.msk [vmem:[%s3287_s1 + $0x8] sm:$0xff] %vm1026_vm7, %v1068_v21  }
 0x122   :  { %v1101_v22 = vpop.permute.xlu1 %1100  }
 0x123   :  { %1670 = vst.msk [vmem:[%s3287_s1 + $0x68] sm:$0xff] %vm1026_vm7, %v1101_v22  }
 0x124   :  { %v1090_v23 = vpop.permute.xlu0 %1089  }
 0x125   :  { %1667 = vst.msk [vmem:[%s3287_s1 + $0x48] sm:$0xff] %vm1026_vm7, %v1090_v23  }
 0x126   :  { %v1123_v24 = vpop.permute.xlu1 %1122  }
 0x127   :  { %1676 = vst.msk [vmem:[%s3287_s1 + $0x30] sm:$0xff] %vm1026_vm7, %v1123_v24  }
 0x128   :  { %v1112_v25 = vpop.permute.xlu0 %1111  }
 0x129   :  { %1673 = vst.msk [vmem:[%s3287_s1 + $0x10] sm:$0xff] %vm1026_vm7, %v1112_v25  }
 0x12a   :  { %v1145_v26 = vpop.permute.xlu1 %1144  }
 0x12b   :  { %1682 = vst.msk [vmem:[%s3287_s1 + $0x70] sm:$0xff] %vm1026_vm7, %v1145_v26  }
 0x12c   :  { %v1134_v27 = vpop.permute.xlu0 %1133  }
 0x12d   :  { %1679 = vst.msk [vmem:[%s3287_s1 + $0x50] sm:$0xff] %vm1026_vm7, %v1134_v27  }
 0x12e   :  { %v1167_v28 = vpop.permute.xlu1 %1166  }
 0x12f   :  { %1688 = vst.msk [vmem:[%s3287_s1 + $0x38] sm:$0xff] %vm1026_vm7, %v1167_v28  }
 0x130   :  { %v1156_v29 = vpop.permute.xlu0 %1155  }
 0x131   :  { %1685 = vst.msk [vmem:[%s3287_s1 + $0x18] sm:$0xff] %vm1026_vm7, %v1156_v29  }
 0x132   :  { %v1189_v30 = vpop.permute.xlu1 %1188  }
 0x133   :  { %1694 = vst.msk [vmem:[%s3287_s1 + $0x78] sm:$0xff] %vm1026_vm7, %v1189_v30  }
 0x134   :  { %v1178_v31 = vpop.permute.xlu0 %1177  }
 0x135   :  { %1691 = vst.msk [vmem:[%s3287_s1 + $0x58] sm:$0xff] %vm1026_vm7, %v1178_v31  }
 0x136   :  { %v1210_v32 = vpop.permute.xlu1 %1209  }
 0x137   :  { %1699 = vst.msk [vmem:[%s3287_s1 + $0x20] sm:$0xff] %vm1201_vm8, %v1210_v32  }
 0x138   :  { %v1200_v33 = vpop.permute.xlu0 %1199  }
 0x139   :  { %1202 = vst.msk [vmem:[%s3287_s1] sm:$0xff] %vm1201_vm8, %v1200_v33  }
 0x13a   :  { %v1232_v34 = vpop.permute.xlu1 %1231  }
 0x13b   :  { %1705 = vst.msk [vmem:[%s3287_s1 + $0x60] sm:$0xff] %vm1201_vm8, %v1232_v34  }
 0x13c   :  { %v1221_v35 = vpop.permute.xlu0 %1220  }
 0x13d   :  { %1702 = vst.msk [vmem:[%s3287_s1 + $0x40] sm:$0xff] %vm1201_vm8, %v1221_v35  }
 0x13e   :  { %v1254_v36 = vpop.permute.xlu1 %1253  }
 0x13f   :  { %1711 = vst.msk [vmem:[%s3287_s1 + $0x28] sm:$0xff] %vm1201_vm8, %v1254_v36  }
 0x140   :  { %v1243_v37 = vpop.permute.xlu0 %1242  }
 0x141   :  { %1708 = vst.msk [vmem:[%s3287_s1 + $0x8] sm:$0xff] %vm1201_vm8, %v1243_v37  }
 0x142   :  { %v1276_v38 = vpop.permute.xlu1 %1275  }
 0x143   :  { %1717 = vst.msk [vmem:[%s3287_s1 + $0x68] sm:$0xff] %vm1201_vm8, %v1276_v38  }
 0x144   :  { %v1265_v39 = vpop.permute.xlu0 %1264  }
 0x145   :  { %1714 = vst.msk [vmem:[%s3287_s1 + $0x48] sm:$0xff] %vm1201_vm8, %v1265_v39  }
 0x146   :  { %v1298_v40 = vpop.permute.xlu1 %1297  }
 0x147   :  { %1723 = vst.msk [vmem:[%s3287_s1 + $0x30] sm:$0xff] %vm1201_vm8, %v1298_v40  }
 0x148   :  { %v1287_v41 = vpop.permute.xlu0 %1286  }
 0x149   :  { %1720 = vst.msk [vmem:[%s3287_s1 + $0x10] sm:$0xff] %vm1201_vm8, %v1287_v41  }
 0x14a   :  { %v1320_v42 = vpop.permute.xlu1 %1319  }
 0x14b   :  { %1729 = vst.msk [vmem:[%s3287_s1 + $0x70] sm:$0xff] %vm1201_vm8, %v1320_v42  }
 0x14c   :  { %v1309_v43 = vpop.permute.xlu0 %1308  }
 0x14d   :  { %1726 = vst.msk [vmem:[%s3287_s1 + $0x50] sm:$0xff] %vm1201_vm8, %v1309_v43  }
 0x14e   :  { %v1342_v44 = vpop.permute.xlu1 %1341  }
 0x14f   :  { %1735 = vst.msk [vmem:[%s3287_s1 + $0x38] sm:$0xff] %vm1201_vm8, %v1342_v44  }
 0x150   :  { %v1331_v45 = vpop.permute.xlu0 %1330  }
 0x151   :  { %1732 = vst.msk [vmem:[%s3287_s1 + $0x18] sm:$0xff] %vm1201_vm8, %v1331_v45  }
 0x152   :  { %v1364_v46 = vpop.permute.xlu1 %1363  }
 0x153   :  { %1741 = vst.msk [vmem:[%s3287_s1 + $0x78] sm:$0xff] %vm1201_vm8, %v1364_v46  }
 0x154   :  { %v1353_v47 = vpop.permute.xlu0 %1352  }
 0x155   :  { %1738 = vst.msk [vmem:[%s3287_s1 + $0x58] sm:$0xff] %vm1201_vm8, %v1353_v47  }

// kernel: vit_forward.1
= control target key start
LH: loop header
LB: loop body
LE: loop exit
PB: predicated region body
PF: predicated region fallthrough
CT: control target
= control target key end

     0   :  { %vm148_vm0 = vcmask 261120   ;;  %s6382_s25 = smov 64   ;;  %s9276_s0 = inlined_call_operand.vmem [shape: f32[128,32], index: 0, kind: input, shape index: {}]   ;;  %s9277_s1 = inlined_call_operand.vmem [shape: f32[128,32], index: 1, kind: input, shape index: {}]   ;;  %s9278_s8 = inlined_call_operand.vmem [shape: bf16[2,32,96], index: 8, kind: input, shape index: {}]   ;;  %s9279_s6 = inlined_call_operand.vmem [shape: f32[2,32], index: 6, kind: input, shape index: {}]   ;;  %s9280_s7 = inlined_call_operand.vmem [shape: f32[2,32], index: 7, kind: input, shape index: {}]   ;;  %s9281_s2 = inlined_call_operand.vmem [shape: f32[128,128], index: 2, kind: input, shape index: {}]   ;;  %s9282_s9 = inlined_call_operand.vmem [shape: f32[2,128,128], index: 9, kind: input, shape index: {}]   ;;  %s9283_s4 = inlined_call_operand.vmem [shape: f32[2,128,128], index: 4, kind: input, shape index: {}]   ;;  %s9284_s5 = inlined_call_operand.vmem [shape: f32[2,128,128], index: 5, kind: input, shape index: {}]   ;;  %s9285_s10 = inlined_call_operand.vmem [shape: f32[2,1,128], index: 10, kind: input, shape index: {}]   ;;  %s9286_s11 = inlined_call_operand.vmem [shape: f32[2,1], index: 11, kind: input, shape index: {}]   ;;  %s9287_s3 = inlined_call_operand.vmem [shape: f32[128,128], index: 3, kind: input, shape index: {}]   ;;  %s9288_s12 = inlined_call_operand.vmem [shape: bf16[2,32,32], index: 12, kind: input, shape index: {}]   ;;  %s9289_s13 = inlined_call_operand.vmem [shape: f32[2,32], index: 13, kind: input, shape index: {}]   ;;  %s9290_s16 = inlined_call_operand.vmem [shape: bf16[2,32,32], index: 16, kind: input, shape index: {}]   ;;  %s9291_s14 = inlined_call_operand.vmem [shape: f32[2,32], index: 14, kind: input, shape index: {}]   ;;  %s9292_s15 = inlined_call_operand.vmem [shape: f32[2,32], index: 15, kind: input, shape index: {}]   ;;  %s9293_s18 = inlined_call_operand.vmem [shape: bf16[2,32,32], index: 18, kind: input, shape index: {}]   ;;  %s9294_s17 = inlined_call_operand.vmem [shape: f32[2,32], index: 17, kind: input, shape index: {}]   ;;  %s9295_s19 = inlined_call_operand.vmem [shape: f32[2,32], index: 19, kind: input, shape index: {}]   ;;  %s9296_s20 = inlined_call_operand.vmem [shape: f32[32,128], index: 20, kind: output, shape index: {}]  }
   0x1   :  { %9333 = sst [smem:[#allocation16_spill]] %s9276_s0 }
   0x2   :  { %9334 = sst [smem:[#allocation17_spill]] %s9277_s1  ;;  %s9339_s23 = sld [smem:[#allocation16_spill]] }
   0x3   :  { %9335 = sst [smem:[#allocation18_spill]] %s9278_s8  ;;  %s6380_s8 = smov 96  }
   0x4   :  { %9336 = sst [smem:[#allocation19_spill]] %s9279_s6  ;;  %s9341_s28 = sld [smem:[#allocation18_spill]] }
   0x5   :  { %9337 = sst [smem:[#allocation20_spill]] %s9280_s7  ;;  %s9342_s21 = sld [smem:[#allocation19_spill]] }
   0x6   :  { %9338 = sst [smem:[#allocation21_spill]] %s9291_s14  ;;  %s9340_s14 = sld [smem:[#allocation17_spill]] }
   0x7   :  { %s9343_s24 = sld [smem:[#allocation20_spill]]  ;;  %s9347_s30 = sld [smem:[#allocation21_spill]] }
   0x8   :  { %v66_v0 = vld [vmem:[%s9339_s23] sm:$0xff]  ;;  %v68_v2 = vld [vmem:[%s9339_s23 + $0x10] sm:$0xff]  ;;  %v67_v5 = vld [vmem:[%s9339_s23 + $0x8] sm:$0xff] }
   0x9   :  { %v69_v9 = vld [vmem:[%s9339_s23 + $0x18] sm:$0xff]  ;;  %v70_v11 = vld [vmem:[%s9339_s23 + $0x20] sm:$0xff]  ;;  %v71_v15 = vld [vmem:[%s9339_s23 + $0x28] sm:$0xff] }
   0xa   :  { %v72_v22 = vld [vmem:[%s9339_s23 + $0x30] sm:$0xff]  ;;  %v73_v24 = vld [vmem:[%s9339_s23 + $0x38] sm:$0xff]  ;;  %v74_v30 = vld [vmem:[%s9339_s23 + $0x40] sm:$0xff] }
   0xb   :  { %v75_v32 = vld [vmem:[%s9339_s23 + $0x48] sm:$0xff]  ;;  %v76_v38 = vld [vmem:[%s9339_s23 + $0x50] sm:$0xff]  ;;  %v77_v40 = vld [vmem:[%s9339_s23 + $0x58] sm:$0xff] }
   0xc   :  { %v82_v1 = vld [vmem:[%s9340_s14] sm:$0xff]  ;;  %v84_v4 = vld [vmem:[%s9340_s14 + $0x10] sm:$0xff]  ;;  %v83_v6 = vld [vmem:[%s9340_s14 + $0x8] sm:$0xff] }
   0xd   :  { %v6497_v3 = vadd.f32 %v82_v1, %v66_v0  ;;  %v6508_v7 = vadd.f32 %v84_v4, %v68_v2  ;;  %v6510_v8 = vadd.f32 %v83_v6, %v67_v5  ;;  %v85_v10 = vld [vmem:[%s9340_s14 + $0x18] sm:$0xff]  ;;  %v86_v14 = vld [vmem:[%s9340_s14 + $0x20] sm:$0xff]  ;;  %v87_v16 = vld [vmem:[%s9340_s14 + $0x28] sm:$0xff] }
   0xe   :  { %v6523_v13 = vadd.f32 %v85_v10, %v69_v9  ;;  %v6538_v19 = vadd.f32 %v86_v14, %v70_v11  ;;  %v6542_v21 = vadd.f32 %v87_v16, %v71_v15  ;;  %v88_v23 = vld [vmem:[%s9340_s14 + $0x30] sm:$0xff]  ;;  %v89_v25 = vld [vmem:[%s9340_s14 + $0x38] sm:$0xff]  ;;  %v90_v31 = vld [vmem:[%s9340_s14 + $0x40] sm:$0xff] }
   0xf   :  { %v149_v12 = vsel %vm148_vm0, %v6497_v3, 0.0  ;;  %v155_v17 = vsel %vm148_vm0, %v6508_v7, 0.0  ;;  %v152_v18 = vsel %vm148_vm0, %v6510_v8, 0.0  ;;  %v6558_v27 = vadd.f32 %v88_v23, %v72_v22  ;;  %v91_v33 = vld [vmem:[%s9340_s14 + $0x48] sm:$0xff]  ;;  %v92_v39 = vld [vmem:[%s9340_s14 + $0x50] sm:$0xff]  ;;  %v93_v41 = vld [vmem:[%s9340_s14 + $0x58] sm:$0xff] }
  0x10   :  { %150 = vadd.xlane.f32.xlu0 %v149_v12  ;;  %156 = vadd.xlane.f32.xlu1 %v155_v17  ;;  %v158_v20 = vsel %vm148_vm0, %v6523_v13, 0.0  ;;  %v161_v26 = vsel %vm148_vm0, %v6538_v19, 0.0  ;;  %v164_v28 = vsel %vm148_vm0, %v6542_v21, 0.0  ;;  %v6562_v29 = vadd.f32 %v89_v25, %v73_v24  ;;  %v78_v46 = vld [vmem:[%s9339_s23 + $0x60] sm:$0xff]  ;;  %v79_v48 = vld [vmem:[%s9339_s23 + $0x68] sm:$0xff]  ;;  %v80_v54 = vld [vmem:[%s9339_s23 + $0x70] sm:$0xff] }
  0x11   :  { %v167_v34 = vsel %vm148_vm0, %v6558_v27, 0.0  ;;  %v6578_v35 = vadd.f32 %v90_v31, %v74_v30  ;;  %v6582_v37 = vadd.f32 %v91_v33, %v75_v32  ;;  %v6598_v43 = vadd.f32 %v92_v39, %v76_v38  ;;  %v94_v47 = vld [vmem:[%s9340_s14 + $0x60] sm:$0xff]  ;;  %v95_v49 = vld [vmem:[%s9340_s14 + $0x68] sm:$0xff]  ;;  %v96_v55 = vld [vmem:[%s9340_s14 + $0x70] sm:$0xff] }
  0x12   :  { %v170_v36 = vsel %vm148_vm0, %v6562_v29, 0.0  ;;  %v6602_v45 = vadd.f32 %v93_v41, %v77_v40  ;;  %v6618_v51 = vadd.f32 %v94_v47, %v78_v46  ;;  %v6622_v53 = vadd.f32 %v95_v49, %v79_v48  ;;  %v81_v56 = vld [vmem:[%s9339_s23 + $0x78] sm:$0xff] }
  0x13   :  { %v173_v42 = vsel %vm148_vm0, %v6578_v35, 0.0  ;;  %v176_v44 = vsel %vm148_vm0, %v6582_v37, 0.0  ;;  %v179_v50 = vsel %vm148_vm0, %v6598_v43, 0.0  ;;  %v97_v57 = vld [vmem:[%s9340_s14 + $0x78] sm:$0xff]  ;;  %v6638_v59 = vadd.f32 %v96_v55, %v80_v54 }
  0x14   :  { %153 = vadd.xlane.f32.xlu0 %v152_v18  ;;  %159 = vadd.xlane.f32.xlu1 %v158_v20  ;;  %v182_v52 = vsel %vm148_vm0, %v6602_v45, 0.0  ;;  %v185_v58 = vsel %vm148_vm0, %v6618_v51, 0.0  ;;  %v188_v60 = vsel %vm148_vm0, %v6622_v53, 0.0  ;;  %v6642_v61 = vadd.f32 %v97_v57, %v81_v56 }
  0x15   :  { %v191_v62 = vsel %vm148_vm0, %v6638_v59, 0.0 }
  0x16   :  { %v194_v63 = vsel %vm148_vm0, %v6642_v61, 0.0 }
  0x18   :  { %162 = vadd.xlane.f32.xlu0 %v161_v26  ;;  %165 = vadd.xlane.f32.xlu1 %v164_v28 }
  0x1c   :  { %168 = vadd.xlane.f32.xlu0 %v167_v34  ;;  %171 = vadd.xlane.f32.xlu1 %v170_v36 }
  0x20   :  { %174 = vadd.xlane.f32.xlu0 %v173_v42  ;;  %177 = vadd.xlane.f32.xlu1 %v176_v44 }
  0x24   :  { %180 = vadd.xlane.f32.xlu0 %v179_v50  ;;  %183 = vadd.xlane.f32.xlu1 %v182_v52 }
  0x28   :  { %186 = vadd.xlane.f32.xlu0 %v185_v58  ;;  %189 = vadd.xlane.f32.xlu1 %v188_v60 }
  0x2c   :  { %192 = vadd.xlane.f32.xlu0 %v191_v62  ;;  %195 = vadd.xlane.f32.xlu1 %v194_v63 }
  0x9d   :  { %v151_v0 = vpop.xlane.xlu0 %150  ;;  %v157_v2 = vpop.xlane.xlu1 %156 }
  0x9e   :  { %v198_v1 = vmul.f32 0.03125, %v151_v0  ;;  %v200_v4 = vmul.f32 0.03125, %v157_v2 }
  0xa0   :  { %v6649_v5 = vsub.f32 %v6497_v3, %v198_v1  ;;  %v6652_v6 = vsub.f32 %v6508_v7, %v200_v4 }
  0xa1   :  { %v154_v9 = vpop.xlane.xlu0 %153  ;;  %v160_v11 = vpop.xlane.xlu1 %159 }
  0xa2   :  { %v199_v10 = vmul.f32 0.03125, %v154_v9  ;;  %v230_v12 = vmul.f32 %v6649_v5, %v6649_v5  ;;  %v201_v14 = vmul.f32 0.03125, %v160_v11  ;;  %v232_v15 = vmul.f32 %v6652_v6, %v6652_v6 }
  0xa4   :  { %v6659_v16 = vsub.f32 %v6510_v8, %v199_v10  ;;  %v246_v17 = vsel %vm148_vm0, %v230_v12, 0.0  ;;  %v6663_v18 = vsub.f32 %v6523_v13, %v201_v14  ;;  %v252_v24 = vsel %vm148_vm0, %v232_v15, 0.0 }
  0xa5   :  { %247 = vadd.xlane.f32.xlu0 %v246_v17  ;;  %v163_v20 = vpop.xlane.xlu0 %162  ;;  %v166_v23 = vpop.xlane.xlu1 %165 }
  0xa6   :  { %v202_v22 = vmul.f32 0.03125, %v163_v20  ;;  %v231_v25 = vmul.f32 %v6659_v16, %v6659_v16  ;;  %v203_v26 = vmul.f32 0.03125, %v166_v23  ;;  %v233_v28 = vmul.f32 %v6663_v18, %v6663_v18 }
  0xa8   :  { %v6671_v30 = vsub.f32 %v6538_v19, %v202_v22  ;;  %v249_v31 = vsel %vm148_vm0, %v231_v25, 0.0  ;;  %v6675_v32 = vsub.f32 %v6542_v21, %v203_v26  ;;  %v255_v38 = vsel %vm148_vm0, %v233_v28, 0.0 }
  0xa9   :  { %253 = vadd.xlane.f32.xlu0 %v252_v24  ;;  %250 = vadd.xlane.f32.xlu1 %v249_v31  ;;  %v169_v33 = vpop.xlane.xlu0 %168  ;;  %v172_v36 = vpop.xlane.xlu1 %171 }
  0xaa   :  { %v204_v34 = vmul.f32 0.03125, %v169_v33  ;;  %v234_v39 = vmul.f32 %v6671_v30, %v6671_v30  ;;  %v205_v40 = vmul.f32 0.03125, %v172_v36  ;;  %v235_v41 = vmul.f32 %v6675_v32, %v6675_v32 }
  0xac   :  { %v6683_v42 = vsub.f32 %v6558_v27, %v204_v34  ;;  %v258_v44 = vsel %vm148_vm0, %v234_v39, 0.0  ;;  %v6687_v46 = vsub.f32 %v6562_v29, %v205_v40  ;;  %v261_v50 = vsel %vm148_vm0, %v235_v41, 0.0 }
  0xad   :  { %256 = vadd.xlane.f32.xlu1 %v255_v38  ;;  %259 = vadd.xlane.f32.xlu0 %v258_v44  ;;  %v175_v47 = vpop.xlane.xlu0 %174  ;;  %v178_v49 = vpop.xlane.xlu1 %177 }
  0xae   :  { %v206_v48 = vmul.f32 0.03125, %v175_v47  ;;  %v236_v52 = vmul.f32 %v6683_v42, %v6683_v42  ;;  %v207_v54 = vmul.f32 0.03125, %v178_v49  ;;  %v237_v55 = vmul.f32 %v6687_v46, %v6687_v46 }
  0xb0   :  { %v6695_v56 = vsub.f32 %v6578_v35, %v206_v48  ;;  %v264_v57 = vsel %vm148_vm0, %v236_v52, 0.0  ;;  %v6699_v58 = vsub.f32 %v6582_v37, %v207_v54  ;;  %v267_v0 = vsel %vm148_vm0, %v237_v55, 0.0  ;;  %v5740_v54 = vld [vmem:[%s9341_s28] sm:$0xff]   ;;  %v5741_v55 = vld [vmem:[%s9341_s28 + $0x8] sm:$0xff]  }
  0xb1   :  { %262 = vadd.xlane.f32.xlu1 %v261_v50  ;;  %265 = vadd.xlane.f32.xlu0 %v264_v57  ;;  %v181_v60 = vpop.xlane.xlu0 %180  ;;  %v184_v63 = vpop.xlane.xlu1 %183 }
  0xb2   :  { %v208_v62 = vmul.f32 0.03125, %v181_v60  ;;  %v238_v1 = vmul.f32 %v6695_v56, %v6695_v56  ;;  %v209_v2 = vmul.f32 0.03125, %v184_v63  ;;  %v239_v4 = vmul.f32 %v6699_v58, %v6699_v58  ;;  %5251 = vmatprep.subr.bf16.mxu0 %v5740_v54 }
  0xb3   :  { %5252 = vmatpush3.bf16.msra.mxu0 %v5740_v54 }
  0xb4   :  { %v6707_v9 = vsub.f32 %v6598_v43, %v208_v62  ;;  %v270_v10 = vsel %vm148_vm0, %v238_v1, 0.0  ;;  %v6711_v11 = vsub.f32 %v6602_v45, %v209_v2  ;;  %v273_v17 = vsel %vm148_vm0, %v239_v4, 0.0  ;;  %5253 = vmatprep.subr.bf16.mxu0 %v5741_v55 }
  0xb5   :  { %268 = vadd.xlane.f32.xlu1 %v267_v0  ;;  %271 = vadd.xlane.f32.xlu0 %v270_v10  ;;  %v187_v12 = vpop.xlane.xlu0 %186  ;;  %v190_v15 = vpop.xlane.xlu1 %189 }
  0xb6   :  { %v210_v14 = vmul.f32 0.03125, %v187_v12  ;;  %v240_v20 = vmul.f32 %v6707_v9, %v6707_v9  ;;  %v211_v22 = vmul.f32 0.03125, %v190_v15  ;;  %v241_v23 = vmul.f32 %v6711_v11, %v6711_v11 }
  0xb7   :  { %5254 = vmatpush3.bf16.msra.mxu0 %v5741_v55 }
  0xb8   :  { %v6719_v24 = vsub.f32 %v6618_v51, %v210_v14  ;;  %v276_v25 = vsel %vm148_vm0, %v240_v20, 0.0  ;;  %v6723_v26 = vsub.f32 %v6622_v53, %v211_v22  ;;  %v279_v34 = vsel %vm148_vm0, %v241_v23, 0.0 }
  0xb9   :  { %274 = vadd.xlane.f32.xlu1 %v273_v17  ;;  %277 = vadd.xlane.f32.xlu0 %v276_v25  ;;  %v193_v28 = vpop.xlane.xlu0 %192  ;;  %v196_v33 = vpop.xlane.xlu1 %195 }
  0xba   :  { %v212_v31 = vmul.f32 0.03125, %v193_v28  ;;  %v242_v36 = vmul.f32 %v6719_v24, %v6719_v24  ;;  %v213_v38 = vmul.f32 0.03125, %v196_v33  ;;  %v243_v39 = vmul.f32 %v6723_v26, %v6723_v26 }
  0xbc   :  { %v6731_v40 = vsub.f32 %v6638_v59, %v212_v31  ;;  %v282_v41 = vsel %vm148_vm0, %v242_v36, 0.0  ;;  %v6735_v44 = vsub.f32 %v6642_v61, %v213_v38  ;;  %v285_v47 = vsel %vm148_vm0, %v243_v39, 0.0 }
  0xbd   :  { %280 = vadd.xlane.f32.xlu1 %v279_v34  ;;  %283 = vadd.xlane.f32.xlu0 %v282_v41 }
  0xbe   :  { %v244_v48 = vmul.f32 %v6731_v40, %v6731_v40  ;;  %v245_v49 = vmul.f32 %v6735_v44, %v6735_v44 }
  0xc0   :  { %v288_v50 = vsel %vm148_vm0, %v244_v48, 0.0  ;;  %v291_v52 = vsel %vm148_vm0, %v245_v49, 0.0  ;;  %v6754_v49 = vld [vmem:[%s9342_s21] ss:$0 sm:$0xff] }
  0xc1   :  { %286 = vadd.xlane.f32.xlu1 %v285_v47  ;;  %289 = vadd.xlane.f32.xlu0 %v288_v50 }
  0xc5   :  { %292 = vadd.xlane.f32.xlu1 %v291_v52 }
 0x132   :  { %v248_v57 = vpop.xlane.xlu0 %247 }
 0x133   :  { %v294_v60 = vmul.f32 0.03125, %v248_v57 }
 0x135   :  { %v310_v62 = vadd.f32 1e-05, %v294_v60 }
 0x136   :  { %v251_v63 = vpop.xlane.xlu1 %250  ;;  %v254_v0 = vpop.xlane.xlu0 %253 }
 0x137   :  { %5756 = vrsqrt.f32 %v310_v62  ;;  %v295_v1 = vmul.f32 0.03125, %v251_v63  ;;  %v296_v2 = vmul.f32 0.03125, %v254_v0 }
 0x139   :  { %v311_v4 = vadd.f32 1e-05, %v295_v1  ;;  %v312_v10 = vadd.f32 1e-05, %v296_v2  ;;  %v6761_v1 = vld [vmem:[%s9343_s24] ss:$0 sm:$0xff] }
 0x13a   :  { %v257_v12 = vpop.xlane.xlu1 %256  ;;  %v260_v14 = vpop.xlane.xlu0 %259 }
 0x13b   :  { %5758 = vrsqrt.f32 %v311_v4  ;;  %v297_v15 = vmul.f32 0.03125, %v257_v12  ;;  %v298_v17 = vmul.f32 0.03125, %v260_v14 }
 0x13c   :  { %5760 = vrsqrt.f32 %v312_v10 }
 0x13d   :  { %v313_v20 = vadd.f32 1e-05, %v297_v15  ;;  %v314_v22 = vadd.f32 1e-05, %v298_v17 }
 0x13e   :  { %v263_v23 = vpop.xlane.xlu1 %262  ;;  %v266_v25 = vpop.xlane.xlu0 %265 }
 0x13f   :  { %5762 = vrsqrt.f32 %v313_v20  ;;  %v299_v28 = vmul.f32 0.03125, %v263_v23  ;;  %v300_v31 = vmul.f32 0.03125, %v266_v25 }
 0x140   :  { %5764 = vrsqrt.f32 %v314_v22 }
 0x141   :  { %v5757_v33 = vpop.eup %5756  ;;  %v315_v34 = vadd.f32 1e-05, %v299_v28  ;;  %v316_v36 = vadd.f32 1e-05, %v300_v31 }
 0x142   :  { %v269_v38 = vpop.xlane.xlu1 %268  ;;  %v272_v39 = vpop.xlane.xlu0 %271  ;;  %v342_v41 = vmul.f32 %v5757_v33, %v6649_v5 }
 0x143   :  { %5766 = vrsqrt.f32 %v315_v34  ;;  %v301_v47 = vmul.f32 0.03125, %v269_v38  ;;  %v302_v48 = vmul.f32 0.03125, %v272_v39 }
 0x144   :  { %5768 = vrsqrt.f32 %v316_v36  ;;  %v362_v63 = vmul.f32 %v6754_v49, %v342_v41 }
 0x145   :  { %v5759_v50 = vpop.eup %5758  ;;  %v317_v52 = vadd.f32 1e-05, %v301_v47  ;;  %v318_v54 = vadd.f32 1e-05, %v302_v48 }
 0x146   :  { %v5761_v55 = vpop.eup %5760  ;;  %v275_v57 = vpop.xlane.xlu1 %274  ;;  %v343_v62 = vmul.f32 %v5759_v50, %v6659_v16  ;;  %v382_v20 = vadd.f32 %v6761_v1, %v362_v63 }
 0x147   :  { %v278_v60 = vpop.xlane.xlu0 %277  ;;  %5770 = vrsqrt.f32 %v317_v52  ;;  %v303_v5 = vmul.f32 0.03125, %v275_v57  ;;  %v344_v2 = vmul.f32 %v5761_v55, %v6652_v6 }
 0x148   :  { %v304_v0 = vmul.f32 0.03125, %v278_v60  ;;  %5772 = vrsqrt.f32 %v318_v54  ;;  %v363_v4 = vmul.f32 %v6754_v49, %v343_v62 }
 0x149   :  { %v5763_v10 = vpop.eup %5762  ;;  %v319_v12 = vadd.f32 1e-05, %v303_v5  ;;  %v364_v25 = vmul.f32 %v6754_v49, %v344_v2 }
 0x14a   :  { %v320_v14 = vadd.f32 1e-05, %v304_v0  ;;  %v5765_v15 = vpop.eup %5764  ;;  %v281_v16 = vpop.xlane.xlu1 %280  ;;  %v383_v22 = vadd.f32 %v6761_v1, %v363_v4  ;;  %v345_v23 = vmul.f32 %v5763_v10, %v6663_v18 }
 0x14b   :  { %v284_v17 = vpop.xlane.xlu0 %283  ;;  %5774 = vrsqrt.f32 %v319_v12  ;;  %v305_v28 = vmul.f32 0.03125, %v281_v16  ;;  %v346_v34 = vmul.f32 %v5765_v15, %v6671_v30  ;;  %v384_v18 = vadd.f32 %v6761_v1, %v364_v25 }
 0x14c   :  { %v306_v6 = vmul.f32 0.03125, %v284_v17  ;;  %5776 = vrsqrt.f32 %v320_v14  ;;  %v398_v31 = vpack.c.bf16 %v383_v22, %v382_v20  ;;  %v365_v33 = vmul.f32 %v6754_v49, %v345_v23 }
 0x14d   :  { %v5767_v36 = vpop.eup %5766  ;;  %v321_v38 = vadd.f32 1e-05, %v305_v28  ;;  %v366_v54 = vmul.f32 %v6754_v49, %v346_v34 }
 0x14e   :  { %v322_v39 = vadd.f32 1e-05, %v306_v6  ;;  %v5769_v41 = vpop.eup %5768  ;;  %v287_v47 = vpop.xlane.xlu1 %286  ;;  %5255 = vmatprep.mubr.msk.bf16.mxu0 %vm148_vm0, %v398_v31  ;;  %v385_v50 = vadd.f32 %v6761_v1, %v365_v33  ;;  %v347_v52 = vmul.f32 %v5767_v36, %v6675_v32 }
 0x14f   :  { %v290_v48 = vpop.xlane.xlu0 %289  ;;  %5778 = vrsqrt.f32 %v321_v38  ;;  %v307_v55 = vmul.f32 0.03125, %v287_v47  ;;  %v348_v30 = vmul.f32 %v5769_v41, %v6683_v42  ;;  %v386_v32 = vadd.f32 %v6761_v1, %v366_v54 }
 0x150   :  { %v308_v57 = vmul.f32 0.03125, %v290_v48  ;;  %5780 = vrsqrt.f32 %v322_v39  ;;  %v399_v60 = vpack.c.bf16 %v385_v50, %v384_v18  ;;  %v367_v62 = vmul.f32 %v6754_v49, %v347_v52 }
 0x151   :  { %v5771_v63 = vpop.eup %5770  ;;  %v323_v5 = vadd.f32 1e-05, %v307_v55  ;;  %v368_v14 = vmul.f32 %v6754_v49, %v348_v30 }
 0x152   :  { %v324_v0 = vadd.f32 1e-05, %v308_v57  ;;  %v5773_v2 = vpop.eup %5772  ;;  %v293_v4 = vpop.xlane.xlu1 %292  ;;  %5256 = vmatmul.mubr.msk.bf16.vlgmr.msra.gmra.mrb[0].mxu0 %vm148_vm0, %v399_v60  ;;  %v387_v10 = vadd.f32 %v6761_v1, %v367_v62  ;;  %v349_v12 = vmul.f32 %v5771_v63, %v6687_v46 }
 0x153   :  { %5782 = vrsqrt.f32 %v323_v5  ;;  %v309_v42 = vmul.f32 0.03125, %v293_v4  ;;  %v350_v15 = vmul.f32 %v5773_v2, %v6695_v56  ;;  %v388_v25 = vadd.f32 %v6761_v1, %v368_v14 }
 0x154   :  { %5784 = vrsqrt.f32 %v324_v0  ;;  %v400_v16 = vpack.c.bf16 %v387_v10, %v386_v32  ;;  %v369_v17 = vmul.f32 %v6754_v49, %v349_v12 }
 0x155   :  { %v5775_v20 = vpop.eup %5774  ;;  %v325_v22 = vadd.f32 1e-05, %v309_v42  ;;  %v370_v6 = vmul.f32 %v6754_v49, %v350_v15 }
 0x156   :  { %v5777_v23 = vpop.eup %5776  ;;  %5259 = vmatprep.mubr.msk.bf16.mxu0 %vm148_vm0, %v400_v16  ;;  %v389_v28 = vadd.f32 %v6761_v1, %v369_v17  ;;  %v351_v46 = vmul.f32 %v5775_v20, %v6699_v58 }
 0x157   :  { %5786 = vrsqrt.f32 %v325_v22  ;;  %v352_v56 = vmul.f32 %v5777_v23, %v6707_v9  ;;  %v390_v38 = vadd.f32 %v6761_v1, %v370_v6 }
 0x158   :  { %v401_v31 = vpack.c.bf16 %v389_v28, %v388_v25  ;;  %v371_v33 = vmul.f32 %v6754_v49, %v351_v46 }
 0x159   :  { %v5779_v34 = vpop.eup %5778  ;;  %v372_v58 = vmul.f32 %v6754_v49, %v352_v56 }
 0x15a   :  { %v5781_v36 = vpop.eup %5780  ;;  %5260 = vmatmul.mubr.msk.bf16.gmra.mrb[4].mxu0 %vm148_vm0, %v401_v31  ;;  %v391_v39 = vadd.f32 %v6761_v1, %v371_v33  ;;  %v353_v41 = vmul.f32 %v5779_v34, %v6711_v11 }
 0x15b   :  { %v354_v47 = vmul.f32 %v5781_v36, %v6719_v24  ;;  %v392_v52 = vadd.f32 %v6761_v1, %v372_v58 }
 0x15c   :  { %v402_v48 = vpack.c.bf16 %v391_v39, %v390_v38  ;;  %v373_v9 = vmul.f32 %v6754_v49, %v353_v41 }
 0x15d   :  { %v5783_v18 = vpop.eup %5782  ;;  %v374_v57 = vmul.f32 %v6754_v49, %v354_v47 }
 0x15e   :  { %v5785_v50 = vpop.eup %5784  ;;  %5263 = vmatprep.mubr.msk.bf16.mxu0 %vm148_vm0, %v402_v48  ;;  %v393_v54 = vadd.f32 %v6761_v1, %v373_v9  ;;  %v355_v55 = vmul.f32 %v5783_v18, %v6723_v26 }
 0x15f   :  { %v356_v11 = vmul.f32 %v5785_v50, %v6731_v40  ;;  %v394_v62 = vadd.f32 %v6761_v1, %v374_v57 }
 0x160   :  { %v403_v30 = vpack.c.bf16 %v393_v54, %v392_v52  ;;  %v375_v24 = vmul.f32 %v6754_v49, %v355_v55 }
 0x161   :  { %v5787_v60 = vpop.eup %5786  ;;  %v376_v0 = vmul.f32 %v6754_v49, %v356_v11 }
 0x162   :  { %5264 = vmatmul.mubr.msk.bf16.gmra.mrb[8].mxu0 %vm148_vm0, %v403_v30  ;;  %v395_v63 = vadd.f32 %v6761_v1, %v375_v24  ;;  %v357_v5 = vmul.f32 %v5787_v60, %v6735_v44 }
 0x163   :  { %v396_v40 = vadd.f32 %v6761_v1, %v376_v0 }
 0x164   :  { %v404_v2 = vpack.c.bf16 %v395_v63, %v394_v62  ;;  %v377_v26 = vmul.f32 %v6754_v49, %v357_v5  ;;  %v114_v63 = vld [vmem:[%s9281_s2] sm:$0xff] }
 0x166   :  { %5267 = vmatprep.mubr.msk.bf16.mxu0 %vm148_vm0, %v404_v2  ;;  %v397_v4 = vadd.f32 %v6761_v1, %v377_v26  ;;  %v115_v2 = vld [vmem:[%s9281_s2 + $0x8] sm:$0xff] }
 0x168   :  { %v405_v32 = vpack.c.bf16 %v397_v4, %v396_v40  ;;  %v116_v4 = vld [vmem:[%s9281_s2 + $0x10] sm:$0xff] }
 0x16a   :  { %5268 = vmatmul.mubr.msk.bf16.gmra.mrb[12].mxu0 %vm148_vm0, %v405_v32 }
 0x225   :  { %v5257_v10 = vpop.f32.mrb[0].mxu0 }
 0x226   :  { %v480_v12 = vpop.f32.mrb[1].mxu0 }
 0x227   :  { %v5258_v14 = vpop.f32.mrb[2].mxu0 }
 0x228   :  { %v6816_v42 = vpack.c.bf16 %v5258_v14, %v5257_v10  ;;  %v483_v44 = vpop.f32.mrb[3].mxu0  ;;  %v117_v14 = vld [vmem:[%s9281_s2 + $0x18] sm:$0xff] }
 0x229   :  { %v6818_v15 = vpack.c.bf16 %v483_v44, %v480_v12 }
 0x22a   :  { %561 = vrot.lane.b32.xlu1 %v6816_v42, %s6380_s8 }
 0x22b   :  { %559 = vrot.lane.b32.xlu0 %v6818_v15, %s6380_s8  ;;  %5287 = vmatprep.mubr.msk.bf16.mxu1 %vm148_vm0, %v6818_v15 }
 0x22d   :  { %v5261_v49 = vpop.f32.mrb[4].mxu0 }
 0x22e   :  { %v496_v1 = vpop.f32.mrb[5].mxu0 }
 0x22f   :  { %v5262_v16 = vpop.f32.mrb[6].mxu0 }
 0x230   :  { %v6826_v17 = vpack.c.bf16 %v5262_v16, %v5261_v49  ;;  %v499_v20 = vpop.f32.mrb[7].mxu0 }
 0x231   :  { %v6828_v22 = vpack.c.bf16 %v499_v20, %v496_v1  ;;  %v119_v1 = vld [vmem:[%s9281_s2 + $0x28] sm:$0xff] }
 0x233   :  { %563 = vrot.lane.b32.xlu1 %v6828_v22, %s6380_s8 }
 0x235   :  { %v5265_v23 = vpop.f32.mrb[8].mxu0 }
 0x236   :  { %v512_v25 = vpop.f32.mrb[9].mxu0 }
 0x237   :  { %565 = vrot.lane.b32.xlu1 %v6826_v17, %s6380_s8  ;;  %v5266_v28 = vpop.f32.mrb[10].mxu0 }
 0x238   :  { %v6834_v46 = vpack.c.bf16 %v5266_v28, %v5265_v23  ;;  %v515_v6 = vpop.f32.mrb[11].mxu0  ;;  %v118_v23 = vld [vmem:[%s9281_s2 + $0x20] sm:$0xff] }
 0x239   :  { %v6836_v56 = vpack.c.bf16 %v515_v6, %v512_v25  ;;  %v121_v6 = vld [vmem:[%s9281_s2 + $0x38] sm:$0xff] }
 0x23b   :  { %569 = vrot.lane.b32.xlu1 %v6834_v46, %s6380_s8  ;;  %567 = vrot.lane.b32.xlu0 %v6836_v56, %s6380_s8 }
 0x23d   :  { %v5269_v31 = vpop.f32.mrb[12].mxu0 }
 0x23e   :  { %v528_v33 = vpop.f32.mrb[13].mxu0 }
 0x23f   :  { %v5270_v34 = vpop.f32.mrb[14].mxu0 }
 0x240   :  { %v6842_v36 = vpack.c.bf16 %v5270_v34, %v5269_v31  ;;  %v531_v38 = vpop.f32.mrb[15].mxu0 }
 0x241   :  { %v6844_v39 = vpack.c.bf16 %v531_v38, %v528_v33  ;;  %v120_v33 = vld [vmem:[%s9281_s2 + $0x30] sm:$0xff] }
 0x242   :  { %573 = vrot.lane.b32.xlu1 %v6842_v36, %s6380_s8 }
 0x243   :  { %571 = vrot.lane.b32.xlu0 %v6844_v39, %s6380_s8 }
 0x29c   :  { %v562_v47 = vpop.permute.xlu1 %561 }
 0x29d   :  { %v560_v41 = vpop.permute.xlu0 %559  ;;  %v603_v48 = vsel %vm148_vm0, %v562_v47, 0 }
 0x29e   :  { %5719 = vmatprep.subr.msk.bf16.mxu1 %vm148_vm0, %v560_v41  ;;  %v600_v58 = vsel %vm148_vm0, %v560_v41, 0 }
 0x29f   :  { %5272 = vmatpush3.bf16.xpose.msra.mxu1 %v600_v58  ;;  %v123_v58 = vld [vmem:[%s9281_s2 + $0x48] sm:$0xff] }
 0x2a0   :  { %5720 = vmatprep.subr.msk.bf16.mxu1 %vm148_vm0, %v562_v47 }
 0x2a5   :  { %v564_v9 = vpop.permute.xlu1 %563 }
 0x2a6   :  { %v606_v18 = vsel %vm148_vm0, %v564_v9, 0 }
 0x2a7   :  { %5274 = vmatpush3.bf16.xpose.msra.mxu1 %v603_v48 }
 0x2a8   :  { %5721 = vmatprep.subr.msk.bf16.mxu1 %vm148_vm0, %v564_v9  ;;  %v122_v9 = vld [vmem:[%s9281_s2 + $0x40] sm:$0xff] }
 0x2a9   :  { %v566_v50 = vpop.permute.xlu1 %565 }
 0x2aa   :  { %v609_v52 = vsel %vm148_vm0, %v566_v50, 0 }
 0x2ad   :  { %v568_v54 = vpop.permute.xlu0 %567  ;;  %v570_v57 = vpop.permute.xlu1 %569 }
 0x2ae   :  { %v612_v55 = vsel %vm148_vm0, %v568_v54, 0  ;;  %v615_v11 = vsel %vm148_vm0, %v570_v57, 0 }
 0x2af   :  { %5276 = vmatpush3.bf16.xpose.msra.mxu1 %v606_v18 }
 0x2b0   :  { %5722 = vmatprep.subr.msk.bf16.mxu1 %vm148_vm0, %v566_v50 }
 0x2b4   :  { %v574_v60 = vpop.permute.xlu1 %573 }
 0x2b5   :  { %v572_v30 = vpop.permute.xlu0 %571  ;;  %v621_v62 = vsel %vm148_vm0, %v574_v60, 0 }
 0x2b6   :  { %v618_v24 = vsel %vm148_vm0, %v572_v30, 0 }
 0x2b7   :  { %5278 = vmatpush3.bf16.xpose.msra.mxu1 %v609_v52  ;;  %v125_v52 = vld [vmem:[%s9281_s2 + $0x58] sm:$0xff] }
 0x2b8   :  { %5723 = vmatprep.subr.msk.bf16.mxu1 %vm148_vm0, %v568_v54 }
 0x2bf   :  { %5280 = vmatpush3.bf16.xpose.msra.mxu1 %v612_v55  ;;  %v124_v55 = vld [vmem:[%s9281_s2 + $0x50] sm:$0xff] }
 0x2c0   :  { %5724 = vmatprep.subr.msk.bf16.mxu1 %vm148_vm0, %v570_v57 }
 0x2c7   :  { %5282 = vmatpush3.bf16.xpose.msra.mxu1 %v615_v11 }
 0x2c8   :  { %5725 = vmatprep.subr.msk.bf16.mxu1 %vm148_vm0, %v572_v30 }
 0x2cf   :  { %5284 = vmatpush3.bf16.xpose.msra.mxu1 %v618_v24  ;;  %v127_v24 = vld [vmem:[%s9281_s2 + $0x68] sm:$0xff] }
 0x2d0   :  { %5726 = vmatprep.subr.msk.bf16.mxu1 %vm148_vm0, %v574_v60 }
 0x2d7   :  { %5286 = vmatpush3.bf16.xpose.msra.mxu1 %v621_v62 }
 0x2de   :  { %5288 = vmatmul.mubr.msk.bf16.vlgmr.msra.gmra.mrb[0].mxu1 %vm148_vm0, %v6816_v42 }
 0x2df   :  { %5291 = vmatprep.mubr.msk.bf16.mxu1 %vm148_vm0, %v6828_v22 }
 0x2e6   :  { %5292 = vmatmul.mubr.msk.bf16.gmra.mrb[4].mxu1 %vm148_vm0, %v6826_v17 }
 0x2e7   :  { %5295 = vmatprep.mubr.msk.bf16.mxu1 %vm148_vm0, %v6836_v56 }
 0x2ee   :  { %5296 = vmatmul.mubr.msk.bf16.gmra.mrb[8].mxu1 %vm148_vm0, %v6834_v46 }
 0x2ef   :  { %5299 = vmatprep.mubr.msk.bf16.mxu1 %vm148_vm0, %v6844_v39 }
 0x2f6   :  { %5300 = vmatmul.mubr.msk.bf16.gmra.mrb[12].mxu1 %vm148_vm0, %v6842_v36 }
 0x3b1   :  { %v5289_v5 = vpop.f32.mrb[0].mxu1 }
 0x3b2   :  { %v657_v0 = vpop.f32.mrb[1].mxu1  ;;  %v6894_v12 = vadd.f32 %v5289_v5, %v116_v4  ;;  %v128_v4 = vld [vmem:[%s9281_s2 + $0x70] sm:$0xff] }
 0x3b3   :  { %v6886_v26 = vadd.f32 %v657_v0, %v114_v63  ;;  %v5290_v40 = vpop.f32.mrb[2].mxu1  ;;  %v126_v63 = vld [vmem:[%s9281_s2 + $0x60] sm:$0xff] }
 0x3b4   :  { %v660_v32 = vpop.f32.mrb[3].mxu1  ;;  %v6904_v16 = vadd.f32 %v5290_v40, %v117_v14 }
 0x3b5   :  { %v6891_v10 = vadd.f32 %v660_v32, %v115_v2  ;;  %720 = vmax.xlane.f32.xlu0 %v6886_v26  ;;  %v129_v2 = vld [vmem:[%s9281_s2 + $0x78] sm:$0xff] }
 0x3b7   :  { %722 = vmax.xlane.f32.xlu1 %v6891_v10 }
 0x3b9   :  { %v5293_v44 = vpop.f32.mrb[4].mxu1  ;;  %724 = vmax.xlane.f32.xlu0 %v6894_v12 }
 0x3ba   :  { %v673_v49 = vpop.f32.mrb[5].mxu1  ;;  %v6927_v47 = vadd.f32 %v5293_v44, %v120_v33  ;;  %v896_v44 = vld [vmem:[%s9282_s9] sm:$0xff]  ;;  %v901_v33 = vld [vmem:[%s9282_s9 + $0x28] sm:$0xff] }
 0x3bb   :  { %v5294_v20 = vpop.f32.mrb[6].mxu1  ;;  %v6915_v31 = vadd.f32 %v673_v49, %v118_v23  ;;  %v897_v49 = vld [vmem:[%s9282_s9 + $0x8] sm:$0xff]  ;;  %v899_v23 = vld [vmem:[%s9282_s9 + $0x18] sm:$0xff] }
 0x3bc   :  { %v676_v25 = vpop.f32.mrb[7].mxu1  ;;  %v6921_v34 = vadd.f32 %v5294_v20, %v121_v6  ;;  %v5651_v20 = vpack.c.bf16 %v897_v49, %v896_v44  ;;  %v900_v6 = vld [vmem:[%s9282_s9 + $0x20] sm:$0xff] }
 0x3bd   :  { %v6909_v28 = vadd.f32 %v676_v25, %v119_v1  ;;  %726 = vmax.xlane.f32.xlu0 %v6904_v16  ;;  %v898_v1 = vld [vmem:[%s9282_s9 + $0x10] sm:$0xff] }
 0x3be   :  { %v5655_v25 = vpack.c.bf16 %v899_v23, %v898_v1  ;;  %5652 = vmatprep.subr.bf16.mxu0 %v5651_v20 }
 0x3bf   :  { %730 = vmax.xlane.f32.xlu1 %v6909_v28  ;;  %5654 = vmatpush3.bf16.msra.mxu0 %v5651_v20 }
 0x3c0   :  { %5656 = vmatprep.subr.bf16.mxu0 %v5655_v25 }
 0x3c1   :  { %v5297_v38 = vpop.f32.mrb[8].mxu1  ;;  %728 = vmax.xlane.f32.xlu0 %v6915_v31 }
 0x3c2   :  { %v689_v41 = vpop.f32.mrb[9].mxu1  ;;  %v6951_v60 = vadd.f32 %v5297_v38, %v124_v55  ;;  %v5659_v38 = vpack.c.bf16 %v901_v33, %v900_v6 }
 0x3c3   :  { %v5298_v48 = vpop.f32.mrb[10].mxu1  ;;  %734 = vmax.xlane.f32.xlu1 %v6921_v34  ;;  %v6939_v54 = vadd.f32 %v689_v41, %v122_v9  ;;  %v902_v41 = vld [vmem:[%s9282_s9 + $0x30] sm:$0xff]  ;;  %5658 = vmatpush3.bf16.msra.mxu0 %v5655_v25 }
 0x3c4   :  { %v692_v18 = vpop.f32.mrb[11].mxu1  ;;  %v6945_v57 = vadd.f32 %v5298_v48, %v125_v52  ;;  %5660 = vmatprep.subr.bf16.mxu0 %v5659_v38 }
 0x3c5   :  { %v6933_v50 = vadd.f32 %v692_v18, %v123_v58  ;;  %732 = vmax.xlane.f32.xlu0 %v6927_v47  ;;  %v903_v58 = vld [vmem:[%s9282_s9 + $0x38] sm:$0xff] }
 0x3c6   :  { %v5663_v48 = vpack.c.bf16 %v903_v58, %v902_v41 }
 0x3c7   :  { %738 = vmax.xlane.f32.xlu1 %v6933_v50  ;;  %5662 = vmatpush3.bf16.msra.mxu0 %v5659_v38 }
 0x3c8   :  { %5664 = vmatprep.subr.bf16.mxu0 %v5663_v48 }
 0x3c9   :  { %v5301_v11 = vpop.f32.mrb[12].mxu1  ;;  %736 = vmax.xlane.f32.xlu0 %v6939_v54 }
 0x3ca   :  { %v705_v30 = vpop.f32.mrb[13].mxu1  ;;  %v6972_v14 = vadd.f32 %v5301_v11, %v128_v4 }
 0x3cb   :  { %v5302_v62 = vpop.f32.mrb[14].mxu1  ;;  %742 = vmax.xlane.f32.xlu1 %v6945_v57  ;;  %v6963_v40 = vadd.f32 %v705_v30, %v126_v63  ;;  %5666 = vmatpush3.bf16.msra.mxu0 %v5663_v48 }
 0x3cc   :  { %v708_v5 = vpop.f32.mrb[15].mxu1  ;;  %v6969_v32 = vadd.f32 %v5302_v62, %v129_v2 }
 0x3cd   :  { %v6957_v0 = vadd.f32 %v708_v5, %v127_v24  ;;  %740 = vmax.xlane.f32.xlu0 %v6951_v60 }
 0x3cf   :  { %746 = vmax.xlane.f32.xlu1 %v6957_v0 }
 0x3d1   :  { %744 = vmax.xlane.f32.xlu0 %v6963_v40 }
 0x3d3   :  { %750 = vmax.xlane.f32.xlu1 %v6969_v32 }
 0x3d5   :  { %748 = vmax.xlane.f32.xlu0 %v6972_v14 }
 0x442   :  { %v721_v9 = vpop.xlane.xlu0 %720 }
 0x443   :  { %v752_v18 = vsub.f32 %v6886_v26, %v721_v9 }
 0x444   :  { %v723_v52 = vpop.xlane.xlu1 %722 }
 0x445   :  { %v768_v55 = vmul.f32 1.442695, %v752_v18  ;;  %v753_v11 = vsub.f32 %v6891_v10, %v723_v52 }
 0x446   :  { %v725_v30 = vpop.xlane.xlu0 %724 }
 0x447   :  { %5788 = vpow2.f32 %v768_v55  ;;  %v770_v24 = vmul.f32 1.442695, %v753_v11  ;;  %v754_v62 = vsub.f32 %v6894_v12, %v725_v30 }
 0x449   :  { %5790 = vpow2.f32 %v770_v24  ;;  %v772_v63 = vmul.f32 1.442695, %v754_v62 }
 0x44a   :  { %v727_v5 = vpop.xlane.xlu0 %726 }
 0x44b   :  { %5792 = vpow2.f32 %v772_v63  ;;  %v755_v2 = vsub.f32 %v6904_v16, %v727_v5 }
 0x44c   :  { %v731_v4 = vpop.xlane.xlu1 %730 }
 0x44d   :  { %v774_v44 = vmul.f32 1.442695, %v755_v2  ;;  %v757_v49 = vsub.f32 %v6909_v28, %v731_v4 }
 0x44e   :  { %v729_v26 = vpop.xlane.xlu0 %728 }
 0x44f   :  { %5794 = vpow2.f32 %v774_v44  ;;  %v778_v1 = vmul.f32 1.442695, %v757_v49  ;;  %v756_v10 = vsub.f32 %v6915_v31, %v729_v26  ;;  %v904_v49 = vld [vmem:[%s9282_s9 + $0x40] sm:$0xff] }
 0x450   :  { %v735_v20 = vpop.xlane.xlu1 %734 }
 0x451   :  { %v7006_v23 = vpop.eup %5788  ;;  %v776_v25 = vmul.f32 1.442695, %v756_v10  ;;  %v759_v12 = vsub.f32 %v6921_v34, %v735_v20  ;;  %5796 = vpow2.f32 %v778_v1 }
 0x452   :  { %800 = vadd.xlane.f32.xlu0 %v7006_v23  ;;  %v733_v6 = vpop.xlane.xlu0 %732 }
 0x453   :  { %v7010_v16 = vpop.eup %5790  ;;  %5798 = vpow2.f32 %v776_v25  ;;  %v782_v33 = vmul.f32 1.442695, %v759_v12  ;;  %v758_v28 = vsub.f32 %v6927_v47, %v733_v6 }
 0x454   :  { %802 = vadd.xlane.f32.xlu1 %v7010_v16  ;;  %v739_v38 = vpop.xlane.xlu1 %738 }
 0x455   :  { %v7014_v31 = vpop.eup %5792  ;;  %v780_v41 = vmul.f32 1.442695, %v758_v28  ;;  %v761_v58 = vsub.f32 %v6933_v50, %v739_v38  ;;  %5800 = vpow2.f32 %v782_v33  ;;  %v906_v33 = vld [vmem:[%s9282_s9 + $0x50] sm:$0xff] }
 0x456   :  { %804 = vadd.xlane.f32.xlu0 %v7014_v31  ;;  %v737_v34 = vpop.xlane.xlu0 %736 }
 0x457   :  { %5802 = vpow2.f32 %v780_v41  ;;  %v786_v48 = vmul.f32 1.442695, %v761_v58  ;;  %v760_v9 = vsub.f32 %v6939_v54, %v737_v34  ;;  %v908_v58 = vld [vmem:[%s9282_s9 + $0x60] sm:$0xff]  ;;  %v909_v34 = vld [vmem:[%s9282_s9 + $0x68] sm:$0xff] }
 0x458   :  { %v743_v18 = vpop.xlane.xlu1 %742 }
 0x459   :  { %v7019_v52 = vpop.eup %5794  ;;  %v784_v47 = vmul.f32 1.442695, %v760_v9  ;;  %v763_v55 = vsub.f32 %v6945_v57, %v743_v18  ;;  %5804 = vpow2.f32 %v786_v48  ;;  %v5675_v9 = vpack.c.bf16 %v909_v34, %v908_v58  ;;  %v867_v34 = vld [vmem:[%s9283_s4 + $0x18] sm:$0xff] }
 0x45a   :  { %806 = vadd.xlane.f32.xlu1 %v7019_v52  ;;  %v741_v11 = vpop.xlane.xlu0 %740 }
 0x45b   :  { %5806 = vpow2.f32 %v784_v47  ;;  %v790_v50 = vmul.f32 1.442695, %v763_v55  ;;  %v762_v30 = vsub.f32 %v6951_v60, %v741_v11  ;;  %v7024_v24 = vpop.eup %5796  ;;  %v910_v47 = vld [vmem:[%s9282_s9 + $0x70] sm:$0xff]  ;;  %v911_v55 = vld [vmem:[%s9282_s9 + $0x78] sm:$0xff] }
 0x45c   :  { %v747_v62 = vpop.xlane.xlu1 %746 }
 0x45d   :  { %v7026_v63 = vpop.eup %5798  ;;  %v788_v54 = vmul.f32 1.442695, %v762_v30  ;;  %v765_v5 = vsub.f32 %v6957_v0, %v747_v62  ;;  %5808 = vpow2.f32 %v790_v50  ;;  %v905_v0 = vld [vmem:[%s9282_s9 + $0x48] sm:$0xff]  ;;  %v5679_v50 = vpack.c.bf16 %v911_v55, %v910_v47 }
 0x45e   :  { %810 = vadd.xlane.f32.xlu1 %v7024_v24  ;;  %808 = vadd.xlane.f32.xlu0 %v7026_v63  ;;  %v745_v57 = vpop.xlane.xlu0 %744  ;;  %v5667_v20 = vpack.c.bf16 %v905_v0, %v904_v49 }
 0x45f   :  { %5810 = vpow2.f32 %v788_v54  ;;  %v794_v2 = vmul.f32 1.442695, %v765_v5  ;;  %v764_v4 = vsub.f32 %v6963_v40, %v745_v57  ;;  %v7032_v44 = vpop.eup %5800 }
 0x460   :  { %v751_v60 = vpop.xlane.xlu1 %750  ;;  %5668 = vmatprep.subr.bf16.mxu0 %v5667_v20 }
 0x461   :  { %v7040_v26 = vpop.eup %5802  ;;  %v792_v1 = vmul.f32 1.442695, %v764_v4  ;;  %v767_v10 = vsub.f32 %v6969_v32, %v751_v60  ;;  %5812 = vpow2.f32 %v794_v2  ;;  %5670 = vmatpush3.bf16.msra.mxu0 %v5667_v20  ;;  %v907_v32 = vld [vmem:[%s9282_s9 + $0x58] sm:$0xff]  ;;  %v864_v60 = vld [vmem:[%s9283_s4] sm:$0xff]  ;;  %v865_v20 = vld [vmem:[%s9283_s4 + $0x8] sm:$0xff] }
 0x462   :  { %814 = vadd.xlane.f32.xlu1 %v7032_v44  ;;  %812 = vadd.xlane.f32.xlu0 %v7040_v26  ;;  %v749_v40 = vpop.xlane.xlu0 %748  ;;  %v5671_v41 = vpack.c.bf16 %v907_v32, %v906_v33  ;;  %v866_v33 = vld [vmem:[%s9283_s4 + $0x10] sm:$0xff] }
 0x463   :  { %5814 = vpow2.f32 %v792_v1  ;;  %v798_v25 = vmul.f32 1.442695, %v767_v10  ;;  %v766_v12 = vsub.f32 %v6972_v14, %v749_v40  ;;  %v7046_v6 = vpop.eup %5804 }
 0x464   :  { %5672 = vmatprep.subr.bf16.mxu0 %v5671_v41 }
 0x465   :  { %v7054_v28 = vpop.eup %5806  ;;  %v796_v38 = vmul.f32 1.442695, %v766_v12  ;;  %5816 = vpow2.f32 %v798_v25  ;;  %5674 = vmatpush3.bf16.msra.mxu0 %v5671_v41 }
 0x466   :  { %818 = vadd.xlane.f32.xlu1 %v7046_v6  ;;  %816 = vadd.xlane.f32.xlu0 %v7054_v28 }
 0x467   :  { %5818 = vpow2.f32 %v796_v38  ;;  %v7058_v14 = vpop.eup %5808  ;;  %5676 = vmatprep.subr.bf16.mxu0 %v5675_v9 }
 0x469   :  { %v7066_v48 = vpop.eup %5810  ;;  %5678 = vmatpush3.bf16.msra.mxu0 %v5675_v9 }
 0x46a   :  { %822 = vadd.xlane.f32.xlu1 %v7058_v14  ;;  %820 = vadd.xlane.f32.xlu0 %v7066_v48 }
 0x46b   :  { %v7070_v18 = vpop.eup %5812  ;;  %5680 = vmatprep.subr.bf16.mxu0 %v5679_v50 }
 0x46d   :  { %v7078_v11 = vpop.eup %5814  ;;  %5682 = vmatpush3.bf16.msra.mxu0 %v5679_v50 }
 0x46e   :  { %826 = vadd.xlane.f32.xlu1 %v7070_v18  ;;  %824 = vadd.xlane.f32.xlu0 %v7078_v11 }
 0x46f   :  { %v7082_v30 = vpop.eup %5816 }
 0x471   :  { %v7084_v62 = vpop.eup %5818 }
 0x472   :  { %830 = vadd.xlane.f32.xlu1 %v7082_v30  ;;  %828 = vadd.xlane.f32.xlu0 %v7084_v62 }
 0x4df   :  { %v801_v54 = vpop.xlane.xlu0 %800 }
 0x4e0   :  { %5820 = vrcp.f32 %v801_v54  ;;  %v869_v54 = vld [vmem:[%s9283_s4 + $0x28] sm:$0xff] }
 0x4e1   :  { %v803_v5 = vpop.xlane.xlu1 %802 }
 0x4e2   :  { %5822 = vrcp.f32 %v803_v5 }
 0x4e3   :  { %v805_v57 = vpop.xlane.xlu0 %804 }
 0x4e4   :  { %5824 = vrcp.f32 %v805_v57 }
 0x4e7   :  { %v807_v2 = vpop.xlane.xlu1 %806 }
 0x4e8   :  { %5826 = vrcp.f32 %v807_v2 }
 0x4ea   :  { %v5821_v4 = vpop.eup %5820 }
 0x4eb   :  { %v811_v49 = vpop.xlane.xlu1 %810  ;;  %v809_v0 = vpop.xlane.xlu0 %808  ;;  %v7092_v1 = vmul.f32 %v5821_v4, %v7006_v23  ;;  %v868_v4 = vld [vmem:[%s9283_s4 + $0x20] sm:$0xff] }
 0x4ec   :  { %v5823_v10 = vpop.eup %5822  ;;  %5828 = vrcp.f32 %v811_v49 }
 0x4ed   :  { %v7098_v40 = vmul.f32 %v5823_v10, %v7010_v16  ;;  %5830 = vrcp.f32 %v809_v0  ;;  %v880_v25 = vadd.f32 %v864_v60, %v7092_v1 }
 0x4ee   :  { %v5825_v12 = vpop.eup %5824 }
 0x4ef   :  { %v815_v32 = vpop.xlane.xlu1 %814  ;;  %5335 = vmatprep.mubr.f32.mxu0 %v880_v25  ;;  %v813_v23 = vpop.xlane.xlu0 %812  ;;  %v881_v38 = vadd.f32 %v865_v20, %v7098_v40  ;;  %v7106_v41 = vmul.f32 %v5825_v12, %v7014_v31  ;;  %v871_v20 = vld [vmem:[%s9283_s4 + $0x38] sm:$0xff] }
 0x4f0   :  { %5832 = vrcp.f32 %v815_v32 }
 0x4f1   :  { %5834 = vrcp.f32 %v813_v23  ;;  %5336 = vmatmul.mubr.f32.vlgmr.msra.gmra.mrb[16].mxu0 %v881_v38  ;;  %v882_v16 = vadd.f32 %v866_v33, %v7106_v41 }
 0x4f2   :  { %v5827_v58 = vpop.eup %5826 }
 0x4f3   :  { %v819_v9 = vpop.xlane.xlu1 %818  ;;  %5338 = vmatprep.mubr.f32.mxu0 %v882_v16  ;;  %v817_v47 = vpop.xlane.xlu0 %816  ;;  %v7113_v55 = vmul.f32 %v5827_v58, %v7019_v52  ;;  %v873_v58 = vld [vmem:[%s9283_s4 + $0x48] sm:$0xff] }
 0x4f4   :  { %5836 = vrcp.f32 %v819_v9 }
 0x4f5   :  { %5838 = vrcp.f32 %v817_v47  ;;  %v883_v31 = vadd.f32 %v867_v34, %v7113_v55  ;;  %v872_v47 = vld [vmem:[%s9283_s4 + $0x40] sm:$0xff] }
 0x4f6   :  { %v5829_v50 = vpop.eup %5828 }
 0x4f7   :  { %v5831_v5 = vpop.eup %5830  ;;  %v823_v57 = vpop.xlane.xlu1 %822  ;;  %5339 = vmatmul.mubr.f32.gmra.mrb[18].mxu0 %v883_v31  ;;  %v7123_v52 = vmul.f32 %v5829_v50, %v7024_v24  ;;  %v870_v24 = vld [vmem:[%s9283_s4 + $0x30] sm:$0xff] }
 0x4f8   :  { %v821_v2 = vpop.xlane.xlu0 %820  ;;  %5840 = vrcp.f32 %v823_v57  ;;  %v7126_v60 = vmul.f32 %v5831_v5, %v7026_v63  ;;  %v875_v57 = vld [vmem:[%s9283_s4 + $0x58] sm:$0xff] }
 0x4f9   :  { %5842 = vrcp.f32 %v821_v2  ;;  %v885_v49 = vadd.f32 %v869_v54, %v7123_v52 }
 0x4fa   :  { %v5833_v0 = vpop.eup %5832  ;;  %v884_v10 = vadd.f32 %v868_v4, %v7126_v60 }
 0x4fb   :  { %v5835_v25 = vpop.eup %5834  ;;  %v827_v12 = vpop.xlane.xlu1 %826  ;;  %v7137_v63 = vmul.f32 %v5833_v0, %v7032_v44 }
 0x4fc   :  { %v825_v33 = vpop.xlane.xlu0 %824  ;;  %5844 = vrcp.f32 %v827_v12  ;;  %5341 = vmatprep.mubr.f32.mxu0 %v884_v10  ;;  %v7140_v32 = vmul.f32 %v5835_v25, %v7040_v26 }
 0x4fd   :  { %5846 = vrcp.f32 %v825_v33  ;;  %5342 = vmatmul.mubr.f32.gmra.mrb[20].mxu0 %v885_v49  ;;  %v887_v23 = vadd.f32 %v871_v20, %v7137_v63  ;;  %v877_v20 = vld [vmem:[%s9283_s4 + $0x68] sm:$0xff] }
 0x4fe   :  { %v5837_v38 = vpop.eup %5836  ;;  %v886_v16 = vadd.f32 %v870_v24, %v7140_v32 }
 0x4ff   :  { %v5839_v34 = vpop.eup %5838  ;;  %v831_v9 = vpop.xlane.xlu1 %830  ;;  %v7151_v26 = vmul.f32 %v5837_v38, %v7046_v6  ;;  %v874_v6 = vld [vmem:[%s9283_s4 + $0x50] sm:$0xff]  ;;  %v879_v38 = vld [vmem:[%s9283_s4 + $0x78] sm:$0xff] }
 0x500   :  { %v829_v44 = vpop.xlane.xlu0 %828  ;;  %5848 = vrcp.f32 %v831_v9  ;;  %5344 = vmatprep.mubr.f32.mxu0 %v886_v16  ;;  %v7154_v31 = vmul.f32 %v5839_v34, %v7054_v28 }
 0x501   :  { %5850 = vrcp.f32 %v829_v44  ;;  %5345 = vmatmul.mubr.f32.gmra.mrb[22].mxu0 %v887_v23  ;;  %v889_v50 = vadd.f32 %v873_v58, %v7151_v26  ;;  %v913_v44 = vld [vmem:[%s9284_s5 + $0x8] sm:$0xff] }
 0x502   :  { %v5841_v54 = vpop.eup %5840  ;;  %v888_v5 = vadd.f32 %v872_v47, %v7154_v31 }
 0x503   :  { %v5843_v2 = vpop.eup %5842  ;;  %v7165_v4 = vmul.f32 %v5841_v54, %v7058_v14  ;;  %v876_v14 = vld [vmem:[%s9283_s4 + $0x60] sm:$0xff] }
 0x504   :  { %5347 = vmatprep.mubr.f32.mxu0 %v888_v5  ;;  %v7168_v28 = vmul.f32 %v5843_v2, %v7066_v48  ;;  %v7209_v5 = vld [vmem:[%s9285_s10] ss:$0 sm:$0xff] }
 0x505   :  { %5348 = vmatmul.mubr.f32.gmra.mrb[24].mxu0 %v889_v50  ;;  %v891_v49 = vadd.f32 %v875_v57, %v7165_v4 }
 0x506   :  { %v5845_v0 = vpop.eup %5844  ;;  %v890_v10 = vadd.f32 %v874_v6, %v7168_v28  ;;  %v915_v6 = vld [vmem:[%s9284_s5 + $0x18] sm:$0xff] }
 0x507   :  { %v5847_v25 = vpop.eup %5846  ;;  %v7179_v12 = vmul.f32 %v5845_v0, %v7070_v18  ;;  %v878_v18 = vld [vmem:[%s9283_s4 + $0x70] sm:$0xff] }
 0x508   :  { %5350 = vmatprep.mubr.f32.mxu0 %v890_v10  ;;  %v7182_v48 = vmul.f32 %v5847_v25, %v7078_v11  ;;  %v914_v0 = vld [vmem:[%s9284_s5 + $0x10] sm:$0xff] }
 0x509   :  { %5351 = vmatmul.mubr.f32.gmra.mrb[26].mxu0 %v891_v49  ;;  %v893_v33 = vadd.f32 %v877_v20, %v7179_v12 }
 0x50a   :  { %v5849_v24 = vpop.eup %5848  ;;  %v892_v23 = vadd.f32 %v876_v14, %v7182_v48 }
 0x50b   :  { %v5851_v16 = vpop.eup %5850  ;;  %v7193_v58 = vmul.f32 %v5849_v24, %v7082_v30  ;;  %v912_v30 = vld [vmem:[%s9284_s5] sm:$0xff] }
 0x50c   :  { %5353 = vmatprep.mubr.f32.mxu0 %v892_v23  ;;  %v7196_v11 = vmul.f32 %v5851_v16, %v7084_v62  ;;  %v916_v16 = vld [vmem:[%s9284_s5 + $0x20] sm:$0xff] }
 0x50d   :  { %5354 = vmatmul.mubr.f32.gmra.mrb[28].mxu0 %v893_v33  ;;  %v895_v34 = vadd.f32 %v879_v38, %v7193_v58  ;;  %v917_v38 = vld [vmem:[%s9284_s5 + $0x28] sm:$0xff] }
 0x50e   :  { %v894_v9 = vadd.f32 %v878_v18, %v7196_v11 }
 0x510   :  { %5356 = vmatprep.mubr.f32.mxu0 %v894_v9 }
 0x511   :  { %5357 = vmatmul.mubr.f32.gmra.mrb[30].mxu0 %v895_v34 }
 0x5c4   :  { %v5337_v47 = vpop.f32.mrb[16].mxu0 }
 0x5c5   :  { %v1000_v50 = vadd.f32 %v5337_v47, %v913_v44  ;;  %v994_v54 = vpop.f32.mrb[17].mxu0 }
 0x5c6   :  { %v995_v62 = vadd.f32 %v994_v54, %v912_v30 }
 0x5c7   :  { %v1074_v57 = vmax.f32 %v1000_v50, 0.0  ;;  %v919_v50 = vld [vmem:[%s9284_s5 + $0x38] sm:$0xff] }
 0x5c8   :  { %v1073_v2 = vmax.f32 %v995_v62, 0.0  ;;  %v918_v62 = vld [vmem:[%s9284_s5 + $0x30] sm:$0xff] }
 0x5c9   :  { %v1097_v49 = vmul.f32 %v7209_v5, %v1074_v57 }
 0x5ca   :  { %v5340_v10 = vpop.f32.mrb[18].mxu0  ;;  %v1096_v20 = vmul.f32 %v7209_v5, %v1073_v2 }
 0x5cb   :  { %v1010_v25 = vadd.f32 %v5340_v10, %v915_v6  ;;  %1114 = vadd.xlane.f32.xlu1 %v1097_v49  ;;  %v1004_v14 = vpop.f32.mrb[19].mxu0 }
 0x5cc   :  { %v1005_v33 = vadd.f32 %v1004_v14, %v914_v0  ;;  %1112 = vadd.xlane.f32.xlu0 %v1096_v20 }
 0x5cd   :  { %v1076_v24 = vmax.f32 %v1010_v25, 0.0  ;;  %v921_v25 = vld [vmem:[%s9284_s5 + $0x48] sm:$0xff] }
 0x5ce   :  { %v1075_v23 = vmax.f32 %v1005_v33, 0.0  ;;  %v920_v33 = vld [vmem:[%s9284_s5 + $0x40] sm:$0xff] }
 0x5cf   :  { %v1099_v18 = vmul.f32 %v7209_v5, %v1076_v24 }
 0x5d0   :  { %v5343_v34 = vpop.f32.mrb[20].mxu0  ;;  %v1098_v9 = vmul.f32 %v7209_v5, %v1075_v23 }
 0x5d1   :  { %v1020_v44 = vadd.f32 %v5343_v34, %v917_v38  ;;  %v1014_v30 = vpop.f32.mrb[21].mxu0  ;;  %1118 = vadd.xlane.f32.xlu1 %v1099_v18 }
 0x5d2   :  { %v1015_v47 = vadd.f32 %v1014_v30, %v916_v16  ;;  %1116 = vadd.xlane.f32.xlu0 %v1098_v9 }
 0x5d3   :  { %v1078_v54 = vmax.f32 %v1020_v44, 0.0  ;;  %v923_v44 = vld [vmem:[%s9284_s5 + $0x58] sm:$0xff] }
 0x5d4   :  { %v1077_v57 = vmax.f32 %v1015_v47, 0.0  ;;  %v5346_v2 = vpop.f32.mrb[22].mxu0  ;;  %v922_v47 = vld [vmem:[%s9284_s5 + $0x50] sm:$0xff] }
 0x5d5   :  { %v1030_v6 = vadd.f32 %v5346_v2, %v919_v50  ;;  %v1024_v49 = vpop.f32.mrb[23].mxu0  ;;  %v1101_v0 = vmul.f32 %v7209_v5, %v1078_v54 }
 0x5d6   :  { %v1025_v10 = vadd.f32 %v1024_v49, %v918_v62  ;;  %v1100_v20 = vmul.f32 %v7209_v5, %v1077_v57 }
 0x5d7   :  { %v1080_v14 = vmax.f32 %v1030_v6, 0.0  ;;  %1122 = vadd.xlane.f32.xlu1 %v1101_v0  ;;  %v925_v0 = vld [vmem:[%s9284_s5 + $0x68] sm:$0xff] }
 0x5d8   :  { %v1079_v24 = vmax.f32 %v1025_v10, 0.0  ;;  %1120 = vadd.xlane.f32.xlu0 %v1100_v20  ;;  %v5349_v23 = vpop.f32.mrb[24].mxu0  ;;  %v924_v20 = vld [vmem:[%s9284_s5 + $0x60] sm:$0xff] }
 0x5d9   :  { %v1040_v38 = vadd.f32 %v5349_v23, %v921_v25  ;;  %v1034_v16 = vpop.f32.mrb[25].mxu0  ;;  %v1103_v18 = vmul.f32 %v7209_v5, %v1080_v14 }
 0x5da   :  { %v1035_v34 = vadd.f32 %v1034_v16, %v920_v33  ;;  %v1102_v9 = vmul.f32 %v7209_v5, %v1079_v24 }
 0x5db   :  { %v1082_v30 = vmax.f32 %v1040_v38, 0.0  ;;  %1126 = vadd.xlane.f32.xlu1 %v1103_v18  ;;  %v927_v18 = vld [vmem:[%s9284_s5 + $0x78] sm:$0xff] }
 0x5dc   :  { %v1081_v50 = vmax.f32 %v1035_v34, 0.0  ;;  %1124 = vadd.xlane.f32.xlu0 %v1102_v9  ;;  %v5352_v54 = vpop.f32.mrb[26].mxu0  ;;  %v926_v9 = vld [vmem:[%s9284_s5 + $0x70] sm:$0xff] }
 0x5dd   :  { %v1050_v62 = vadd.f32 %v5352_v54, %v923_v44  ;;  %v1044_v57 = vpop.f32.mrb[27].mxu0  ;;  %v1105_v2 = vmul.f32 %v7209_v5, %v1082_v30 }
 0x5de   :  { %v1045_v6 = vadd.f32 %v1044_v57, %v922_v47  ;;  %v1104_v49 = vmul.f32 %v7209_v5, %v1081_v50 }
 0x5df   :  { %v1084_v10 = vmax.f32 %v1050_v62, 0.0  ;;  %1130 = vadd.xlane.f32.xlu1 %v1105_v2 }
 0x5e0   :  { %v1083_v25 = vmax.f32 %v1045_v6, 0.0  ;;  %1128 = vadd.xlane.f32.xlu0 %v1104_v49  ;;  %v5355_v14 = vpop.f32.mrb[28].mxu0 }
 0x5e1   :  { %v1060_v33 = vadd.f32 %v5355_v14, %v925_v0  ;;  %v1054_v24 = vpop.f32.mrb[29].mxu0  ;;  %v1107_v23 = vmul.f32 %v7209_v5, %v1084_v10  ;;  %v6381_v10 = vmov 0  }
 0x5e2   :  { %v1055_v38 = vadd.f32 %v1054_v24, %v924_v20  ;;  %v1106_v16 = vmul.f32 %v7209_v5, %v1083_v25  ;;  %5739 = vset.pattern.permute.xlu1 %v6381_v10  ;;  %5738 = vset.pattern.permute.xlu0 %v6381_v10  ;;  %v7272_v20 = vld [vmem:[%s9286_s11] ss:$0 sm:$0xff] }
 0x5e3   :  { %v1086_v34 = vmax.f32 %v1060_v33, 0.0  ;;  %1134 = vadd.xlane.f32.xlu1 %v1107_v23 }
 0x5e4   :  { %v1085_v44 = vmax.f32 %v1055_v38, 0.0  ;;  %1132 = vadd.xlane.f32.xlu0 %v1106_v16  ;;  %v5358_v30 = vpop.f32.mrb[30].mxu0 }
 0x5e5   :  { %v1070_v47 = vadd.f32 %v5358_v30, %v927_v18  ;;  %v1064_v50 = vpop.f32.mrb[31].mxu0  ;;  %v1109_v54 = vmul.f32 %v7209_v5, %v1086_v34 }
 0x5e6   :  { %v1065_v62 = vadd.f32 %v1064_v50, %v926_v9  ;;  %v1108_v57 = vmul.f32 %v7209_v5, %v1085_v44 }
 0x5e7   :  { %v1088_v2 = vmax.f32 %v1070_v47, 0.0  ;;  %1138 = vadd.xlane.f32.xlu1 %v1109_v54 }
 0x5e8   :  { %v1087_v6 = vmax.f32 %v1065_v62, 0.0  ;;  %1136 = vadd.xlane.f32.xlu0 %v1108_v57 }
 0x5e9   :  { %v1111_v49 = vmul.f32 %v7209_v5, %v1088_v2 }
 0x5ea   :  { %v1110_v0 = vmul.f32 %v7209_v5, %v1087_v6 }
 0x5eb   :  { %1142 = vadd.xlane.f32.xlu1 %v1111_v49 }
 0x5ec   :  { %1140 = vadd.xlane.f32.xlu0 %v1110_v0 }
 0x658   :  { %v1115_v25 = vpop.xlane.xlu1 %1114 }
 0x659   :  { %v1150_v14 = vadd.f32 %v7272_v20, %v1115_v25  ;;  %v1113_v33 = vpop.xlane.xlu0 %1112 }
 0x65a   :  { %v1149_v24 = vadd.f32 %v7272_v20, %v1113_v33 }
 0x65b   :  { %v1166_v23 = vmul.f32 2.0, %v1150_v14 }
 0x65c   :  { %v1165_v38 = vmul.f32 2.0, %v1149_v24 }
 0x65d   :  { %v1182_v16 = vmul.f32 %v1166_v23, %v1150_v14 }
 0x65e   :  { %v1181_v5 = vmul.f32 %v1165_v38, %v1149_v24  ;;  %v1119_v18 = vpop.xlane.xlu1 %1118 }
 0x65f   :  { %v1198_v34 = vadd.f32 1e-06, %v1182_v16  ;;  %v1152_v9 = vadd.f32 %v7272_v20, %v1119_v18  ;;  %v1117_v44 = vpop.xlane.xlu0 %1116 }
 0x660   :  { %v1197_v30 = vadd.f32 1e-06, %v1181_v5  ;;  %v1151_v47 = vadd.f32 %v7272_v20, %v1117_v44 }
 0x661   :  { %5852 = vrcp.f32 %v1198_v34  ;;  %v1168_v50 = vmul.f32 2.0, %v1152_v9 }
 0x662   :  { %5854 = vrcp.f32 %v1197_v30  ;;  %v1167_v54 = vmul.f32 2.0, %v1151_v47 }
 0x663   :  { %v1184_v62 = vmul.f32 %v1168_v50, %v1152_v9 }
 0x664   :  { %v1123_v57 = vpop.xlane.xlu1 %1122  ;;  %v1183_v6 = vmul.f32 %v1167_v54, %v1151_v47 }
 0x665   :  { %v1200_v2 = vadd.f32 1e-06, %v1184_v62  ;;  %v1154_v49 = vadd.f32 %v7272_v20, %v1123_v57  ;;  %v1121_v0 = vpop.xlane.xlu0 %1120 }
 0x666   :  { %v1153_v10 = vadd.f32 %v7272_v20, %v1121_v0  ;;  %v1199_v24 = vadd.f32 1e-06, %v1183_v6 }
 0x667   :  { %v1170_v25 = vmul.f32 2.0, %v1154_v49  ;;  %5856 = vrcp.f32 %v1200_v2 }
 0x668   :  { %v1169_v14 = vmul.f32 2.0, %v1153_v10  ;;  %v1127_v33 = vpop.xlane.xlu1 %1126  ;;  %5858 = vrcp.f32 %v1199_v24 }
 0x669   :  { %v1186_v23 = vmul.f32 %v1170_v25, %v1154_v49  ;;  %v1156_v38 = vadd.f32 %v7272_v20, %v1127_v33  ;;  %v1125_v16 = vpop.xlane.xlu0 %1124 }
 0x66a   :  { %v1185_v18 = vmul.f32 %v1169_v14, %v1153_v10  ;;  %v1155_v44 = vadd.f32 %v7272_v20, %v1125_v16 }
 0x66b   :  { %v5853_v5 = vpop.eup %5852  ;;  %v1172_v9 = vmul.f32 2.0, %v1156_v38  ;;  %v1202_v47 = vadd.f32 1e-06, %v1186_v23 }
 0x66c   :  { %v5855_v34 = vpop.eup %5854  ;;  %v1131_v30 = vpop.xlane.xlu1 %1130  ;;  %1252 = vperm.xlu1 %5739, %v5853_v5   ;;  %v1201_v62 = vadd.f32 1e-06, %v1185_v18  ;;  %v1171_v6 = vmul.f32 2.0, %v1155_v44 }
 0x66d   :  { %v1158_v50 = vadd.f32 %v7272_v20, %v1131_v30  ;;  %v1129_v54 = vpop.xlane.xlu0 %1128  ;;  %1247 = vperm.xlu0 %5738, %v5855_v34   ;;  %v1188_v2 = vmul.f32 %v1172_v9, %v1156_v38  ;;  %5860 = vrcp.f32 %v1202_v47 }
 0x66e   :  { %v1157_v49 = vadd.f32 %v7272_v20, %v1129_v54  ;;  %5862 = vrcp.f32 %v1201_v62  ;;  %v1187_v16 = vmul.f32 %v1171_v6, %v1155_v44 }
 0x66f   :  { %v1174_v57 = vmul.f32 2.0, %v1158_v50  ;;  %v1204_v38 = vadd.f32 1e-06, %v1188_v2 }
 0x670   :  { %v1135_v0 = vpop.xlane.xlu1 %1134  ;;  %1559 = vrot.lane.b32.xlu1 %v6816_v42, %s6382_s25  ;;  %v1173_v5 = vmul.f32 2.0, %v1157_v49  ;;  %v1203_v54 = vadd.f32 1e-06, %v1187_v16 }
 0x671   :  { %v1190_v10 = vmul.f32 %v1174_v57, %v1158_v50  ;;  %v1160_v25 = vadd.f32 %v7272_v20, %v1135_v0  ;;  %v1133_v14 = vpop.xlane.xlu0 %1132  ;;  %1557 = vrot.lane.b32.xlu0 %v6818_v15, %s6382_s25  ;;  %v5857_v33 = vpop.eup %5856 }
 0x672   :  { %v1159_v18 = vadd.f32 %v7272_v20, %v1133_v14  ;;  %v5859_v15 = vpop.eup %5858  ;;  %v1189_v62 = vmul.f32 %v1173_v5, %v1157_v49 }
 0x673   :  { %v1206_v24 = vadd.f32 1e-06, %v1190_v10  ;;  %v1176_v23 = vmul.f32 2.0, %v1160_v25 }
 0x674   :  { %v1139_v34 = vpop.xlane.xlu1 %1138  ;;  %1262 = vperm.xlu1 %5739, %v5857_v33   ;;  %v1175_v44 = vmul.f32 2.0, %v1159_v18  ;;  %v1205_v33 = vadd.f32 1e-06, %v1189_v62 }
 0x675   :  { %5864 = vrcp.f32 %v1206_v24  ;;  %v1192_v42 = vmul.f32 %v1176_v23, %v1160_v25  ;;  %v1162_v9 = vadd.f32 %v7272_v20, %v1139_v34  ;;  %v1137_v30 = vpop.xlane.xlu0 %1136  ;;  %1561 = vrot.lane.b32.xlu0 %v6828_v22, %s6382_s25 }
 0x676   :  { %5866 = vrcp.f32 %v1204_v38  ;;  %v1161_v6 = vadd.f32 %v7272_v20, %v1137_v30  ;;  %v1191_v24 = vmul.f32 %v1175_v44, %v1159_v18 }
 0x677   :  { %v1208_v47 = vadd.f32 1e-06, %v1192_v42  ;;  %v1178_v50 = vmul.f32 2.0, %v1162_v9  ;;  %v5861_v22 = vpop.eup %5860 }
 0x678   :  { %v1143_v57 = vpop.xlane.xlu1 %1142  ;;  %1257 = vperm.xlu1 %5739, %v5859_v15   ;;  %v5863_v49 = vpop.eup %5862  ;;  %v1177_v23 = vmul.f32 2.0, %v1161_v6 }
 0x679   :  { %5868 = vrcp.f32 %v1208_v47  ;;  %v1194_v2 = vmul.f32 %v1178_v50, %v1162_v9  ;;  %v1164_v0 = vadd.f32 %v7272_v20, %v1143_v57  ;;  %1563 = vrot.lane.b32.xlu0 %v6826_v17, %s6382_s25  ;;  %v1141_v10 = vpop.xlane.xlu0 %1140  ;;  %v1207_v17 = vadd.f32 1e-06, %v1191_v24 }
 0x67a   :  { %5870 = vrcp.f32 %v1203_v54  ;;  %v1163_v16 = vadd.f32 %v7272_v20, %v1141_v10  ;;  %v1193_v42 = vmul.f32 %v1177_v23, %v1161_v6  ;;  %v7306_v10 = vld [vmem:[%s9287_s3] sm:$0xff]  ;;  %v7317_v23 = vld [vmem:[%s9287_s3 + $0x18] sm:$0xff] }
 0x67b   :  { %v1210_v25 = vadd.f32 1e-06, %v1194_v2  ;;  %v1180_v14 = vmul.f32 2.0, %v1164_v0 }
 0x67c   :  { %1272 = vperm.xlu1 %5739, %v5861_v22   ;;  %v1179_v9 = vmul.f32 2.0, %v1163_v16  ;;  %v1209_v18 = vadd.f32 1e-06, %v1193_v42  ;;  %v7323_v42 = vld [vmem:[%s9287_s3 + $0x10] sm:$0xff] }
 0x67d   :  { %5872 = vrcp.f32 %v1210_v25  ;;  %v1196_v38 = vmul.f32 %v1180_v14, %v1164_v0  ;;  %v7301_v0 = vld [vmem:[%s9287_s3 + $0x8] sm:$0xff]  ;;  %v9310_v25 = vsub.f32 0.0, %v7306_v10 }
 0x67e   :  { %5874 = vrcp.f32 %v1205_v33  ;;  %v1195_v47 = vmul.f32 %v1179_v9, %v1163_v16  ;;  %v9311_v22 = vsub.f32 0.0, %v7301_v0 }
 0x67f   :  { %v5865_v5 = vpop.eup %5864  ;;  %v1212_v34 = vadd.f32 1e-06, %v1196_v38 }
 0x680   :  { %1292 = vperm.xlu0 %5738, %v5865_v5   ;;  %1267 = vperm.xlu1 %5739, %v5863_v49   ;;  %v5867_v30 = vpop.eup %5866  ;;  %v1211_v20 = vadd.f32 1e-06, %v1195_v47  ;;  %v7331_v47 = vld [vmem:[%s9287_s3 + $0x28] sm:$0xff] }
 0x681   :  { %5876 = vrcp.f32 %v1212_v34 }
 0x682   :  { %5878 = vrcp.f32 %v1207_v17  ;;  %v9307_v17 = vsub.f32 0.0, %v7317_v23 }
 0x683   :  { %v5869_v15 = vpop.eup %5868  ;;  %5880 = vrcp.f32 %v1209_v18  ;;  %v9306_v18 = vsub.f32 0.0, %v7323_v42 }
 0x684   :  { %1302 = vperm.xlu0 %5738, %v5869_v15   ;;  %1282 = vperm.xlu1 %5739, %v5867_v30   ;;  %v5871_v50 = vpop.eup %5870  ;;  %5882 = vrcp.f32 %v1211_v20 }
 0x687   :  { %v5873_v54 = vpop.eup %5872 }
 0x688   :  { %1312 = vperm.xlu0 %5738, %v5873_v54   ;;  %1277 = vperm.xlu1 %5739, %v5871_v50   ;;  %v5875_v62 = vpop.eup %5874 }
 0x68b   :  { %v5877_v44 = vpop.eup %5876 }
 0x68c   :  { %1322 = vperm.xlu0 %5738, %v5877_v44   ;;  %1287 = vperm.xlu1 %5739, %v5875_v62   ;;  %v5879_v57 = vpop.eup %5878  ;;  %v9305_v62 = vsub.f32 0.0, %v7331_v47  ;;  %v7339_v44 = vld [vmem:[%s9287_s3 + $0x48] sm:$0xff] }
 0x68d   :  { %v5881_v2 = vpop.eup %5880 }
 0x68e   :  { %v5883_v6 = vpop.eup %5882 }
 0x690   :  { %1297 = vperm.xlu1 %5739, %v5879_v57   ;;  %v7344_v57 = vld [vmem:[%s9287_s3 + $0x20] sm:$0xff] }
 0x694   :  { %1307 = vperm.xlu1 %5739, %v5881_v2  }
 0x698   :  { %1317 = vperm.xlu1 %5739, %v5883_v6  }
 0x6eb   :  { %v1253_v14 = vpop.permute.xlu1 %1252 }
 0x6ec   :  { %v1326_v33 = vmul.f32 %v1253_v14, %v9311_v22  ;;  %v1248_v24 = vpop.permute.xlu0 %1247  ;;  %v6335_v22 = vld [vmem:[%s9281_s2 + $0x10] sm:$0xff] }
 0x6ed   :  { %v1325_v49 = vmul.f32 %v1248_v24, %v9310_v25 }
 0x6ee   :  { %v1343_v38 = vmul.f32 1.442695, %v1326_v33 }
 0x6ef   :  { %v1341_v16 = vmul.f32 1.442695, %v1325_v49  ;;  %v1560_v5 = vpop.permute.xlu1 %1559  ;;  %v9303_v49 = vsub.f32 0.0, %v7339_v44 }
 0x6f0   :  { %5884 = vpow2.f32 %v1343_v38  ;;  %v1558_v34 = vpop.permute.xlu0 %1557 }
 0x6f1   :  { %5886 = vpow2.f32 %v1341_v16  ;;  %5359 = vmatprep.subr.bf16.mxu0 %v1558_v34 }
 0x6f2   :  { %5360 = vmatpush3.bf16.msra.mxu0 %v1558_v34 }
 0x6f3   :  { %v1263_v9 = vpop.permute.xlu1 %1262  ;;  %5361 = vmatprep.subr.bf16.mxu0 %v1560_v5 }
 0x6f4   :  { %v1328_v30 = vmul.f32 %v1263_v9, %v9307_v17  ;;  %v1562_v15 = vpop.permute.xlu0 %1561  ;;  %v7355_v9 = vld [vmem:[%s9287_s3 + $0x58] sm:$0xff]  ;;  %v7400_v17 = vld [vmem:[%s9287_s3 + $0x40] sm:$0xff] }
 0x6f5   :  { %9344 = vst [vmem:[#allocation2_spill] sm:$0xff] %v7355_v9 }
 0x6f6   :  { %v1347_v50 = vmul.f32 1.442695, %v1328_v30  ;;  %5362 = vmatpush3.bf16.msra.mxu0 %v1560_v5  ;;  %v9304_v5 = vsub.f32 0.0, %v7344_v57  ;;  %v6332_v30 = vld [vmem:[%s9281_s2 + $0x8] sm:$0xff] }
 0x6f7   :  { %v1258_v54 = vpop.permute.xlu1 %1257  ;;  %5363 = vmatprep.subr.bf16.mxu0 %v1562_v15 }
 0x6f8   :  { %5888 = vpow2.f32 %v1347_v50  ;;  %v1327_v20 = vmul.f32 %v1258_v54, %v9306_v18  ;;  %v1564_v14 = vpop.permute.xlu0 %1563 }
 0x6fa   :  { %v5885_v2 = vpop.eup %5884  ;;  %v1345_v6 = vmul.f32 1.442695, %v1327_v20  ;;  %5364 = vmatpush3.bf16.msra.mxu0 %v1562_v15 }
 0x6fb   :  { %v5887_v33 = vpop.eup %5886  ;;  %v1273_v24 = vpop.permute.xlu1 %1272  ;;  %5365 = vmatprep.subr.bf16.mxu0 %v1564_v14  ;;  %v1374_v38 = vmul.f32 %v5885_v2, %v7098_v40  ;;  %v7365_v40 = vld [vmem:[%s9287_s3 + $0x38] sm:$0xff] }
 0x6fc   :  { %5890 = vpow2.f32 %v1345_v6  ;;  %v1330_v16 = vmul.f32 %v1273_v24, %v9305_v62  ;;  %v1373_v34 = vmul.f32 %v5887_v33, %v7092_v1  ;;  %v6333_v1 = vld [vmem:[%s9281_s2] sm:$0xff]  ;;  %v9308_v6 = vsub.f32 0.0, %v7355_v9 }
 0x6fd   :  { %v7360_v15 = vadd.f32 %v6332_v30, %v1374_v38  ;;  %v7383_v38 = vld [vmem:[%s9287_s3 + $0x68] sm:$0xff] }
 0x6fe   :  { %v1351_v50 = vmul.f32 1.442695, %v1330_v16  ;;  %5366 = vmatpush3.bf16.msra.mxu0 %v1564_v14  ;;  %v7370_v54 = vadd.f32 %v6333_v1, %v1373_v34  ;;  %v9309_v14 = vsub.f32 0.0, %v7365_v40  ;;  %9345 = vst [vmem:[#allocation3_spill] sm:$0xff] %v7383_v38  ;;  %v7388_v16 = vld [vmem:[%s9287_s3 + $0x30] sm:$0xff] }
 0x6ff   :  { %v1293_v20 = vpop.permute.xlu0 %1292  ;;  %1407 = vmax.xlane.f32.xlu0 %v7360_v15  ;;  %v1268_v2 = vpop.permute.xlu1 %1267  ;;  %v9314_v18 = vsub.f32 0.0, %v7388_v16 }
 0x700   :  { %5892 = vpow2.f32 %v1351_v50  ;;  %v1334_v33 = vmul.f32 %v1293_v20, %v9303_v49  ;;  %v1329_v24 = vmul.f32 %v1268_v2, %v9304_v5  ;;  %1405 = vmax.xlane.f32.xlu1 %v7370_v54  ;;  %v9313_v20 = vsub.f32 0.0, %v7383_v38 }
 0x702   :  { %v5889_v34 = vpop.eup %5888  ;;  %v1349_v30 = vmul.f32 1.442695, %v1329_v24  ;;  %v1359_v49 = vmul.f32 1.442695, %v1334_v33  ;;  %v6334_v24 = vld [vmem:[%s9281_s2 + $0x18] sm:$0xff] }
 0x703   :  { %v1303_v50 = vpop.permute.xlu0 %1302  ;;  %v1283_v1 = vpop.permute.xlu1 %1282  ;;  %v1376_v2 = vmul.f32 %v5889_v34, %v7113_v55 }
 0x704   :  { %v1336_v5 = vmul.f32 %v1303_v50, %v9308_v6  ;;  %v1332_v62 = vmul.f32 %v1283_v1, %v9309_v14  ;;  %5894 = vpow2.f32 %v1349_v30  ;;  %v7410_v50 = vld [vmem:[%s9287_s3 + $0x78] sm:$0xff]  ;;  %v9316_v30 = vsub.f32 0.0, %v7400_v17 }
 0x705   :  { %v7405_v55 = vadd.f32 %v6334_v24, %v1376_v2  ;;  %9346 = vst [vmem:[#allocation4_spill] sm:$0xff] %v7410_v50  ;;  %5896 = vpow2.f32 %v1359_v49  ;;  %v9315_v24 = vsub.f32 0.0, %v7410_v50 }
 0x706   :  { %v5891_v33 = vpop.eup %5890  ;;  %v1355_v34 = vmul.f32 1.442695, %v1332_v62  ;;  %v1363_v25 = vmul.f32 1.442695, %v1336_v5 }
 0x707   :  { %v1313_v1 = vpop.permute.xlu0 %1312  ;;  %v1278_v6 = vpop.permute.xlu1 %1277  ;;  %1411 = vmax.xlane.f32.xlu1 %v7405_v55  ;;  %v1375_v14 = vmul.f32 %v5891_v33, %v7106_v41  ;;  %v7428_v41 = vld [vmem:[%s9287_s3 + $0x50] sm:$0xff] }
 0x708   :  { %v1338_v2 = vmul.f32 %v1313_v1, %v9313_v20  ;;  %v1331_v62 = vmul.f32 %v1278_v6, %v9314_v18  ;;  %5898 = vpow2.f32 %v1355_v34 }
 0x709   :  { %v7423_v9 = vadd.f32 %v6335_v22, %v1375_v14  ;;  %5900 = vpow2.f32 %v1363_v25  ;;  %v9317_v22 = vsub.f32 0.0, %v7428_v41 }
 0x70a   :  { %v5893_v49 = vpop.eup %5892  ;;  %v1353_v5 = vmul.f32 1.442695, %v1331_v62  ;;  %v1367_v1 = vmul.f32 1.442695, %v1338_v2  ;;  %v6336_v62 = vld [vmem:[%s9281_s2 + $0x28] sm:$0xff] }
 0x70b   :  { %v1323_v33 = vpop.permute.xlu0 %1322  ;;  %1409 = vmax.xlane.f32.xlu0 %v7423_v9  ;;  %v1288_v6 = vpop.permute.xlu1 %1287  ;;  %v1378_v34 = vmul.f32 %v5893_v49, %v7123_v52  ;;  %v7445_v52 = vld [vmem:[%s9287_s3 + $0x60] sm:$0xff] }
 0x70c   :  { %v1333_v20 = vmul.f32 %v1288_v6, %v9316_v30  ;;  %5902 = vpow2.f32 %v1353_v5  ;;  %v1340_v14 = vmul.f32 %v1323_v33, %v9315_v24  ;;  %v9321_v6 = vsub.f32 0.0, %v7445_v52 }
 0x70d   :  { %v7440_v18 = vadd.f32 %v6336_v62, %v1378_v34  ;;  %5904 = vpow2.f32 %v1367_v1  ;;  %v7455_v62 = vld [vmem:[%s9287_s3 + $0x70] sm:$0xff]  ;;  %v6337_v1 = vld [vmem:[%s9281_s2 + $0x20] sm:$0xff] }
 0x70e   :  { %v1357_v25 = vmul.f32 1.442695, %v1333_v20  ;;  %v5895_v2 = vpop.eup %5894  ;;  %v1371_v34 = vmul.f32 1.442695, %v1340_v14  ;;  %v9320_v14 = vsub.f32 0.0, %v7455_v62 }
 0x70f   :  { %v1298_v49 = vpop.permute.xlu1 %1297  ;;  %1415 = vmax.xlane.f32.xlu1 %v7440_v18  ;;  %v1377_v33 = vmul.f32 %v5895_v2, %v7126_v60  ;;  %v5897_v20 = vpop.eup %5896 }
 0x710   :  { %v1335_v5 = vmul.f32 %v1298_v49, %v9317_v22  ;;  %5906 = vpow2.f32 %v1357_v25 }
 0x711   :  { %v7460_v30 = vadd.f32 %v6337_v1, %v1377_v33  ;;  %v6338_v33 = vld [vmem:[%s9281_s2 + $0x38] sm:$0xff] }
 0x712   :  { %v1361_v24 = vmul.f32 1.442695, %v1335_v5  ;;  %v5899_v49 = vpop.eup %5898 }
 0x713   :  { %v1308_v22 = vpop.permute.xlu1 %1307  ;;  %1413 = vmax.xlane.f32.xlu0 %v7460_v30  ;;  %v1380_v25 = vmul.f32 %v5899_v49, %v7137_v63  ;;  %v5901_v2 = vpop.eup %5900 }
 0x714   :  { %5908 = vpow2.f32 %v1361_v24  ;;  %v1337_v60 = vmul.f32 %v1308_v22, %v9321_v6  ;;  %v1382_v24 = vmul.f32 %v5897_v20, %v7151_v26  ;;  %v6340_v26 = vld [vmem:[%s9281_s2 + $0x48] sm:$0xff] }
 0x715   :  { %5910 = vpow2.f32 %v1371_v34  ;;  %v7470_v1 = vadd.f32 %v6338_v33, %v1380_v25  ;;  %v6341_v33 = vld [vmem:[%s9281_s2 + $0x40] sm:$0xff] }
 0x716   :  { %v1365_v5 = vmul.f32 1.442695, %v1337_v60  ;;  %v5903_v50 = vpop.eup %5902  ;;  %v6339_v60 = vld [vmem:[%s9281_s2 + $0x30] sm:$0xff]  ;;  %v7485_v20 = vadd.f32 %v6340_v26, %v1382_v24  ;;  %v6342_v24 = vld [vmem:[%s9281_s2 + $0x58] sm:$0xff] }
 0x717   :  { %v1318_v38 = vpop.permute.xlu1 %1317  ;;  %1419 = vmax.xlane.f32.xlu1 %v7470_v1  ;;  %v1379_v63 = vmul.f32 %v5903_v50, %v7140_v32  ;;  %v5905_v34 = vpop.eup %5904 }
 0x718   :  { %5912 = vpow2.f32 %v1365_v5  ;;  %v1339_v22 = vmul.f32 %v1318_v38, %v9320_v14  ;;  %v1384_v38 = vmul.f32 %v5901_v2, %v7165_v4  ;;  %v1386_v2 = vmul.f32 %v5905_v34, %v7179_v12  ;;  %v6345_v34 = vld [vmem:[%s9281_s2 + $0x60] sm:$0xff] }
 0x719   :  { %v7480_v25 = vadd.f32 %v6339_v60, %v1379_v63 }
 0x71a   :  { %v1369_v49 = vmul.f32 1.442695, %v1339_v22  ;;  %v5907_v5 = vpop.eup %5906  ;;  %v7499_v4 = vadd.f32 %v6342_v24, %v1384_v38  ;;  %v6344_v38 = vld [vmem:[%s9281_s2 + $0x68] sm:$0xff] }
 0x71b   :  { %1417 = vmax.xlane.f32.xlu0 %v7480_v25  ;;  %1423 = vmax.xlane.f32.xlu1 %v7485_v20  ;;  %v1381_v32 = vmul.f32 %v5907_v5, %v7154_v31  ;;  %v6343_v31 = vld [vmem:[%s9281_s2 + $0x50] sm:$0xff]  ;;  %v7513_v5 = vadd.f32 %v6344_v38, %v1386_v2 }
 0x71c   :  { %5914 = vpow2.f32 %v1369_v49 }
 0x71d   :  { %v7494_v22 = vadd.f32 %v6341_v33, %v1381_v32  ;;  %v6346_v33 = vld [vmem:[%s9281_s2 + $0x78] sm:$0xff] }
 0x71e   :  { %v5909_v50 = vpop.eup %5908 }
 0x71f   :  { %v5911_v63 = vpop.eup %5910  ;;  %v1383_v49 = vmul.f32 %v5909_v50, %v7168_v28  ;;  %1421 = vmax.xlane.f32.xlu0 %v7494_v22  ;;  %1427 = vmax.xlane.f32.xlu1 %v7499_v4 }
 0x720   :  { %v1388_v12 = vmul.f32 %v5911_v63, %v7193_v58 }
 0x721   :  { %v7508_v60 = vadd.f32 %v6343_v31, %v1383_v49 }
 0x722   :  { %v5913_v26 = vpop.eup %5912  ;;  %v7527_v24 = vadd.f32 %v6346_v33, %v1388_v12 }
 0x723   :  { %v1385_v28 = vmul.f32 %v5913_v26, %v7182_v48  ;;  %1425 = vmax.xlane.f32.xlu0 %v7508_v60  ;;  %1431 = vmax.xlane.f32.xlu1 %v7513_v5  ;;  %v6347_v48 = vld [vmem:[%s9281_s2 + $0x70] sm:$0xff] }
 0x725   :  { %v7522_v32 = vadd.f32 %v6345_v34, %v1385_v28 }
 0x726   :  { %v5915_v50 = vpop.eup %5914 }
 0x727   :  { %v1387_v58 = vmul.f32 %v5915_v50, %v7196_v11  ;;  %1429 = vmax.xlane.f32.xlu0 %v7522_v32  ;;  %1435 = vmax.xlane.f32.xlu1 %v7527_v24 }
 0x729   :  { %v7535_v2 = vadd.f32 %v6347_v48, %v1387_v58 }
 0x72b   :  { %1433 = vmax.xlane.f32.xlu0 %v7535_v2 }
 0x738   :  { %1567 = vrot.lane.b32.xlu1 %v6834_v46, %s6382_s25 }
 0x741   :  { %1565 = vrot.lane.b32.xlu0 %v6836_v56, %s6382_s25 }
 0x78c   :  { %v1408_v63 = vpop.xlane.xlu0 %1407 }
 0x78d   :  { %v1438_v11 = vsub.f32 %v7360_v15, %v1408_v63  ;;  %v1406_v49 = vpop.xlane.xlu1 %1405 }
 0x78e   :  { %v1437_v31 = vsub.f32 %v7370_v54, %v1406_v49 }
 0x78f   :  { %v1455_v26 = vmul.f32 1.442695, %v1438_v11 }
 0x790   :  { %v1453_v38 = vmul.f32 1.442695, %v1437_v31 }
 0x791   :  { %5916 = vpow2.f32 %v1455_v26 }
 0x792   :  { %5918 = vpow2.f32 %v1453_v38 }
 0x794   :  { %v1412_v12 = vpop.xlane.xlu1 %1411 }
 0x795   :  { %v1440_v28 = vsub.f32 %v7405_v55, %v1412_v12 }
 0x797   :  { %v1459_v34 = vmul.f32 1.442695, %v1440_v28 }
 0x798   :  { %v1410_v50 = vpop.xlane.xlu0 %1409 }
 0x799   :  { %5920 = vpow2.f32 %v1459_v34  ;;  %v1439_v46 = vsub.f32 %v7423_v9, %v1410_v50 }
 0x79b   :  { %v7546_v33 = vpop.eup %5916  ;;  %v1457_v56 = vmul.f32 1.442695, %v1439_v46 }
 0x79c   :  { %v1416_v58 = vpop.xlane.xlu1 %1415  ;;  %1487 = vadd.xlane.f32.xlu1 %v7546_v33  ;;  %v7550_v54 = vpop.eup %5918 }
 0x79d   :  { %5922 = vpow2.f32 %v1457_v56  ;;  %v1442_v15 = vsub.f32 %v7440_v18, %v1416_v58 }
 0x79f   :  { %v1463_v48 = vmul.f32 1.442695, %v1442_v15 }
 0x7a0   :  { %1485 = vadd.xlane.f32.xlu1 %v7550_v54  ;;  %v1414_v55 = vpop.xlane.xlu0 %1413 }
 0x7a1   :  { %5924 = vpow2.f32 %v1463_v48  ;;  %v1441_v63 = vsub.f32 %v7460_v30, %v1414_v55 }
 0x7a3   :  { %v7554_v11 = vpop.eup %5920  ;;  %v1461_v9 = vmul.f32 1.442695, %v1441_v63 }
 0x7a4   :  { %1491 = vadd.xlane.f32.xlu1 %v7554_v11  ;;  %v1420_v49 = vpop.xlane.xlu1 %1419 }
 0x7a5   :  { %5926 = vpow2.f32 %v1461_v9  ;;  %v1444_v31 = vsub.f32 %v7470_v1, %v1420_v49 }
 0x7a7   :  { %v7558_v26 = vpop.eup %5922  ;;  %v1467_v18 = vmul.f32 1.442695, %v1444_v31 }
 0x7a8   :  { %1489 = vadd.xlane.f32.xlu1 %v7558_v26  ;;  %v1424_v38 = vpop.xlane.xlu1 %1423  ;;  %v1418_v12 = vpop.xlane.xlu0 %1417 }
 0x7a9   :  { %5928 = vpow2.f32 %v1467_v18  ;;  %v1443_v28 = vsub.f32 %v7480_v25, %v1418_v12 }
 0x7ab   :  { %v7562_v30 = vpop.eup %5924  ;;  %v1465_v34 = vmul.f32 1.442695, %v1443_v28 }
 0x7ac   :  { %1495 = vadd.xlane.f32.xlu1 %v7562_v30  ;;  %v1428_v50 = vpop.xlane.xlu1 %1427  ;;  %v1422_v46 = vpop.xlane.xlu0 %1421 }
 0x7ad   :  { %5930 = vpow2.f32 %v1465_v34  ;;  %v1445_v31 = vsub.f32 %v7494_v22, %v1422_v46  ;;  %v1448_v18 = vsub.f32 %v7499_v4, %v1428_v50 }
 0x7af   :  { %v7565_v56 = vpop.eup %5926  ;;  %v1469_v12 = vmul.f32 1.442695, %v1445_v31  ;;  %v1475_v28 = vmul.f32 1.442695, %v1448_v18 }
 0x7b0   :  { %1493 = vadd.xlane.f32.xlu0 %v7565_v56  ;;  %v1426_v1 = vpop.xlane.xlu0 %1425  ;;  %v1432_v58 = vpop.xlane.xlu1 %1431 }
 0x7b1   :  { %5932 = vpow2.f32 %v1469_v12  ;;  %v1450_v34 = vsub.f32 %v7513_v5, %v1432_v58  ;;  %v5742_v58 = vld [vmem:[%s9288_s12] sm:$0xff]  }
 0x7b2   :  { %5934 = vpow2.f32 %v1475_v28  ;;  %5715 = vmatprep.subr.bf16.mxu1 %v5742_v58 }
 0x7b3   :  { %v7568_v15 = vpop.eup %5928  ;;  %v1479_v14 = vmul.f32 1.442695, %v1450_v34  ;;  %5717 = vmatpush3.bf16.msra.mxu1 %v5742_v58 }
 0x7b4   :  { %1499 = vadd.xlane.f32.xlu0 %v7568_v15  ;;  %v1430_v48 = vpop.xlane.xlu0 %1429  ;;  %v1436_v55 = vpop.xlane.xlu1 %1435 }
 0x7b5   :  { %5936 = vpow2.f32 %v1479_v14  ;;  %v1449_v50 = vsub.f32 %v7522_v32, %v1430_v48 }
 0x7b7   :  { %v7571_v25 = vpop.eup %5930  ;;  %v1477_v14 = vmul.f32 1.442695, %v1449_v50 }
 0x7b8   :  { %v1434_v63 = vpop.xlane.xlu0 %1433  ;;  %1497 = vadd.xlane.f32.xlu0 %v7571_v25  ;;  %v1568_v49 = vpop.permute.xlu1 %1567 }
 0x7bb   :  { %v7583_v6 = vpop.eup %5932 }
 0x7bc   :  { %v1566_v9 = vpop.permute.xlu0 %1565  ;;  %v7587_v4 = vpop.eup %5934 }
 0x7bd   :  { %1571 = vrot.lane.b32.xlu1 %v6842_v36, %s6382_s25  ;;  %5367 = vmatprep.subr.bf16.mxu0 %v1566_v9  ;;  %v1452_v36 = vsub.f32 %v7527_v24, %v1436_v55 }
 0x7be   :  { %5368 = vmatpush3.bf16.msra.mxu0 %v1566_v9  ;;  %v1446_v9 = vsub.f32 %v7485_v20, %v1424_v38  ;;  %v1451_v20 = vsub.f32 %v7535_v2, %v1434_v63 }
 0x7bf   :  { %5369 = vmatprep.subr.bf16.mxu0 %v1568_v49  ;;  %v7591_v24 = vpop.eup %5936 }
 0x7c0   :  { %v1471_v22 = vmul.f32 1.442695, %v1446_v9  ;;  %v1481_v38 = vmul.f32 1.442695, %v1451_v20 }
 0x7c2   :  { %5370 = vmatpush3.bf16.msra.mxu0 %v1568_v49  ;;  %v1483_v49 = vmul.f32 1.442695, %v1452_v36 }
 0x7c4   :  { %5938 = vpow2.f32 %v1483_v49 }
 0x7c5   :  { %5940 = vpow2.f32 %v1471_v22 }
 0x7ce   :  { %1569 = vrot.lane.b32.xlu0 %v6844_v39, %s6382_s25  ;;  %v1447_v39 = vsub.f32 %v7508_v60, %v1426_v1  ;;  %v7595_v60 = vpop.eup %5938 }
 0x7cf   :  { %v7598_v46 = vpop.eup %5940 }
 0x7d0   :  { %v1473_v5 = vmul.f32 1.442695, %v1447_v39 }
 0x7d2   :  { %5942 = vpow2.f32 %v1473_v5 }
 0x7d3   :  { %5944 = vpow2.f32 %v1477_v14 }
 0x7d4   :  { %5946 = vpow2.f32 %v1481_v38 }
 0x7dc   :  { %v7601_v32 = vpop.eup %5942 }
 0x7dd   :  { %v7604_v1 = vpop.eup %5944 }
 0x7de   :  { %v7607_v2 = vpop.eup %5946 }
 0x7e1   :  { %1501 = vadd.xlane.f32.xlu1 %v7583_v6 }
 0x7e5   :  { %1507 = vadd.xlane.f32.xlu1 %v7587_v4 }
 0x7e9   :  { %1511 = vadd.xlane.f32.xlu1 %v7591_v24 }
 0x7ed   :  { %1515 = vadd.xlane.f32.xlu1 %v7595_v60  ;;  %1503 = vadd.xlane.f32.xlu0 %v7598_v46 }
 0x7f1   :  { %1505 = vadd.xlane.f32.xlu0 %v7601_v32 }
 0x7f5   :  { %1509 = vadd.xlane.f32.xlu0 %v7604_v1 }
 0x7f9   :  { %1513 = vadd.xlane.f32.xlu0 %v7607_v2 }
 0x829   :  { %v1488_v48 = vpop.xlane.xlu1 %1487 }
 0x82a   :  { %5948 = vrcp.f32 %v1488_v48 }
 0x82d   :  { %v1486_v55 = vpop.xlane.xlu1 %1485 }
 0x82e   :  { %5950 = vrcp.f32 %v1486_v55 }
 0x831   :  { %v1492_v63 = vpop.xlane.xlu1 %1491 }
 0x834   :  { %v5949_v31 = vpop.eup %5948 }
 0x835   :  { %v1534_v28 = vmul.f32 %v5949_v31, %v7546_v33  ;;  %v1490_v34 = vpop.xlane.xlu1 %1489 }
 0x836   :  { %5952 = vrcp.f32 %v1490_v34 }
 0x838   :  { %v5951_v18 = vpop.eup %5950 }
 0x839   :  { %v1533_v12 = vmul.f32 %v5951_v18, %v7550_v54  ;;  %v1496_v49 = vpop.xlane.xlu1 %1495 }
 0x83b   :  { %v1549_v36 = vpack.c.bf16 %v1534_v28, %v1533_v12 }
 0x83d   :  { %5375 = vmatprep.mubr.bf16.mxu0 %v1549_v36  ;;  %v1494_v9 = vpop.xlane.xlu0 %1493  ;;  %v1572_v20 = vpop.permute.xlu1 %1571 }
 0x83e   :  { %5954 = vrcp.f32 %v1494_v9 }
 0x83f   :  { %5956 = vrcp.f32 %v1492_v63 }
 0x840   :  { %5958 = vrcp.f32 %v1496_v49  ;;  %v5953_v5 = vpop.eup %5952 }
 0x841   :  { %v1500_v22 = vpop.xlane.xlu0 %1499  ;;  %v1535_v38 = vmul.f32 %v5953_v5, %v7558_v26 }
 0x845   :  { %v1498_v39 = vpop.xlane.xlu0 %1497 }
 0x846   :  { %5960 = vrcp.f32 %v1498_v39 }
 0x847   :  { %5962 = vrcp.f32 %v1500_v22 }
 0x848   :  { %v5955_v14 = vpop.eup %5954 }
 0x849   :  { %v1570_v50 = vpop.permute.xlu0 %1569  ;;  %v5957_v54 = vpop.eup %5956  ;;  %v1537_v48 = vmul.f32 %v5955_v14, %v7565_v56 }
 0x84a   :  { %5371 = vmatprep.subr.bf16.mxu0 %v1570_v50  ;;  %v5959_v33 = vpop.eup %5958  ;;  %v1536_v55 = vmul.f32 %v5957_v54, %v7554_v11 }
 0x84b   :  { %5372 = vmatpush3.bf16.msra.mxu0 %v1570_v50  ;;  %v1538_v63 = vmul.f32 %v5959_v33, %v7562_v30 }
 0x84c   :  { %5373 = vmatprep.subr.bf16.mxu0 %v1572_v20  ;;  %v1550_v31 = vpack.c.bf16 %v1536_v55, %v1535_v38 }
 0x84d   :  { %v1551_v12 = vpack.c.bf16 %v1538_v63, %v1537_v48 }
 0x84f   :  { %5374 = vmatpush3.bf16.msra.mxu0 %v1572_v20 }
 0x850   :  { %5391 = vmatprep.subr.bf16.mxu0 %v5742_v58  ;;  %v5961_v18 = vpop.eup %5960 }
 0x851   :  { %v5963_v28 = vpop.eup %5962  ;;  %v1539_v34 = vmul.f32 %v5961_v18, %v7571_v25 }
 0x852   :  { %5376 = vmatmul.mubr.bf16.vlgmr.msra.gmra.mrb[32].mxu0 %v1550_v31  ;;  %v1540_v26 = vmul.f32 %v5963_v28, %v7568_v15 }
 0x853   :  { %5379 = vmatprep.mubr.bf16.mxu0 %v1551_v12  ;;  %5392 = vmatpush3.bf16.msra.mxu0 %v5742_v58 }
 0x854   :  { %v1552_v36 = vpack.c.bf16 %v1540_v26, %v1539_v34 }
 0x85a   :  { %5380 = vmatmul.mubr.bf16.gmra.mrb[36].mxu0 %v1552_v36 }
 0x86e   :  { %v1502_v56 = vpop.xlane.xlu1 %1501 }
 0x86f   :  { %5964 = vrcp.f32 %v1502_v56 }
 0x872   :  { %v1508_v9 = vpop.xlane.xlu1 %1507 }
 0x876   :  { %v1512_v30 = vpop.xlane.xlu1 %1511 }
 0x879   :  { %v5965_v5 = vpop.eup %5964 }
 0x87a   :  { %v1504_v11 = vpop.xlane.xlu0 %1503  ;;  %v1516_v22 = vpop.xlane.xlu1 %1515  ;;  %v1541_v15 = vmul.f32 %v5965_v5, %v7583_v6 }
 0x87b   :  { %5966 = vrcp.f32 %v1504_v11 }
 0x87c   :  { %5968 = vrcp.f32 %v1508_v9 }
 0x87e   :  { %v1506_v49 = vpop.xlane.xlu0 %1505 }
 0x87f   :  { %5970 = vrcp.f32 %v1506_v49 }
 0x880   :  { %5972 = vrcp.f32 %v1512_v30 }
 0x882   :  { %v1510_v39 = vpop.xlane.xlu0 %1509 }
 0x883   :  { %5974 = vrcp.f32 %v1510_v39 }
 0x884   :  { %5976 = vrcp.f32 %v1516_v22 }
 0x885   :  { %v5967_v58 = vpop.eup %5966 }
 0x886   :  { %v1514_v25 = vpop.xlane.xlu0 %1513  ;;  %v1542_v50 = vmul.f32 %v5967_v58, %v7598_v46  ;;  %v5969_v14 = vpop.eup %5968 }
 0x887   :  { %5978 = vrcp.f32 %v1514_v25  ;;  %v1544_v38 = vmul.f32 %v5969_v14, %v7587_v4  ;;  %v5743_v4 = vld [vmem:[%s9288_s12 + $0x8] sm:$0xff]  }
 0x888   :  { %v1553_v54 = vpack.c.bf16 %v1542_v50, %v1541_v15  ;;  %5393 = vmatprep.subr.bf16.mxu0 %v5743_v4  ;;  %5716 = vmatprep.subr.bf16.mxu1 %v5743_v4 }
 0x889   :  { %v5971_v20 = vpop.eup %5970  ;;  %5394 = vmatpush3.bf16.msra.mxu0 %v5743_v4  ;;  %5718 = vmatpush3.bf16.msra.mxu1 %v5743_v4 }
 0x88a   :  { %5383 = vmatprep.mubr.bf16.mxu0 %v1553_v54  ;;  %v1543_v33 = vmul.f32 %v5971_v20, %v7601_v32  ;;  %v5973_v48 = vpop.eup %5972 }
 0x88b   :  { %v1546_v18 = vmul.f32 %v5973_v48, %v7591_v24 }
 0x88c   :  { %v1554_v55 = vpack.c.bf16 %v1544_v38, %v1543_v33 }
 0x88d   :  { %v5975_v63 = vpop.eup %5974 }
 0x88e   :  { %5384 = vmatmul.mubr.bf16.gmra.mrb[40].mxu0 %v1554_v55  ;;  %v1545_v31 = vmul.f32 %v5975_v63, %v7604_v1  ;;  %v5977_v6 = vpop.eup %5976  ;;  %v7643_v55 = vld [vmem:[%s9289_s13] ss:$0 sm:$0xff] }
 0x88f   :  { %v1548_v34 = vmul.f32 %v5977_v6, %v7595_v60 }
 0x890   :  { %v1555_v12 = vpack.c.bf16 %v1546_v18, %v1545_v31 }
 0x891   :  { %v5979_v46 = vpop.eup %5978 }
 0x892   :  { %5387 = vmatprep.mubr.bf16.mxu0 %v1555_v12  ;;  %v1547_v28 = vmul.f32 %v5979_v46, %v7607_v2 }
 0x894   :  { %v1556_v26 = vpack.c.bf16 %v1548_v34, %v1547_v28 }
 0x896   :  { %5388 = vmatmul.mubr.bf16.gmra.mrb[44].mxu0 %v1556_v26 }
 0x925   :  { %v5377_v32 = vpop.f32.mrb[32].mxu0 }
 0x926   :  { %v1615_v24 = vpop.f32.mrb[33].mxu0 }
 0x927   :  { %v5378_v1 = vpop.f32.mrb[34].mxu0 }
 0x928   :  { %v1679_v36 = vpack.c.bf16 %v5378_v1, %v5377_v32  ;;  %v1618_v56 = vpop.f32.mrb[35].mxu0 }
 0x929   :  { %v1678_v9 = vpack.c.bf16 %v1618_v56, %v1615_v24 }
 0x92b   :  { %5395 = vmatprep.mubr.msk.bf16.mxu0 %vm148_vm0, %v1678_v9 }
 0x92c   :  { %5396 = vmatmul.mubr.msk.bf16.vlgmr.msra.gmra.mrb[48].mxu0 %vm148_vm0, %v1679_v36 }
 0x92d   :  { %v5381_v60 = vpop.f32.mrb[36].mxu0 }
 0x92e   :  { %v1631_v2 = vpop.f32.mrb[37].mxu0 }
 0x92f   :  { %v5382_v11 = vpop.f32.mrb[38].mxu0 }
 0x930   :  { %v1681_v30 = vpack.c.bf16 %v5382_v11, %v5381_v60  ;;  %v1634_v49 = vpop.f32.mrb[39].mxu0 }
 0x931   :  { %v1680_v22 = vpack.c.bf16 %v1634_v49, %v1631_v2 }
 0x933   :  { %5399 = vmatprep.mubr.msk.bf16.mxu1 %vm148_vm0, %v1680_v22 }
 0x934   :  { %5400 = vmatmul.mubr.msk.bf16.vlgmr.msra.gmra.mrb[16].mxu1 %vm148_vm0, %v1681_v30 }
 0x961   :  { %v5385_v39 = vpop.f32.mrb[40].mxu0 }
 0x962   :  { %v1647_v5 = vpop.f32.mrb[41].mxu0 }
 0x963   :  { %v5386_v58 = vpop.f32.mrb[42].mxu0 }
 0x964   :  { %v1683_v25 = vpack.c.bf16 %v5386_v58, %v5385_v39  ;;  %v1650_v15 = vpop.f32.mrb[43].mxu0 }
 0x965   :  { %v1682_v50 = vpack.c.bf16 %v1650_v15, %v1647_v5 }
 0x967   :  { %5403 = vmatprep.mubr.msk.bf16.mxu1 %vm148_vm0, %v1682_v50 }
 0x968   :  { %5404 = vmatmul.mubr.msk.bf16.gmra.mrb[20].mxu1 %vm148_vm0, %v1683_v25 }
 0x969   :  { %v5389_v14 = vpop.f32.mrb[44].mxu0 }
 0x96a   :  { %v1663_v54 = vpop.f32.mrb[45].mxu0 }
 0x96b   :  { %v5390_v20 = vpop.f32.mrb[46].mxu0 }
 0x96c   :  { %v1685_v33 = vpack.c.bf16 %v5390_v20, %v5389_v14  ;;  %v1666_v38 = vpop.f32.mrb[47].mxu0 }
 0x96d   :  { %v1684_v48 = vpack.c.bf16 %v1666_v38, %v1663_v54 }
 0x96f   :  { %5407 = vmatprep.mubr.msk.bf16.mxu1 %vm148_vm0, %v1684_v48 }
 0x970   :  { %5408 = vmatmul.mubr.msk.bf16.gmra.mrb[24].mxu1 %vm148_vm0, %v1685_v33 }
 0x9ff   :  { %v5397_v63 = vpop.f32.mrb[48].mxu0 }
 0xa00   :  { %v1765_v31 = vpop.f32.mrb[49].mxu0  ;;  %v1774_v18 = vadd.f32 %v5397_v63, %v7643_v55 }
 0xa01   :  { %v1766_v6 = vadd.f32 %v7643_v55, %v1765_v31  ;;  %v5398_v12 = vpop.f32.mrb[50].mxu0 }
 0xa02   :  { %v1768_v46 = vpop.f32.mrb[51].mxu0  ;;  %v1777_v34 = vadd.f32 %v5398_v12, %v7643_v55  ;;  %v7653_v4 = vadd.f32 %v1774_v18, %v6508_v7 }
 0xa03   :  { %v7648_v28 = vadd.f32 %v1766_v6, %v6497_v3  ;;  %v1769_v26 = vadd.f32 %v7643_v55, %v1768_v46 }
 0xa04   :  { %v7661_v1 = vadd.f32 %v1777_v34, %v6523_v13 }
 0xa05   :  { %v7656_v32 = vadd.f32 %v1769_v26, %v6510_v8  ;;  %v1846_v24 = vsel %vm148_vm0, %v7648_v28, 0.0  ;;  %v1852_v8 = vsel %vm148_vm0, %v7653_v4, 0.0 }
 0xa06   :  { %1847 = vadd.xlane.f32.xlu0 %v1846_v24  ;;  %v1855_v49 = vsel %vm148_vm0, %v7661_v1, 0.0 }
 0xa07   :  { %v5401_v36 = vpop.f32.mrb[16].mxu1  ;;  %v1849_v3 = vsel %vm148_vm0, %v7656_v32, 0.0 }
 0xa08   :  { %v1781_v56 = vpop.f32.mrb[17].mxu1  ;;  %1850 = vadd.xlane.f32.xlu1 %v1849_v3  ;;  %v1790_v9 = vadd.f32 %v5401_v36, %v7643_v55 }
 0xa09   :  { %v1782_v7 = vadd.f32 %v7643_v55, %v1781_v56  ;;  %v5402_v60 = vpop.f32.mrb[18].mxu1 }
 0xa0a   :  { %v1784_v2 = vpop.f32.mrb[19].mxu1  ;;  %1853 = vadd.xlane.f32.xlu0 %v1852_v8  ;;  %v1793_v13 = vadd.f32 %v5402_v60, %v7643_v55  ;;  %v7677_v22 = vadd.f32 %v1790_v9, %v6558_v27 }
 0xa0b   :  { %v7670_v11 = vadd.f32 %v1782_v7, %v6538_v19  ;;  %v1785_v30 = vadd.f32 %v7643_v55, %v1784_v2 }
 0xa0c   :  { %1856 = vadd.xlane.f32.xlu1 %v1855_v49  ;;  %v7685_v19 = vadd.f32 %v1793_v13, %v6562_v29  ;;  %v1864_v25 = vsel %vm148_vm0, %v7677_v22, 0.0 }
 0xa0d   :  { %v7680_v39 = vadd.f32 %v1785_v30, %v6542_v21  ;;  %v1858_v5 = vsel %vm148_vm0, %v7670_v11, 0.0 }
 0xa0e   :  { %1859 = vadd.xlane.f32.xlu0 %v1858_v5  ;;  %v1867_v27 = vsel %vm148_vm0, %v7685_v19, 0.0 }
 0xa0f   :  { %v1861_v58 = vsel %vm148_vm0, %v7680_v39, 0.0 }
 0xa10   :  { %1862 = vadd.xlane.f32.xlu1 %v1861_v58 }
 0xa12   :  { %1865 = vadd.xlane.f32.xlu0 %v1864_v25 }
 0xa14   :  { %1868 = vadd.xlane.f32.xlu1 %v1867_v27 }
 0xa3b   :  { %v5405_v21 = vpop.f32.mrb[20].mxu1 }
 0xa3c   :  { %v1797_v15 = vpop.f32.mrb[21].mxu1  ;;  %v1806_v50 = vadd.f32 %v5405_v21, %v7643_v55 }
 0xa3d   :  { %v1798_v14 = vadd.f32 %v7643_v55, %v1797_v15  ;;  %v5406_v29 = vpop.f32.mrb[22].mxu1 }
 0xa3e   :  { %v1800_v54 = vpop.f32.mrb[23].mxu1  ;;  %v1809_v33 = vadd.f32 %v5406_v29, %v7643_v55  ;;  %v7701_v48 = vadd.f32 %v1806_v50, %v6598_v43 }
 0xa3f   :  { %v7696_v20 = vadd.f32 %v1798_v14, %v6578_v35  ;;  %v1801_v38 = vadd.f32 %v7643_v55, %v1800_v54 }
 0xa40   :  { %v7709_v18 = vadd.f32 %v1809_v33, %v6602_v45 }
 0xa41   :  { %v7704_v63 = vadd.f32 %v1801_v38, %v6582_v37  ;;  %v1870_v31 = vsel %vm148_vm0, %v7696_v20, 0.0  ;;  %v1876_v37 = vsel %vm148_vm0, %v7701_v48, 0.0 }
 0xa42   :  { %1871 = vadd.xlane.f32.xlu0 %v1870_v31  ;;  %v1879_v3 = vsel %vm148_vm0, %v7709_v18, 0.0 }
 0xa43   :  { %v5409_v6 = vpop.f32.mrb[24].mxu1  ;;  %v1873_v35 = vsel %vm148_vm0, %v7704_v63, 0.0 }
 0xa44   :  { %1874 = vadd.xlane.f32.xlu1 %v1873_v35  ;;  %v1813_v12 = vpop.f32.mrb[25].mxu1  ;;  %v1822_v46 = vadd.f32 %v5409_v6, %v7643_v55 }
 0xa45   :  { %v1814_v43 = vadd.f32 %v7643_v55, %v1813_v12  ;;  %v5410_v34 = vpop.f32.mrb[26].mxu1 }
 0xa46   :  { %1877 = vadd.xlane.f32.xlu0 %v1876_v37  ;;  %v1816_v26 = vpop.f32.mrb[27].mxu1  ;;  %v1825_v45 = vadd.f32 %v5410_v34, %v7643_v55  ;;  %v7725_v56 = vadd.f32 %v1822_v46, %v6638_v59 }
 0xa47   :  { %v7718_v24 = vadd.f32 %v1814_v43, %v6618_v51  ;;  %v1817_v36 = vadd.f32 %v7643_v55, %v1816_v26 }
 0xa48   :  { %1880 = vadd.xlane.f32.xlu1 %v1879_v3  ;;  %v7733_v51 = vadd.f32 %v1825_v45, %v6642_v61  ;;  %v1888_v60 = vsel %vm148_vm0, %v7725_v56, 0.0 }
 0xa49   :  { %v7728_v9 = vadd.f32 %v1817_v36, %v6622_v53  ;;  %v1882_v7 = vsel %vm148_vm0, %v7718_v24, 0.0 }
 0xa4a   :  { %1883 = vadd.xlane.f32.xlu0 %v1882_v7  ;;  %v1891_v59 = vsel %vm148_vm0, %v7733_v51, 0.0 }
 0xa4b   :  { %v1885_v55 = vsel %vm148_vm0, %v7728_v9, 0.0 }
 0xa4c   :  { %1886 = vadd.xlane.f32.xlu1 %v1885_v55 }
 0xa4e   :  { %1889 = vadd.xlane.f32.xlu0 %v1888_v60 }
 0xa50   :  { %1892 = vadd.xlane.f32.xlu1 %v1891_v59 }
 0xa93   :  { %v1848_v53 = vpop.xlane.xlu0 %1847 }
 0xa94   :  { %v1894_v8 = vmul.f32 0.03125, %v1848_v53 }
 0xa95   :  { %v1851_v2 = vpop.xlane.xlu1 %1850 }
 0xa96   :  { %v7742_v13 = vsub.f32 %v7648_v28, %v1894_v8  ;;  %v1895_v61 = vmul.f32 0.03125, %v1851_v2 }
 0xa97   :  { %v1854_v30 = vpop.xlane.xlu0 %1853 }
 0xa98   :  { %v7745_v49 = vsub.f32 %v7656_v32, %v1895_v61  ;;  %v1896_v5 = vmul.f32 0.03125, %v1854_v30  ;;  %v1926_v58 = vmul.f32 %v7742_v13, %v7742_v13 }
 0xa99   :  { %v1857_v25 = vpop.xlane.xlu1 %1856 }
 0xa9a   :  { %v7750_v27 = vsub.f32 %v7653_v4, %v1896_v5  ;;  %v1897_v21 = vmul.f32 0.03125, %v1857_v25  ;;  %v1942_v15 = vsel %vm148_vm0, %v1926_v58, 0.0  ;;  %v1927_v50 = vmul.f32 %v7745_v49, %v7745_v49  ;;  %v5744_v5 = vld [vmem:[%s9290_s16] sm:$0xff]   ;;  %v5745_v58 = vld [vmem:[%s9290_s16 + $0x8] sm:$0xff]  }
 0xa9b   :  { %v1860_v14 = vpop.xlane.xlu0 %1859  ;;  %1943 = vadd.xlane.f32.xlu0 %v1942_v15  ;;  %5411 = vmatprep.subr.bf16.mxu0 %v5744_v5 }
 0xa9c   :  { %v7756_v29 = vsub.f32 %v7661_v1, %v1897_v21  ;;  %v1898_v54 = vmul.f32 0.03125, %v1860_v14  ;;  %v1945_v33 = vsel %vm148_vm0, %v1927_v50, 0.0  ;;  %v1928_v38 = vmul.f32 %v7750_v27, %v7750_v27  ;;  %5412 = vmatpush3.bf16.msra.mxu0 %v5744_v5 }
 0xa9d   :  { %v1863_v31 = vpop.xlane.xlu1 %1862  ;;  %1946 = vadd.xlane.f32.xlu1 %v1945_v33  ;;  %5413 = vmatprep.subr.bf16.mxu0 %v5745_v58 }
 0xa9e   :  { %v7762_v6 = vsub.f32 %v7670_v11, %v1898_v54  ;;  %v1899_v35 = vmul.f32 0.03125, %v1863_v31  ;;  %v1948_v12 = vsel %vm148_vm0, %v1928_v38, 0.0  ;;  %v1929_v46 = vmul.f32 %v7756_v29, %v7756_v29 }
 0xa9f   :  { %v1866_v43 = vpop.xlane.xlu0 %1865  ;;  %1949 = vadd.xlane.f32.xlu0 %v1948_v12 }
 0xaa0   :  { %v7768_v34 = vsub.f32 %v7680_v39, %v1899_v35  ;;  %v1900_v37 = vmul.f32 0.03125, %v1866_v43  ;;  %v1951_v26 = vsel %vm148_vm0, %v1929_v46, 0.0  ;;  %v1930_v45 = vmul.f32 %v7762_v6, %v7762_v6  ;;  %5414 = vmatpush3.bf16.msra.mxu0 %v5745_v58 }
 0xaa1   :  { %v1869_v36 = vpop.xlane.xlu1 %1868  ;;  %1952 = vadd.xlane.f32.xlu1 %v1951_v26 }
 0xaa2   :  { %v7774_v3 = vsub.f32 %v7677_v22, %v1900_v37  ;;  %v1901_v7 = vmul.f32 0.03125, %v1869_v36  ;;  %v1954_v55 = vsel %vm148_vm0, %v1930_v45, 0.0  ;;  %v1931_v60 = vmul.f32 %v7768_v34, %v7768_v34 }
 0xaa3   :  { %1955 = vadd.xlane.f32.xlu0 %v1954_v55 }
 0xaa4   :  { %v7780_v59 = vsub.f32 %v7685_v19, %v1901_v7  ;;  %v1957_v53 = vsel %vm148_vm0, %v1931_v60, 0.0  ;;  %v1932_v8 = vmul.f32 %v7774_v3, %v7774_v3 }
 0xaa5   :  { %1958 = vadd.xlane.f32.xlu1 %v1957_v53 }
 0xaa6   :  { %v1960_v2 = vsel %vm148_vm0, %v1932_v8, 0.0  ;;  %v1933_v61 = vmul.f32 %v7780_v59, %v7780_v59 }
 0xaa7   :  { %1961 = vadd.xlane.f32.xlu0 %v1960_v2 }
 0xaa8   :  { %v1963_v30 = vsel %vm148_vm0, %v1933_v61, 0.0 }
 0xaa9   :  { %1964 = vadd.xlane.f32.xlu1 %v1963_v30 }
 0xacf   :  { %v1872_v25 = vpop.xlane.xlu0 %1871 }
 0xad0   :  { %v1902_v21 = vmul.f32 0.03125, %v1872_v25 }
 0xad1   :  { %v1875_v15 = vpop.xlane.xlu1 %1874 }
 0xad2   :  { %v7796_v50 = vsub.f32 %v7696_v20, %v1902_v21  ;;  %v1903_v14 = vmul.f32 0.03125, %v1875_v15 }
 0xad3   :  { %v1878_v54 = vpop.xlane.xlu0 %1877 }
 0xad4   :  { %v7799_v33 = vsub.f32 %v7704_v63, %v1903_v14  ;;  %v1904_v38 = vmul.f32 0.03125, %v1878_v54  ;;  %v1934_v31 = vmul.f32 %v7796_v50, %v7796_v50 }
 0xad5   :  { %v1881_v35 = vpop.xlane.xlu1 %1880 }
 0xad6   :  { %v7804_v12 = vsub.f32 %v7701_v48, %v1904_v38  ;;  %v1905_v46 = vmul.f32 0.03125, %v1881_v35  ;;  %v1966_v43 = vsel %vm148_vm0, %v1934_v31, 0.0  ;;  %v1935_v37 = vmul.f32 %v7799_v33, %v7799_v33 }
 0xad7   :  { %1967 = vadd.xlane.f32.xlu0 %v1966_v43  ;;  %v1884_v26 = vpop.xlane.xlu0 %1883 }
 0xad8   :  { %v7810_v45 = vsub.f32 %v7709_v18, %v1905_v46  ;;  %v1906_v36 = vmul.f32 0.03125, %v1884_v26  ;;  %v1969_v7 = vsel %vm148_vm0, %v1935_v37, 0.0  ;;  %v1936_v55 = vmul.f32 %v7804_v12, %v7804_v12 }
 0xad9   :  { %1970 = vadd.xlane.f32.xlu1 %v1969_v7  ;;  %v1887_v60 = vpop.xlane.xlu1 %1886 }
 0xada   :  { %v7816_v53 = vsub.f32 %v7718_v24, %v1906_v36  ;;  %v1907_v8 = vmul.f32 0.03125, %v1887_v60  ;;  %v1972_v2 = vsel %vm148_vm0, %v1936_v55, 0.0  ;;  %v1937_v61 = vmul.f32 %v7810_v45, %v7810_v45 }
 0xadb   :  { %1973 = vadd.xlane.f32.xlu0 %v1972_v2  ;;  %v1890_v30 = vpop.xlane.xlu0 %1889 }
 0xadc   :  { %v7822_v5 = vsub.f32 %v7728_v9, %v1907_v8  ;;  %v1908_v58 = vmul.f32 0.03125, %v1890_v30  ;;  %v1975_v25 = vsel %vm148_vm0, %v1937_v61, 0.0  ;;  %v1938_v21 = vmul.f32 %v7816_v53, %v7816_v53 }
 0xadd   :  { %1976 = vadd.xlane.f32.xlu1 %v1975_v25  ;;  %v1893_v15 = vpop.xlane.xlu1 %1892 }
 0xade   :  { %v7828_v14 = vsub.f32 %v7725_v56, %v1908_v58  ;;  %v1909_v54 = vmul.f32 0.03125, %v1893_v15  ;;  %v1978_v38 = vsel %vm148_vm0, %v1938_v21, 0.0  ;;  %v1939_v31 = vmul.f32 %v7822_v5, %v7822_v5 }
 0xadf   :  { %1979 = vadd.xlane.f32.xlu0 %v1978_v38 }
 0xae0   :  { %v7834_v35 = vsub.f32 %v7733_v51, %v1909_v54  ;;  %v1981_v46 = vsel %vm148_vm0, %v1939_v31, 0.0  ;;  %v1940_v43 = vmul.f32 %v7828_v14, %v7828_v14 }
 0xae1   :  { %1982 = vadd.xlane.f32.xlu1 %v1981_v46 }
 0xae2   :  { %v1984_v37 = vsel %vm148_vm0, %v1940_v43, 0.0  ;;  %v1941_v26 = vmul.f32 %v7834_v35, %v7834_v35 }
 0xae3   :  { %1985 = vadd.xlane.f32.xlu0 %v1984_v37 }
 0xae4   :  { %v1987_v36 = vsel %vm148_vm0, %v1941_v26, 0.0 }
 0xae5   :  { %1988 = vadd.xlane.f32.xlu1 %v1987_v36 }
 0xb28   :  { %v1944_v7 = vpop.xlane.xlu0 %1943 }
 0xb29   :  { %v1990_v55 = vmul.f32 0.03125, %v1944_v7 }
 0xb2a   :  { %v1947_v60 = vpop.xlane.xlu1 %1946 }
 0xb2b   :  { %v2006_v8 = vadd.f32 1e-05, %v1990_v55  ;;  %v1991_v2 = vmul.f32 0.03125, %v1947_v60 }
 0xb2c   :  { %v1950_v61 = vpop.xlane.xlu0 %1949 }
 0xb2d   :  { %5980 = vrsqrt.f32 %v2006_v8  ;;  %v2007_v30 = vadd.f32 1e-05, %v1991_v2  ;;  %v1992_v58 = vmul.f32 0.03125, %v1950_v61  ;;  %v7846_v8 = vld [vmem:[%s9347_s30] ss:$0 sm:$0xff] }
 0xb2e   :  { %v1953_v25 = vpop.xlane.xlu1 %1952 }
 0xb2f   :  { %5982 = vrsqrt.f32 %v2007_v30  ;;  %v2008_v21 = vadd.f32 1e-05, %v1992_v58  ;;  %v1993_v15 = vmul.f32 0.03125, %v1953_v25 }
 0xb30   :  { %v1956_v54 = vpop.xlane.xlu0 %1955 }
 0xb31   :  { %5984 = vrsqrt.f32 %v2008_v21  ;;  %v2009_v38 = vadd.f32 1e-05, %v1993_v15  ;;  %v1994_v31 = vmul.f32 0.03125, %v1956_v54 }
 0xb32   :  { %v1959_v46 = vpop.xlane.xlu1 %1958 }
 0xb33   :  { %5986 = vrsqrt.f32 %v2009_v38  ;;  %v2010_v43 = vadd.f32 1e-05, %v1994_v31  ;;  %v1995_v37 = vmul.f32 0.03125, %v1959_v46  ;;  %v7854_v38 = vld [vmem:[%s9292_s15] ss:$0 sm:$0xff] }
 0xb34   :  { %v1962_v26 = vpop.xlane.xlu0 %1961 }
 0xb35   :  { %5988 = vrsqrt.f32 %v2010_v43  ;;  %v2011_v36 = vadd.f32 1e-05, %v1995_v37  ;;  %v1996_v7 = vmul.f32 0.03125, %v1962_v26 }
 0xb36   :  { %v1965_v55 = vpop.xlane.xlu1 %1964 }
 0xb37   :  { %v5981_v60 = vpop.eup %5980  ;;  %5990 = vrsqrt.f32 %v2011_v36  ;;  %v2012_v2 = vadd.f32 1e-05, %v1996_v7  ;;  %v1997_v61 = vmul.f32 0.03125, %v1965_v55 }
 0xb38   :  { %v2038_v30 = vmul.f32 %v5981_v60, %v7742_v13 }
 0xb39   :  { %v5983_v58 = vpop.eup %5982  ;;  %5992 = vrsqrt.f32 %v2012_v2  ;;  %v2013_v25 = vadd.f32 1e-05, %v1997_v61 }
 0xb3a   :  { %v2039_v21 = vmul.f32 %v5983_v58, %v7745_v49  ;;  %v2058_v15 = vmul.f32 %v7846_v8, %v2038_v30 }
 0xb3b   :  { %v5985_v54 = vpop.eup %5984  ;;  %5994 = vrsqrt.f32 %v2013_v25 }
 0xb3c   :  { %v2040_v31 = vmul.f32 %v5985_v54, %v7750_v27  ;;  %v2059_v46 = vmul.f32 %v7846_v8, %v2039_v21  ;;  %v2078_v49 = vadd.f32 %v7854_v38, %v2058_v15 }
 0xb3d   :  { %v5987_v43 = vpop.eup %5986 }
 0xb3e   :  { %v2060_v13 = vmul.f32 %v7846_v8, %v2040_v31  ;;  %v2041_v37 = vmul.f32 %v5987_v43, %v7756_v29  ;;  %v2079_v26 = vadd.f32 %v7854_v38, %v2059_v46 }
 0xb3f   :  { %v5989_v36 = vpop.eup %5988 }
 0xb40   :  { %v2061_v7 = vmul.f32 %v7846_v8, %v2041_v37  ;;  %v2094_v55 = vpack.c.bf16 %v2079_v26, %v2078_v49  ;;  %v2042_v60 = vmul.f32 %v5989_v36, %v7762_v6  ;;  %v2080_v27 = vadd.f32 %v7854_v38, %v2060_v13 }
 0xb41   :  { %v5991_v2 = vpop.eup %5990 }
 0xb42   :  { %5415 = vmatprep.mubr.msk.bf16.mxu0 %vm148_vm0, %v2094_v55  ;;  %v2081_v61 = vadd.f32 %v7854_v38, %v2061_v7  ;;  %v2043_v30 = vmul.f32 %v5991_v2, %v7768_v34  ;;  %v2062_v29 = vmul.f32 %v7846_v8, %v2042_v60 }
 0xb43   :  { %v5993_v58 = vpop.eup %5992 }
 0xb44   :  { %v2095_v25 = vpack.c.bf16 %v2081_v61, %v2080_v27  ;;  %v2063_v21 = vmul.f32 %v7846_v8, %v2043_v30  ;;  %v2044_v15 = vmul.f32 %v5993_v58, %v7774_v3  ;;  %v2082_v6 = vadd.f32 %v7854_v38, %v2062_v29 }
 0xb45   :  { %v5995_v54 = vpop.eup %5994 }
 0xb46   :  { %5416 = vmatmul.mubr.msk.bf16.vlgmr.msra.gmra.mrb[52].mxu0 %vm148_vm0, %v2095_v25  ;;  %v2083_v31 = vadd.f32 %v7854_v38, %v2063_v21  ;;  %v2045_v46 = vmul.f32 %v5995_v54, %v7780_v59  ;;  %v2064_v43 = vmul.f32 %v7846_v8, %v2044_v15 }
 0xb48   :  { %v2096_v34 = vpack.c.bf16 %v2083_v31, %v2082_v6  ;;  %v2065_v13 = vmul.f32 %v7846_v8, %v2045_v46  ;;  %v2084_v37 = vadd.f32 %v7854_v38, %v2064_v43 }
 0xb4a   :  { %5419 = vmatprep.mubr.msk.bf16.mxu0 %vm148_vm0, %v2096_v34  ;;  %v2085_v3 = vadd.f32 %v7854_v38, %v2065_v13 }
 0xb4c   :  { %v2097_v49 = vpack.c.bf16 %v2085_v3, %v2084_v37 }
 0xb4e   :  { %5420 = vmatmul.mubr.msk.bf16.gmra.mrb[56].mxu0 %vm148_vm0, %v2097_v49 }
 0xb64   :  { %v1968_v26 = vpop.xlane.xlu0 %1967 }
 0xb65   :  { %v1998_v36 = vmul.f32 0.03125, %v1968_v26 }
 0xb66   :  { %v1971_v7 = vpop.xlane.xlu1 %1970 }
 0xb67   :  { %v2014_v55 = vadd.f32 1e-05, %v1998_v36  ;;  %v1999_v60 = vmul.f32 0.03125, %v1971_v7 }
 0xb68   :  { %v1974_v59 = vpop.xlane.xlu0 %1973 }
 0xb69   :  { %5996 = vrsqrt.f32 %v2014_v55  ;;  %v2015_v2 = vadd.f32 1e-05, %v1999_v60  ;;  %v2000_v27 = vmul.f32 0.03125, %v1974_v59 }
 0xb6a   :  { %v1977_v61 = vpop.xlane.xlu1 %1976 }
 0xb6b   :  { %5998 = vrsqrt.f32 %v2015_v2  ;;  %v2016_v30 = vadd.f32 1e-05, %v2000_v27  ;;  %v2001_v29 = vmul.f32 0.03125, %v1977_v61 }
 0xb6c   :  { %v1980_v58 = vpop.xlane.xlu0 %1979 }
 0xb6d   :  { %6000 = vrsqrt.f32 %v2016_v30  ;;  %v2017_v25 = vadd.f32 1e-05, %v2001_v29  ;;  %v2002_v21 = vmul.f32 0.03125, %v1980_v58 }
 0xb6e   :  { %v1983_v15 = vpop.xlane.xlu1 %1982 }
 0xb6f   :  { %6002 = vrsqrt.f32 %v2017_v25  ;;  %v2018_v54 = vadd.f32 1e-05, %v2002_v21  ;;  %v2003_v6 = vmul.f32 0.03125, %v1983_v15 }
 0xb70   :  { %v1986_v31 = vpop.xlane.xlu0 %1985 }
 0xb71   :  { %6004 = vrsqrt.f32 %v2018_v54  ;;  %v2019_v46 = vadd.f32 1e-05, %v2003_v6  ;;  %v2004_v43 = vmul.f32 0.03125, %v1986_v31 }
 0xb72   :  { %v1989_v34 = vpop.xlane.xlu1 %1988 }
 0xb73   :  { %v5997_v13 = vpop.eup %5996  ;;  %6006 = vrsqrt.f32 %v2019_v46  ;;  %v2020_v37 = vadd.f32 1e-05, %v2004_v43  ;;  %v2005_v3 = vmul.f32 0.03125, %v1989_v34 }
 0xb74   :  { %v2046_v49 = vmul.f32 %v5997_v13, %v7796_v50 }
 0xb75   :  { %v5999_v26 = vpop.eup %5998  ;;  %6008 = vrsqrt.f32 %v2020_v37  ;;  %v2021_v36 = vadd.f32 1e-05, %v2005_v3 }
 0xb76   :  { %v2047_v7 = vmul.f32 %v5999_v26, %v7799_v33  ;;  %v2066_v55 = vmul.f32 %v7846_v8, %v2046_v49 }
 0xb77   :  { %v6001_v60 = vpop.eup %6000  ;;  %6010 = vrsqrt.f32 %v2021_v36 }
 0xb78   :  { %v2067_v59 = vmul.f32 %v7846_v8, %v2047_v7  ;;  %v2048_v2 = vmul.f32 %v6001_v60, %v7804_v12  ;;  %v2086_v61 = vadd.f32 %v7854_v38, %v2066_v55  ;;  %v5746_v55 = vld [vmem:[%s9293_s18] sm:$0xff]  }
 0xb79   :  { %v6003_v27 = vpop.eup %6002  ;;  %5431 = vmatprep.subr.bf16.mxu1 %v5746_v55 }
 0xb7a   :  { %v2087_v30 = vadd.f32 %v7854_v38, %v2067_v59  ;;  %v2049_v50 = vmul.f32 %v6003_v27, %v7810_v45  ;;  %v2068_v29 = vmul.f32 %v7846_v8, %v2048_v2  ;;  %5432 = vmatpush3.bf16.msra.mxu1 %v5746_v55 }
 0xb7b   :  { %v6005_v58 = vpop.eup %6004 }
 0xb7c   :  { %v2098_v25 = vpack.c.bf16 %v2087_v30, %v2086_v61  ;;  %v2069_v33 = vmul.f32 %v7846_v8, %v2049_v50  ;;  %v2050_v21 = vmul.f32 %v6005_v58, %v7816_v53  ;;  %v2088_v12 = vadd.f32 %v7854_v38, %v2068_v29 }
 0xb7d   :  { %v6007_v15 = vpop.eup %6006 }
 0xb7e   :  { %5423 = vmatprep.mubr.msk.bf16.mxu0 %vm148_vm0, %v2098_v25  ;;  %v2089_v54 = vadd.f32 %v7854_v38, %v2069_v33  ;;  %v2051_v6 = vmul.f32 %v6007_v15, %v7822_v5  ;;  %v2070_v31 = vmul.f32 %v7846_v8, %v2050_v21 }
 0xb7f   :  { %v6009_v45 = vpop.eup %6008 }
 0xb80   :  { %v2099_v46 = vpack.c.bf16 %v2089_v54, %v2088_v12  ;;  %v2071_v43 = vmul.f32 %v7846_v8, %v2051_v6  ;;  %v2052_v34 = vmul.f32 %v6009_v45, %v7828_v14  ;;  %v2090_v53 = vadd.f32 %v7854_v38, %v2070_v31 }
 0xb81   :  { %v6011_v13 = vpop.eup %6010 }
 0xb82   :  { %5424 = vmatmul.mubr.msk.bf16.gmra.mrb[60].mxu0 %vm148_vm0, %v2099_v46  ;;  %v2091_v37 = vadd.f32 %v7854_v38, %v2071_v43  ;;  %v2053_v3 = vmul.f32 %v6011_v13, %v7834_v35  ;;  %v2072_v49 = vmul.f32 %v7846_v8, %v2052_v34  ;;  %v5747_v35 = vld [vmem:[%s9293_s18 + $0x8] sm:$0xff]  }
 0xb83   :  { %5433 = vmatprep.subr.bf16.mxu1 %v5747_v35 }
 0xb84   :  { %v2100_v5 = vpack.c.bf16 %v2091_v37, %v2090_v53  ;;  %v2073_v26 = vmul.f32 %v7846_v8, %v2053_v3  ;;  %v2092_v36 = vadd.f32 %v7854_v38, %v2072_v49  ;;  %5434 = vmatpush3.bf16.msra.mxu1 %v5747_v35  ;;  %v7918_v8 = vld [vmem:[%s9294_s17] ss:$0 sm:$0xff] }
 0xb86   :  { %5427 = vmatprep.mubr.msk.bf16.mxu0 %vm148_vm0, %v2100_v5  ;;  %v2093_v14 = vadd.f32 %v7854_v38, %v2073_v26 }
 0xb88   :  { %v2101_v7 = vpack.c.bf16 %v2093_v14, %v2092_v36 }
 0xb8a   :  { %5428 = vmatmul.mubr.msk.bf16.gmra.mrb[64].mxu0 %vm148_vm0, %v2101_v7 }
 0xc19   :  { %v5417_v38 = vpop.f32.mrb[52].mxu0 }
 0xc1a   :  { %v2190_v60 = vadd.f32 %v5417_v38, %v7918_v8  ;;  %v2181_v59 = vpop.f32.mrb[53].mxu0 }
 0xc1b   :  { %v2182_v2 = vadd.f32 %v7918_v8, %v2181_v59  ;;  %v5418_v27 = vpop.f32.mrb[54].mxu0 }
 0xc1c   :  { %v2262_v61 = vmul.f32 0.70710677, %v2190_v60  ;;  %v2193_v30 = vadd.f32 %v5418_v27, %v7918_v8  ;;  %v2184_v50 = vpop.f32.mrb[55].mxu0  ;;  %v2246_v14 = vmul.f32 0.5, %v2190_v60 }
 0xc1d   :  { %v2260_v29 = vmul.f32 0.70710677, %v2182_v2  ;;  %v2185_v58 = vadd.f32 %v7918_v8, %v2184_v50  ;;  %v2244_v35 = vmul.f32 0.5, %v2182_v2 }
 0xc1e   :  { %6012 = verf.f32 %v2262_v61  ;;  %v2263_v25 = vmul.f32 0.70710677, %v2193_v30  ;;  %v2247_v7 = vmul.f32 0.5, %v2193_v30 }
 0xc1f   :  { %6014 = verf.f32 %v2260_v29  ;;  %v2261_v33 = vmul.f32 0.70710677, %v2185_v58  ;;  %v2245_v38 = vmul.f32 0.5, %v2185_v58 }
 0xc20   :  { %6016 = verf.f32 %v2263_v25 }
 0xc21   :  { %6018 = verf.f32 %v2261_v33  ;;  %v5421_v21 = vpop.f32.mrb[56].mxu0 }
 0xc22   :  { %v2206_v15 = vadd.f32 %v5421_v21, %v7918_v8  ;;  %v2197_v12 = vpop.f32.mrb[57].mxu0 }
 0xc23   :  { %v2198_v54 = vadd.f32 %v7918_v8, %v2197_v12  ;;  %v5422_v6 = vpop.f32.mrb[58].mxu0 }
 0xc24   :  { %v2266_v31 = vmul.f32 0.70710677, %v2206_v15  ;;  %v2209_v45 = vadd.f32 %v5422_v6, %v7918_v8  ;;  %v2200_v46 = vpop.f32.mrb[59].mxu0  ;;  %v2250_v60 = vmul.f32 0.5, %v2206_v15 }
 0xc25   :  { %v2264_v43 = vmul.f32 0.70710677, %v2198_v54  ;;  %v2201_v34 = vadd.f32 %v7918_v8, %v2200_v46  ;;  %v2248_v2 = vmul.f32 0.5, %v2198_v54 }
 0xc26   :  { %6020 = verf.f32 %v2266_v31  ;;  %v2267_v13 = vmul.f32 0.70710677, %v2209_v45  ;;  %v2251_v30 = vmul.f32 0.5, %v2209_v45 }
 0xc27   :  { %6022 = verf.f32 %v2264_v43  ;;  %v2265_v53 = vmul.f32 0.70710677, %v2201_v34  ;;  %v2249_v58 = vmul.f32 0.5, %v2201_v34 }
 0xc28   :  { %v6013_v37 = vpop.eup %6012  ;;  %6024 = verf.f32 %v2267_v13 }
 0xc29   :  { %v6015_v3 = vpop.eup %6014  ;;  %v2294_v49 = vadd.f32 1.0, %v6013_v37  ;;  %6026 = verf.f32 %v2265_v53 }
 0xc2a   :  { %v6017_v5 = vpop.eup %6016  ;;  %v2292_v26 = vadd.f32 1.0, %v6015_v3 }
 0xc2b   :  { %v6019_v36 = vpop.eup %6018  ;;  %v2295_v55 = vadd.f32 1.0, %v6017_v5  ;;  %v2310_v27 = vmul.f32 %v2294_v49, %v2246_v14 }
 0xc2c   :  { %v2293_v59 = vadd.f32 1.0, %v6019_v36  ;;  %v2308_v50 = vmul.f32 %v2292_v26, %v2244_v35 }
 0xc2d   :  { %v2311_v61 = vmul.f32 %v2295_v55, %v2247_v7 }
 0xc2e   :  { %v2309_v29 = vmul.f32 %v2293_v59, %v2245_v38 }
 0xc2f   :  { %v2325_v25 = vpack.c.bf16 %v2311_v61, %v2310_v27 }
 0xc30   :  { %v6021_v33 = vpop.eup %6020  ;;  %v2324_v21 = vpack.c.bf16 %v2309_v29, %v2308_v50 }
 0xc31   :  { %v6023_v12 = vpop.eup %6022  ;;  %v2298_v6 = vadd.f32 1.0, %v6021_v33 }
 0xc32   :  { %v6025_v31 = vpop.eup %6024  ;;  %v2296_v46 = vadd.f32 1.0, %v6023_v12  ;;  %5435 = vmatprep.mubr.msk.bf16.mxu1 %vm148_vm0, %v2324_v21 }
 0xc33   :  { %v6027_v43 = vpop.eup %6026  ;;  %v2299_v13 = vadd.f32 1.0, %v6025_v31  ;;  %5436 = vmatmul.mubr.msk.bf16.vlgmr.msra.gmra.mrb[28].mxu1 %vm148_vm0, %v2325_v25  ;;  %v2314_v37 = vmul.f32 %v2298_v6, %v2250_v60 }
 0xc34   :  { %v2297_v53 = vadd.f32 1.0, %v6027_v43  ;;  %v2312_v49 = vmul.f32 %v2296_v46, %v2248_v2 }
 0xc35   :  { %v2315_v3 = vmul.f32 %v2299_v13, %v2251_v30 }
 0xc36   :  { %v2313_v5 = vmul.f32 %v2297_v53, %v2249_v58 }
 0xc37   :  { %v2327_v26 = vpack.c.bf16 %v2315_v3, %v2314_v37 }
 0xc38   :  { %v2326_v36 = vpack.c.bf16 %v2313_v5, %v2312_v49 }
 0xc3a   :  { %5439 = vmatprep.mubr.msk.bf16.mxu1 %vm148_vm0, %v2326_v36 }
 0xc3b   :  { %5440 = vmatmul.mubr.msk.bf16.gmra.mrb[32].mxu1 %vm148_vm0, %v2327_v26 }
 0xc55   :  { %v5425_v14 = vpop.f32.mrb[60].mxu0 }
 0xc56   :  { %v2222_v15 = vadd.f32 %v5425_v14, %v7918_v8  ;;  %v2213_v45 = vpop.f32.mrb[61].mxu0 }
 0xc57   :  { %v2214_v7 = vadd.f32 %v7918_v8, %v2213_v45  ;;  %v5426_v55 = vpop.f32.mrb[62].mxu0 }
 0xc58   :  { %v2270_v54 = vmul.f32 0.70710677, %v2222_v15  ;;  %v2225_v34 = vadd.f32 %v5426_v55, %v7918_v8  ;;  %v2216_v35 = vpop.f32.mrb[63].mxu0  ;;  %v2254_v49 = vmul.f32 0.5, %v2222_v15 }
 0xc59   :  { %v2268_v38 = vmul.f32 0.70710677, %v2214_v7  ;;  %v2217_v59 = vadd.f32 %v7918_v8, %v2216_v35  ;;  %v2252_v36 = vmul.f32 0.5, %v2214_v7 }
 0xc5a   :  { %6028 = verf.f32 %v2270_v54  ;;  %v2271_v27 = vmul.f32 0.70710677, %v2225_v34  ;;  %v2255_v5 = vmul.f32 0.5, %v2225_v34 }
 0xc5b   :  { %6030 = verf.f32 %v2268_v38  ;;  %v2269_v61 = vmul.f32 0.70710677, %v2217_v59  ;;  %v2253_v14 = vmul.f32 0.5, %v2217_v59 }
 0xc5c   :  { %6032 = verf.f32 %v2271_v27 }
 0xc5d   :  { %6034 = verf.f32 %v2269_v61  ;;  %v5429_v50 = vpop.f32.mrb[64].mxu0 }
 0xc5e   :  { %v2238_v29 = vadd.f32 %v5429_v50, %v7918_v8  ;;  %v2229_v25 = vpop.f32.mrb[65].mxu0 }
 0xc5f   :  { %v2230_v33 = vadd.f32 %v7918_v8, %v2229_v25  ;;  %v5430_v21 = vpop.f32.mrb[66].mxu0 }
 0xc60   :  { %v2274_v12 = vmul.f32 0.70710677, %v2238_v29  ;;  %v2241_v6 = vadd.f32 %v5430_v21, %v7918_v8  ;;  %v2232_v31 = vpop.f32.mrb[67].mxu0  ;;  %v2258_v15 = vmul.f32 0.5, %v2238_v29  ;;  %v7947_v29 = vld [vmem:[%s9295_s19] ss:$0 sm:$0xff] }
 0xc61   :  { %v2272_v46 = vmul.f32 0.70710677, %v2230_v33  ;;  %v2233_v43 = vadd.f32 %v7918_v8, %v2232_v31  ;;  %v2256_v7 = vmul.f32 0.5, %v2230_v33 }
 0xc62   :  { %6036 = verf.f32 %v2274_v12  ;;  %v2275_v60 = vmul.f32 0.70710677, %v2241_v6  ;;  %v2259_v34 = vmul.f32 0.5, %v2241_v6 }
 0xc63   :  { %6038 = verf.f32 %v2272_v46  ;;  %v2273_v30 = vmul.f32 0.70710677, %v2233_v43  ;;  %v2257_v59 = vmul.f32 0.5, %v2233_v43 }
 0xc64   :  { %v6029_v13 = vpop.eup %6028  ;;  %6040 = verf.f32 %v2275_v60 }
 0xc65   :  { %v6031_v2 = vpop.eup %6030  ;;  %v2302_v58 = vadd.f32 1.0, %v6029_v13  ;;  %6042 = verf.f32 %v2273_v30 }
 0xc66   :  { %v6033_v53 = vpop.eup %6032  ;;  %v2300_v37 = vadd.f32 1.0, %v6031_v2 }
 0xc67   :  { %v6035_v3 = vpop.eup %6034  ;;  %v2303_v26 = vadd.f32 1.0, %v6033_v53  ;;  %v2318_v55 = vmul.f32 %v2302_v58, %v2254_v49 }
 0xc68   :  { %v2301_v45 = vadd.f32 1.0, %v6035_v3  ;;  %v2316_v54 = vmul.f32 %v2300_v37, %v2252_v36 }
 0xc69   :  { %v2319_v8 = vmul.f32 %v2303_v26, %v2255_v5 }
 0xc6a   :  { %v2317_v35 = vmul.f32 %v2301_v45, %v2253_v14 }
 0xc6b   :  { %v2329_v38 = vpack.c.bf16 %v2319_v8, %v2318_v55 }
 0xc6c   :  { %v6037_v27 = vpop.eup %6036  ;;  %v2328_v61 = vpack.c.bf16 %v2317_v35, %v2316_v54 }
 0xc6d   :  { %v6039_v50 = vpop.eup %6038  ;;  %v2306_v25 = vadd.f32 1.0, %v6037_v27 }
 0xc6e   :  { %v6041_v21 = vpop.eup %6040  ;;  %v2304_v12 = vadd.f32 1.0, %v6039_v50  ;;  %5443 = vmatprep.mubr.msk.bf16.mxu1 %vm148_vm0, %v2328_v61 }
 0xc6f   :  { %v6043_v31 = vpop.eup %6042  ;;  %v2307_v46 = vadd.f32 1.0, %v6041_v21  ;;  %5444 = vmatmul.mubr.msk.bf16.gmra.mrb[36].mxu1 %vm148_vm0, %v2329_v38  ;;  %v2322_v30 = vmul.f32 %v2306_v25, %v2258_v15 }
 0xc70   :  { %v2305_v60 = vadd.f32 1.0, %v6043_v31  ;;  %v2320_v2 = vmul.f32 %v2304_v12, %v2256_v7 }
 0xc71   :  { %v2323_v13 = vmul.f32 %v2307_v46, %v2259_v34 }
 0xc72   :  { %v2321_v58 = vmul.f32 %v2305_v60, %v2257_v59 }
 0xc73   :  { %v2331_v53 = vpack.c.bf16 %v2323_v13, %v2322_v30 }
 0xc74   :  { %v2330_v37 = vpack.c.bf16 %v2321_v58, %v2320_v2 }
 0xc76   :  { %5447 = vmatprep.mubr.msk.bf16.mxu1 %vm148_vm0, %v2330_v37 }
 0xc77   :  { %5448 = vmatmul.mubr.msk.bf16.gmra.mrb[40].mxu1 %vm148_vm0, %v2331_v53 }
 0xd06   :  { %v5437_v6 = vpop.f32.mrb[28].mxu1 }
 0xd07   :  { %v2411_v3 = vpop.f32.mrb[29].mxu1  ;;  %v2420_v33 = vadd.f32 %v5437_v6, %v7947_v29 }
 0xd08   :  { %v2412_v43 = vadd.f32 %v7947_v29, %v2411_v3  ;;  %v5438_v49 = vpop.f32.mrb[30].mxu1 }
 0xd09   :  { %v2414_v5 = vpop.f32.mrb[31].mxu1  ;;  %v2423_v36 = vadd.f32 %v5438_v49, %v7947_v29  ;;  %v7957_v45 = vadd.f32 %v2420_v33, %v7653_v4 }
 0xd0a   :  { %v7952_v26 = vadd.f32 %v2412_v43, %v7648_v28  ;;  %v2415_v14 = vadd.f32 %v7947_v29, %v2414_v5 }
 0xd0b   :  { %v7965_v54 = vadd.f32 %v2423_v36, %v7661_v1 }
 0xd0c   :  { %v7960_v55 = vadd.f32 %v2415_v14, %v7656_v32  ;;  %v2492_v8 = vsel %vm148_vm0, %v7952_v26, 0.0  ;;  %v2498_v32 = vsel %vm148_vm0, %v7957_v45, 0.0 }
 0xd0d   :  { %2493 = vadd.xlane.f32.xlu0 %v2492_v8  ;;  %v2501_v12 = vsel %vm148_vm0, %v7965_v54, 0.0 }
 0xd0e   :  { %v5441_v35 = vpop.f32.mrb[32].mxu1  ;;  %v2495_v28 = vsel %vm148_vm0, %v7960_v55, 0.0 }
 0xd0f   :  { %2496 = vadd.xlane.f32.xlu1 %v2495_v28  ;;  %v2427_v38 = vpop.f32.mrb[33].mxu1  ;;  %v2436_v27 = vadd.f32 %v5441_v35, %v7947_v29 }
 0xd10   :  { %v2428_v4 = vadd.f32 %v7947_v29, %v2427_v38  ;;  %v5442_v61 = vpop.f32.mrb[34].mxu1 }
 0xd11   :  { %2499 = vadd.xlane.f32.xlu0 %v2498_v32  ;;  %v2430_v50 = vpop.f32.mrb[35].mxu1  ;;  %v2439_v1 = vadd.f32 %v5442_v61, %v7947_v29  ;;  %v7981_v31 = vadd.f32 %v2436_v27, %v7677_v22 }
 0xd12   :  { %v7974_v25 = vadd.f32 %v2428_v4, %v7670_v11  ;;  %v2431_v21 = vadd.f32 %v7947_v29, %v2430_v50 }
 0xd13   :  { %2502 = vadd.xlane.f32.xlu1 %v2501_v12  ;;  %9348 = vst [vmem:[#allocation5_spill] sm:$0xff] %v7981_v31  ;;  %v7989_v11 = vadd.f32 %v2439_v1, %v7685_v19  ;;  %v2510_v7 = vsel %vm148_vm0, %v7981_v31, 0.0 }
 0xd14   :  { %v7984_v15 = vadd.f32 %v2431_v21, %v7680_v39  ;;  %v2504_v34 = vsel %vm148_vm0, %v7974_v25, 0.0 }
 0xd15   :  { %2505 = vadd.xlane.f32.xlu0 %v2504_v34  ;;  %9350 = vst [vmem:[#allocation7_spill] sm:$0xff] %v7989_v11  ;;  %v2513_v22 = vsel %vm148_vm0, %v7989_v11, 0.0 }
 0xd16   :  { %9349 = vst [vmem:[#allocation6_spill] sm:$0xff] %v7984_v15  ;;  %v2507_v46 = vsel %vm148_vm0, %v7984_v15, 0.0 }
 0xd17   :  { %2508 = vadd.xlane.f32.xlu1 %v2507_v46 }
 0xd19   :  { %2511 = vadd.xlane.f32.xlu0 %v2510_v7 }
 0xd1b   :  { %2514 = vadd.xlane.f32.xlu1 %v2513_v22 }
 0xd42   :  { %v5445_v39 = vpop.f32.mrb[36].mxu1 }
 0xd43   :  { %v2443_v59 = vpop.f32.mrb[37].mxu1  ;;  %v2452_v60 = vadd.f32 %v5445_v39, %v7947_v29 }
 0xd44   :  { %v2444_v30 = vadd.f32 %v7947_v29, %v2443_v59  ;;  %v5446_v19 = vpop.f32.mrb[38].mxu1 }
 0xd45   :  { %v2446_v13 = vpop.f32.mrb[39].mxu1  ;;  %v2455_v58 = vadd.f32 %v5446_v19, %v7947_v29  ;;  %v8005_v37 = vadd.f32 %v2452_v60, %v7701_v48 }
 0xd46   :  { %v8000_v2 = vadd.f32 %v2444_v30, %v7696_v20  ;;  %v2447_v53 = vadd.f32 %v7947_v29, %v2446_v13 }
 0xd47   :  { %9352 = vst [vmem:[#allocation9_spill] sm:$0xff] %v8005_v37  ;;  %v8013_v33 = vadd.f32 %v2455_v58, %v7709_v18 }
 0xd48   :  { %9351 = vst [vmem:[#allocation8_spill] sm:$0xff] %v8000_v2  ;;  %v8008_v6 = vadd.f32 %v2447_v53, %v7704_v63  ;;  %v2516_v3 = vsel %vm148_vm0, %v8000_v2, 0.0  ;;  %v2522_v63 = vsel %vm148_vm0, %v8005_v37, 0.0 }
 0xd49   :  { %2517 = vadd.xlane.f32.xlu0 %v2516_v3  ;;  %9354 = vst [vmem:[#allocation11_spill] sm:$0xff] %v8013_v33  ;;  %v2525_v28 = vsel %vm148_vm0, %v8013_v33, 0.0 }
 0xd4a   :  { %9353 = vst [vmem:[#allocation10_spill] sm:$0xff] %v8008_v6  ;;  %v5449_v43 = vpop.f32.mrb[40].mxu1  ;;  %v2519_v20 = vsel %vm148_vm0, %v8008_v6, 0.0 }
 0xd4b   :  { %2520 = vadd.xlane.f32.xlu1 %v2519_v20  ;;  %v2459_v49 = vpop.f32.mrb[41].mxu1  ;;  %v2468_v5 = vadd.f32 %v5449_v43, %v7947_v29 }
 0xd4c   :  { %v2460_v48 = vadd.f32 %v7947_v29, %v2459_v49  ;;  %v5450_v36 = vpop.f32.mrb[42].mxu1 }
 0xd4d   :  { %2523 = vadd.xlane.f32.xlu0 %v2522_v63  ;;  %v2462_v14 = vpop.f32.mrb[43].mxu1  ;;  %v2471_v18 = vadd.f32 %v5450_v36, %v7947_v29  ;;  %v8029_v38 = vadd.f32 %v2468_v5, %v7725_v56 }
 0xd4e   :  { %v8022_v8 = vadd.f32 %v2460_v48, %v7718_v24  ;;  %v2463_v35 = vadd.f32 %v7947_v29, %v2462_v14 }
 0xd4f   :  { %2526 = vadd.xlane.f32.xlu1 %v2525_v28  ;;  %9356 = vst [vmem:[#allocation13_spill] sm:$0xff] %v8029_v38  ;;  %v8037_v24 = vadd.f32 %v2471_v18, %v7733_v51  ;;  %v2534_v61 = vsel %vm148_vm0, %v8029_v38, 0.0 }
 0xd50   :  { %9355 = vst [vmem:[#allocation12_spill] sm:$0xff] %v8022_v8  ;;  %v8032_v27 = vadd.f32 %v2463_v35, %v7728_v9  ;;  %v2528_v4 = vsel %vm148_vm0, %v8022_v8, 0.0 }
 0xd51   :  { %2529 = vadd.xlane.f32.xlu0 %v2528_v4  ;;  %9358 = vst [vmem:[#allocation15_spill] sm:$0xff] %v8037_v24  ;;  %v2537_v56 = vsel %vm148_vm0, %v8037_v24, 0.0 }
 0xd52   :  { %9357 = vst [vmem:[#allocation14_spill] sm:$0xff] %v8032_v27  ;;  %v2531_v29 = vsel %vm148_vm0, %v8032_v27, 0.0 }
 0xd53   :  { %2532 = vadd.xlane.f32.xlu1 %v2531_v29 }
 0xd55   :  { %2535 = vadd.xlane.f32.xlu0 %v2534_v61 }
 0xd57   :  { %2538 = vadd.xlane.f32.xlu1 %v2537_v56 }
 0xd9a   :  { %v2494_v9 = vpop.xlane.xlu0 %2493 }
 0xd9b   :  { %v2540_v32 = vmul.f32 0.03125, %v2494_v9 }
 0xd9c   :  { %v2497_v50 = vpop.xlane.xlu1 %2496 }
 0xd9d   :  { %v8046_v1 = vsub.f32 %v7952_v26, %v2540_v32  ;;  %v2541_v51 = vmul.f32 0.03125, %v2497_v50 }
 0xd9e   :  { %v2500_v21 = vpop.xlane.xlu0 %2499 }
 0xd9f   :  { %v8049_v12 = vsub.f32 %v7960_v55, %v2541_v51  ;;  %v2542_v34 = vmul.f32 0.03125, %v2500_v21  ;;  %v2572_v46 = vmul.f32 %v8046_v1, %v8046_v1 }
 0xda0   :  { %v2503_v7 = vpop.xlane.xlu1 %2502 }
 0xda1   :  { %v8054_v22 = vsub.f32 %v7957_v45, %v2542_v34  ;;  %v2543_v39 = vmul.f32 0.03125, %v2503_v7  ;;  %v2588_v59 = vsel %vm148_vm0, %v2572_v46, 0.0  ;;  %v2573_v60 = vmul.f32 %v8049_v12, %v8049_v12  ;;  %v5748_v34 = vld [vmem:[%s9341_s28 + $0x10] sm:$0xff]   ;;  %v5749_v46 = vld [vmem:[%s9341_s28 + $0x18] sm:$0xff]  }
 0xda2   :  { %2589 = vadd.xlane.f32.xlu0 %v2588_v59  ;;  %v2506_v30 = vpop.xlane.xlu0 %2505  ;;  %5451 = vmatprep.subr.bf16.mxu0 %v5748_v34 }
 0xda3   :  { %v8060_v19 = vsub.f32 %v7965_v54, %v2543_v39  ;;  %v2544_v13 = vmul.f32 0.03125, %v2506_v30  ;;  %v2591_v58 = vsel %vm148_vm0, %v2573_v60, 0.0  ;;  %v2574_v53 = vmul.f32 %v8054_v22, %v8054_v22  ;;  %5452 = vmatpush3.bf16.msra.mxu0 %v5748_v34 }
 0xda4   :  { %v2509_v3 = vpop.xlane.xlu1 %2508  ;;  %2592 = vadd.xlane.f32.xlu1 %v2591_v58  ;;  %5453 = vmatprep.subr.bf16.mxu0 %v5749_v46 }
 0xda5   :  { %v8066_v43 = vsub.f32 %v7974_v25, %v2544_v13  ;;  %v2545_v20 = vmul.f32 0.03125, %v2509_v3  ;;  %v2594_v49 = vsel %vm148_vm0, %v2574_v53, 0.0  ;;  %v2575_v5 = vmul.f32 %v8060_v19, %v8060_v19 }
 0xda6   :  { %2595 = vadd.xlane.f32.xlu0 %v2594_v49  ;;  %v2512_v48 = vpop.xlane.xlu0 %2511 }
 0xda7   :  { %v8072_v36 = vsub.f32 %v7984_v15, %v2545_v20  ;;  %v2546_v63 = vmul.f32 0.03125, %v2512_v48  ;;  %v2597_v14 = vsel %vm148_vm0, %v2575_v5, 0.0  ;;  %v2576_v18 = vmul.f32 %v8066_v43, %v8066_v43  ;;  %5454 = vmatpush3.bf16.msra.mxu0 %v5749_v46 }
 0xda8   :  { %v2515_v35 = vpop.xlane.xlu1 %2514  ;;  %2598 = vadd.xlane.f32.xlu1 %v2597_v14 }
 0xda9   :  { %v8078_v28 = vsub.f32 %v7981_v31, %v2546_v63  ;;  %v2547_v4 = vmul.f32 0.03125, %v2515_v35  ;;  %v2600_v29 = vsel %vm148_vm0, %v2576_v18, 0.0  ;;  %v2577_v61 = vmul.f32 %v8072_v36, %v8072_v36 }
 0xdaa   :  { %2601 = vadd.xlane.f32.xlu0 %v2600_v29 }
 0xdab   :  { %v8084_v56 = vsub.f32 %v7989_v11, %v2547_v4  ;;  %v2603_v9 = vsel %vm148_vm0, %v2577_v61, 0.0  ;;  %v2578_v32 = vmul.f32 %v8078_v28, %v8078_v28 }
 0xdac   :  { %2604 = vadd.xlane.f32.xlu1 %v2603_v9 }
 0xdad   :  { %v2606_v50 = vsel %vm148_vm0, %v2578_v32, 0.0  ;;  %v2579_v51 = vmul.f32 %v8084_v56, %v8084_v56 }
 0xdae   :  { %2607 = vadd.xlane.f32.xlu0 %v2606_v50 }
 0xdaf   :  { %v2609_v21 = vsel %vm148_vm0, %v2579_v51, 0.0 }
 0xdb0   :  { %2610 = vadd.xlane.f32.xlu1 %v2609_v21 }
 0xdd6   :  { %v2518_v7 = vpop.xlane.xlu0 %2517 }
 0xdd7   :  { %v2548_v39 = vmul.f32 0.03125, %v2518_v7 }
 0xdd8   :  { %v2521_v59 = vpop.xlane.xlu1 %2520 }
 0xdd9   :  { %v8100_v60 = vsub.f32 %v8000_v2, %v2548_v39  ;;  %v2549_v30 = vmul.f32 0.03125, %v2521_v59 }
 0xdda   :  { %v2524_v13 = vpop.xlane.xlu0 %2523 }
 0xddb   :  { %v8103_v58 = vsub.f32 %v8008_v6, %v2549_v30  ;;  %v2550_v53 = vmul.f32 0.03125, %v2524_v13  ;;  %v2580_v3 = vmul.f32 %v8100_v60, %v8100_v60 }
 0xddc   :  { %v2527_v20 = vpop.xlane.xlu1 %2526 }
 0xddd   :  { %v8108_v49 = vsub.f32 %v8005_v37, %v2550_v53  ;;  %v2551_v5 = vmul.f32 0.03125, %v2527_v20  ;;  %v2612_v48 = vsel %vm148_vm0, %v2580_v3, 0.0  ;;  %v2581_v63 = vmul.f32 %v8103_v58, %v8103_v58 }
 0xdde   :  { %2613 = vadd.xlane.f32.xlu0 %v2612_v48  ;;  %v2530_v14 = vpop.xlane.xlu0 %2529 }
 0xddf   :  { %v8114_v18 = vsub.f32 %v8013_v33, %v2551_v5  ;;  %v2552_v35 = vmul.f32 0.03125, %v2530_v14  ;;  %v2615_v4 = vsel %vm148_vm0, %v2581_v63, 0.0  ;;  %v2582_v29 = vmul.f32 %v8108_v49, %v8108_v49 }
 0xde0   :  { %2616 = vadd.xlane.f32.xlu1 %v2615_v4  ;;  %v2533_v61 = vpop.xlane.xlu1 %2532 }
 0xde1   :  { %v8120_v9 = vsub.f32 %v8022_v8, %v2552_v35  ;;  %v2553_v32 = vmul.f32 0.03125, %v2533_v61  ;;  %v2618_v50 = vsel %vm148_vm0, %v2582_v29, 0.0  ;;  %v2583_v51 = vmul.f32 %v8114_v18, %v8114_v18 }
 0xde2   :  { %2619 = vadd.xlane.f32.xlu0 %v2618_v50  ;;  %v2536_v21 = vpop.xlane.xlu0 %2535 }
 0xde3   :  { %v8126_v34 = vsub.f32 %v8032_v27, %v2553_v32  ;;  %v2554_v46 = vmul.f32 0.03125, %v2536_v21  ;;  %v2621_v7 = vsel %vm148_vm0, %v2583_v51, 0.0  ;;  %v2584_v39 = vmul.f32 %v8120_v9, %v8120_v9 }
 0xde4   :  { %2622 = vadd.xlane.f32.xlu1 %v2621_v7  ;;  %v2539_v59 = vpop.xlane.xlu1 %2538 }
 0xde5   :  { %v8132_v30 = vsub.f32 %v8029_v38, %v2554_v46  ;;  %v2555_v13 = vmul.f32 0.03125, %v2539_v59  ;;  %v2624_v53 = vsel %vm148_vm0, %v2584_v39, 0.0  ;;  %v2585_v3 = vmul.f32 %v8126_v34, %v8126_v34 }
 0xde6   :  { %2625 = vadd.xlane.f32.xlu0 %v2624_v53 }
 0xde7   :  { %v8138_v20 = vsub.f32 %v8037_v24, %v2555_v13  ;;  %v2627_v5 = vsel %vm148_vm0, %v2585_v3, 0.0  ;;  %v2586_v48 = vmul.f32 %v8132_v30, %v8132_v30 }
 0xde8   :  { %2628 = vadd.xlane.f32.xlu1 %v2627_v5 }
 0xde9   :  { %v2630_v63 = vsel %vm148_vm0, %v2586_v48, 0.0  ;;  %v2587_v14 = vmul.f32 %v8138_v20, %v8138_v20 }
 0xdea   :  { %2631 = vadd.xlane.f32.xlu0 %v2630_v63 }
 0xdeb   :  { %v2633_v35 = vsel %vm148_vm0, %v2587_v14, 0.0 }
 0xdec   :  { %2634 = vadd.xlane.f32.xlu1 %v2633_v35 }
 0xe2f   :  { %v2590_v4 = vpop.xlane.xlu0 %2589 }
 0xe30   :  { %v2636_v29 = vmul.f32 0.03125, %v2590_v4 }
 0xe31   :  { %v2593_v61 = vpop.xlane.xlu1 %2592 }
 0xe32   :  { %v2652_v32 = vadd.f32 1e-05, %v2636_v29  ;;  %v2637_v50 = vmul.f32 0.03125, %v2593_v61 }
 0xe33   :  { %v2596_v51 = vpop.xlane.xlu0 %2595 }
 0xe34   :  { %6044 = vrsqrt.f32 %v2652_v32  ;;  %v2653_v21 = vadd.f32 1e-05, %v2637_v50  ;;  %v2638_v46 = vmul.f32 0.03125, %v2596_v51  ;;  %v8150_v32 = vld [vmem:[%s9342_s21 + $0x1] ss:$0 sm:$0xff] }
 0xe35   :  { %v2599_v7 = vpop.xlane.xlu1 %2598 }
 0xe36   :  { %6046 = vrsqrt.f32 %v2653_v21  ;;  %v2654_v39 = vadd.f32 1e-05, %v2638_v46  ;;  %v2639_v59 = vmul.f32 0.03125, %v2599_v7 }
 0xe37   :  { %v2602_v13 = vpop.xlane.xlu0 %2601 }
 0xe38   :  { %6048 = vrsqrt.f32 %v2654_v39  ;;  %v2655_v53 = vadd.f32 1e-05, %v2639_v59  ;;  %v2640_v3 = vmul.f32 0.03125, %v2602_v13 }
 0xe39   :  { %v2605_v5 = vpop.xlane.xlu1 %2604 }
 0xe3a   :  { %6050 = vrsqrt.f32 %v2655_v53  ;;  %v2656_v48 = vadd.f32 1e-05, %v2640_v3  ;;  %v2641_v63 = vmul.f32 0.03125, %v2605_v5  ;;  %v8158_v53 = vld [vmem:[%s9343_s24 + $0x1] ss:$0 sm:$0xff] }
 0xe3b   :  { %v2608_v14 = vpop.xlane.xlu0 %2607 }
 0xe3c   :  { %6052 = vrsqrt.f32 %v2656_v48  ;;  %v2657_v35 = vadd.f32 1e-05, %v2641_v63  ;;  %v2642_v4 = vmul.f32 0.03125, %v2608_v14 }
 0xe3d   :  { %v2611_v29 = vpop.xlane.xlu1 %2610 }
 0xe3e   :  { %v6045_v61 = vpop.eup %6044  ;;  %6054 = vrsqrt.f32 %v2657_v35  ;;  %v2658_v50 = vadd.f32 1e-05, %v2642_v4  ;;  %v2643_v51 = vmul.f32 0.03125, %v2611_v29 }
 0xe3f   :  { %v2684_v21 = vmul.f32 %v6045_v61, %v8046_v1 }
 0xe40   :  { %v6047_v46 = vpop.eup %6046  ;;  %6056 = vrsqrt.f32 %v2658_v50  ;;  %v2659_v7 = vadd.f32 1e-05, %v2643_v51 }
 0xe41   :  { %v2685_v39 = vmul.f32 %v6047_v46, %v8049_v12  ;;  %v2704_v59 = vmul.f32 %v8150_v32, %v2684_v21 }
 0xe42   :  { %v6049_v13 = vpop.eup %6048  ;;  %6058 = vrsqrt.f32 %v2659_v7 }
 0xe43   :  { %v2686_v3 = vmul.f32 %v6049_v13, %v8054_v22  ;;  %v2705_v5 = vmul.f32 %v8150_v32, %v2685_v39  ;;  %v2724_v12 = vadd.f32 %v8158_v53, %v2704_v59 }
 0xe44   :  { %v6051_v48 = vpop.eup %6050 }
 0xe45   :  { %v2706_v1 = vmul.f32 %v8150_v32, %v2686_v3  ;;  %v2687_v63 = vmul.f32 %v6051_v48, %v8060_v19  ;;  %v2725_v14 = vadd.f32 %v8158_v53, %v2705_v5 }
 0xe46   :  { %v6053_v35 = vpop.eup %6052 }
 0xe47   :  { %v2707_v4 = vmul.f32 %v8150_v32, %v2687_v63  ;;  %v2740_v29 = vpack.c.bf16 %v2725_v14, %v2724_v12  ;;  %v2688_v61 = vmul.f32 %v6053_v35, %v8066_v43  ;;  %v2726_v22 = vadd.f32 %v8158_v53, %v2706_v1 }
 0xe48   :  { %v6055_v50 = vpop.eup %6054 }
 0xe49   :  { %v2727_v51 = vadd.f32 %v8158_v53, %v2707_v4  ;;  %5455 = vmatprep.mubr.msk.bf16.mxu0 %vm148_vm0, %v2740_v29  ;;  %v2689_v21 = vmul.f32 %v6055_v50, %v8072_v36  ;;  %v2708_v19 = vmul.f32 %v8150_v32, %v2688_v61 }
 0xe4a   :  { %v6057_v46 = vpop.eup %6056 }
 0xe4b   :  { %v2741_v7 = vpack.c.bf16 %v2727_v51, %v2726_v22  ;;  %v2709_v39 = vmul.f32 %v8150_v32, %v2689_v21  ;;  %v2690_v59 = vmul.f32 %v6057_v46, %v8078_v28  ;;  %v2728_v43 = vadd.f32 %v8158_v53, %v2708_v19 }
 0xe4c   :  { %v6059_v13 = vpop.eup %6058 }
 0xe4d   :  { %5456 = vmatmul.mubr.msk.bf16.vlgmr.msra.gmra.mrb[68].mxu0 %vm148_vm0, %v2741_v7  ;;  %v2729_v3 = vadd.f32 %v8158_v53, %v2709_v39  ;;  %v2691_v5 = vmul.f32 %v6059_v13, %v8084_v56  ;;  %v2710_v48 = vmul.f32 %v8150_v32, %v2690_v59 }
 0xe4f   :  { %v2742_v36 = vpack.c.bf16 %v2729_v3, %v2728_v43  ;;  %v2711_v1 = vmul.f32 %v8150_v32, %v2691_v5  ;;  %v2730_v63 = vadd.f32 %v8158_v53, %v2710_v48 }
 0xe51   :  { %5459 = vmatprep.mubr.msk.bf16.mxu0 %vm148_vm0, %v2742_v36  ;;  %v2731_v28 = vadd.f32 %v8158_v53, %v2711_v1 }
 0xe53   :  { %v2743_v12 = vpack.c.bf16 %v2731_v28, %v2730_v63 }
 0xe55   :  { %5460 = vmatmul.mubr.msk.bf16.gmra.mrb[72].mxu0 %vm148_vm0, %v2743_v12 }
 0xe6b   :  { %v2614_v14 = vpop.xlane.xlu0 %2613 }
 0xe6c   :  { %v2644_v35 = vmul.f32 0.03125, %v2614_v14 }
 0xe6d   :  { %v2617_v4 = vpop.xlane.xlu1 %2616 }
 0xe6e   :  { %v2660_v29 = vadd.f32 1e-05, %v2644_v35  ;;  %v2645_v61 = vmul.f32 0.03125, %v2617_v4 }
 0xe6f   :  { %v2620_v56 = vpop.xlane.xlu0 %2619 }
 0xe70   :  { %6060 = vrsqrt.f32 %v2660_v29  ;;  %v2661_v50 = vadd.f32 1e-05, %v2645_v61  ;;  %v2646_v22 = vmul.f32 0.03125, %v2620_v56 }
 0xe71   :  { %v2623_v51 = vpop.xlane.xlu1 %2622 }
 0xe72   :  { %6062 = vrsqrt.f32 %v2661_v50  ;;  %v2662_v21 = vadd.f32 1e-05, %v2646_v22  ;;  %v2647_v19 = vmul.f32 0.03125, %v2623_v51 }
 0xe73   :  { %v2626_v46 = vpop.xlane.xlu0 %2625 }
 0xe74   :  { %6064 = vrsqrt.f32 %v2662_v21  ;;  %v2663_v7 = vadd.f32 1e-05, %v2647_v19  ;;  %v2648_v39 = vmul.f32 0.03125, %v2626_v46 }
 0xe75   :  { %v2629_v59 = vpop.xlane.xlu1 %2628 }
 0xe76   :  { %6066 = vrsqrt.f32 %v2663_v7  ;;  %v2664_v13 = vadd.f32 1e-05, %v2648_v39  ;;  %v2649_v43 = vmul.f32 0.03125, %v2629_v59 }
 0xe77   :  { %v2632_v3 = vpop.xlane.xlu0 %2631 }
 0xe78   :  { %6068 = vrsqrt.f32 %v2664_v13  ;;  %v2665_v5 = vadd.f32 1e-05, %v2649_v43  ;;  %v2650_v48 = vmul.f32 0.03125, %v2632_v3 }
 0xe79   :  { %v2635_v36 = vpop.xlane.xlu1 %2634 }
 0xe7a   :  { %v6061_v1 = vpop.eup %6060  ;;  %6070 = vrsqrt.f32 %v2665_v5  ;;  %v2666_v63 = vadd.f32 1e-05, %v2650_v48  ;;  %v2651_v28 = vmul.f32 0.03125, %v2635_v36 }
 0xe7b   :  { %v2692_v12 = vmul.f32 %v6061_v1, %v8100_v60 }
 0xe7c   :  { %v6063_v14 = vpop.eup %6062  ;;  %6072 = vrsqrt.f32 %v2666_v63  ;;  %v2667_v35 = vadd.f32 1e-05, %v2651_v28 }
 0xe7d   :  { %v2693_v4 = vmul.f32 %v6063_v14, %v8103_v58  ;;  %v2712_v29 = vmul.f32 %v8150_v32, %v2692_v12 }
 0xe7e   :  { %v6065_v61 = vpop.eup %6064  ;;  %6074 = vrsqrt.f32 %v2667_v35 }
 0xe7f   :  { %v2713_v56 = vmul.f32 %v8150_v32, %v2693_v4  ;;  %v2694_v50 = vmul.f32 %v6065_v61, %v8108_v49  ;;  %v2732_v51 = vadd.f32 %v8158_v53, %v2712_v29 }
 0xe80   :  { %v6067_v22 = vpop.eup %6066 }
 0xe81   :  { %v2733_v21 = vadd.f32 %v8158_v53, %v2713_v56  ;;  %v2695_v60 = vmul.f32 %v6067_v22, %v8114_v18  ;;  %v2714_v19 = vmul.f32 %v8150_v32, %v2694_v50 }
 0xe82   :  { %v6069_v46 = vpop.eup %6068 }
 0xe83   :  { %v2744_v7 = vpack.c.bf16 %v2733_v21, %v2732_v51  ;;  %v2715_v58 = vmul.f32 %v8150_v32, %v2695_v60  ;;  %v2696_v39 = vmul.f32 %v6069_v46, %v8120_v9  ;;  %v2734_v49 = vadd.f32 %v8158_v53, %v2714_v19 }
 0xe84   :  { %v6071_v59 = vpop.eup %6070 }
 0xe85   :  { %5463 = vmatprep.mubr.msk.bf16.mxu0 %vm148_vm0, %v2744_v7  ;;  %v2735_v13 = vadd.f32 %v8158_v53, %v2715_v58  ;;  %v2697_v43 = vmul.f32 %v6071_v59, %v8126_v34  ;;  %v2716_v3 = vmul.f32 %v8150_v32, %v2696_v39 }
 0xe86   :  { %v6073_v18 = vpop.eup %6072 }
 0xe87   :  { %v2745_v5 = vpack.c.bf16 %v2735_v13, %v2734_v49  ;;  %v2717_v48 = vmul.f32 %v8150_v32, %v2697_v43  ;;  %v2698_v36 = vmul.f32 %v6073_v18, %v8132_v30  ;;  %v2736_v9 = vadd.f32 %v8158_v53, %v2716_v3 }
 0xe88   :  { %v6075_v1 = vpop.eup %6074 }
 0xe89   :  { %5464 = vmatmul.mubr.msk.bf16.gmra.mrb[76].mxu0 %vm148_vm0, %v2745_v5  ;;  %v2737_v63 = vadd.f32 %v8158_v53, %v2717_v48  ;;  %v2699_v28 = vmul.f32 %v6075_v1, %v8138_v20  ;;  %v2718_v12 = vmul.f32 %v8150_v32, %v2698_v36 }
 0xe8b   :  { %v2746_v34 = vpack.c.bf16 %v2737_v63, %v2736_v9  ;;  %v2719_v14 = vmul.f32 %v8150_v32, %v2699_v28  ;;  %v2738_v35 = vadd.f32 %v8158_v53, %v2718_v12 }
 0xe8d   :  { %5467 = vmatprep.mubr.msk.bf16.mxu0 %vm148_vm0, %v2746_v34  ;;  %v2739_v30 = vadd.f32 %v8158_v53, %v2719_v14 }
 0xe8f   :  { %v2747_v4 = vpack.c.bf16 %v2739_v30, %v2738_v35 }
 0xe91   :  { %5468 = vmatmul.mubr.msk.bf16.gmra.mrb[80].mxu0 %vm148_vm0, %v2747_v4 }
 0xf20   :  { %v5457_v29 = vpop.f32.mrb[68].mxu0 }
 0xf21   :  { %v2823_v61 = vpop.f32.mrb[69].mxu0 }
 0xf22   :  { %v5458_v56 = vpop.f32.mrb[70].mxu0 }
 0xf23   :  { %v8213_v50 = vpack.c.bf16 %v5458_v56, %v5457_v29  ;;  %v2826_v20 = vpop.f32.mrb[71].mxu0 }
 0xf24   :  { %v8215_v22 = vpack.c.bf16 %v2826_v20, %v2823_v61 }
 0xf25   :  { %2904 = vrot.lane.b32.xlu1 %v8213_v50, %s6380_s8 }
 0xf26   :  { %2902 = vrot.lane.b32.xlu0 %v8215_v22, %s6380_s8  ;;  %5487 = vmatprep.mubr.msk.bf16.mxu1 %vm148_vm0, %v8215_v22 }
 0xf28   :  { %v5461_v32 = vpop.f32.mrb[72].mxu0 }
 0xf29   :  { %v2839_v53 = vpop.f32.mrb[73].mxu0 }
 0xf2a   :  { %v5462_v51 = vpop.f32.mrb[74].mxu0 }
 0xf2b   :  { %v8223_v21 = vpack.c.bf16 %v5462_v51, %v5461_v32  ;;  %v2842_v60 = vpop.f32.mrb[75].mxu0 }
 0xf2c   :  { %v8225_v19 = vpack.c.bf16 %v2842_v60, %v2839_v53  ;;  %v6348_v60 = vld [vmem:[%s9281_s2] sm:$0xff] }
 0xf2d   :  { %2908 = vrot.lane.b32.xlu0 %v8223_v21, %s6380_s8 }
 0xf2e   :  { %2906 = vrot.lane.b32.xlu1 %v8225_v19, %s6380_s8 }
 0xf5c   :  { %v5465_v46 = vpop.f32.mrb[76].mxu0 }
 0xf5d   :  { %v2855_v7 = vpop.f32.mrb[77].mxu0 }
 0xf5e   :  { %v5466_v58 = vpop.f32.mrb[78].mxu0 }
 0xf5f   :  { %v8231_v39 = vpack.c.bf16 %v5466_v58, %v5465_v46  ;;  %v2858_v59 = vpop.f32.mrb[79].mxu0 }
 0xf60   :  { %v8233_v49 = vpack.c.bf16 %v2858_v59, %v2855_v7  ;;  %v6349_v59 = vld [vmem:[%s9281_s2 + $0x8] sm:$0xff] }
 0xf61   :  { %2912 = vrot.lane.b32.xlu0 %v8231_v39, %s6380_s8 }
 0xf62   :  { %2910 = vrot.lane.b32.xlu1 %v8233_v49, %s6380_s8 }
 0xf64   :  { %v5469_v13 = vpop.f32.mrb[80].mxu0 }
 0xf65   :  { %v2871_v43 = vpop.f32.mrb[81].mxu0 }
 0xf66   :  { %v5470_v3 = vpop.f32.mrb[82].mxu0 }
 0xf67   :  { %v8239_v18 = vpack.c.bf16 %v5470_v3, %v5469_v13  ;;  %v2874_v5 = vpop.f32.mrb[83].mxu0 }
 0xf68   :  { %v8241_v48 = vpack.c.bf16 %v2874_v5, %v2871_v43  ;;  %v6350_v43 = vld [vmem:[%s9281_s2 + $0x18] sm:$0xff]  ;;  %v6351_v5 = vld [vmem:[%s9281_s2 + $0x10] sm:$0xff] }
 0xf69   :  { %2916 = vrot.lane.b32.xlu0 %v8239_v18, %s6380_s8 }
 0xf6a   :  { %2914 = vrot.lane.b32.xlu1 %v8241_v48, %s6380_s8 }
 0xf97   :  { %v2905_v9 = vpop.permute.xlu1 %2904 }
 0xf98   :  { %v2903_v36 = vpop.permute.xlu0 %2902  ;;  %v2946_v63 = vsel %vm148_vm0, %v2905_v9, 0 }
 0xf99   :  { %5727 = vmatprep.subr.msk.bf16.mxu1 %vm148_vm0, %v2903_v36  ;;  %v2943_v1 = vsel %vm148_vm0, %v2903_v36, 0 }
 0xf9a   :  { %5472 = vmatpush3.bf16.xpose.msra.mxu1 %v2943_v1 }
 0xf9b   :  { %5728 = vmatprep.subr.msk.bf16.mxu1 %vm148_vm0, %v2905_v9 }
 0xf9f   :  { %v2909_v34 = vpop.permute.xlu0 %2908 }
 0xfa0   :  { %v2907_v28 = vpop.permute.xlu1 %2906  ;;  %v2952_v14 = vsel %vm148_vm0, %v2909_v34, 0 }
 0xfa1   :  { %v2949_v12 = vsel %vm148_vm0, %v2907_v28, 0 }
 0xfa2   :  { %5474 = vmatpush3.bf16.xpose.msra.mxu1 %v2946_v63 }
 0xfa3   :  { %5729 = vmatprep.subr.msk.bf16.mxu1 %vm148_vm0, %v2907_v28 }
 0xfaa   :  { %5476 = vmatpush3.bf16.xpose.msra.mxu1 %v2949_v12  ;;  %v6352_v12 = vld [vmem:[%s9281_s2 + $0x20] sm:$0xff] }
 0xfab   :  { %5730 = vmatprep.subr.msk.bf16.mxu1 %vm148_vm0, %v2909_v34 }
 0xfb2   :  { %5478 = vmatpush3.bf16.xpose.msra.mxu1 %v2952_v14  ;;  %v6353_v14 = vld [vmem:[%s9281_s2 + $0x28] sm:$0xff] }
 0xfd3   :  { %v2913_v4 = vpop.permute.xlu0 %2912 }
 0xfd4   :  { %v2911_v35 = vpop.permute.xlu1 %2910  ;;  %v2958_v29 = vsel %vm148_vm0, %v2913_v4, 0 }
 0xfd5   :  { %5731 = vmatprep.subr.msk.bf16.mxu1 %vm148_vm0, %v2911_v35  ;;  %v2955_v30 = vsel %vm148_vm0, %v2911_v35, 0 }
 0xfd6   :  { %5480 = vmatpush3.bf16.xpose.msra.mxu1 %v2955_v30  ;;  %v6354_v30 = vld [vmem:[%s9281_s2 + $0x30] sm:$0xff] }
 0xfd7   :  { %5732 = vmatprep.subr.msk.bf16.mxu1 %vm148_vm0, %v2913_v4 }
 0xfdb   :  { %v2917_v20 = vpop.permute.xlu0 %2916 }
 0xfdc   :  { %v2915_v61 = vpop.permute.xlu1 %2914  ;;  %v2964_v32 = vsel %vm148_vm0, %v2917_v20, 0 }
 0xfdd   :  { %v2961_v56 = vsel %vm148_vm0, %v2915_v61, 0 }
 0xfde   :  { %5482 = vmatpush3.bf16.xpose.msra.mxu1 %v2958_v29  ;;  %v6355_v29 = vld [vmem:[%s9281_s2 + $0x38] sm:$0xff] }
 0xfdf   :  { %5733 = vmatprep.subr.msk.bf16.mxu1 %vm148_vm0, %v2915_v61 }
 0xfe6   :  { %5484 = vmatpush3.bf16.xpose.msra.mxu1 %v2961_v56 }
 0xfe7   :  { %5734 = vmatprep.subr.msk.bf16.mxu1 %vm148_vm0, %v2917_v20 }
 0xfee   :  { %5486 = vmatpush3.bf16.xpose.msra.mxu1 %v2964_v32 }
 0xff5   :  { %5488 = vmatmul.mubr.msk.bf16.vlgmr.msra.gmra.mrb[44].mxu1 %vm148_vm0, %v8213_v50 }
 0xff6   :  { %5491 = vmatprep.mubr.msk.bf16.mxu1 %vm148_vm0, %v8225_v19 }
 0xffd   :  { %5492 = vmatmul.mubr.msk.bf16.gmra.mrb[48].mxu1 %vm148_vm0, %v8223_v21 }
 0xffe   :  { %5495 = vmatprep.mubr.msk.bf16.mxu1 %vm148_vm0, %v8233_v49 }
0x1005   :  { %5496 = vmatmul.mubr.msk.bf16.gmra.mrb[52].mxu1 %vm148_vm0, %v8231_v39 }
0x1006   :  { %5499 = vmatprep.mubr.msk.bf16.mxu1 %vm148_vm0, %v8241_v48 }
0x100d   :  { %5500 = vmatmul.mubr.msk.bf16.gmra.mrb[56].mxu1 %vm148_vm0, %v8239_v18 }
0x10c8   :  { %v5489_v53 = vpop.f32.mrb[44].mxu1 }
0x10c9   :  { %v3000_v51 = vpop.f32.mrb[45].mxu1  ;;  %v8297_v36 = vadd.f32 %v6351_v5, %v5489_v53  ;;  %v6359_v5 = vld [vmem:[%s9281_s2 + $0x58] sm:$0xff] }
0x10ca   :  { %v8280_v46 = vadd.f32 %v6348_v60, %v3000_v51  ;;  %v5490_v7 = vpop.f32.mrb[46].mxu1  ;;  %v6356_v51 = vld [vmem:[%s9281_s2 + $0x40] sm:$0xff] }
0x10cb   :  { %v3003_v58 = vpop.f32.mrb[47].mxu1  ;;  %v8291_v3 = vadd.f32 %v6350_v43, %v5490_v7  ;;  %v6357_v7 = vld [vmem:[%s9281_s2 + $0x48] sm:$0xff] }
0x10cc   :  { %v8285_v13 = vadd.f32 %v6349_v59, %v3003_v58  ;;  %3063 = vmax.xlane.f32.xlu1 %v8280_v46  ;;  %v6358_v59 = vld [vmem:[%s9281_s2 + $0x50] sm:$0xff] }
0x10ce   :  { %3065 = vmax.xlane.f32.xlu0 %v8285_v13 }
0x10d0   :  { %v5493_v1 = vpop.f32.mrb[48].mxu1  ;;  %3069 = vmax.xlane.f32.xlu1 %v8291_v3 }
0x10d1   :  { %v3016_v9 = vpop.f32.mrb[49].mxu1  ;;  %v8316_v4 = vadd.f32 %v6354_v30, %v5493_v1 }
0x10d2   :  { %v5494_v63 = vpop.f32.mrb[50].mxu1  ;;  %3067 = vmax.xlane.f32.xlu0 %v8297_v36  ;;  %v8304_v34 = vadd.f32 %v6352_v12, %v3016_v9 }
0x10d3   :  { %v3019_v28 = vpop.f32.mrb[51].mxu1  ;;  %v8321_v61 = vadd.f32 %v6355_v29, %v5494_v63  ;;  %v6361_v29 = vld [vmem:[%s9281_s2 + $0x68] sm:$0xff] }
0x10d4   :  { %v8309_v35 = vadd.f32 %v6353_v14, %v3019_v28  ;;  %v6360_v14 = vld [vmem:[%s9281_s2 + $0x60] sm:$0xff] }
0x10d6   :  { %3071 = vmax.xlane.f32.xlu0 %v8304_v34  ;;  %3073 = vmax.xlane.f32.xlu1 %v8309_v35 }
0x10d8   :  { %v5497_v56 = vpop.f32.mrb[52].mxu1 }
0x10d9   :  { %v3032_v20 = vpop.f32.mrb[53].mxu1  ;;  %v8340_v43 = vadd.f32 %v6358_v59, %v5497_v56  ;;  %v4962_v59 = vld [vmem:[%s9282_s9 + $0x88] sm:$0xff] }
0x10da   :  { %v5498_v32 = vpop.f32.mrb[54].mxu1  ;;  %3075 = vmax.xlane.f32.xlu0 %v8316_v4  ;;  %3077 = vmax.xlane.f32.xlu1 %v8321_v61  ;;  %v8328_v60 = vadd.f32 %v6356_v51, %v3032_v20  ;;  %v6362_v20 = vld [vmem:[%s9281_s2 + $0x70] sm:$0xff] }
0x10db   :  { %v3035_v53 = vpop.f32.mrb[55].mxu1  ;;  %v8345_v1 = vadd.f32 %v6359_v5, %v5498_v32  ;;  %v4963_v5 = vld [vmem:[%s9282_s9 + $0x90] sm:$0xff] }
0x10dc   :  { %v8333_v58 = vadd.f32 %v6357_v7, %v3035_v53  ;;  %v6363_v53 = vld [vmem:[%s9281_s2 + $0x78] sm:$0xff]  ;;  %v4961_v7 = vld [vmem:[%s9282_s9 + $0x80] sm:$0xff] }
0x10de   :  { %3079 = vmax.xlane.f32.xlu0 %v8328_v60  ;;  %3081 = vmax.xlane.f32.xlu1 %v8333_v58 }
0x10e0   :  { %v5501_v9 = vpop.f32.mrb[56].mxu1 }
0x10e1   :  { %v3048_v63 = vpop.f32.mrb[57].mxu1  ;;  %v8364_v32 = vadd.f32 %v6362_v20, %v5501_v9  ;;  %v5683_v9 = vpack.c.bf16 %v4962_v59, %v4961_v7  ;;  %v4967_v20 = vld [vmem:[%s9282_s9 + $0xb0] sm:$0xff] }
0x10e2   :  { %v5502_v28 = vpop.f32.mrb[58].mxu1  ;;  %3083 = vmax.xlane.f32.xlu0 %v8340_v43  ;;  %3085 = vmax.xlane.f32.xlu1 %v8345_v1  ;;  %v8352_v30 = vadd.f32 %v6360_v14, %v3048_v63  ;;  %v4964_v63 = vld [vmem:[%s9282_s9 + $0x98] sm:$0xff]  ;;  %v4966_v14 = vld [vmem:[%s9282_s9 + $0xa8] sm:$0xff] }
0x10e3   :  { %v3051_v12 = vpop.f32.mrb[59].mxu1  ;;  %v8369_v51 = vadd.f32 %v6363_v53, %v5502_v28  ;;  %v5687_v28 = vpack.c.bf16 %v4964_v63, %v4963_v5  ;;  %5684 = vmatprep.subr.bf16.mxu0 %v5683_v9  ;;  %v4968_v53 = vld [vmem:[%s9282_s9 + $0xb8] sm:$0xff] }
0x10e4   :  { %v8357_v56 = vadd.f32 %v6361_v29, %v3051_v12  ;;  %v4965_v12 = vld [vmem:[%s9282_s9 + $0xa0] sm:$0xff]  ;;  %5686 = vmatpush3.bf16.msra.mxu0 %v5683_v9  ;;  %v5695_v7 = vpack.c.bf16 %v4968_v53, %v4967_v20 }
0x10e5   :  { %5688 = vmatprep.subr.bf16.mxu0 %v5687_v28  ;;  %v5691_v29 = vpack.c.bf16 %v4966_v14, %v4965_v12 }
0x10e6   :  { %3087 = vmax.xlane.f32.xlu0 %v8352_v30  ;;  %3089 = vmax.xlane.f32.xlu1 %v8357_v56 }
0x10e8   :  { %5690 = vmatpush3.bf16.msra.mxu0 %v5687_v28 }
0x10e9   :  { %5692 = vmatprep.subr.bf16.mxu0 %v5691_v29 }
0x10ea   :  { %3091 = vmax.xlane.f32.xlu0 %v8364_v32  ;;  %3093 = vmax.xlane.f32.xlu1 %v8369_v51 }
0x10ec   :  { %5694 = vmatpush3.bf16.msra.mxu0 %v5691_v29 }
0x10ed   :  { %5696 = vmatprep.subr.bf16.mxu0 %v5695_v7 }
0x10f0   :  { %5698 = vmatpush3.bf16.msra.mxu0 %v5695_v7 }
0x1159   :  { %v3064_v59 = vpop.xlane.xlu1 %3063 }
0x115a   :  { %v3095_v5 = vsub.f32 %v8280_v46, %v3064_v59 }
0x115b   :  { %v3066_v9 = vpop.xlane.xlu0 %3065 }
0x115c   :  { %v3111_v63 = vmul.f32 1.442695, %v3095_v5  ;;  %v3096_v12 = vsub.f32 %v8285_v13, %v3066_v9 }
0x115d   :  { %v3070_v14 = vpop.xlane.xlu1 %3069 }
0x115e   :  { %6076 = vpow2.f32 %v3111_v63  ;;  %v3113_v24 = vmul.f32 1.442695, %v3096_v12  ;;  %v3098_v27 = vsub.f32 %v8291_v3, %v3070_v14 }
0x115f   :  { %v3068_v8 = vpop.xlane.xlu0 %3067 }
0x1160   :  { %6078 = vpow2.f32 %v3113_v24  ;;  %v3117_v28 = vmul.f32 1.442695, %v3098_v27  ;;  %v3097_v20 = vsub.f32 %v8297_v36, %v3068_v8 }
0x1162   :  { %v3115_v29 = vmul.f32 1.442695, %v3097_v20  ;;  %6080 = vpow2.f32 %v3117_v28 }
0x1163   :  { %v3072_v53 = vpop.xlane.xlu0 %3071  ;;  %v3074_v7 = vpop.xlane.xlu1 %3073 }
0x1164   :  { %6082 = vpow2.f32 %v3115_v29  ;;  %v3099_v46 = vsub.f32 %v8304_v34, %v3072_v53  ;;  %v3100_v59 = vsub.f32 %v8309_v35, %v3074_v7 }
0x1166   :  { %v3119_v13 = vmul.f32 1.442695, %v3099_v46  ;;  %v3121_v5 = vmul.f32 1.442695, %v3100_v59 }
0x1167   :  { %v3076_v9 = vpop.xlane.xlu0 %3075  ;;  %v3078_v63 = vpop.xlane.xlu1 %3077 }
0x1168   :  { %v8403_v12 = vpop.eup %6076  ;;  %6084 = vpow2.f32 %v3119_v13  ;;  %v3101_v27 = vsub.f32 %v8316_v4, %v3076_v9  ;;  %v3102_v8 = vsub.f32 %v8321_v61, %v3078_v63 }
0x1169   :  { %6086 = vpow2.f32 %v3121_v5  ;;  %3143 = vadd.xlane.f32.xlu0 %v8403_v12 }
0x116a   :  { %v8408_v24 = vpop.eup %6078  ;;  %v3123_v3 = vmul.f32 1.442695, %v3101_v27  ;;  %v3125_v36 = vmul.f32 1.442695, %v3102_v8 }
0x116b   :  { %v3080_v34 = vpop.xlane.xlu0 %3079  ;;  %3145 = vadd.xlane.f32.xlu1 %v8408_v24  ;;  %v3082_v35 = vpop.xlane.xlu1 %3081 }
0x116c   :  { %6088 = vpow2.f32 %v3123_v3  ;;  %v3103_v14 = vsub.f32 %v8328_v60, %v3080_v34  ;;  %v3104_v28 = vsub.f32 %v8333_v58, %v3082_v35  ;;  %v8413_v20 = vpop.eup %6080  ;;  %v4970_v34 = vld [vmem:[%s9282_s9 + $0xc8] sm:$0xff] }
0x116d   :  { %6090 = vpow2.f32 %v3125_v36  ;;  %v4969_v36 = vld [vmem:[%s9282_s9 + $0xc0] sm:$0xff] }
0x116e   :  { %v8415_v4 = vpop.eup %6082  ;;  %v3127_v61 = vmul.f32 1.442695, %v3103_v14  ;;  %v3129_v29 = vmul.f32 1.442695, %v3104_v28 }
0x116f   :  { %v3084_v53 = vpop.xlane.xlu0 %3083  ;;  %3147 = vadd.xlane.f32.xlu0 %v8415_v4  ;;  %3149 = vadd.xlane.f32.xlu1 %v8413_v20  ;;  %v3086_v7 = vpop.xlane.xlu1 %3085 }
0x1170   :  { %6092 = vpow2.f32 %v3127_v61  ;;  %v3105_v46 = vsub.f32 %v8340_v43, %v3084_v53  ;;  %v3106_v60 = vsub.f32 %v8345_v1, %v3086_v7 }
0x1171   :  { %6094 = vpow2.f32 %v3129_v29 }
0x1172   :  { %v8421_v58 = vpop.eup %6084  ;;  %v3131_v59 = vmul.f32 1.442695, %v3105_v46  ;;  %v3133_v13 = vmul.f32 1.442695, %v3106_v60  ;;  %v4971_v46 = vld [vmem:[%s9282_s9 + $0xd0] sm:$0xff]  ;;  %v4972_v60 = vld [vmem:[%s9282_s9 + $0xd8] sm:$0xff] }
0x1173   :  { %v8423_v5 = vpop.eup %6086  ;;  %v3088_v9 = vpop.xlane.xlu0 %3087  ;;  %3151 = vadd.xlane.f32.xlu0 %v8421_v58 }
0x1174   :  { %v3090_v63 = vpop.xlane.xlu1 %3089  ;;  %6096 = vpow2.f32 %v3131_v59  ;;  %v3107_v27 = vsub.f32 %v8352_v30, %v3088_v9  ;;  %3153 = vadd.xlane.f32.xlu1 %v8423_v5  ;;  %v4974_v9 = vld [vmem:[%s9282_s9 + $0xe8] sm:$0xff] }
0x1175   :  { %v3108_v43 = vsub.f32 %v8357_v56, %v3090_v63  ;;  %6098 = vpow2.f32 %v3133_v13  ;;  %v5699_v56 = vpack.c.bf16 %v4970_v34, %v4969_v36  ;;  %v4973_v13 = vld [vmem:[%s9282_s9 + $0xe0] sm:$0xff] }
0x1176   :  { %v8429_v1 = vpop.eup %6088  ;;  %v3135_v8 = vmul.f32 1.442695, %v3107_v27  ;;  %v5707_v27 = vpack.c.bf16 %v4974_v9, %v4973_v13 }
0x1177   :  { %v3137_v3 = vmul.f32 1.442695, %v3108_v43  ;;  %v8437_v35 = vpop.eup %6090  ;;  %v3092_v30 = vpop.xlane.xlu0 %3091  ;;  %3155 = vadd.xlane.f32.xlu0 %v8429_v1  ;;  %5700 = vmatprep.subr.bf16.mxu0 %v5699_v56 }
0x1178   :  { %v3094_v14 = vpop.xlane.xlu1 %3093  ;;  %6100 = vpow2.f32 %v3135_v8  ;;  %v3109_v28 = vsub.f32 %v8364_v32, %v3092_v30  ;;  %3157 = vadd.xlane.f32.xlu1 %v8437_v35  ;;  %5702 = vmatpush3.bf16.msra.mxu0 %v5699_v56  ;;  %v4975_v8 = vld [vmem:[%s9282_s9 + $0xf0] sm:$0xff] }
0x1179   :  { %v3110_v61 = vsub.f32 %v8369_v51, %v3094_v14  ;;  %6102 = vpow2.f32 %v3137_v3  ;;  %v5703_v51 = vpack.c.bf16 %v4972_v60, %v4971_v46  ;;  %v4976_v3 = vld [vmem:[%s9282_s9 + $0xf8] sm:$0xff] }
0x117a   :  { %v8443_v29 = vpop.eup %6092  ;;  %v3139_v53 = vmul.f32 1.442695, %v3109_v28  ;;  %v5711_v34 = vpack.c.bf16 %v4976_v3, %v4975_v8 }
0x117b   :  { %v3141_v7 = vmul.f32 1.442695, %v3110_v61  ;;  %v8451_v32 = vpop.eup %6094  ;;  %3159 = vadd.xlane.f32.xlu0 %v8443_v29  ;;  %5704 = vmatprep.subr.bf16.mxu0 %v5703_v51 }
0x117c   :  { %6104 = vpow2.f32 %v3139_v53  ;;  %3161 = vadd.xlane.f32.xlu1 %v8451_v32  ;;  %5706 = vmatpush3.bf16.msra.mxu0 %v5703_v51  ;;  %v4945_v51 = vld [vmem:[%s9283_s4 + $0x80] sm:$0xff] }
0x117d   :  { %6106 = vpow2.f32 %v3141_v7  ;;  %5708 = vmatprep.subr.bf16.mxu0 %v5707_v27 }
0x117e   :  { %v8455_v59 = vpop.eup %6096 }
0x117f   :  { %v8463_v63 = vpop.eup %6098  ;;  %3163 = vadd.xlane.f32.xlu0 %v8455_v59 }
0x1180   :  { %3165 = vadd.xlane.f32.xlu1 %v8463_v63  ;;  %5710 = vmatpush3.bf16.msra.mxu0 %v5707_v27  ;;  %v4946_v27 = vld [vmem:[%s9283_s4 + $0x88] sm:$0xff] }
0x1181   :  { %5712 = vmatprep.subr.bf16.mxu0 %v5711_v34 }
0x1182   :  { %v8467_v43 = vpop.eup %6100 }
0x1183   :  { %v8475_v36 = vpop.eup %6102  ;;  %3167 = vadd.xlane.f32.xlu0 %v8467_v43 }
0x1184   :  { %3169 = vadd.xlane.f32.xlu1 %v8475_v36  ;;  %5714 = vmatpush3.bf16.msra.mxu0 %v5711_v34 }
0x1186   :  { %v8479_v30 = vpop.eup %6104 }
0x1187   :  { %v8481_v14 = vpop.eup %6106  ;;  %3171 = vadd.xlane.f32.xlu0 %v8479_v30 }
0x1188   :  { %3173 = vadd.xlane.f32.xlu1 %v8481_v14 }
0x11f6   :  { %v3144_v56 = vpop.xlane.xlu0 %3143 }
0x11f7   :  { %6108 = vrcp.f32 %v3144_v56 }
0x11f8   :  { %v3146_v28 = vpop.xlane.xlu1 %3145 }
0x11f9   :  { %6110 = vrcp.f32 %v3146_v28 }
0x11fc   :  { %v3148_v61 = vpop.xlane.xlu0 %3147  ;;  %v3150_v53 = vpop.xlane.xlu1 %3149 }
0x11fd   :  { %6112 = vrcp.f32 %v3148_v61 }
0x11fe   :  { %6114 = vrcp.f32 %v3150_v53 }
0x1200   :  { %v3152_v7 = vpop.xlane.xlu0 %3151 }
0x1201   :  { %v6109_v46 = vpop.eup %6108  ;;  %6116 = vrcp.f32 %v3152_v7  ;;  %v3154_v60 = vpop.xlane.xlu1 %3153 }
0x1202   :  { %6118 = vrcp.f32 %v3154_v60  ;;  %v8489_v13 = vmul.f32 %v6109_v46, %v8403_v12  ;;  %v4947_v12 = vld [vmem:[%s9283_s4 + $0x90] sm:$0xff]  ;;  %v4948_v46 = vld [vmem:[%s9283_s4 + $0x98] sm:$0xff] }
0x1203   :  { %v6111_v9 = vpop.eup %6110 }
0x1204   :  { %v8495_v8 = vmul.f32 %v6111_v9, %v8408_v24  ;;  %v3156_v3 = vpop.xlane.xlu0 %3155  ;;  %v3224_v34 = vadd.f32 %v4945_v51, %v8489_v13 }
0x1205   :  { %6120 = vrcp.f32 %v3156_v3  ;;  %v3158_v56 = vpop.xlane.xlu1 %3157 }
0x1206   :  { %6122 = vrcp.f32 %v3158_v56  ;;  %5535 = vmatprep.mubr.f32.mxu0 %v3224_v34  ;;  %v3225_v28 = vadd.f32 %v4946_v27, %v8495_v8 }
0x1207   :  { %v6113_v61 = vpop.eup %6112 }
0x1208   :  { %v6115_v53 = vpop.eup %6114  ;;  %v3160_v7 = vpop.xlane.xlu0 %3159  ;;  %5536 = vmatmul.mubr.f32.vlgmr.msra.gmra.mrb[84].mxu0 %v3225_v28  ;;  %v8503_v24 = vmul.f32 %v6113_v61, %v8415_v4  ;;  %v4949_v4 = vld [vmem:[%s9283_s4 + $0xa0] sm:$0xff] }
0x1209   :  { %6124 = vrcp.f32 %v3160_v7  ;;  %v3162_v60 = vpop.xlane.xlu1 %3161  ;;  %v8509_v51 = vmul.f32 %v6115_v53, %v8413_v20  ;;  %v4950_v20 = vld [vmem:[%s9283_s4 + $0xa8] sm:$0xff] }
0x120a   :  { %6126 = vrcp.f32 %v3162_v60  ;;  %v3226_v9 = vadd.f32 %v4947_v12, %v8503_v24 }
0x120b   :  { %v6117_v27 = vpop.eup %6116  ;;  %v3227_v3 = vadd.f32 %v4948_v46, %v8509_v51 }
0x120c   :  { %v6119_v34 = vpop.eup %6118  ;;  %v3164_v56 = vpop.xlane.xlu0 %3163  ;;  %5538 = vmatprep.mubr.f32.mxu0 %v3226_v9  ;;  %v8517_v28 = vmul.f32 %v6117_v27, %v8421_v58  ;;  %v4951_v58 = vld [vmem:[%s9283_s4 + $0xb0] sm:$0xff] }
0x120d   :  { %6128 = vrcp.f32 %v3164_v56  ;;  %v3166_v61 = vpop.xlane.xlu1 %3165  ;;  %5539 = vmatmul.mubr.f32.gmra.mrb[86].mxu0 %v3227_v3  ;;  %v8523_v12 = vmul.f32 %v6119_v34, %v8423_v5  ;;  %v4952_v5 = vld [vmem:[%s9283_s4 + $0xb8] sm:$0xff] }
0x120e   :  { %6130 = vrcp.f32 %v3166_v61  ;;  %v3228_v53 = vadd.f32 %v4949_v4, %v8517_v28 }
0x120f   :  { %v6121_v7 = vpop.eup %6120  ;;  %v3229_v46 = vadd.f32 %v4950_v20, %v8523_v12 }
0x1210   :  { %v6123_v60 = vpop.eup %6122  ;;  %v3168_v9 = vpop.xlane.xlu0 %3167  ;;  %5541 = vmatprep.mubr.f32.mxu0 %v3228_v53  ;;  %v8531_v27 = vmul.f32 %v6121_v7, %v8429_v1  ;;  %v4953_v1 = vld [vmem:[%s9283_s4 + $0xc0] sm:$0xff] }
0x1211   :  { %6132 = vrcp.f32 %v3168_v9  ;;  %v3170_v3 = vpop.xlane.xlu1 %3169  ;;  %5542 = vmatmul.mubr.f32.gmra.mrb[88].mxu0 %v3229_v46  ;;  %v8537_v4 = vmul.f32 %v6123_v60, %v8437_v35  ;;  %v4954_v35 = vld [vmem:[%s9283_s4 + $0xc8] sm:$0xff] }
0x1212   :  { %6134 = vrcp.f32 %v3170_v3  ;;  %v3230_v34 = vadd.f32 %v4951_v58, %v8531_v27 }
0x1213   :  { %v6125_v56 = vpop.eup %6124  ;;  %v3231_v20 = vadd.f32 %v4952_v5, %v8537_v4 }
0x1214   :  { %v6127_v61 = vpop.eup %6126  ;;  %v3172_v53 = vpop.xlane.xlu0 %3171  ;;  %5544 = vmatprep.mubr.f32.mxu0 %v3230_v34  ;;  %v8545_v7 = vmul.f32 %v6125_v56, %v8443_v29  ;;  %v4955_v29 = vld [vmem:[%s9283_s4 + $0xd0] sm:$0xff] }
0x1215   :  { %6136 = vrcp.f32 %v3172_v53  ;;  %v3174_v46 = vpop.xlane.xlu1 %3173  ;;  %5545 = vmatmul.mubr.f32.gmra.mrb[90].mxu0 %v3231_v20  ;;  %v8551_v58 = vmul.f32 %v6127_v61, %v8451_v32  ;;  %v4956_v32 = vld [vmem:[%s9283_s4 + $0xd8] sm:$0xff]  ;;  %v4957_v53 = vld [vmem:[%s9283_s4 + $0xe0] sm:$0xff] }
0x1216   :  { %6138 = vrcp.f32 %v3174_v46  ;;  %v3232_v60 = vadd.f32 %v4953_v1, %v8545_v7  ;;  %v4958_v46 = vld [vmem:[%s9283_s4 + $0xe8] sm:$0xff] }
0x1217   :  { %v6129_v9 = vpop.eup %6128  ;;  %v3233_v5 = vadd.f32 %v4954_v35, %v8551_v58 }
0x1218   :  { %v6131_v3 = vpop.eup %6130  ;;  %5547 = vmatprep.mubr.f32.mxu0 %v3232_v60  ;;  %v8559_v34 = vmul.f32 %v6129_v9, %v8455_v59 }
0x1219   :  { %5548 = vmatmul.mubr.f32.gmra.mrb[92].mxu0 %v3233_v5  ;;  %v8565_v56 = vmul.f32 %v6131_v3, %v8463_v63 }
0x121a   :  { %v3234_v20 = vadd.f32 %v4955_v29, %v8559_v34  ;;  %v4959_v29 = vld [vmem:[%s9283_s4 + $0xf0] sm:$0xff] }
0x121b   :  { %v6133_v1 = vpop.eup %6132  ;;  %v3235_v61 = vadd.f32 %v4956_v32, %v8565_v56  ;;  %v4960_v32 = vld [vmem:[%s9283_s4 + $0xf8] sm:$0xff] }
0x121c   :  { %v6135_v35 = vpop.eup %6134  ;;  %5550 = vmatprep.mubr.f32.mxu0 %v3234_v20  ;;  %v8573_v59 = vmul.f32 %v6133_v1, %v8467_v43 }
0x121d   :  { %5551 = vmatmul.mubr.f32.gmra.mrb[94].mxu0 %v3235_v61  ;;  %v8579_v63 = vmul.f32 %v6135_v35, %v8475_v36  ;;  %v4978_v61 = vld [vmem:[%s9284_s5 + $0x88] sm:$0xff] }
0x121e   :  { %v3236_v60 = vadd.f32 %v4957_v53, %v8573_v59 }
0x121f   :  { %v6137_v9 = vpop.eup %6136  ;;  %v3237_v5 = vadd.f32 %v4958_v46, %v8579_v63 }
0x1220   :  { %v6139_v3 = vpop.eup %6138  ;;  %5553 = vmatprep.mubr.f32.mxu0 %v3236_v60  ;;  %v8587_v43 = vmul.f32 %v6137_v9, %v8479_v30  ;;  %v4977_v30 = vld [vmem:[%s9284_s5 + $0x80] sm:$0xff] }
0x1221   :  { %5554 = vmatmul.mubr.f32.gmra.mrb[96].mxu0 %v3237_v5  ;;  %v8593_v36 = vmul.f32 %v6139_v3, %v8481_v14  ;;  %v8606_v14 = vld [vmem:[%s9285_s10 + $0x1] ss:$0 sm:$0xff]  ;;  %v4980_v5 = vld [vmem:[%s9284_s5 + $0x98] sm:$0xff]  ;;  %v4979_v3 = vld [vmem:[%s9284_s5 + $0x90] sm:$0xff] }
0x1222   :  { %v3238_v20 = vadd.f32 %v4959_v29, %v8587_v43 }
0x1223   :  { %v3239_v1 = vadd.f32 %v4960_v32, %v8593_v36 }
0x1224   :  { %5556 = vmatprep.mubr.f32.mxu0 %v3238_v20 }
0x1225   :  { %5557 = vmatmul.mubr.f32.gmra.mrb[98].mxu0 %v3239_v1 }
0x12db   :  { %v5537_v53 = vpop.f32.mrb[84].mxu0 }
0x12dc   :  { %v3346_v35 = vadd.f32 %v5537_v53, %v4978_v61  ;;  %v3340_v46 = vpop.f32.mrb[85].mxu0 }
0x12dd   :  { %v3341_v60 = vadd.f32 %v4977_v30, %v3340_v46  ;;  %v4982_v30 = vld [vmem:[%s9284_s5 + $0xa8] sm:$0xff]  ;;  %v4981_v46 = vld [vmem:[%s9284_s5 + $0xa0] sm:$0xff] }
0x12de   :  { %v3420_v9 = vmax.f32 %v3346_v35, 0.0 }
0x12df   :  { %v3419_v29 = vmax.f32 %v3341_v60, 0.0 }
0x12e0   :  { %v3444_v32 = vmul.f32 %v8606_v14, %v3420_v9  ;;  %v5540_v20 = vpop.f32.mrb[86].mxu0 }
0x12e1   :  { %v3443_v1 = vmul.f32 %v8606_v14, %v3419_v29  ;;  %v3356_v61 = vadd.f32 %v5540_v20, %v4980_v5  ;;  %v3350_v53 = vpop.f32.mrb[87].mxu0 }
0x12e2   :  { %v3351_v6 = vadd.f32 %v4979_v3, %v3350_v53  ;;  %3461 = vadd.xlane.f32.xlu1 %v3444_v32  ;;  %v4984_v32 = vld [vmem:[%s9284_s5 + $0xb8] sm:$0xff] }
0x12e3   :  { %v3422_v35 = vmax.f32 %v3356_v61, 0.0  ;;  %3459 = vadd.xlane.f32.xlu0 %v3443_v1  ;;  %v4983_v1 = vld [vmem:[%s9284_s5 + $0xb0] sm:$0xff] }
0x12e4   :  { %v3421_v60 = vmax.f32 %v3351_v6, 0.0  ;;  %v5543_v33 = vpop.f32.mrb[88].mxu0 }
0x12e5   :  { %v3446_v9 = vmul.f32 %v8606_v14, %v3422_v35  ;;  %v3366_v2 = vadd.f32 %v5543_v33, %v4982_v30  ;;  %v3360_v29 = vpop.f32.mrb[89].mxu0 }
0x12e6   :  { %v3445_v5 = vmul.f32 %v8606_v14, %v3421_v60  ;;  %v3361_v3 = vadd.f32 %v4981_v46, %v3360_v29  ;;  %v4986_v60 = vld [vmem:[%s9284_s5 + $0xc8] sm:$0xff] }
0x12e7   :  { %v3424_v20 = vmax.f32 %v3366_v2, 0.0  ;;  %3465 = vadd.xlane.f32.xlu1 %v3446_v9  ;;  %v4985_v9 = vld [vmem:[%s9284_s5 + $0xc0] sm:$0xff] }
0x12e8   :  { %v3423_v61 = vmax.f32 %v3361_v3, 0.0  ;;  %3463 = vadd.xlane.f32.xlu0 %v3445_v5  ;;  %v5546_v6 = vpop.f32.mrb[90].mxu0 }
0x12e9   :  { %v3448_v53 = vmul.f32 %v8606_v14, %v3424_v20  ;;  %v3376_v33 = vadd.f32 %v5546_v6, %v4984_v32  ;;  %v3370_v30 = vpop.f32.mrb[91].mxu0  ;;  %v4988_v6 = vld [vmem:[%s9284_s5 + $0xd8] sm:$0xff] }
0x12ea   :  { %v3447_v35 = vmul.f32 %v8606_v14, %v3423_v61  ;;  %v3371_v46 = vadd.f32 %v4983_v1, %v3370_v30 }
0x12eb   :  { %v3426_v2 = vmax.f32 %v3376_v33, 0.0  ;;  %3469 = vadd.xlane.f32.xlu1 %v3448_v53  ;;  %v4987_v53 = vld [vmem:[%s9284_s5 + $0xd0] sm:$0xff] }
0x12ec   :  { %v3425_v29 = vmax.f32 %v3371_v46, 0.0  ;;  %3467 = vadd.xlane.f32.xlu0 %v3447_v35  ;;  %v5549_v5 = vpop.f32.mrb[92].mxu0 }
0x12ed   :  { %v3450_v3 = vmul.f32 %v8606_v14, %v3426_v2  ;;  %v3386_v32 = vadd.f32 %v5549_v5, %v4986_v60  ;;  %v3380_v20 = vpop.f32.mrb[93].mxu0  ;;  %v4990_v5 = vld [vmem:[%s9284_s5 + $0xe8] sm:$0xff] }
0x12ee   :  { %v3449_v61 = vmul.f32 %v8606_v14, %v3425_v29  ;;  %v3381_v1 = vadd.f32 %v4985_v9, %v3380_v20 }
0x12ef   :  { %v3428_v33 = vmax.f32 %v3386_v32, 0.0  ;;  %3473 = vadd.xlane.f32.xlu1 %v3450_v3  ;;  %v4989_v3 = vld [vmem:[%s9284_s5 + $0xe0] sm:$0xff] }
0x12f0   :  { %v3427_v30 = vmax.f32 %v3381_v1, 0.0  ;;  %3471 = vadd.xlane.f32.xlu0 %v3449_v61  ;;  %v5552_v35 = vpop.f32.mrb[94].mxu0 }
0x12f1   :  { %v3452_v46 = vmul.f32 %v8606_v14, %v3428_v33  ;;  %v3396_v60 = vadd.f32 %v5552_v35, %v4988_v6  ;;  %v3390_v2 = vpop.f32.mrb[95].mxu0  ;;  %v4992_v35 = vld [vmem:[%s9284_s5 + $0xf8] sm:$0xff] }
0x12f2   :  { %v3451_v29 = vmul.f32 %v8606_v14, %v3427_v30  ;;  %v3391_v9 = vadd.f32 %v4987_v53, %v3390_v2 }
0x12f3   :  { %v3430_v32 = vmax.f32 %v3396_v60, 0.0  ;;  %3477 = vadd.xlane.f32.xlu1 %v3452_v46  ;;  %v4991_v46 = vld [vmem:[%s9284_s5 + $0xf0] sm:$0xff] }
0x12f4   :  { %v3429_v20 = vmax.f32 %v3391_v9, 0.0  ;;  %3475 = vadd.xlane.f32.xlu0 %v3451_v29  ;;  %v5555_v61 = vpop.f32.mrb[96].mxu0 }
0x12f5   :  { %v3454_v1 = vmul.f32 %v8606_v14, %v3430_v32  ;;  %v3406_v6 = vadd.f32 %v5555_v61, %v4990_v5  ;;  %v3400_v33 = vpop.f32.mrb[97].mxu0 }
0x12f6   :  { %v3453_v30 = vmul.f32 %v8606_v14, %v3429_v20  ;;  %v3401_v53 = vadd.f32 %v4989_v3, %v3400_v33 }
0x12f7   :  { %v3432_v60 = vmax.f32 %v3406_v6, 0.0  ;;  %3481 = vadd.xlane.f32.xlu1 %v3454_v1 }
0x12f8   :  { %v3431_v2 = vmax.f32 %v3401_v53, 0.0  ;;  %3479 = vadd.xlane.f32.xlu0 %v3453_v30  ;;  %v5558_v29 = vpop.f32.mrb[98].mxu0  ;;  %v8669_v30 = vld [vmem:[%s9286_s11 + $0x1] ss:$0 sm:$0xff] }
0x12f9   :  { %v3456_v9 = vmul.f32 %v8606_v14, %v3432_v60  ;;  %v3416_v5 = vadd.f32 %v5558_v29, %v4992_v35  ;;  %v3410_v32 = vpop.f32.mrb[99].mxu0 }
0x12fa   :  { %v3455_v20 = vmul.f32 %v8606_v14, %v3431_v2  ;;  %v3411_v3 = vadd.f32 %v4991_v46, %v3410_v32 }
0x12fb   :  { %v3434_v61 = vmax.f32 %v3416_v5, 0.0  ;;  %3485 = vadd.xlane.f32.xlu1 %v3456_v9 }
0x12fc   :  { %v3433_v33 = vmax.f32 %v3411_v3, 0.0  ;;  %3483 = vadd.xlane.f32.xlu0 %v3455_v20 }
0x12fd   :  { %v3458_v1 = vmul.f32 %v8606_v14, %v3434_v61 }
0x12fe   :  { %v3457_v6 = vmul.f32 %v8606_v14, %v3433_v33 }
0x12ff   :  { %3489 = vadd.xlane.f32.xlu1 %v3458_v1 }
0x1300   :  { %3487 = vadd.xlane.f32.xlu0 %v3457_v6 }
0x136f   :  { %v3462_v53 = vpop.xlane.xlu1 %3461 }
0x1370   :  { %v3497_v35 = vadd.f32 %v8669_v30, %v3462_v53  ;;  %v3460_v60 = vpop.xlane.xlu0 %3459 }
0x1371   :  { %v3496_v46 = vadd.f32 %v8669_v30, %v3460_v60 }
0x1372   :  { %v3513_v2 = vmul.f32 2.0, %v3497_v35 }
0x1373   :  { %v3512_v29 = vmul.f32 2.0, %v3496_v46 }
0x1374   :  { %v3529_v9 = vmul.f32 %v3513_v2, %v3497_v35  ;;  %v3466_v5 = vpop.xlane.xlu1 %3465 }
0x1375   :  { %v3528_v32 = vmul.f32 %v3512_v29, %v3496_v46  ;;  %v3499_v14 = vadd.f32 %v8669_v30, %v3466_v5  ;;  %v3464_v20 = vpop.xlane.xlu0 %3463 }
0x1376   :  { %v3545_v3 = vadd.f32 1e-06, %v3529_v9  ;;  %v3498_v61 = vadd.f32 %v8669_v30, %v3464_v20 }
0x1377   :  { %v3544_v33 = vadd.f32 1e-06, %v3528_v32  ;;  %v3515_v1 = vmul.f32 2.0, %v3499_v14 }
0x1378   :  { %6140 = vrcp.f32 %v3545_v3  ;;  %v3514_v6 = vmul.f32 2.0, %v3498_v61  ;;  %v3470_v37 = vpop.xlane.xlu1 %3469 }
0x1379   :  { %6142 = vrcp.f32 %v3544_v33  ;;  %v3531_v53 = vmul.f32 %v3515_v1, %v3499_v14  ;;  %v3501_v60 = vadd.f32 %v8669_v30, %v3470_v37  ;;  %v3468_v38 = vpop.xlane.xlu0 %3467 }
0x137a   :  { %v3530_v15 = vmul.f32 %v3514_v6, %v3498_v61  ;;  %v3500_v35 = vadd.f32 %v8669_v30, %v3468_v38 }
0x137b   :  { %v3547_v46 = vadd.f32 1e-06, %v3531_v53  ;;  %v3517_v2 = vmul.f32 2.0, %v3501_v60 }
0x137c   :  { %v3546_v29 = vadd.f32 1e-06, %v3530_v15  ;;  %v3516_v5 = vmul.f32 2.0, %v3500_v35  ;;  %v3474_v9 = vpop.xlane.xlu1 %3473 }
0x137d   :  { %6144 = vrcp.f32 %v3547_v46  ;;  %v3533_v20 = vmul.f32 %v3517_v2, %v3501_v60  ;;  %v3503_v32 = vadd.f32 %v8669_v30, %v3474_v9  ;;  %v3472_v3 = vpop.xlane.xlu0 %3471 }
0x137e   :  { %6146 = vrcp.f32 %v3546_v29  ;;  %v3532_v11 = vmul.f32 %v3516_v5, %v3500_v35  ;;  %v3502_v14 = vadd.f32 %v8669_v30, %v3472_v3 }
0x137f   :  { %v3549_v33 = vadd.f32 1e-06, %v3533_v20  ;;  %v3519_v37 = vmul.f32 2.0, %v3503_v32 }
0x1380   :  { %v3548_v1 = vadd.f32 1e-06, %v3532_v11  ;;  %v3518_v61 = vmul.f32 2.0, %v3502_v14  ;;  %v3478_v6 = vpop.xlane.xlu1 %3477 }
0x1381   :  { %6148 = vrcp.f32 %v3549_v33  ;;  %v3535_v38 = vmul.f32 %v3519_v37, %v3503_v32  ;;  %v3505_v15 = vadd.f32 %v8669_v30, %v3478_v6  ;;  %v3476_v53 = vpop.xlane.xlu0 %3475 }
0x1382   :  { %v6141_v31 = vpop.eup %6140  ;;  %6150 = vrcp.f32 %v3548_v1  ;;  %v3534_v60 = vmul.f32 %v3518_v61, %v3502_v14  ;;  %v3504_v46 = vadd.f32 %v8669_v30, %v3476_v53 }
0x1383   :  { %v6143_v2 = vpop.eup %6142  ;;  %v3551_v29 = vadd.f32 1e-06, %v3535_v38  ;;  %v3521_v35 = vmul.f32 2.0, %v3505_v15  ;;  %3583 = vperm.xlu1 %5739, %v6141_v31  }
0x1384   :  { %v3550_v5 = vadd.f32 1e-06, %v3534_v60  ;;  %v3520_v9 = vmul.f32 2.0, %v3504_v46  ;;  %3578 = vperm.xlu0 %5738, %v6143_v2   ;;  %v3482_v11 = vpop.xlane.xlu1 %3481 }
0x1385   :  { %6152 = vrcp.f32 %v3551_v29  ;;  %v3537_v20 = vmul.f32 %v3521_v35, %v3505_v15  ;;  %v3507_v32 = vadd.f32 %v8669_v30, %v3482_v11  ;;  %v3480_v3 = vpop.xlane.xlu0 %3479 }
0x1386   :  { %6154 = vrcp.f32 %v3550_v5  ;;  %v3536_v33 = vmul.f32 %v3520_v9, %v3504_v46  ;;  %v3506_v37 = vadd.f32 %v8669_v30, %v3480_v3 }
0x1387   :  { %v6145_v14 = vpop.eup %6144  ;;  %v3553_v1 = vadd.f32 1e-06, %v3537_v20  ;;  %v3523_v61 = vmul.f32 2.0, %v3507_v32 }
0x1388   :  { %v6147_v6 = vpop.eup %6146  ;;  %v3552_v38 = vadd.f32 1e-06, %v3536_v33  ;;  %v3522_v53 = vmul.f32 2.0, %v3506_v37  ;;  %3593 = vperm.xlu0 %5738, %v6145_v14   ;;  %v3486_v31 = vpop.xlane.xlu1 %3485 }
0x1389   :  { %6156 = vrcp.f32 %v3553_v1  ;;  %v3539_v60 = vmul.f32 %v3523_v61, %v3507_v32  ;;  %v3509_v2 = vadd.f32 %v8669_v30, %v3486_v31  ;;  %v3484_v15 = vpop.xlane.xlu0 %3483  ;;  %3588 = vperm.xlu1 %5739, %v6147_v6  }
0x138a   :  { %6158 = vrcp.f32 %v3552_v38  ;;  %v3538_v29 = vmul.f32 %v3522_v53, %v3506_v37  ;;  %v3508_v46 = vadd.f32 %v8669_v30, %v3484_v15 }
0x138b   :  { %v6149_v35 = vpop.eup %6148  ;;  %v3555_v5 = vadd.f32 1e-06, %v3539_v60  ;;  %v3525_v9 = vmul.f32 2.0, %v3509_v2 }
0x138c   :  { %v6151_v11 = vpop.eup %6150  ;;  %v3554_v20 = vadd.f32 1e-06, %v3538_v29  ;;  %v3524_v3 = vmul.f32 2.0, %v3508_v46  ;;  %3603 = vperm.xlu0 %5738, %v6149_v35   ;;  %v3490_v33 = vpop.xlane.xlu1 %3489 }
0x138d   :  { %6160 = vrcp.f32 %v3555_v5  ;;  %v3541_v14 = vmul.f32 %v3525_v9, %v3509_v2  ;;  %v3511_v32 = vadd.f32 %v8669_v30, %v3490_v33  ;;  %v3488_v1 = vpop.xlane.xlu0 %3487  ;;  %3598 = vperm.xlu1 %5739, %v6151_v11  }
0x138e   :  { %6162 = vrcp.f32 %v3554_v20  ;;  %v3540_v61 = vmul.f32 %v3524_v3, %v3508_v46  ;;  %v3510_v37 = vadd.f32 %v8669_v30, %v3488_v1  ;;  %v9359_v1 = vsub.f32 0.0, %v7301_v0 }
0x138f   :  { %v6153_v6 = vpop.eup %6152  ;;  %v3557_v38 = vadd.f32 1e-06, %v3541_v14  ;;  %v3527_v53 = vmul.f32 2.0, %v3511_v32 }
0x1390   :  { %v6155_v31 = vpop.eup %6154  ;;  %v3556_v60 = vadd.f32 1e-06, %v3540_v61  ;;  %v3526_v15 = vmul.f32 2.0, %v3510_v37  ;;  %3613 = vperm.xlu0 %5738, %v6153_v6   ;;  %v9360_v6 = vsub.f32 0.0, %v7306_v10 }
0x1391   :  { %6164 = vrcp.f32 %v3557_v38  ;;  %v3543_v29 = vmul.f32 %v3527_v53, %v3511_v32  ;;  %3608 = vperm.xlu1 %5739, %v6155_v31  }
0x1392   :  { %6166 = vrcp.f32 %v3556_v60  ;;  %v3542_v2 = vmul.f32 %v3526_v15, %v3510_v37  ;;  %v9361_v15 = vsub.f32 0.0, %v7317_v23 }
0x1393   :  { %v6157_v35 = vpop.eup %6156  ;;  %v3559_v5 = vadd.f32 1e-06, %v3543_v29 }
0x1394   :  { %v6159_v9 = vpop.eup %6158  ;;  %v3558_v11 = vadd.f32 1e-06, %v3542_v2  ;;  %3623 = vperm.xlu0 %5738, %v6157_v35   ;;  %v9362_v2 = vsub.f32 0.0, %v7323_v42 }
0x1395   :  { %6168 = vrcp.f32 %v3559_v5  ;;  %3618 = vperm.xlu1 %5739, %v6159_v9   ;;  %v9363_v9 = vsub.f32 0.0, %v7331_v47 }
0x1396   :  { %6170 = vrcp.f32 %v3558_v11 }
0x1397   :  { %v6161_v30 = vpop.eup %6160 }
0x1398   :  { %v6163_v46 = vpop.eup %6162  ;;  %3633 = vperm.xlu0 %5738, %v6161_v30   ;;  %v9364_v30 = vsub.f32 0.0, %v7344_v57 }
0x1399   :  { %3628 = vperm.xlu1 %5739, %v6163_v46  }
0x139b   :  { %v6165_v20 = vpop.eup %6164 }
0x139c   :  { %v6167_v3 = vpop.eup %6166  ;;  %3643 = vperm.xlu0 %5738, %v6165_v20  }
0x139d   :  { %3638 = vperm.xlu1 %5739, %v6167_v3  }
0x139f   :  { %v6169_v33 = vpop.eup %6168 }
0x13a0   :  { %v6171_v14 = vpop.eup %6170  ;;  %3653 = vperm.xlu0 %5738, %v6169_v33   ;;  %v9365_v33 = vsub.f32 0.0, %v7365_v40 }
0x13a1   :  { %3648 = vperm.xlu1 %5739, %v6171_v14  }
0x13a4   :  { %3888 = vrot.lane.b32.xlu0 %v8215_v22, %s6382_s25 }
0x13a5   :  { %3890 = vrot.lane.b32.xlu1 %v8213_v50, %s6382_s25 }
0x1402   :  { %v3584_v32 = vpop.permute.xlu1 %3583 }
0x1403   :  { %v3657_v61 = vmul.f32 %v3584_v32, %v9359_v1  ;;  %v3579_v37 = vpop.permute.xlu0 %3578  ;;  %v9366_v1 = vsub.f32 0.0, %v7388_v16  ;;  %v9368_v16 = vsub.f32 0.0, %v7400_v17  ;;  %v9369_v17 = vld [vmem:[#allocation2_spill] sm:$0xff] }
0x1404   :  { %v3656_v38 = vmul.f32 %v3579_v37, %v9360_v6 }
0x1405   :  { %v3674_v53 = vmul.f32 1.442695, %v3657_v61 }
0x1406   :  { %v3672_v31 = vmul.f32 1.442695, %v3656_v38 }
0x1407   :  { %6172 = vpow2.f32 %v3674_v53  ;;  %v3594_v60 = vpop.permute.xlu0 %3593 }
0x1408   :  { %6174 = vpow2.f32 %v3672_v31  ;;  %v3659_v29 = vmul.f32 %v3594_v60, %v9361_v15  ;;  %v3589_v22 = vpop.permute.xlu1 %3588  ;;  %v9367_v31 = vsub.f32 0.0, %v7339_v44  ;;  %v6364_v15 = vld [vmem:[%s9281_s2 + $0x8] sm:$0xff] }
0x1409   :  { %v3658_v50 = vmul.f32 %v3589_v22, %v9362_v2 }
0x140a   :  { %v3678_v35 = vmul.f32 1.442695, %v3659_v29 }
0x140b   :  { %v3676_v5 = vmul.f32 1.442695, %v3658_v50  ;;  %v3604_v0 = vpop.permute.xlu0 %3603 }
0x140c   :  { %6176 = vpow2.f32 %v3678_v35  ;;  %v3661_v10 = vmul.f32 %v3604_v0, %v9363_v9  ;;  %v3599_v11 = vpop.permute.xlu1 %3598  ;;  %v9370_v9 = vsub.f32 0.0, %v9369_v17 }
0x140d   :  { %6178 = vpow2.f32 %v3676_v5  ;;  %v3660_v46 = vmul.f32 %v3599_v11, %v9364_v30 }
0x140e   :  { %v3682_v20 = vmul.f32 1.442695, %v3661_v10 }
0x140f   :  { %v3680_v3 = vmul.f32 1.442695, %v3660_v46  ;;  %v3614_v23 = vpop.permute.xlu0 %3613  ;;  %v9371_v46 = vsub.f32 0.0, %v7428_v41 }
0x1410   :  { %6180 = vpow2.f32 %v3682_v20  ;;  %v3663_v42 = vmul.f32 %v3614_v23, %v9365_v33  ;;  %v3609_v14 = vpop.permute.xlu1 %3608 }
0x1411   :  { %v6173_v32 = vpop.eup %6172  ;;  %6182 = vpow2.f32 %v3680_v3  ;;  %v3662_v61 = vmul.f32 %v3609_v14, %v9366_v1  ;;  %v6366_v3 = vld [vmem:[%s9281_s2 + $0x18] sm:$0xff] }
0x1412   :  { %v6175_v47 = vpop.eup %6174  ;;  %v3686_v37 = vmul.f32 1.442695, %v3663_v42  ;;  %v3705_v6 = vmul.f32 %v6173_v32, %v8495_v8  ;;  %v6365_v8 = vld [vmem:[%s9281_s2] sm:$0xff] }
0x1413   :  { %v3684_v38 = vmul.f32 1.442695, %v3662_v61  ;;  %v3624_v57 = vpop.permute.xlu0 %3623  ;;  %v3704_v53 = vmul.f32 %v6175_v47, %v8489_v13  ;;  %v9372_v61 = vld [vmem:[#allocation3_spill] sm:$0xff] }
0x1414   :  { %6184 = vpow2.f32 %v3686_v37  ;;  %v3665_v60 = vmul.f32 %v3624_v57, %v9367_v31  ;;  %v3619_v40 = vpop.permute.xlu1 %3618  ;;  %v8714_v29 = vadd.f32 %v6364_v15, %v3705_v6  ;;  %v9373_v47 = vsub.f32 0.0, %v9372_v61  ;;  %v6368_v31 = vld [vmem:[%s9281_s2 + $0x28] sm:$0xff]  ;;  %v6369_v15 = vld [vmem:[%s9281_s2 + $0x20] sm:$0xff] }
0x1415   :  { %6186 = vpow2.f32 %v3684_v38  ;;  %v3664_v22 = vmul.f32 %v3619_v40, %v9368_v16  ;;  %v8721_v13 = vadd.f32 %v6365_v8, %v3704_v53  ;;  %v9374_v57 = vsub.f32 0.0, %v7445_v52 }
0x1416   :  { %v6177_v2 = vpop.eup %6176  ;;  %v3690_v44 = vmul.f32 1.442695, %v3665_v60  ;;  %3738 = vmax.xlane.f32.xlu0 %v8714_v29 }
0x1417   :  { %v6179_v50 = vpop.eup %6178  ;;  %v3688_v35 = vmul.f32 1.442695, %v3664_v22  ;;  %3736 = vmax.xlane.f32.xlu1 %v8721_v13  ;;  %v3634_v5 = vpop.permute.xlu0 %3633  ;;  %v3707_v0 = vmul.f32 %v6177_v2, %v8509_v51  ;;  %v6367_v51 = vld [vmem:[%s9281_s2 + $0x10] sm:$0xff] }
0x1418   :  { %6188 = vpow2.f32 %v3690_v44  ;;  %v3667_v10 = vmul.f32 %v3634_v5, %v9370_v9  ;;  %v3629_v11 = vpop.permute.xlu1 %3628  ;;  %v3706_v30 = vmul.f32 %v6179_v50, %v8503_v24  ;;  %v9375_v2 = vld [vmem:[#allocation4_spill] sm:$0xff]  ;;  %v6370_v9 = vld [vmem:[%s9281_s2 + $0x38] sm:$0xff] }
0x1419   :  { %6190 = vpow2.f32 %v3688_v35  ;;  %v3666_v20 = vmul.f32 %v3629_v11, %v9371_v46  ;;  %v8734_v23 = vadd.f32 %v6366_v3, %v3707_v0  ;;  %v9376_v44 = vsub.f32 0.0, %v9375_v2  ;;  %v6379_v2 = vld [vmem:[%s9281_s2 + $0x70] sm:$0xff] }
0x141a   :  { %v6181_v33 = vpop.eup %6180  ;;  %v3694_v42 = vmul.f32 1.442695, %v3667_v10  ;;  %v8739_v14 = vadd.f32 %v6367_v51, %v3706_v30  ;;  %v9377_v0 = vsub.f32 0.0, %v7455_v62  ;;  %v6371_v30 = vld [vmem:[%s9281_s2 + $0x30] sm:$0xff]  ;;  %v6372_v51 = vld [vmem:[%s9281_s2 + $0x48] sm:$0xff] }
0x141b   :  { %v6183_v32 = vpop.eup %6182  ;;  %v3692_v24 = vmul.f32 1.442695, %v3666_v20  ;;  %3742 = vmax.xlane.f32.xlu1 %v8734_v23  ;;  %v3644_v41 = vpop.permute.xlu0 %3643  ;;  %v3709_v1 = vmul.f32 %v6181_v33, %v8523_v12 }
0x141c   :  { %6192 = vpow2.f32 %v3694_v42  ;;  %v3669_v37 = vmul.f32 %v3644_v41, %v9373_v47  ;;  %3740 = vmax.xlane.f32.xlu0 %v8739_v14  ;;  %v3639_v6 = vpop.permute.xlu1 %3638  ;;  %v3708_v38 = vmul.f32 %v6183_v32, %v8517_v28  ;;  %v6374_v47 = vld [vmem:[%s9281_s2 + $0x58] sm:$0xff] }
0x141d   :  { %6194 = vpow2.f32 %v3692_v24  ;;  %v3668_v53 = vmul.f32 %v3639_v6, %v9374_v57  ;;  %v8752_v60 = vadd.f32 %v6368_v31, %v3709_v1  ;;  %v6376_v31 = vld [vmem:[%s9281_s2 + $0x68] sm:$0xff] }
0x141e   :  { %v6185_v12 = vpop.eup %6184  ;;  %v3698_v40 = vmul.f32 1.442695, %v3669_v37  ;;  %v8757_v16 = vadd.f32 %v6369_v15, %v3708_v38  ;;  %v6375_v38 = vld [vmem:[%s9281_s2 + $0x50] sm:$0xff]  ;;  %v6377_v15 = vld [vmem:[%s9281_s2 + $0x60] sm:$0xff] }
0x141f   :  { %v6187_v22 = vpop.eup %6186  ;;  %v3696_v28 = vmul.f32 1.442695, %v3668_v53  ;;  %3746 = vmax.xlane.f32.xlu1 %v8752_v60  ;;  %v3654_v52 = vpop.permute.xlu0 %3653  ;;  %v3711_v8 = vmul.f32 %v6185_v12, %v8537_v4 }
0x1420   :  { %6196 = vpow2.f32 %v3698_v40  ;;  %v3671_v50 = vmul.f32 %v3654_v52, %v9376_v44  ;;  %3744 = vmax.xlane.f32.xlu0 %v8757_v16  ;;  %v3649_v35 = vpop.permute.xlu1 %3648  ;;  %v3710_v5 = vmul.f32 %v6187_v22, %v8531_v27  ;;  %v6378_v52 = vld [vmem:[%s9281_s2 + $0x78] sm:$0xff] }
0x1421   :  { %6198 = vpow2.f32 %v3696_v28  ;;  %v3670_v17 = vmul.f32 %v3649_v35, %v9377_v0  ;;  %v8770_v10 = vadd.f32 %v6370_v9, %v3711_v8 }
0x1422   :  { %v6189_v4 = vpop.eup %6188  ;;  %v3702_v11 = vmul.f32 1.442695, %v3671_v50  ;;  %v8775_v46 = vadd.f32 %v6371_v30, %v3710_v5 }
0x1423   :  { %v6191_v20 = vpop.eup %6190  ;;  %v3700_v27 = vmul.f32 1.442695, %v3670_v17  ;;  %3750 = vmax.xlane.f32.xlu1 %v8770_v10  ;;  %v3889_v62 = vpop.permute.xlu0 %3888  ;;  %v3713_v3 = vmul.f32 %v6189_v4, %v8551_v58  ;;  %v6373_v58 = vld [vmem:[%s9281_s2 + $0x40] sm:$0xff] }
0x1424   :  { %6200 = vpow2.f32 %v3702_v11  ;;  %5559 = vmatprep.subr.bf16.mxu0 %v3889_v62  ;;  %3748 = vmax.xlane.f32.xlu0 %v8775_v46  ;;  %v3891_v33 = vpop.permute.xlu1 %3890  ;;  %v3712_v42 = vmul.f32 %v6191_v20, %v8545_v7 }
0x1425   :  { %6202 = vpow2.f32 %v3700_v27  ;;  %5560 = vmatpush3.bf16.msra.mxu0 %v3889_v62  ;;  %v8784_v32 = vadd.f32 %v6372_v51, %v3713_v3 }
0x1426   :  { %v6193_v24 = vpop.eup %6192  ;;  %5561 = vmatprep.subr.bf16.mxu0 %v3891_v33  ;;  %v8789_v41 = vadd.f32 %v6373_v58, %v3712_v42 }
0x1427   :  { %v6195_v1 = vpop.eup %6194  ;;  %3754 = vmax.xlane.f32.xlu1 %v8784_v32  ;;  %v3715_v7 = vmul.f32 %v6193_v24, %v8565_v56 }
0x1428   :  { %3752 = vmax.xlane.f32.xlu0 %v8789_v41  ;;  %v3714_v61 = vmul.f32 %v6195_v1, %v8559_v34 }
0x1429   :  { %5562 = vmatpush3.bf16.msra.mxu0 %v3891_v33  ;;  %v8798_v37 = vadd.f32 %v6374_v47, %v3715_v7 }
0x142a   :  { %v6197_v6 = vpop.eup %6196  ;;  %v8803_v57 = vadd.f32 %v6375_v38, %v3714_v61 }
0x142b   :  { %v6199_v53 = vpop.eup %6198  ;;  %3758 = vmax.xlane.f32.xlu1 %v8798_v37  ;;  %v3717_v56 = vmul.f32 %v6197_v6, %v8579_v63 }
0x142c   :  { %3756 = vmax.xlane.f32.xlu0 %v8803_v57  ;;  %v3716_v34 = vmul.f32 %v6199_v53, %v8573_v59 }
0x142d   :  { %v8812_v12 = vadd.f32 %v6376_v31, %v3717_v56 }
0x142e   :  { %v6201_v40 = vpop.eup %6200  ;;  %v8817_v22 = vadd.f32 %v6377_v15, %v3716_v34 }
0x142f   :  { %v6203_v28 = vpop.eup %6202  ;;  %3762 = vmax.xlane.f32.xlu1 %v8812_v12  ;;  %v3719_v63 = vmul.f32 %v6201_v40, %v8593_v36 }
0x1430   :  { %3760 = vmax.xlane.f32.xlu0 %v8817_v22  ;;  %v3718_v59 = vmul.f32 %v6203_v28, %v8587_v43 }
0x1431   :  { %v8826_v8 = vadd.f32 %v6378_v52, %v3719_v63 }
0x1432   :  { %v8831_v44 = vadd.f32 %v6379_v2, %v3718_v59 }
0x1433   :  { %3766 = vmax.xlane.f32.xlu1 %v8826_v8 }
0x1434   :  { %3764 = vmax.xlane.f32.xlu0 %v8831_v44 }
0x1444   :  { %3896 = vrot.lane.b32.xlu1 %v8233_v49, %s6382_s25 }
0x1448   :  { %3898 = vrot.lane.b32.xlu1 %v8231_v39, %s6382_s25 }
0x144a   :  { %3892 = vrot.lane.b32.xlu0 %v8225_v19, %s6382_s25 }
0x144e   :  { %3894 = vrot.lane.b32.xlu0 %v8223_v21, %s6382_s25 }
0x1452   :  { %3900 = vrot.lane.b32.xlu0 %v8241_v48, %s6382_s25 }
0x14a3   :  { %v3739_v43 = vpop.xlane.xlu0 %3738 }
0x14a4   :  { %v3769_v36 = vsub.f32 %v8714_v29, %v3739_v43  ;;  %v3737_v50 = vpop.xlane.xlu1 %3736 }
0x14a5   :  { %v3768_v35 = vsub.f32 %v8721_v13, %v3737_v50 }
0x14a6   :  { %v3786_v5 = vmul.f32 1.442695, %v3769_v36 }
0x14a7   :  { %v3784_v49 = vmul.f32 1.442695, %v3768_v35 }
0x14a8   :  { %6204 = vpow2.f32 %v3786_v5  ;;  %v3743_v0 = vpop.xlane.xlu1 %3742 }
0x14a9   :  { %v3771_v39 = vsub.f32 %v8734_v23, %v3743_v0  ;;  %v3741_v17 = vpop.xlane.xlu0 %3740  ;;  %6206 = vpow2.f32 %v3784_v49 }
0x14aa   :  { %v3770_v21 = vsub.f32 %v8739_v14, %v3741_v17 }
0x14ab   :  { %v3790_v19 = vmul.f32 1.442695, %v3771_v39 }
0x14ac   :  { %v3747_v9 = vpop.xlane.xlu1 %3746  ;;  %v3788_v29 = vmul.f32 1.442695, %v3770_v21 }
0x14ad   :  { %v3745_v4 = vpop.xlane.xlu0 %3744  ;;  %6208 = vpow2.f32 %v3790_v19  ;;  %v3773_v11 = vsub.f32 %v8752_v60, %v3747_v9  ;;  %v5750_v9 = vld [vmem:[%s9288_s12 + $0x10] sm:$0xff]  }
0x14ae   :  { %v3772_v48 = vsub.f32 %v8757_v16, %v3745_v4  ;;  %v5751_v4 = vld [vmem:[%s9288_s12 + $0x18] sm:$0xff]   ;;  %5591 = vmatprep.subr.bf16.mxu1 %v5750_v9 }
0x14af   :  { %v3794_v14 = vmul.f32 1.442695, %v3773_v11  ;;  %5592 = vmatpush3.bf16.msra.mxu1 %v5750_v9 }
0x14b0   :  { %v3792_v13 = vmul.f32 1.442695, %v3772_v48  ;;  %v3751_v30 = vpop.xlane.xlu1 %3750  ;;  %5593 = vmatprep.subr.bf16.mxu1 %v5751_v4 }
0x14b1   :  { %v3775_v20 = vsub.f32 %v8770_v10, %v3751_v30  ;;  %v3749_v27 = vpop.xlane.xlu0 %3748 }
0x14b2   :  { %v8852_v62 = vpop.eup %6204  ;;  %6210 = vpow2.f32 %v3792_v13  ;;  %v3774_v23 = vsub.f32 %v8775_v46, %v3749_v27 }
0x14b3   :  { %v3798_v3 = vmul.f32 1.442695, %v3775_v20  ;;  %3818 = vadd.xlane.f32.xlu1 %v8852_v62  ;;  %6212 = vpow2.f32 %v3788_v29  ;;  %v8857_v42 = vpop.eup %6206  ;;  %5594 = vmatpush3.bf16.msra.mxu1 %v5751_v4 }
0x14b4   :  { %v3755_v16 = vpop.xlane.xlu1 %3754  ;;  %v3796_v51 = vmul.f32 1.442695, %v3774_v23 }
0x14b5   :  { %6214 = vpow2.f32 %v3798_v3  ;;  %v3777_v33 = vsub.f32 %v8784_v32, %v3755_v16  ;;  %v3753_v60 = vpop.xlane.xlu0 %3752 }
0x14b6   :  { %v3776_v10 = vsub.f32 %v8789_v41, %v3753_v60  ;;  %6216 = vpow2.f32 %v3794_v14 }
0x14b7   :  { %3816 = vadd.xlane.f32.xlu1 %v8857_v42  ;;  %v3802_v24 = vmul.f32 1.442695, %v3777_v33  ;;  %v8862_v7 = vpop.eup %6208  ;;  %6218 = vpow2.f32 %v3796_v51 }
0x14b8   :  { %v3759_v46 = vpop.xlane.xlu1 %3758  ;;  %v3800_v61 = vmul.f32 1.442695, %v3776_v10 }
0x14b9   :  { %v3779_v58 = vsub.f32 %v8798_v37, %v3759_v46  ;;  %v3757_v1 = vpop.xlane.xlu0 %3756  ;;  %6220 = vpow2.f32 %v3802_v24 }
0x14ba   :  { %v3778_v41 = vsub.f32 %v8803_v57, %v3757_v1  ;;  %6222 = vpow2.f32 %v3800_v61 }
0x14bb   :  { %3822 = vadd.xlane.f32.xlu1 %v8862_v7  ;;  %v3806_v47 = vmul.f32 1.442695, %v3779_v58 }
0x14bc   :  { %v8865_v32 = vpop.eup %6210  ;;  %v3763_v6 = vpop.xlane.xlu1 %3762  ;;  %v3804_v31 = vmul.f32 1.442695, %v3778_v41 }
0x14bd   :  { %v3761_v38 = vpop.xlane.xlu0 %3760  ;;  %3824 = vadd.xlane.f32.xlu0 %v8865_v32  ;;  %v8869_v53 = vpop.eup %6212  ;;  %6224 = vpow2.f32 %v3806_v47  ;;  %v3781_v15 = vsub.f32 %v8812_v12, %v3763_v6 }
0x14be   :  { %v3780_v37 = vsub.f32 %v8817_v22, %v3761_v38 }
0x14bf   :  { %v8872_v56 = vpop.eup %6214  ;;  %3820 = vadd.xlane.f32.xlu1 %v8869_v53  ;;  %v3810_v43 = vmul.f32 1.442695, %v3781_v15 }
0x14c0   :  { %v3808_v34 = vmul.f32 1.442695, %v3780_v37  ;;  %v8876_v57 = vpop.eup %6216  ;;  %v3767_v63 = vpop.xlane.xlu1 %3766 }
0x14c1   :  { %v3765_v40 = vpop.xlane.xlu0 %3764  ;;  %3830 = vadd.xlane.f32.xlu0 %v8872_v56  ;;  %v8881_v22 = vpop.eup %6218  ;;  %v3783_v36 = vsub.f32 %v8826_v8, %v3767_v63 }
0x14c2   :  { %6226 = vpow2.f32 %v3808_v34  ;;  %v3782_v28 = vsub.f32 %v8831_v44, %v3765_v40 }
0x14c3   :  { %3826 = vadd.xlane.f32.xlu1 %v8876_v57  ;;  %6228 = vpow2.f32 %v3804_v31  ;;  %v8884_v2 = vpop.eup %6220  ;;  %v3814_v35 = vmul.f32 1.442695, %v3783_v36 }
0x14c4   :  { %v3812_v59 = vmul.f32 1.442695, %v3782_v28  ;;  %v8888_v12 = vpop.eup %6222  ;;  %v3897_v44 = vpop.permute.xlu1 %3896 }
0x14c5   :  { %v3893_v52 = vpop.permute.xlu0 %3892  ;;  %3828 = vadd.xlane.f32.xlu0 %v8881_v22 }
0x14c6   :  { %6230 = vpow2.f32 %v3812_v59  ;;  %5563 = vmatprep.subr.bf16.mxu0 %v3893_v52 }
0x14c7   :  { %5564 = vmatpush3.bf16.msra.mxu0 %v3893_v52  ;;  %3834 = vadd.xlane.f32.xlu1 %v8884_v2  ;;  %6232 = vpow2.f32 %v3810_v43  ;;  %v8891_v5 = vpop.eup %6224 }
0x14c8   :  { %6234 = vpow2.f32 %v3814_v35  ;;  %v3899_v0 = vpop.permute.xlu1 %3898 }
0x14c9   :  { %v3895_v50 = vpop.permute.xlu0 %3894  ;;  %3832 = vadd.xlane.f32.xlu0 %v8888_v12 }
0x14ca   :  { %5565 = vmatprep.subr.bf16.mxu0 %v3895_v50 }
0x14cb   :  { %5566 = vmatpush3.bf16.msra.mxu0 %v3895_v50 }
0x14cc   :  { %v8893_v49 = vpop.eup %6226  ;;  %5567 = vmatprep.subr.bf16.mxu0 %v3897_v44 }
0x14cd   :  { %3840 = vadd.xlane.f32.xlu1 %v8893_v49  ;;  %3838 = vadd.xlane.f32.xlu0 %v8891_v5  ;;  %v8897_v8 = vpop.eup %6228  ;;  %v3901_v17 = vpop.permute.xlu0 %3900 }
0x14cf   :  { %5568 = vmatpush3.bf16.msra.mxu0 %v3897_v44 }
0x14d0   :  { %v8899_v39 = vpop.eup %6230  ;;  %5569 = vmatprep.subr.bf16.mxu0 %v3899_v0 }
0x14d1   :  { %3844 = vadd.xlane.f32.xlu1 %v8899_v39  ;;  %3836 = vadd.xlane.f32.xlu0 %v8897_v8  ;;  %v8903_v19 = vpop.eup %6232 }
0x14d2   :  { %v8906_v21 = vpop.eup %6234 }
0x14d3   :  { %5570 = vmatpush3.bf16.msra.mxu0 %v3899_v0 }
0x14d4   :  { %5571 = vmatprep.subr.bf16.mxu0 %v3901_v17 }
0x14d5   :  { %3842 = vadd.xlane.f32.xlu0 %v8903_v19 }
0x14d7   :  { %5572 = vmatpush3.bf16.msra.mxu0 %v3901_v17 }
0x14d9   :  { %3846 = vadd.xlane.f32.xlu0 %v8906_v21 }
0x14e2   :  { %3902 = vrot.lane.b32.xlu1 %v8239_v18, %s6382_s25 }
0x1540   :  { %v3819_v48 = vpop.xlane.xlu1 %3818 }
0x1541   :  { %6236 = vrcp.f32 %v3819_v48 }
0x1544   :  { %v3817_v29 = vpop.xlane.xlu1 %3816 }
0x1545   :  { %6238 = vrcp.f32 %v3817_v29 }
0x1548   :  { %v3823_v11 = vpop.xlane.xlu1 %3822 }
0x154a   :  { %v3825_v13 = vpop.xlane.xlu0 %3824 }
0x154b   :  { %v6237_v18 = vpop.eup %6236 }
0x154c   :  { %v3821_v30 = vpop.xlane.xlu1 %3820  ;;  %v3865_v14 = vmul.f32 %v6237_v18, %v8852_v62 }
0x154d   :  { %6240 = vrcp.f32 %v3821_v30 }
0x154e   :  { %v3831_v20 = vpop.xlane.xlu0 %3830 }
0x154f   :  { %v6239_v27 = vpop.eup %6238 }
0x1550   :  { %v3827_v23 = vpop.xlane.xlu1 %3826  ;;  %v3864_v3 = vmul.f32 %v6239_v27, %v8857_v42 }
0x1551   :  { %6242 = vrcp.f32 %v3827_v23 }
0x1552   :  { %v3829_v16 = vpop.xlane.xlu0 %3828  ;;  %v3880_v33 = vpack.c.bf16 %v3865_v14, %v3864_v3  ;;  %6244 = vrcp.f32 %v3823_v11 }
0x1553   :  { %6246 = vrcp.f32 %v3825_v13 }
0x1554   :  { %5575 = vmatprep.mubr.bf16.mxu0 %v3880_v33  ;;  %v3835_v60 = vpop.xlane.xlu1 %3834  ;;  %6248 = vrcp.f32 %v3829_v16 }
0x1556   :  { %v3833_v51 = vpop.xlane.xlu0 %3832 }
0x1557   :  { %6250 = vrcp.f32 %v3833_v51  ;;  %v6241_v46 = vpop.eup %6240 }
0x1558   :  { %6252 = vrcp.f32 %v3831_v20  ;;  %v3866_v47 = vmul.f32 %v6241_v46, %v8869_v53 }
0x1559   :  { %6254 = vrcp.f32 %v3835_v60 }
0x155a   :  { %v3839_v10 = vpop.xlane.xlu0 %3838  ;;  %v3841_v24 = vpop.xlane.xlu1 %3840 }
0x155b   :  { %v6243_v42 = vpop.eup %6242 }
0x155c   :  { %v6245_v62 = vpop.eup %6244  ;;  %v3869_v38 = vmul.f32 %v6243_v42, %v8876_v57 }
0x155d   :  { %v6247_v61 = vpop.eup %6246  ;;  %v3867_v37 = vmul.f32 %v6245_v62, %v8862_v7 }
0x155e   :  { %v3837_v58 = vpop.xlane.xlu0 %3836  ;;  %v3845_v1 = vpop.xlane.xlu1 %3844  ;;  %v3868_v34 = vmul.f32 %v6247_v61, %v8865_v32  ;;  %v8944_v61 = vld [vmem:[%s9289_s13 + $0x1] ss:$0 sm:$0xff] }
0x155f   :  { %6256 = vrcp.f32 %v3837_v58  ;;  %v3881_v31 = vpack.c.bf16 %v3867_v37, %v3866_v47  ;;  %v6249_v40 = vpop.eup %6248 }
0x1560   :  { %v3882_v15 = vpack.c.bf16 %v3869_v38, %v3868_v34  ;;  %v3870_v57 = vmul.f32 %v6249_v40, %v8881_v22 }
0x1561   :  { %v6251_v28 = vpop.eup %6250 }
0x1562   :  { %v3843_v41 = vpop.xlane.xlu0 %3842  ;;  %v3903_v6 = vpop.permute.xlu1 %3902  ;;  %v3872_v7 = vmul.f32 %v6251_v28, %v8888_v12 }
0x1563   :  { %5573 = vmatprep.subr.bf16.mxu0 %v3903_v6  ;;  %6258 = vrcp.f32 %v3843_v41  ;;  %v6253_v53 = vpop.eup %6252 }
0x1564   :  { %5574 = vmatpush3.bf16.msra.mxu0 %v3903_v6  ;;  %6260 = vrcp.f32 %v3839_v10  ;;  %v6255_v63 = vpop.eup %6254  ;;  %v3871_v52 = vmul.f32 %v6253_v53, %v8872_v56 }
0x1565   :  { %6262 = vrcp.f32 %v3841_v24  ;;  %v3873_v32 = vmul.f32 %v6255_v63, %v8884_v2 }
0x1566   :  { %v3847_v59 = vpop.xlane.xlu0 %3846  ;;  %v3883_v43 = vpack.c.bf16 %v3871_v52, %v3870_v57 }
0x1567   :  { %5576 = vmatmul.mubr.bf16.vlgmr.msra.gmra.mrb[100].mxu0 %v3881_v31  ;;  %6264 = vrcp.f32 %v3847_v59  ;;  %v3884_v44 = vpack.c.bf16 %v3873_v32, %v3872_v7 }
0x1568   :  { %5579 = vmatprep.mubr.bf16.mxu0 %v3882_v15  ;;  %6266 = vrcp.f32 %v3845_v1 }
0x1569   :  { %v6257_v36 = vpop.eup %6256 }
0x156a   :  { %v3874_v17 = vmul.f32 %v6257_v36, %v8897_v8 }
0x156d   :  { %v6259_v50 = vpop.eup %6258 }
0x156e   :  { %v6261_v35 = vpop.eup %6260  ;;  %v3877_v22 = vmul.f32 %v6259_v50, %v8903_v19 }
0x156f   :  { %5580 = vmatmul.mubr.bf16.gmra.mrb[104].mxu0 %v3883_v43  ;;  %v6263_v0 = vpop.eup %6262  ;;  %v3875_v12 = vmul.f32 %v6261_v35, %v8891_v5  ;;  %v9378_v35 = vld [vmem:[#allocation5_spill] sm:$0xff] }
0x1570   :  { %5583 = vmatprep.mubr.bf16.mxu0 %v3884_v44  ;;  %v3876_v56 = vmul.f32 %v6263_v0, %v8893_v49 }
0x1571   :  { %v3885_v9 = vpack.c.bf16 %v3875_v12, %v3874_v17  ;;  %v6265_v4 = vpop.eup %6264 }
0x1572   :  { %v3886_v2 = vpack.c.bf16 %v3877_v22, %v3876_v56  ;;  %v6267_v48 = vpop.eup %6266  ;;  %v3879_v29 = vmul.f32 %v6265_v4, %v8906_v21  ;;  %v9379_v56 = vld [vmem:[#allocation7_spill] sm:$0xff] }
0x1573   :  { %v3878_v11 = vmul.f32 %v6267_v48, %v8899_v39 }
0x1575   :  { %v3887_v13 = vpack.c.bf16 %v3879_v29, %v3878_v11  ;;  %v9380_v29 = vld [vmem:[#allocation6_spill] sm:$0xff] }
0x1577   :  { %5584 = vmatmul.mubr.bf16.gmra.mrb[108].mxu0 %v3885_v9 }
0x1578   :  { %5587 = vmatprep.mubr.bf16.mxu0 %v3886_v2 }
0x157f   :  { %5588 = vmatmul.mubr.bf16.gmra.mrb[112].mxu0 %v3887_v13 }
0x163a   :  { %v5577_v30 = vpop.f32.mrb[100].mxu0 }
0x163b   :  { %v3946_v8 = vpop.f32.mrb[101].mxu0 }
0x163c   :  { %v5578_v18 = vpop.f32.mrb[102].mxu0 }
0x163d   :  { %v4010_v19 = vpack.c.bf16 %v5578_v18, %v5577_v30  ;;  %v3949_v20 = vpop.f32.mrb[103].mxu0 }
0x163e   :  { %v4009_v5 = vpack.c.bf16 %v3949_v20, %v3946_v8  ;;  %v9381_v20 = vld [vmem:[#allocation13_spill] sm:$0xff] }
0x1640   :  { %5595 = vmatprep.mubr.msk.bf16.mxu1 %vm148_vm0, %v4009_v5 }
0x1641   :  { %5596 = vmatmul.mubr.msk.bf16.vlgmr.msra.gmra.mrb[60].mxu1 %vm148_vm0, %v4010_v19 }
0x1642   :  { %v5581_v49 = vpop.f32.mrb[104].mxu0 }
0x1643   :  { %v3962_v27 = vpop.f32.mrb[105].mxu0 }
0x1644   :  { %v5582_v23 = vpop.f32.mrb[106].mxu0 }
0x1645   :  { %v4012_v3 = vpack.c.bf16 %v5582_v23, %v5581_v49  ;;  %v3965_v14 = vpop.f32.mrb[107].mxu0 }
0x1646   :  { %v4011_v21 = vpack.c.bf16 %v3965_v14, %v3962_v27  ;;  %v9382_v27 = vld [vmem:[#allocation9_spill] sm:$0xff] }
0x1648   :  { %5599 = vmatprep.mubr.msk.bf16.mxu1 %vm148_vm0, %v4011_v21 }
0x1649   :  { %5600 = vmatmul.mubr.msk.bf16.gmra.mrb[64].mxu1 %vm148_vm0, %v4012_v3 }
0x164a   :  { %v5585_v39 = vpop.f32.mrb[108].mxu0 }
0x164b   :  { %v3978_v16 = vpop.f32.mrb[109].mxu0 }
0x164c   :  { %v5586_v33 = vpop.f32.mrb[110].mxu0 }
0x164d   :  { %v4014_v60 = vpack.c.bf16 %v5586_v33, %v5585_v39  ;;  %v3981_v51 = vpop.f32.mrb[111].mxu0  ;;  %v9383_v39 = vld [vmem:[#allocation8_spill] sm:$0xff] }
0x164e   :  { %v4013_v10 = vpack.c.bf16 %v3981_v51, %v3978_v16  ;;  %v9384_v51 = vld [vmem:[#allocation11_spill] sm:$0xff] }
0x1650   :  { %5603 = vmatprep.mubr.msk.bf16.mxu1 %vm148_vm0, %v4013_v10 }
0x1651   :  { %5604 = vmatmul.mubr.msk.bf16.gmra.mrb[68].mxu1 %vm148_vm0, %v4014_v60 }
0x1652   :  { %v5589_v24 = vpop.f32.mrb[112].mxu0 }
0x1653   :  { %v3994_v46 = vpop.f32.mrb[113].mxu0 }
0x1654   :  { %v5590_v58 = vpop.f32.mrb[114].mxu0 }
0x1655   :  { %v4016_v1 = vpack.c.bf16 %v5590_v58, %v5589_v24  ;;  %v3997_v42 = vpop.f32.mrb[115].mxu0  ;;  %v9385_v58 = vld [vmem:[#allocation10_spill] sm:$0xff] }
0x1656   :  { %v4015_v62 = vpack.c.bf16 %v3997_v42, %v3994_v46 }
0x1658   :  { %5607 = vmatprep.mubr.msk.bf16.mxu1 %vm148_vm0, %v4015_v62 }
0x1659   :  { %5608 = vmatmul.mubr.msk.bf16.gmra.mrb[72].mxu1 %vm148_vm0, %v4016_v1 }
0x1714   :  { %v5597_v47 = vpop.f32.mrb[60].mxu1 }
0x1715   :  { %v4106_v41 = vadd.f32 %v5597_v47, %v8944_v61  ;;  %v4097_v6 = vpop.f32.mrb[61].mxu1  ;;  %v9386_v47 = vld [vmem:[#allocation12_spill] sm:$0xff] }
0x1716   :  { %v4098_v38 = vadd.f32 %v8944_v61, %v4097_v6  ;;  %v5598_v37 = vpop.f32.mrb[62].mxu1 }
0x1717   :  { %v8949_v34 = vadd.f32 %v4106_v41, %v7957_v45  ;;  %v4100_v31 = vpop.f32.mrb[63].mxu1  ;;  %v4109_v15 = vadd.f32 %v5598_v37, %v8944_v61 }
0x1718   :  { %v8952_v40 = vadd.f32 %v4098_v38, %v7952_v26  ;;  %v4101_v59 = vadd.f32 %v8944_v61, %v4100_v31  ;;  %v9387_v31 = vld [vmem:[#allocation14_spill] sm:$0xff] }
0x1719   :  { %v4184_v28 = vsel %vm148_vm0, %v8949_v34, 0.0  ;;  %v8958_v63 = vadd.f32 %v4109_v15, %v7965_v54 }
0x171a   :  { %4185 = vadd.xlane.f32.xlu0 %v4184_v28  ;;  %v4178_v45 = vsel %vm148_vm0, %v8952_v40, 0.0  ;;  %v8968_v43 = vadd.f32 %v4101_v59, %v7960_v55 }
0x171b   :  { %v4187_v36 = vsel %vm148_vm0, %v8958_v63, 0.0 }
0x171c   :  { %v5601_v53 = vpop.f32.mrb[64].mxu1  ;;  %v4181_v55 = vsel %vm148_vm0, %v8968_v43, 0.0 }
0x171d   :  { %v4113_v57 = vpop.f32.mrb[65].mxu1  ;;  %v4122_v54 = vadd.f32 %v5601_v53, %v8944_v61  ;;  %v9388_v53 = vld [vmem:[#allocation15_spill] sm:$0xff] }
0x171e   :  { %v4114_v7 = vadd.f32 %v8944_v61, %v4113_v57  ;;  %4179 = vadd.xlane.f32.xlu0 %v4178_v45  ;;  %v5602_v26 = vpop.f32.mrb[66].mxu1 }
0x171f   :  { %v4116_v52 = vpop.f32.mrb[67].mxu1  ;;  %v8976_v0 = vadd.f32 %v4122_v54, %v9378_v35 }
0x1720   :  { %v8965_v32 = vadd.f32 %v4114_v7, %v7974_v25  ;;  %v4125_v25 = vadd.f32 %v5602_v26, %v8944_v61  ;;  %v4117_v4 = vadd.f32 %v8944_v61, %v4116_v52 }
0x1721   :  { %v4196_v2 = vsel %vm148_vm0, %v8976_v0, 0.0 }
0x1722   :  { %4188 = vadd.xlane.f32.xlu0 %v4187_v36  ;;  %v4190_v44 = vsel %vm148_vm0, %v8965_v32, 0.0  ;;  %v8982_v9 = vadd.f32 %v4125_v25, %v9379_v56  ;;  %v8988_v11 = vadd.f32 %v4117_v4, %v9380_v29 }
0x1723   :  { %4191 = vadd.xlane.f32.xlu1 %v4190_v44 }
0x1724   :  { %v5605_v50 = vpop.f32.mrb[68].mxu1  ;;  %v4199_v18 = vsel %vm148_vm0, %v8982_v9, 0.0  ;;  %v4193_v14 = vsel %vm148_vm0, %v8988_v11, 0.0 }
0x1725   :  { %v4129_v17 = vpop.f32.mrb[69].mxu1  ;;  %v4138_v13 = vadd.f32 %v5605_v50, %v8944_v61 }
0x1726   :  { %4182 = vadd.xlane.f32.xlu0 %v4181_v55  ;;  %v5606_v22 = vpop.f32.mrb[70].mxu1  ;;  %v4130_v3 = vadd.f32 %v8944_v61, %v4129_v17 }
0x1727   :  { %v4132_v12 = vpop.f32.mrb[71].mxu1  ;;  %v8998_v23 = vadd.f32 %v4138_v13, %v9382_v27  ;;  %v4141_v33 = vadd.f32 %v5606_v22, %v8944_v61 }
0x1728   :  { %v9006_v16 = vadd.f32 %v4130_v3, %v9383_v39  ;;  %v4133_v24 = vadd.f32 %v8944_v61, %v4132_v12 }
0x1729   :  { %v4208_v60 = vsel %vm148_vm0, %v8998_v23, 0.0  ;;  %v9012_v10 = vadd.f32 %v4141_v33, %v9384_v51 }
0x172a   :  { %4197 = vadd.xlane.f32.xlu0 %v4196_v2  ;;  %v4202_v46 = vsel %vm148_vm0, %v9006_v16, 0.0  ;;  %v9018_v1 = vadd.f32 %v4133_v24, %v9385_v58 }
0x172b   :  { %v4211_v62 = vsel %vm148_vm0, %v9012_v10, 0.0 }
0x172c   :  { %v5609_v48 = vpop.f32.mrb[72].mxu1  ;;  %v4205_v38 = vsel %vm148_vm0, %v9018_v1, 0.0 }
0x172d   :  { %v4154_v30 = vadd.f32 %v5609_v48, %v8944_v61  ;;  %v4145_v8 = vpop.f32.mrb[73].mxu1 }
0x172e   :  { %4200 = vadd.xlane.f32.xlu0 %v4199_v18  ;;  %v5610_v19 = vpop.f32.mrb[74].mxu1  ;;  %v4146_v42 = vadd.f32 %v8944_v61, %v4145_v8 }
0x172f   :  { %v8995_v5 = vadd.f32 %v4154_v30, %v9381_v20  ;;  %v4148_v49 = vpop.f32.mrb[75].mxu1  ;;  %v4157_v37 = vadd.f32 %v5610_v19, %v8944_v61 }
0x1730   :  { %v9024_v41 = vadd.f32 %v4146_v42, %v9386_v47  ;;  %v4149_v6 = vadd.f32 %v8944_v61, %v4148_v49 }
0x1731   :  { %v4220_v21 = vsel %vm148_vm0, %v8995_v5, 0.0  ;;  %v9036_v59 = vadd.f32 %v4157_v37, %v9388_v53 }
0x1732   :  { %4194 = vadd.xlane.f32.xlu0 %v4193_v14  ;;  %4221 = vadd.xlane.f32.xlu1 %v4220_v21  ;;  %v9031_v15 = vadd.f32 %v4149_v6, %v9387_v31  ;;  %v4214_v28 = vsel %vm148_vm0, %v9024_v41, 0.0 }
0x1733   :  { %v4223_v45 = vsel %vm148_vm0, %v9036_v59, 0.0 }
0x1734   :  { %v4217_v57 = vsel %vm148_vm0, %v9031_v15, 0.0 }
0x1736   :  { %4209 = vadd.xlane.f32.xlu0 %v4208_v60 }
0x173a   :  { %4203 = vadd.xlane.f32.xlu0 %v4202_v46 }
0x173e   :  { %4212 = vadd.xlane.f32.xlu0 %v4211_v62 }
0x1742   :  { %4206 = vadd.xlane.f32.xlu0 %v4205_v38 }
0x1746   :  { %4215 = vadd.xlane.f32.xlu0 %v4214_v28 }
0x174a   :  { %4218 = vadd.xlane.f32.xlu0 %v4217_v57 }
0x174e   :  { %4224 = vadd.xlane.f32.xlu0 %v4223_v45 }
0x17a7   :  { %v4186_v7 = vpop.xlane.xlu0 %4185 }
0x17a8   :  { %v4228_v61 = vmul.f32 0.03125, %v4186_v7 }
0x17aa   :  { %v9043_v54 = vsub.f32 %v8949_v34, %v4228_v61 }
0x17ab   :  { %v4180_v26 = vpop.xlane.xlu0 %4179 }
0x17ac   :  { %v4226_v52 = vmul.f32 0.03125, %v4180_v26  ;;  %v4260_v22 = vmul.f32 %v9043_v54, %v9043_v54 }
0x17ae   :  { %v9046_v36 = vsub.f32 %v8952_v40, %v4226_v52  ;;  %v4280_v29 = vsel %vm148_vm0, %v4260_v22, 0.0 }
0x17af   :  { %v4189_v44 = vpop.xlane.xlu0 %4188 }
0x17b0   :  { %v4192_v50 = vpop.xlane.xlu1 %4191  ;;  %v4258_v35 = vmul.f32 %v9046_v36, %v9046_v36  ;;  %v4229_v17 = vmul.f32 0.03125, %v4189_v44 }
0x17b1   :  { %v4230_v25 = vmul.f32 0.03125, %v4192_v50 }
0x17b2   :  { %v4274_v55 = vsel %vm148_vm0, %v4258_v35, 0.0  ;;  %v9057_v2 = vsub.f32 %v8958_v63, %v4229_v17  ;;  %v5752_v35 = vld [vmem:[%s9290_s16 + $0x10] sm:$0xff]  }
0x17b3   :  { %v9054_v12 = vsub.f32 %v8965_v32, %v4230_v25  ;;  %v4183_v56 = vpop.xlane.xlu0 %4182  ;;  %4275 = vadd.xlane.f32.xlu1 %v4274_v55  ;;  %5611 = vmatprep.subr.bf16.mxu0 %v5752_v35 }
0x17b4   :  { %v4227_v4 = vmul.f32 0.03125, %v4183_v56  ;;  %v4261_v27 = vmul.f32 %v9057_v2, %v9057_v2  ;;  %5612 = vmatpush3.bf16.msra.mxu0 %v5752_v35 }
0x17b5   :  { %v4262_v13 = vmul.f32 %v9054_v12, %v9054_v12 }
0x17b6   :  { %v9060_v48 = vsub.f32 %v8968_v43, %v4227_v4  ;;  %v4283_v33 = vsel %vm148_vm0, %v4261_v27, 0.0 }
0x17b7   :  { %v4198_v30 = vpop.xlane.xlu0 %4197  ;;  %4281 = vadd.xlane.f32.xlu1 %v4280_v29  ;;  %v4286_v20 = vsel %vm148_vm0, %v4262_v13, 0.0 }
0x17b8   :  { %v4232_v8 = vmul.f32 0.03125, %v4198_v30  ;;  %v4259_v18 = vmul.f32 %v9060_v48, %v9060_v48 }
0x17ba   :  { %v9068_v19 = vsub.f32 %v8976_v0, %v4232_v8  ;;  %v4277_v49 = vsel %vm148_vm0, %v4259_v18, 0.0 }
0x17bb   :  { %v4201_v3 = vpop.xlane.xlu0 %4200  ;;  %4287 = vadd.xlane.f32.xlu1 %v4286_v20  ;;  %4278 = vadd.xlane.f32.xlu0 %v4277_v49 }
0x17bc   :  { %v4264_v14 = vmul.f32 %v9068_v19, %v9068_v19  ;;  %v4233_v21 = vmul.f32 0.03125, %v4201_v3 }
0x17be   :  { %v4292_v39 = vsel %vm148_vm0, %v4264_v14, 0.0  ;;  %v9079_v24 = vsub.f32 %v8982_v9, %v4233_v21 }
0x17bf   :  { %v4195_v60 = vpop.xlane.xlu0 %4194  ;;  %4293 = vadd.xlane.f32.xlu1 %v4292_v39  ;;  %4284 = vadd.xlane.f32.xlu0 %v4283_v33  ;;  %v4222_v52 = vpop.xlane.xlu1 %4221 }
0x17c0   :  { %v4231_v51 = vmul.f32 0.03125, %v4195_v60  ;;  %v4265_v6 = vmul.f32 %v9079_v24, %v9079_v24  ;;  %v4240_v25 = vmul.f32 0.03125, %v4222_v52 }
0x17c2   :  { %v9082_v46 = vsub.f32 %v8988_v11, %v4231_v51  ;;  %v4295_v53 = vsel %vm148_vm0, %v4265_v6, 0.0  ;;  %v9114_v13 = vsub.f32 %v8995_v5, %v4240_v25 }
0x17c3   :  { %v4210_v58 = vpop.xlane.xlu0 %4209 }
0x17c4   :  { %v4263_v42 = vmul.f32 %v9082_v46, %v9082_v46  ;;  %v4236_v62 = vmul.f32 0.03125, %v4210_v58  ;;  %v4272_v39 = vmul.f32 %v9114_v13, %v9114_v13 }
0x17c6   :  { %v4289_v47 = vsel %vm148_vm0, %v4263_v42, 0.0  ;;  %v9090_v31 = vsub.f32 %v8998_v23, %v4236_v62  ;;  %v4316_v42 = vsel %vm148_vm0, %v4272_v39, 0.0  ;;  %v9151_v39 = vld [vmem:[%s9347_s30 + $0x1] ss:$0 sm:$0xff] }
0x17c7   :  { %v4204_v38 = vpop.xlane.xlu0 %4203  ;;  %4290 = vadd.xlane.f32.xlu0 %v4289_v47  ;;  %v5753_v47 = vld [vmem:[%s9290_s16 + $0x18] sm:$0xff]  }
0x17c8   :  { %v4234_v37 = vmul.f32 0.03125, %v4204_v38  ;;  %v4268_v26 = vmul.f32 %v9090_v31, %v9090_v31  ;;  %5613 = vmatprep.subr.bf16.mxu0 %v5753_v47 }
0x17c9   :  { %5614 = vmatpush3.bf16.msra.mxu0 %v5753_v47 }
0x17ca   :  { %v9093_v28 = vsub.f32 %v9006_v16, %v4234_v37  ;;  %v4304_v22 = vsel %vm148_vm0, %v4268_v26, 0.0  ;;  %v5754_v37 = vld [vmem:[%s9293_s18 + $0x10] sm:$0xff]  }
0x17cb   :  { %v4213_v57 = vpop.xlane.xlu0 %4212  ;;  %4296 = vadd.xlane.f32.xlu0 %v4295_v53  ;;  %5631 = vmatprep.subr.bf16.mxu1 %v5754_v37 }
0x17cc   :  { %v4266_v45 = vmul.f32 %v9093_v28, %v9093_v28  ;;  %v4237_v7 = vmul.f32 0.03125, %v4213_v57  ;;  %5632 = vmatpush3.bf16.msra.mxu1 %v5754_v37 }
0x17ce   :  { %v4298_v61 = vsel %vm148_vm0, %v4266_v45, 0.0  ;;  %v9105_v17 = vsub.f32 %v9012_v10, %v4237_v7 }
0x17cf   :  { %v4207_v44 = vpop.xlane.xlu0 %4206  ;;  %4299 = vadd.xlane.f32.xlu1 %v4298_v61 }
0x17d0   :  { %v4235_v50 = vmul.f32 0.03125, %v4207_v44  ;;  %v4269_v18 = vmul.f32 %v9105_v17, %v9105_v17 }
0x17d2   :  { %v9108_v55 = vsub.f32 %v9018_v1, %v4235_v50  ;;  %v4307_v14 = vsel %vm148_vm0, %v4269_v18, 0.0 }
0x17d3   :  { %4305 = vadd.xlane.f32.xlu1 %v4304_v22  ;;  %v4216_v56 = vpop.xlane.xlu0 %4215 }
0x17d4   :  { %v4238_v4 = vmul.f32 0.03125, %v4216_v56  ;;  %v4267_v29 = vmul.f32 %v9108_v55, %v9108_v55 }
0x17d6   :  { %v9117_v30 = vsub.f32 %v9024_v41, %v4238_v4  ;;  %v4301_v8 = vsel %vm148_vm0, %v4267_v29, 0.0 }
0x17d7   :  { %4302 = vadd.xlane.f32.xlu0 %v4301_v8  ;;  %v4219_v20 = vpop.xlane.xlu0 %4218 }
0x17d8   :  { %v4239_v49 = vmul.f32 0.03125, %v4219_v20  ;;  %v4270_v27 = vmul.f32 %v9117_v30, %v9117_v30 }
0x17da   :  { %v9125_v3 = vsub.f32 %v9031_v15, %v4239_v49  ;;  %v4310_v21 = vsel %vm148_vm0, %v4270_v27, 0.0 }
0x17db   :  { %4308 = vadd.xlane.f32.xlu0 %v4307_v14  ;;  %4311 = vadd.xlane.f32.xlu1 %v4310_v21  ;;  %v4225_v33 = vpop.xlane.xlu0 %4224 }
0x17dc   :  { %v4241_v60 = vmul.f32 0.03125, %v4225_v33  ;;  %v4271_v51 = vmul.f32 %v9125_v3, %v9125_v3 }
0x17de   :  { %v9134_v58 = vsub.f32 %v9036_v59, %v4241_v60  ;;  %v4313_v62 = vsel %vm148_vm0, %v4271_v51, 0.0 }
0x17df   :  { %4317 = vadd.xlane.f32.xlu1 %v4316_v42  ;;  %4314 = vadd.xlane.f32.xlu0 %v4313_v62 }
0x17e0   :  { %v4273_v6 = vmul.f32 %v9134_v58, %v9134_v58 }
0x17e2   :  { %v4319_v38 = vsel %vm148_vm0, %v4273_v6, 0.0 }
0x17e3   :  { %4320 = vadd.xlane.f32.xlu0 %v4319_v38 }
0x1840   :  { %v4276_v53 = vpop.xlane.xlu1 %4275 }
0x1841   :  { %v4322_v57 = vmul.f32 0.03125, %v4276_v53 }
0x1843   :  { %v4338_v45 = vadd.f32 1e-05, %v4322_v57 }
0x1844   :  { %v4282_v7 = vpop.xlane.xlu1 %4281 }
0x1845   :  { %v4324_v61 = vmul.f32 0.03125, %v4282_v7  ;;  %6268 = vrsqrt.f32 %v4338_v45 }
0x1847   :  { %v4340_v26 = vadd.f32 1e-05, %v4324_v61 }
0x1848   :  { %v4288_v52 = vpop.xlane.xlu1 %4287  ;;  %v4279_v44 = vpop.xlane.xlu0 %4278 }
0x1849   :  { %v4326_v50 = vmul.f32 0.03125, %v4288_v52  ;;  %v4323_v35 = vmul.f32 0.03125, %v4279_v44  ;;  %6270 = vrsqrt.f32 %v4340_v26 }
0x184b   :  { %v4339_v25 = vadd.f32 1e-05, %v4323_v35  ;;  %v4342_v4 = vadd.f32 1e-05, %v4326_v50 }
0x184c   :  { %v4294_v22 = vpop.xlane.xlu1 %4293  ;;  %v4285_v56 = vpop.xlane.xlu0 %4284 }
0x184d   :  { %v4325_v29 = vmul.f32 0.03125, %v4285_v56  ;;  %6272 = vrsqrt.f32 %v4339_v25  ;;  %v4328_v8 = vmul.f32 0.03125, %v4294_v22 }
0x184e   :  { %6274 = vrsqrt.f32 %v4342_v4 }
0x184f   :  { %v4341_v18 = vadd.f32 1e-05, %v4325_v29  ;;  %v6269_v20 = vpop.eup %6268  ;;  %v4344_v49 = vadd.f32 1e-05, %v4328_v8 }
0x1850   :  { %v4370_v27 = vmul.f32 %v6269_v20, %v9046_v36  ;;  %v9158_v36 = vld [vmem:[%s9292_s15 + $0x1] ss:$0 sm:$0xff] }
0x1851   :  { %6276 = vrsqrt.f32 %v4341_v18 }
0x1852   :  { %6278 = vrsqrt.f32 %v4344_v49  ;;  %v4390_v47 = vmul.f32 %v9151_v39, %v4370_v27 }
0x1853   :  { %v6271_v21 = vpop.eup %6270 }
0x1854   :  { %v4291_v14 = vpop.xlane.xlu0 %4290  ;;  %v4372_v42 = vmul.f32 %v6271_v21, %v9043_v54  ;;  %v4410_v61 = vadd.f32 %v9158_v36, %v4390_v47 }
0x1855   :  { %v4327_v33 = vmul.f32 0.03125, %v4291_v14 }
0x1856   :  { %v4392_v7 = vmul.f32 %v9151_v39, %v4372_v42 }
0x1857   :  { %v4343_v60 = vadd.f32 1e-05, %v4327_v33  ;;  %v6273_v51 = vpop.eup %6272 }
0x1858   :  { %v4297_v62 = vpop.xlane.xlu0 %4296  ;;  %v4371_v6 = vmul.f32 %v6273_v51, %v9060_v48  ;;  %v6275_v37 = vpop.eup %6274  ;;  %v4412_v4 = vadd.f32 %v9158_v36, %v4392_v7 }
0x1859   :  { %6280 = vrsqrt.f32 %v4343_v60  ;;  %v4329_v38 = vmul.f32 0.03125, %v4297_v62  ;;  %v4374_v48 = vmul.f32 %v6275_v37, %v9054_v12 }
0x185a   :  { %v4391_v57 = vmul.f32 %v9151_v39, %v4371_v6 }
0x185b   :  { %v4345_v53 = vadd.f32 1e-05, %v4329_v38  ;;  %v6277_v45 = vpop.eup %6276  ;;  %v4394_v20 = vmul.f32 %v9151_v39, %v4374_v48 }
0x185c   :  { %v4300_v54 = vpop.xlane.xlu1 %4299  ;;  %v4373_v26 = vmul.f32 %v6277_v45, %v9057_v2  ;;  %v4411_v44 = vadd.f32 %v9158_v36, %v4391_v57  ;;  %v6279_v56 = vpop.eup %6278 }
0x185d   :  { %6282 = vrsqrt.f32 %v4345_v53  ;;  %v4330_v52 = vmul.f32 0.03125, %v4300_v54  ;;  %v4376_v12 = vmul.f32 %v6279_v56, %v9068_v19  ;;  %v4414_v42 = vadd.f32 %v9158_v36, %v4394_v20 }
0x185e   :  { %v4393_v50 = vmul.f32 %v9151_v39, %v4373_v26  ;;  %v4426_v25 = vpack.c.bf16 %v4411_v44, %v4410_v61 }
0x185f   :  { %v4346_v35 = vadd.f32 1e-05, %v4330_v52 }
0x1860   :  { %v4306_v22 = vpop.xlane.xlu1 %4305  ;;  %v4413_v29 = vadd.f32 %v9158_v36, %v4393_v50  ;;  %5615 = vmatprep.mubr.msk.bf16.mxu0 %vm148_vm0, %v4426_v25 }
0x1861   :  { %v4332_v8 = vmul.f32 0.03125, %v4306_v22  ;;  %6284 = vrsqrt.f32 %v4346_v35 }
0x1862   :  { %v4427_v18 = vpack.c.bf16 %v4413_v29, %v4412_v4 }
0x1863   :  { %v6281_v2 = vpop.eup %6280  ;;  %v4348_v27 = vadd.f32 1e-05, %v4332_v8 }
0x1864   :  { %v4375_v49 = vmul.f32 %v6281_v2, %v9082_v46  ;;  %v4303_v14 = vpop.xlane.xlu0 %4302  ;;  %5616 = vmatmul.mubr.msk.bf16.vlgmr.msra.gmra.mrb[116].mxu0 %vm148_vm0, %v4427_v18  ;;  %v4396_v46 = vmul.f32 %v9151_v39, %v4376_v12 }
0x1865   :  { %v4331_v21 = vmul.f32 0.03125, %v4303_v14  ;;  %6286 = vrsqrt.f32 %v4348_v27 }
0x1866   :  { %v4395_v33 = vmul.f32 %v9151_v39, %v4375_v49 }
0x1867   :  { %v6283_v60 = vpop.eup %6282  ;;  %v4347_v51 = vadd.f32 1e-05, %v4331_v21 }
0x1868   :  { %v4377_v62 = vmul.f32 %v6283_v60, %v9079_v24  ;;  %v4312_v47 = vpop.xlane.xlu1 %4311  ;;  %v4309_v6 = vpop.xlane.xlu0 %4308  ;;  %v4415_v19 = vadd.f32 %v9158_v36, %v4395_v33  ;;  %v4416_v24 = vadd.f32 %v9158_v36, %v4396_v46 }
0x1869   :  { %6288 = vrsqrt.f32 %v4347_v51  ;;  %v4334_v38 = vmul.f32 0.03125, %v4312_v47  ;;  %v4333_v37 = vmul.f32 0.03125, %v4309_v6 }
0x186a   :  { %v4428_v53 = vpack.c.bf16 %v4415_v19, %v4414_v42  ;;  %v4397_v57 = vmul.f32 %v9151_v39, %v4377_v62 }
0x186b   :  { %v4350_v45 = vadd.f32 1e-05, %v4334_v38  ;;  %v4349_v7 = vadd.f32 1e-05, %v4333_v37  ;;  %v6285_v52 = vpop.eup %6284 }
0x186c   :  { %v4318_v54 = vpop.xlane.xlu1 %4317  ;;  %5619 = vmatprep.mubr.msk.bf16.mxu0 %vm148_vm0, %v4428_v53  ;;  %v4315_v61 = vpop.xlane.xlu0 %4314  ;;  %v4417_v26 = vadd.f32 %v9158_v36, %v4397_v57  ;;  %v4378_v22 = vmul.f32 %v6285_v52, %v9093_v28 }
0x186d   :  { %6290 = vrsqrt.f32 %v4350_v45  ;;  %v4336_v44 = vmul.f32 0.03125, %v4318_v54  ;;  %v4335_v48 = vmul.f32 0.03125, %v4315_v61 }
0x186e   :  { %6292 = vrsqrt.f32 %v4349_v7  ;;  %v4429_v50 = vpack.c.bf16 %v4417_v26, %v4416_v24  ;;  %v4398_v20 = vmul.f32 %v9151_v39, %v4378_v22 }
0x186f   :  { %v4352_v35 = vadd.f32 1e-05, %v4336_v44  ;;  %v4351_v25 = vadd.f32 1e-05, %v4335_v48  ;;  %v6287_v29 = vpop.eup %6286 }
0x1870   :  { %5620 = vmatmul.mubr.msk.bf16.gmra.mrb[120].mxu0 %vm148_vm0, %v4429_v50  ;;  %v4321_v56 = vpop.xlane.xlu0 %4320  ;;  %v4380_v12 = vmul.f32 %v6287_v29, %v9090_v31  ;;  %v4418_v14 = vadd.f32 %v9158_v36, %v4398_v20 }
0x1871   :  { %6294 = vrsqrt.f32 %v4352_v35  ;;  %v4337_v4 = vmul.f32 0.03125, %v4321_v56 }
0x1872   :  { %6296 = vrsqrt.f32 %v4351_v25  ;;  %v4400_v51 = vmul.f32 %v9151_v39, %v4380_v12 }
0x1873   :  { %v6289_v8 = vpop.eup %6288  ;;  %v4353_v2 = vadd.f32 1e-05, %v4337_v4 }
0x1874   :  { %v4379_v18 = vmul.f32 %v6289_v8, %v9108_v55  ;;  %v4420_v19 = vadd.f32 %v9158_v36, %v4400_v51 }
0x1875   :  { %6298 = vrsqrt.f32 %v4353_v2 }
0x1876   :  { %v4399_v49 = vmul.f32 %v9151_v39, %v4379_v18 }
0x1877   :  { %v6291_v27 = vpop.eup %6290 }
0x1878   :  { %v6293_v28 = vpop.eup %6292  ;;  %v4419_v21 = vadd.f32 %v9158_v36, %v4399_v49  ;;  %v4382_v33 = vmul.f32 %v6291_v27, %v9117_v30 }
0x1879   :  { %v4381_v60 = vmul.f32 %v6293_v28, %v9105_v17 }
0x187a   :  { %v4430_v55 = vpack.c.bf16 %v4419_v21, %v4418_v14  ;;  %v4402_v30 = vmul.f32 %v9151_v39, %v4382_v33 }
0x187b   :  { %v6295_v42 = vpop.eup %6294  ;;  %v4401_v62 = vmul.f32 %v9151_v39, %v4381_v60 }
0x187c   :  { %v6297_v31 = vpop.eup %6296  ;;  %v4384_v47 = vmul.f32 %v6295_v42, %v9114_v13  ;;  %5623 = vmatprep.mubr.msk.bf16.mxu0 %vm148_vm0, %v4430_v55  ;;  %v4422_v13 = vadd.f32 %v9158_v36, %v4402_v30 }
0x187d   :  { %v4383_v6 = vmul.f32 %v6297_v31, %v9125_v3  ;;  %v4421_v46 = vadd.f32 %v9158_v36, %v4401_v62 }
0x187e   :  { %v4404_v57 = vmul.f32 %v9151_v39, %v4384_v47 }
0x187f   :  { %v6299_v17 = vpop.eup %6298  ;;  %v4431_v38 = vpack.c.bf16 %v4421_v46, %v4420_v19  ;;  %v4403_v37 = vmul.f32 %v9151_v39, %v4383_v6 }
0x1880   :  { %v4385_v53 = vmul.f32 %v6299_v17, %v9134_v58  ;;  %v4424_v54 = vadd.f32 %v9158_v36, %v4404_v57  ;;  %v5755_v58 = vld [vmem:[%s9293_s18 + $0x18] sm:$0xff]  }
0x1881   :  { %5624 = vmatmul.mubr.msk.bf16.gmra.mrb[124].mxu0 %vm148_vm0, %v4431_v38  ;;  %v4423_v3 = vadd.f32 %v9158_v36, %v4403_v37  ;;  %5633 = vmatprep.subr.bf16.mxu1 %v5755_v58 }
0x1882   :  { %v4405_v45 = vmul.f32 %v9151_v39, %v4385_v53  ;;  %5634 = vmatpush3.bf16.msra.mxu1 %v5755_v58  ;;  %v9219_v39 = vld [vmem:[%s9294_s17 + $0x1] ss:$0 sm:$0xff] }
0x1883   :  { %v4432_v7 = vpack.c.bf16 %v4423_v3, %v4422_v13 }
0x1884   :  { %v4425_v61 = vadd.f32 %v9158_v36, %v4405_v45 }
0x1885   :  { %5627 = vmatprep.mubr.msk.bf16.mxu0 %vm148_vm0, %v4432_v7 }
0x1886   :  { %v4433_v24 = vpack.c.bf16 %v4425_v61, %v4424_v54 }
0x1889   :  { %5628 = vmatmul.mubr.msk.bf16.gmra.mrb[128].mxu0 %vm148_vm0, %v4433_v24 }
0x1937   :  { %v5617_v26 = vpop.f32.mrb[116].mxu0 }
0x1938   :  { %v4523_v52 = vadd.f32 %v5617_v26, %v9219_v39  ;;  %v4514_v36 = vpop.f32.mrb[117].mxu0 }
0x1939   :  { %v4515_v44 = vadd.f32 %v9219_v39, %v4514_v36  ;;  %v5618_v48 = vpop.f32.mrb[118].mxu0 }
0x193a   :  { %v4595_v50 = vmul.f32 0.70710677, %v4523_v52  ;;  %v4526_v35 = vadd.f32 %v5618_v48, %v9219_v39  ;;  %v4517_v25 = vpop.f32.mrb[119].mxu0  ;;  %v4579_v6 = vmul.f32 0.5, %v4523_v52 }
0x193b   :  { %v4593_v22 = vmul.f32 0.70710677, %v4515_v44  ;;  %v4518_v56 = vadd.f32 %v9219_v39, %v4517_v25  ;;  %v4577_v30 = vmul.f32 0.5, %v4515_v44 }
0x193c   :  { %6300 = verf.f32 %v4595_v50  ;;  %v4596_v4 = vmul.f32 0.70710677, %v4526_v35  ;;  %v4580_v19 = vmul.f32 0.5, %v4526_v35 }
0x193d   :  { %6302 = verf.f32 %v4593_v22  ;;  %v4594_v29 = vmul.f32 0.70710677, %v4518_v56  ;;  %v4578_v17 = vmul.f32 0.5, %v4518_v56 }
0x193e   :  { %6304 = verf.f32 %v4596_v4 }
0x193f   :  { %6306 = verf.f32 %v4594_v29 }
0x1943   :  { %v5621_v8 = vpop.f32.mrb[120].mxu0 }
0x1944   :  { %v4539_v2 = vadd.f32 %v5621_v8, %v9219_v39  ;;  %v4530_v18 = vpop.f32.mrb[121].mxu0 }
0x1945   :  { %v4531_v20 = vadd.f32 %v9219_v39, %v4530_v18  ;;  %v5622_v12 = vpop.f32.mrb[122].mxu0 }
0x1946   :  { %v4599_v49 = vmul.f32 0.70710677, %v4539_v2  ;;  %v4542_v27 = vadd.f32 %v5622_v12, %v9219_v39  ;;  %v4533_v28 = vpop.f32.mrb[123].mxu0  ;;  %v6301_v14 = vpop.eup %6300  ;;  %v4583_v36 = vmul.f32 0.5, %v4539_v2 }
0x1947   :  { %v4597_v21 = vmul.f32 0.70710677, %v4531_v20  ;;  %v4534_v33 = vadd.f32 %v9219_v39, %v4533_v28  ;;  %v6303_v60 = vpop.eup %6302  ;;  %v4627_v51 = vadd.f32 1.0, %v6301_v14  ;;  %v4581_v25 = vmul.f32 0.5, %v4531_v20 }
0x1948   :  { %6308 = verf.f32 %v4599_v49  ;;  %v4600_v55 = vmul.f32 0.70710677, %v4542_v27  ;;  %v6305_v42 = vpop.eup %6304  ;;  %v4625_v62 = vadd.f32 1.0, %v6303_v60  ;;  %v4584_v44 = vmul.f32 0.5, %v4542_v27 }
0x1949   :  { %6310 = verf.f32 %v4597_v21  ;;  %v4598_v31 = vmul.f32 0.70710677, %v4534_v33  ;;  %v6307_v47 = vpop.eup %6306  ;;  %v4628_v46 = vadd.f32 1.0, %v6305_v42  ;;  %v4643_v37 = vmul.f32 %v4627_v51, %v4579_v6 }
0x194a   :  { %6312 = verf.f32 %v4600_v55  ;;  %v4626_v38 = vadd.f32 1.0, %v6307_v47  ;;  %v4641_v57 = vmul.f32 %v4625_v62, %v4577_v30  ;;  %v4582_v22 = vmul.f32 0.5, %v4534_v33 }
0x194b   :  { %6314 = verf.f32 %v4598_v31  ;;  %v4644_v53 = vmul.f32 %v4628_v46, %v4580_v19 }
0x194c   :  { %v4642_v13 = vmul.f32 %v4626_v38, %v4578_v17 }
0x194d   :  { %v4658_v3 = vpack.c.bf16 %v4644_v53, %v4643_v37 }
0x194e   :  { %v4657_v45 = vpack.c.bf16 %v4642_v13, %v4641_v57 }
0x1950   :  { %5635 = vmatprep.mubr.msk.bf16.mxu1 %vm148_vm0, %v4657_v45 }
0x1951   :  { %5636 = vmatmul.mubr.msk.bf16.vlgmr.msra.gmra.mrb[76].mxu1 %vm148_vm0, %v4658_v3 }
0x1952   :  { %v6309_v7 = vpop.eup %6308 }
0x1953   :  { %v6311_v54 = vpop.eup %6310  ;;  %v4631_v61 = vadd.f32 1.0, %v6309_v7 }
0x1954   :  { %v6313_v24 = vpop.eup %6312  ;;  %v4629_v58 = vadd.f32 1.0, %v6311_v54  ;;  %v5625_v26 = vpop.f32.mrb[124].mxu0 }
0x1955   :  { %v6315_v52 = vpop.eup %6314  ;;  %v4632_v48 = vadd.f32 1.0, %v6313_v24  ;;  %v4555_v50 = vadd.f32 %v5625_v26, %v9219_v39  ;;  %v4546_v35 = vpop.f32.mrb[125].mxu0  ;;  %v4647_v8 = vmul.f32 %v4631_v61, %v4583_v36 }
0x1956   :  { %v4630_v56 = vadd.f32 1.0, %v6315_v52  ;;  %v4547_v4 = vadd.f32 %v9219_v39, %v4546_v35  ;;  %v5626_v29 = vpop.f32.mrb[126].mxu0  ;;  %v4645_v14 = vmul.f32 %v4629_v58, %v4581_v25 }
0x1957   :  { %v4648_v18 = vmul.f32 %v4632_v48, %v4584_v44  ;;  %v4603_v12 = vmul.f32 0.70710677, %v4555_v50  ;;  %v4558_v49 = vadd.f32 %v5626_v29, %v9219_v39  ;;  %v4549_v28 = vpop.f32.mrb[127].mxu0  ;;  %v4587_v54 = vmul.f32 0.5, %v4555_v50 }
0x1958   :  { %v4646_v21 = vmul.f32 %v4630_v56, %v4582_v22  ;;  %v4601_v2 = vmul.f32 0.70710677, %v4547_v4  ;;  %v4550_v27 = vadd.f32 %v9219_v39, %v4549_v28  ;;  %v4585_v58 = vmul.f32 0.5, %v4547_v4 }
0x1959   :  { %v4660_v60 = vpack.c.bf16 %v4648_v18, %v4647_v8  ;;  %6316 = verf.f32 %v4603_v12  ;;  %v4604_v51 = vmul.f32 0.70710677, %v4558_v49  ;;  %v4588_v61 = vmul.f32 0.5, %v4558_v49 }
0x195a   :  { %v4659_v20 = vpack.c.bf16 %v4646_v21, %v4645_v14  ;;  %6318 = verf.f32 %v4601_v2  ;;  %v4602_v33 = vmul.f32 0.70710677, %v4550_v27  ;;  %v4586_v26 = vmul.f32 0.5, %v4550_v27 }
0x195b   :  { %6320 = verf.f32 %v4604_v51 }
0x195c   :  { %6322 = verf.f32 %v4602_v33  ;;  %v5629_v55 = vpop.f32.mrb[128].mxu0  ;;  %5639 = vmatprep.mubr.msk.bf16.mxu1 %vm148_vm0, %v4659_v20 }
0x195d   :  { %v4571_v42 = vadd.f32 %v5629_v55, %v9219_v39  ;;  %v4562_v62 = vpop.f32.mrb[129].mxu0  ;;  %5640 = vmatmul.mubr.msk.bf16.gmra.mrb[80].mxu1 %vm148_vm0, %v4660_v60  ;;  %v5032_v55 = vld [vmem:[%s9295_s19 + $0x1] ss:$0 sm:$0xff] }
0x195e   :  { %v4563_v31 = vadd.f32 %v9219_v39, %v4562_v62  ;;  %v5630_v47 = vpop.f32.mrb[130].mxu0 }
0x195f   :  { %v4607_v6 = vmul.f32 0.70710677, %v4571_v42  ;;  %v4574_v19 = vadd.f32 %v5630_v47, %v9219_v39  ;;  %v4565_v46 = vpop.f32.mrb[131].mxu0  ;;  %v4591_v50 = vmul.f32 0.5, %v4571_v42 }
0x1960   :  { %v4605_v30 = vmul.f32 0.70710677, %v4563_v31  ;;  %v4566_v17 = vadd.f32 %v9219_v39, %v4565_v46  ;;  %v4589_v4 = vmul.f32 0.5, %v4563_v31 }
0x1961   :  { %6324 = verf.f32 %v4607_v6  ;;  %v4608_v38 = vmul.f32 0.70710677, %v4574_v19  ;;  %v4592_v49 = vmul.f32 0.5, %v4574_v19 }
0x1962   :  { %6326 = verf.f32 %v4605_v30  ;;  %v4606_v37 = vmul.f32 0.70710677, %v4566_v17  ;;  %v4590_v14 = vmul.f32 0.5, %v4566_v17 }
0x1963   :  { %v6317_v53 = vpop.eup %6316  ;;  %6328 = verf.f32 %v4608_v38 }
0x1964   :  { %v6319_v57 = vpop.eup %6318  ;;  %v4635_v13 = vadd.f32 1.0, %v6317_v53  ;;  %6330 = verf.f32 %v4606_v37 }
0x1965   :  { %v6321_v3 = vpop.eup %6320  ;;  %v4633_v45 = vadd.f32 1.0, %v6319_v57 }
0x1966   :  { %v6323_v7 = vpop.eup %6322  ;;  %v4636_v24 = vadd.f32 1.0, %v6321_v3  ;;  %v4651_v36 = vmul.f32 %v4635_v13, %v4587_v54 }
0x1967   :  { %v4634_v52 = vadd.f32 1.0, %v6323_v7  ;;  %v4649_v44 = vmul.f32 %v4633_v45, %v4585_v58 }
0x1968   :  { %v4652_v39 = vmul.f32 %v4636_v24, %v4588_v61 }
0x1969   :  { %v4650_v48 = vmul.f32 %v4634_v52, %v4586_v26 }
0x196a   :  { %v4662_v35 = vpack.c.bf16 %v4652_v39, %v4651_v36 }
0x196b   :  { %v6325_v25 = vpop.eup %6324  ;;  %v4661_v22 = vpack.c.bf16 %v4650_v48, %v4649_v44 }
0x196c   :  { %v6327_v56 = vpop.eup %6326  ;;  %v4639_v29 = vadd.f32 1.0, %v6325_v25 }
0x196d   :  { %v6329_v8 = vpop.eup %6328  ;;  %v4637_v18 = vadd.f32 1.0, %v6327_v56  ;;  %5643 = vmatprep.mubr.msk.bf16.mxu1 %vm148_vm0, %v4661_v22 }
0x196e   :  { %v6331_v12 = vpop.eup %6330  ;;  %v4640_v28 = vadd.f32 1.0, %v6329_v8  ;;  %5644 = vmatmul.mubr.msk.bf16.gmra.mrb[84].mxu1 %vm148_vm0, %v4662_v35  ;;  %v4655_v2 = vmul.f32 %v4639_v29, %v4591_v50 }
0x196f   :  { %v4638_v21 = vadd.f32 1.0, %v6331_v12  ;;  %v4653_v60 = vmul.f32 %v4637_v18, %v4589_v4 }
0x1970   :  { %v4656_v27 = vmul.f32 %v4640_v28, %v4592_v49 }
0x1971   :  { %v4654_v51 = vmul.f32 %v4638_v21, %v4590_v14 }
0x1972   :  { %v4664_v20 = vpack.c.bf16 %v4656_v27, %v4655_v2 }
0x1973   :  { %v4663_v33 = vpack.c.bf16 %v4654_v51, %v4653_v60 }
0x1975   :  { %5647 = vmatprep.mubr.msk.bf16.mxu1 %vm148_vm0, %v4663_v33 }
0x1976   :  { %5648 = vmatmul.mubr.msk.bf16.gmra.mrb[88].mxu1 %vm148_vm0, %v4664_v20 }
0x1a24   :  { %v5637_v42 = vpop.f32.mrb[76].mxu1 }
0x1a25   :  { %v4745_v62 = vpop.f32.mrb[77].mxu1  ;;  %v4754_v30 = vadd.f32 %v5637_v42, %v5032_v55 }
0x1a26   :  { %v4746_v47 = vadd.f32 %v5032_v55, %v4745_v62  ;;  %v5638_v31 = vpop.f32.mrb[78].mxu1 }
0x1a27   :  { %v4748_v6 = vpop.f32.mrb[79].mxu1  ;;  %v4810_v37 = vadd.f32 %v4754_v30, %v8949_v34  ;;  %v4757_v53 = vadd.f32 %v5638_v31, %v5032_v55 }
0x1a28   :  { %v4808_v19 = vadd.f32 %v4746_v47, %v8952_v40  ;;  %v4749_v46 = vadd.f32 %v5032_v55, %v4748_v6 }
0x1a29   :  { %v4811_v45 = vadd.f32 %v4757_v53, %v8958_v63 }
0x1a2a   :  { %4824 = vxpose.xlu1.b32.start [1/16] (narrow) %v4808_v19, 32  ;;  %v4809_v17 = vadd.f32 %v4749_v46, %v8968_v43 }
0x1a2e   :  { %4825 = vxpose.xlu1.b32.cont [2/16] (narrow) %v4809_v17, 32 }
0x1a30   :  { %v5641_v38 = vpop.f32.mrb[80].mxu1 }
0x1a31   :  { %v4761_v57 = vpop.f32.mrb[81].mxu1  ;;  %v4770_v61 = vadd.f32 %v5641_v38, %v5032_v55 }
0x1a32   :  { %v5642_v13 = vpop.f32.mrb[82].mxu1  ;;  %4826 = vxpose.xlu1.b32.cont [3/16] (narrow) %v4810_v37, 32  ;;  %v4762_v7 = vadd.f32 %v5032_v55, %v4761_v57 }
0x1a33   :  { %v4764_v3 = vpop.f32.mrb[83].mxu1  ;;  %v4814_v24 = vadd.f32 %v4770_v61, %v8976_v0  ;;  %v4773_v34 = vadd.f32 %v5642_v13, %v5032_v55 }
0x1a34   :  { %v4812_v40 = vadd.f32 %v4762_v7, %v8965_v32  ;;  %v4765_v54 = vadd.f32 %v5032_v55, %v4764_v3 }
0x1a35   :  { %v4815_v63 = vadd.f32 %v4773_v34, %v8982_v9 }
0x1a36   :  { %4827 = vxpose.xlu1.b32.cont [4/16] (narrow) %v4811_v45, 32  ;;  %v4813_v43 = vadd.f32 %v4765_v54, %v8988_v11 }
0x1a3a   :  { %4828 = vxpose.xlu1.b32.cont [5/16] (narrow) %v4812_v40, 32 }
0x1a3e   :  { %4829 = vxpose.xlu1.b32.cont [6/16] (narrow) %v4813_v43, 32 }
0x1a41   :  { %v5645_v58 = vpop.f32.mrb[84].mxu1 }
0x1a42   :  { %v4777_v26 = vpop.f32.mrb[85].mxu1  ;;  %4830 = vxpose.xlu1.b32.cont [7/16] (narrow) %v4814_v24, 32  ;;  %v4786_v22 = vadd.f32 %v5645_v58, %v5032_v55 }
0x1a43   :  { %v5646_v52 = vpop.f32.mrb[86].mxu1  ;;  %v4778_v39 = vadd.f32 %v5032_v55, %v4777_v26 }
0x1a44   :  { %v4780_v36 = vpop.f32.mrb[87].mxu1  ;;  %v4818_v56 = vadd.f32 %v4786_v22, %v8998_v23  ;;  %v4789_v29 = vadd.f32 %v5646_v52, %v5032_v55 }
0x1a45   :  { %v4816_v32 = vadd.f32 %v4778_v39, %v9006_v16  ;;  %v4781_v44 = vadd.f32 %v5032_v55, %v4780_v36 }
0x1a46   :  { %4831 = vxpose.xlu1.b32.cont [8/16] (narrow) %v4815_v63, 32  ;;  %v4819_v9 = vadd.f32 %v4789_v29, %v9012_v10 }
0x1a47   :  { %v4817_v0 = vadd.f32 %v4781_v44, %v9018_v1 }
0x1a49   :  { %v5649_v48 = vpop.f32.mrb[88].mxu1 }
0x1a4a   :  { %v4793_v35 = vpop.f32.mrb[89].mxu1  ;;  %4832 = vxpose.xlu1.b32.cont [9/16] (narrow) %v4816_v32, 32  ;;  %v4802_v12 = vadd.f32 %v5649_v48, %v5032_v55 }
0x1a4b   :  { %v5650_v11 = vpop.f32.mrb[90].mxu1  ;;  %v4794_v8 = vadd.f32 %v5032_v55, %v4793_v35 }
0x1a4c   :  { %v4796_v25 = vpop.f32.mrb[91].mxu1  ;;  %v4822_v49 = vadd.f32 %v4802_v12, %v8995_v5  ;;  %v4805_v1 = vadd.f32 %v5650_v11, %v5032_v55 }
0x1a4d   :  { %v4820_v16 = vadd.f32 %v4794_v8, %v9024_v41  ;;  %v4797_v18 = vadd.f32 %v5032_v55, %v4796_v25 }
0x1a4e   :  { %4833 = vxpose.xlu1.b32.cont [10/16] (narrow) %v4817_v0, 32  ;;  %v4823_v23 = vadd.f32 %v4805_v1, %v9036_v59 }
0x1a4f   :  { %v4821_v50 = vadd.f32 %v4797_v18, %v9031_v15 }
0x1a52   :  { %4834 = vxpose.xlu1.b32.cont [11/16] (narrow) %v4818_v56, 32 }
0x1a56   :  { %4835 = vxpose.xlu1.b32.cont [12/16] (narrow) %v4819_v9, 32 }
0x1a5a   :  { %4836 = vxpose.xlu1.b32.cont [13/16] (narrow) %v4820_v16, 32 }
0x1a5e   :  { %4837 = vxpose.xlu1.b32.cont [14/16] (narrow) %v4821_v50, 32 }
0x1a62   :  { %4838 = vxpose.xlu1.b32.cont [15/16] (narrow) %v4822_v49, 32 }
0x1a66   :  { %4839 = vxpose.xlu1.b32.end [16/16] (narrow) %v4823_v23, 32 }
0x1aaa   :  { %v4840_v28 = vpop.trf.xlu1 }
0x1aab   :  { %4856 = vst [vmem:[%s9296_s20] sm:$0xff] %v4840_v28 }
0x1aae   :  { %v4841_v10 = vpop.trf.xlu1 }
0x1aaf   :  { %4857 = vst [vmem:[%s9296_s20 + $0x8] sm:$0xff] %v4841_v10 }
0x1ab2   :  { %v4842_v41 = vpop.trf.xlu1 }
0x1ab3   :  { %4858 = vst [vmem:[%s9296_s20 + $0x10] sm:$0xff] %v4842_v41 }
0x1ab6   :  { %v4843_v5 = vpop.trf.xlu1 }
0x1ab7   :  { %4859 = vst [vmem:[%s9296_s20 + $0x18] sm:$0xff] %v4843_v5 }

</bundles_post_ra>
